<compile_context>
chip_gen: v7x
topology: tpu7x:2x2x1
jax: 0.10.0
libtpu: 0.0.40
codegen_flags: <defaults>
</compile_context>

<pallas_src>
import jax
import jax.numpy as jnp
from jax import lax
from jax.experimental import pallas as pl
from jax.experimental.pallas import tpu as pltpu

EPS = 1e-3


def _fused_add_conv_bn_kernel(a_ref, b_ref, w_ref, params_ref, o_ref):
    # a_ref, b_ref : [Cin, R]   (R = N*H*W; free reshape of NCHW for N == 1)
    # w_ref        : [TC, Cin]  (Cout-tile of the native PyTorch [Cout, Cin] weight)
    # params_ref   : [TC, 2]    (col 0 = gamma, col 1 = beta)
    # o_ref        : [TC, R]    (already NCHW for N == 1)
    xs = a_ref[...] + b_ref[...]                      # elementwise add (VPU, tiny)

    # 1x1 conv == matmul.  MXU-canonical: contract lhs lanes (Cin) with rhs
    # sublanes (Cin); no operand transpose is materialized, result is [TC, R].
    y = lax.dot_general(
        w_ref[...], xs,
        dimension_numbers=(((1,), (0,)), ((), ())),
        preferred_element_type=jnp.float32,
    )                                                 # [TC, R] float32

    # BatchNorm (training mode): per-channel batch stats over the R positions.
    # Two-pass (centered) variance for numerical robustness.
    r = y.shape[1]
    inv_r = 1.0 / float(r)
    mean = jnp.sum(y, axis=1, keepdims=True) * inv_r              # [TC, 1]
    centered = y - mean                                           # [TC, R]
    var = jnp.sum(centered * centered, axis=1, keepdims=True) * inv_r  # [TC, 1]
    inv = lax.rsqrt(var + EPS)                                    # [TC, 1]

    params = params_ref[...]                                      # [TC, 2]
    gamma = params[:, 0:1]                                        # [TC, 1]
    beta = params[:, 1:2]                                         # [TC, 1]

    o_ref[...] = centered * (gamma * inv) + beta                  # [TC, R]


def _default_num_cout_tiles():
    # v7x has 2 TensorCores per chip -> shard the Cout axis across them.
    # Single-TC chips (v5e / v6e) run everything in one grid step: the kernel
    # is tiny and per-step overhead / duplicated add would be pure loss.
    try:
        kind = jax.devices()[0].device_kind.lower()
    except Exception:
        return 1
    return 2 if "v7" in kind else 1


def fused_add_conv_bn(x410, x395, weight, gamma, beta, *, n_cout_tiles=None):
    """x410, x395: [N, Cin, H, W] (NCHW, float32)
       weight:     [Cout, Cin]    (1x1 conv weight, native PyTorch layout)
       gamma,beta: [Cout]
       returns:    [N, Cout, H, W] (NCHW, float32)"""
    N, Cin, H, W = x410.shape
    Cout = weight.shape[0]
    R = N * H * W

    if n_cout_tiles is None:
        n_cout_tiles = _default_num_cout_tiles()
    if Cout % n_cout_tiles != 0 or (Cout // n_cout_tiles) % 8 != 0:
        n_cout_tiles = 1
    tile_cout = Cout // n_cout_tiles

    # NCHW -> [Cin, R].  For N == 1 (the module's case) this is a free reshape.
    if N == 1:
        a = x410.reshape(Cin, R)
        b = x395.reshape(Cin, R)
    else:
        a = jnp.transpose(x410, (1, 0, 2, 3)).reshape(Cin, R)
        b = jnp.transpose(x395, (1, 0, 2, 3)).reshape(Cin, R)

    # Pack gamma/beta into one [Cout, 2] per-channel parameter array.
    params = jnp.stack([gamma, beta], axis=1).astype(jnp.float32)   # [Cout, 2]

    cost = pl.CostEstimate(
        flops=2 * R * Cin * Cout,
        transcendentals=Cout,
        bytes_accessed=4 * (2 * Cin * R + Cout * Cin + 2 * Cout + Cout * R),
    )

    out_flat = pl.pallas_call(
        _fused_add_conv_bn_kernel,
        out_shape=jax.ShapeDtypeStruct((Cout, R), jnp.float32),
        grid=(n_cout_tiles,),
        in_specs=[
            pl.BlockSpec((Cin, R), lambda j: (0, 0)),           # a (full, replicated)
            pl.BlockSpec((Cin, R), lambda j: (0, 0)),           # b (full, replicated)
            pl.BlockSpec((tile_cout, Cin), lambda j: (j, 0)),   # weight Cout-tile
            pl.BlockSpec((tile_cout, 2), lambda j: (j, 0)),     # gamma/beta tile
        ],
        out_specs=pl.BlockSpec((tile_cout, R), lambda j: (j, 0)),
        compiler_params=pltpu.CompilerParams(
            dimension_semantics=("parallel",),
            vmem_limit_bytes=32 * 1024 * 1024,
        ),
        cost_estimate=cost,
    )(a, b, weight, params)

    # [Cout, R] -> NCHW.  Free reshape for N == 1; transpose only if N > 1.
    if N == 1:
        return out_flat.reshape(1, Cout, H, W)
    return jnp.transpose(out_flat.reshape(Cout, N, H, W), (1, 0, 2, 3))


def _reference(x410, x395, weight, gamma, beta):
    xs = x410 + x395
    y = jnp.einsum("nchw,oc->nohw", xs, weight)
    mean = jnp.mean(y, axis=(0, 2, 3), keepdims=True)
    var = jnp.mean((y - mean) ** 2, axis=(0, 2, 3), keepdims=True)
    return (y - mean) / jnp.sqrt(var + EPS) * gamma.reshape(1, -1, 1, 1) + beta.reshape(1, -1, 1, 1)


if __name__ == "__main__":
    key = jax.random.PRNGKey(0)
    k1, k2, k3, k4, k5 = jax.random.split(key, 5)

    N, Cin, H, W, Cout = 1, 256, 7, 7, 1536

    x410 = jax.random.normal(k1, (N, Cin, H, W), dtype=jnp.float32)
    x395 = jax.random.normal(k2, (N, Cin, H, W), dtype=jnp.float32)

    # Deterministic synthetic parameters (1x1 conv weight [Cout, Cin];
    # BatchNorm affine params).
    weight = jax.random.normal(k3, (Cout, Cin), dtype=jnp.float32) * 0.05
    gamma = 1.0 + 0.1 * jax.random.normal(k4, (Cout,), dtype=jnp.float32)
    beta = 0.1 * jax.random.normal(k5, (Cout,), dtype=jnp.float32)

    out = fused_add_conv_bn(x410, x395, weight, gamma, beta)
    out = jax.block_until_ready(out)

    ref = _reference(x410, x395, weight, gamma, beta)
    assert out.shape == (N, Cout, H, W)
    assert jnp.allclose(out, ref, atol=1e-3, rtol=1e-3)

    print("KERNEL_OK")
</pallas_src>

<mosaic_0001>
module attributes {stable_mosaic.version = 11 : i64} {
  func.func @_fused_add_conv_bn_kernel(%arg0: i32, %arg1: memref<256x49xf32, #tpu.memory_space<vmem>>, %arg2: memref<256x49xf32, #tpu.memory_space<vmem>>, %arg3: memref<1536x256xf32, #tpu.memory_space<vmem>>, %arg4: memref<1536x2xf32, #tpu.memory_space<vmem>>, %arg5: memref<1536x49xf32, #tpu.memory_space<vmem>>) attributes {dimension_semantics = [#tpu.dimension_semantics<parallel>], iteration_bounds = array<i64: 1>, scalar_prefetch = 0 : i64, scratch_operands = 0 : i64, tpu.core_type = #tpu.core_type<tc>, window_params = [{pipeline_mode = #tpu.pipeline_mode<synchronous>, transform_indices = @transform_0, window_bounds = array<i64: 256, 49>}, {pipeline_mode = #tpu.pipeline_mode<synchronous>, transform_indices = @transform_1, window_bounds = array<i64: 256, 49>}, {transform_indices = @transform_2, window_bounds = array<i64: 1536, 256>}, {transform_indices = @transform_3, window_bounds = array<i64: 1536, 2>}, {transform_indices = @transform_4, window_bounds = array<i64: 1536, 49>}]} {
    %c0 = arith.constant 0 : index
    %c0_0 = arith.constant 0 : index
    %0 = vector.load %arg1[%c0, %c0_0] : memref<256x49xf32, #tpu.memory_space<vmem>>, vector<256x49xf32>
    %c0_1 = arith.constant 0 : index
    %c0_2 = arith.constant 0 : index
    %1 = vector.load %arg2[%c0_1, %c0_2] : memref<256x49xf32, #tpu.memory_space<vmem>>, vector<256x49xf32>
    %2 = arith.addf %0, %1 : vector<256x49xf32>
    %c0_3 = arith.constant 0 : index
    %c0_4 = arith.constant 0 : index
    %3 = vector.load %arg3[%c0_3, %c0_4] : memref<1536x256xf32, #tpu.memory_space<vmem>>, vector<1536x256xf32>
    %cst = arith.constant dense<0.000000e+00> : vector<1536x49xf32>
    %4 = tpu.matmul %3, %2, %cst {dimension_numbers = #tpu.dot_dimension_numbers<[1], [0], [0], [1], [0, 0, 1, 1], [], []>} : vector<1536x256xf32>, vector<256x49xf32>, vector<1536x49xf32> -> vector<1536x49xf32>
    %cst_5 = arith.constant dense<0.000000e+00> : vector<1536xf32>
    %5 = vector.multi_reduction <add>, %4, %cst_5 [1] : vector<1536x49xf32> to vector<1536xf32>
    %6 = vector.shape_cast %5 : vector<1536xf32> to vector<1536x1xf32>
    %cst_6 = arith.constant 0.0204081628 : f32
    %7 = vector.broadcast %cst_6 : f32 to vector<1536x1xf32>
    %8 = arith.mulf %6, %7 : vector<1536x1xf32>
    %9 = vector.broadcast %8 : vector<1536x1xf32> to vector<1536x49xf32>
    %10 = arith.subf %4, %9 : vector<1536x49xf32>
    %11 = arith.mulf %10, %10 : vector<1536x49xf32>
    %cst_7 = arith.constant dense<0.000000e+00> : vector<1536xf32>
    %12 = vector.multi_reduction <add>, %11, %cst_7 [1] : vector<1536x49xf32> to vector<1536xf32>
    %13 = vector.shape_cast %12 : vector<1536xf32> to vector<1536x1xf32>
    %cst_8 = arith.constant 0.0204081628 : f32
    %14 = vector.broadcast %cst_8 : f32 to vector<1536x1xf32>
    %15 = arith.mulf %13, %14 : vector<1536x1xf32>
    %cst_9 = arith.constant 1.000000e-03 : f32
    %16 = vector.broadcast %cst_9 : f32 to vector<1536x1xf32>
    %17 = arith.addf %15, %16 : vector<1536x1xf32>
    %18 = math.rsqrt %17 : vector<1536x1xf32>
    %c0_10 = arith.constant 0 : index
    %c0_11 = arith.constant 0 : index
    %19 = vector.load %arg4[%c0_10, %c0_11] : memref<1536x2xf32, #tpu.memory_space<vmem>>, vector<1536x2xf32>
    %20 = vector.extract_strided_slice %19 {offsets = [0, 0], sizes = [1536, 1], strides = [1, 1]} : vector<1536x2xf32> to vector<1536x1xf32>
    %21 = vector.extract_strided_slice %19 {offsets = [0, 1], sizes = [1536, 1], strides = [1, 1]} : vector<1536x2xf32> to vector<1536x1xf32>
    %22 = arith.mulf %20, %18 : vector<1536x1xf32>
    %23 = vector.broadcast %22 : vector<1536x1xf32> to vector<1536x49xf32>
    %24 = arith.mulf %10, %23 : vector<1536x49xf32>
    %25 = vector.broadcast %21 : vector<1536x1xf32> to vector<1536x49xf32>
    %26 = arith.addf %24, %25 : vector<1536x49xf32>
    %c0_12 = arith.constant 0 : index
    %c0_13 = arith.constant 0 : index
    %27 = vector.load %arg5[%c0_12, %c0_13] : memref<1536x49xf32, #tpu.memory_space<vmem>>, vector<1536x49xf32>
    tpu.vector_store %arg5[%c0_12, %c0_13], %26 {strides = array<i32>} : memref<1536x49xf32, #tpu.memory_space<vmem>>, vector<1536x49xf32>,
    return
  }
  func.func @transform_0(%arg0: i32) -> (i32, i32) {
    %c0_i32 = arith.constant 0 : i32
    %c0_i32_0 = arith.constant 0 : i32
    %c0_i32_1 = arith.constant 0 : i32
    return %c0_i32, %c0_i32_0 : i32, i32
  }
  func.func @transform_1(%arg0: i32) -> (i32, i32) {
    %c0_i32 = arith.constant 0 : i32
    %c0_i32_0 = arith.constant 0 : i32
    %c0_i32_1 = arith.constant 0 : i32
    return %c0_i32, %c0_i32_0 : i32, i32
  }
  func.func @transform_2(%arg0: i32) -> (i32, i32) {
    %c0_i32 = arith.constant 0 : i32
    %c0_i32_0 = arith.constant 0 : i32
    return %arg0, %c0_i32 : i32, i32
  }
  func.func @transform_3(%arg0: i32) -> (i32, i32) {
    %c0_i32 = arith.constant 0 : i32
    %c0_i32_0 = arith.constant 0 : i32
    return %arg0, %c0_i32 : i32, i32
  }
  func.func @transform_4(%arg0: i32) -> (i32, i32) {
    %c0_i32 = arith.constant 0 : i32
    %c0_i32_0 = arith.constant 0 : i32
    return %arg0, %c0_i32 : i32, i32
  }
}

</mosaic_0001>

<bundles_post_ra>
// kernel: tpu_custom_call.1
= control target key start
LH: loop header
LB: loop body
LE: loop exit
PB: predicated region body
PF: predicated region fallthrough
CT: control target
= control target key end

     0   :  { %9 = vsyncpa [#allocation3], 0  ;;  %s7416_s15 = smov [#allocation2]   ;;  %s13155_s0 = inlined_call_operand.vmem [shape: f32[256,49], index: 0, kind: input, shape index: {}]   ;;  %s13156_s1 = inlined_call_operand.vmem [shape: f32[256,49], index: 1, kind: input, shape index: {}]   ;;  %s13157_s2 = inlined_call_operand.hbm [shape: f32[1536,256], index: 2, kind: input, shape index: {}]   ;;  %s13158_s3 = inlined_call_operand.vmem [shape: f32[1536,2], index: 3, kind: input, shape index: {}]   ;;  %s13159_s4 = inlined_call_operand.vmem [shape: f32[1536,49], index: 4, kind: output, shape index: {}]  }
   0x1   :  { %s19_s16 = sshll.u32 %s7416_s15, 4  ;;  %s7392_s19 = scalar_lea.hbm %s13157_s2, 49152  ;;  %s20_s16 = int_to_ptr.vmem [resolvable:$true] %s19_s16 }
   0x2   :  { %p7393_p0 = scmp.ne.s32.totalorder %s13157_s2, %s7392_s19  ;;  %p7396_p1 = scmp.lt.u32.totalorder %s7392_s19, %s13157_s2 }
   0x4   :  { %p7398_p2 = pnand %p7396_p1, %p7393_p0 }
   0x6   :  { %7401 = shalt.err (!%p7398_p2)
}
   0x7   :  { %s7402_s24 = scalar_lea.vmem %s20_s16, 49152  ;;  %p7407_p4 = scmp.lt.s32.totalorder %s20_s16, %s20_s16 }
   0x8   :  { %p7403_p3 = scmp.ne.s32.totalorder %s20_s16, %s7402_s24  ;;  %p7408_p5 = scmp.lt.s32.totalorder %s7402_s24, %s7402_s24 }
   0xa   :  { %p7409_p6 = por %p7408_p5, %p7407_p4 }
   0xc   :  { %p7410_p7 = pnand %p7409_p6, %p7403_p3 }
   0xe   :  { %7413 = shalt.err (!%p7410_p7)
}
   0xf   :  { %s7417_s25 = smov 256   ;;  %s7418_s26 = smov 16  }
  0x10   :  { %25 = dma.hbm_to_vmem [thread:$0]  %s13157_s2, 49152, %s20_s16, [#allocation3], %s7417_s25, %s7417_s25, %s7418_s26  }
  0x11   :  { %7414 = dma.done.wait [#allocation3], 49152  }
  0x12   :  { %7415 = vsyncadd [#allocation3], 4294918144  ;;  %v7419_v0 = vmov 0.0|0.0   ;;  %v31_v1 = vld [vmem:[%s13155_s0] sm:$0xff]  ;;  %v32_v2 = vld [vmem:[%s13155_s0 + $0x8] sm:$0xff]  ;;  %vm1536_vm0 = vcmask 400384  }
  0x13   :  { %6726 = vmatprep.subr.bf16.mxu0 %v7419_v0  ;;  %6774 = vmatprep.subr.bf16.mxu1 %v7419_v0  ;;  %v63_v3 = vld [vmem:[%s13156_s1] sm:$0xff]  ;;  %v64_v4 = vld [vmem:[%s13156_s1 + $0x8] sm:$0xff]  ;;  %v33_v6 = vld [vmem:[%s13155_s0 + $0x10] sm:$0xff] }
  0x14   :  { %v95_v5 = vadd.f32 %v63_v3, %v31_v1  ;;  %v34_v7 = vld [vmem:[%s13155_s0 + $0x18] sm:$0xff]  ;;  %v96_v8 = vadd.f32 %v64_v4, %v32_v2  ;;  %v65_v9 = vld [vmem:[%s13156_s1 + $0x10] sm:$0xff]  ;;  %v35_v11 = vld [vmem:[%s13155_s0 + $0x20] sm:$0xff] }
  0x15   :  { %v66_v10 = vld [vmem:[%s13156_s1 + $0x18] sm:$0xff]  ;;  %v97_v12 = vadd.f32 %v65_v9, %v33_v6  ;;  %v36_v14 = vld [vmem:[%s13155_s0 + $0x28] sm:$0xff]  ;;  %v67_v15 = vld [vmem:[%s13156_s1 + $0x20] sm:$0xff] }
  0x16   :  { %v98_v13 = vadd.f32 %v66_v10, %v34_v7  ;;  %v68_v16 = vld [vmem:[%s13156_s1 + $0x28] sm:$0xff]  ;;  %v6727_v17 = vpack.c.bf16 %v96_v8, %v95_v5  ;;  %v99_v19 = vadd.f32 %v67_v15, %v35_v11  ;;  %v37_v21 = vld [vmem:[%s13155_s0 + $0x30] sm:$0xff]  ;;  %v38_v22 = vld [vmem:[%s13155_s0 + $0x38] sm:$0xff] }
  0x17   :  { %v100_v20 = vadd.f32 %v68_v16, %v36_v14  ;;  %v69_v23 = vld [vmem:[%s13156_s1 + $0x30] sm:$0xff]  ;;  %v70_v24 = vld [vmem:[%s13156_s1 + $0x38] sm:$0xff]  ;;  %v39_v28 = vld [vmem:[%s13155_s0 + $0x40] sm:$0xff] }
  0x18   :  { %6728 = vmatpush1.bf16.msra.mxu0 %v6727_v17  ;;  %6790 = vmatpush1.bf16.msra.mxu1 %v6727_v17  ;;  %v6730_v18 = vpack.c.bf16 %v98_v13, %v97_v12  ;;  %v101_v26 = vadd.f32 %v69_v23, %v37_v21  ;;  %v102_v27 = vadd.f32 %v70_v24, %v38_v22  ;;  %v40_v29 = vld [vmem:[%s13155_s0 + $0x48] sm:$0xff]  ;;  %v71_v30 = vld [vmem:[%s13156_s1 + $0x40] sm:$0xff]  ;;  %v41_v35 = vld [vmem:[%s13155_s0 + $0x50] sm:$0xff] }
  0x19   :  { %6729 = vmatprep.subr.bf16.mxu0 %v7419_v0  ;;  %6775 = vmatprep.subr.bf16.mxu1 %v7419_v0  ;;  %v6733_v25 = vpack.c.bf16 %v100_v20, %v99_v19  ;;  %v72_v31 = vld [vmem:[%s13156_s1 + $0x48] sm:$0xff]  ;;  %v103_v33 = vadd.f32 %v71_v30, %v39_v28  ;;  %v42_v36 = vld [vmem:[%s13155_s0 + $0x58] sm:$0xff]  ;;  %v73_v37 = vld [vmem:[%s13156_s1 + $0x50] sm:$0xff] }
  0x1a   :  { %v6736_v32 = vpack.c.bf16 %v102_v27, %v101_v26  ;;  %v104_v34 = vadd.f32 %v72_v31, %v40_v29  ;;  %v74_v38 = vld [vmem:[%s13156_s1 + $0x58] sm:$0xff]  ;;  %v105_v40 = vadd.f32 %v73_v37, %v41_v35  ;;  %v43_v42 = vld [vmem:[%s13155_s0 + $0x60] sm:$0xff]  ;;  %v44_v43 = vld [vmem:[%s13155_s0 + $0x68] sm:$0xff] }
  0x1b   :  { %v106_v41 = vadd.f32 %v74_v38, %v42_v36  ;;  %v75_v44 = vld [vmem:[%s13156_s1 + $0x60] sm:$0xff]  ;;  %v76_v45 = vld [vmem:[%s13156_s1 + $0x68] sm:$0xff]  ;;  %v45_v51 = vld [vmem:[%s13155_s0 + $0x70] sm:$0xff] }
  0x1c   :  { %6731 = vmatpush1.bf16.msra.mxu0 %v6730_v18  ;;  %6791 = vmatpush1.bf16.msra.mxu1 %v6730_v18  ;;  %v6739_v39 = vpack.c.bf16 %v104_v34, %v103_v33  ;;  %v128_v46 = vld [vmem:[#allocation2 + $0x8] sm:$0xff]  ;;  %v107_v49 = vadd.f32 %v75_v44, %v43_v42  ;;  %v108_v50 = vadd.f32 %v76_v45, %v44_v43  ;;  %v46_v52 = vld [vmem:[%s13155_s0 + $0x78] sm:$0xff]  ;;  %v77_v53 = vld [vmem:[%s13156_s1 + $0x70] sm:$0xff] }
  0x1d   :  { %6732 = vmatprep.subr.bf16.mxu0 %v7419_v0  ;;  %6776 = vmatprep.subr.bf16.mxu1 %v7419_v0  ;;  %v320_v47 = vld [vmem:[#allocation2 + $0x608] sm:$0xff]  ;;  %v6742_v48 = vpack.c.bf16 %v106_v41, %v105_v40  ;;  %v78_v54 = vld [vmem:[%s13156_s1 + $0x78] sm:$0xff]  ;;  %v109_v56 = vadd.f32 %v77_v53, %v45_v51  ;;  %v47_v58 = vld [vmem:[%s13155_s0 + $0x80] sm:$0xff] }
  0x1e   :  { %575 = vmatprep.mubr.f32.mxu0 %v128_v46  ;;  %1055 = vmatprep.mubr.f32.mxu1 %v320_v47  ;;  %v6745_v55 = vpack.c.bf16 %v108_v50, %v107_v49  ;;  %v110_v57 = vadd.f32 %v78_v54, %v46_v52  ;;  %v48_v59 = vld [vmem:[%s13155_s0 + $0x88] sm:$0xff]  ;;  %v79_v60 = vld [vmem:[%s13156_s1 + $0x80] sm:$0xff]  ;;  %v49_v2 = vld [vmem:[%s13155_s0 + $0x90] sm:$0xff] }
  0x1f   :  { %v80_v61 = vld [vmem:[%s13156_s1 + $0x88] sm:$0xff]  ;;  %v111_v63 = vadd.f32 %v79_v60, %v47_v58  ;;  %v50_v3 = vld [vmem:[%s13155_s0 + $0x98] sm:$0xff]  ;;  %v81_v4 = vld [vmem:[%s13156_s1 + $0x90] sm:$0xff] }
  0x20   :  { %6734 = vmatpush1.bf16.msra.mxu0 %v6733_v25  ;;  %6792 = vmatpush1.bf16.msra.mxu1 %v6733_v25  ;;  %v6748_v62 = vpack.c.bf16 %v110_v57, %v109_v56  ;;  %v112_v1 = vadd.f32 %v80_v61, %v48_v59  ;;  %v82_v5 = vld [vmem:[%s13156_s1 + $0x98] sm:$0xff]  ;;  %v113_v7 = vadd.f32 %v81_v4, %v49_v2  ;;  %v51_v9 = vld [vmem:[%s13155_s0 + $0xa0] sm:$0xff]  ;;  %v52_v10 = vld [vmem:[%s13155_s0 + $0xa8] sm:$0xff] }
  0x21   :  { %6735 = vmatprep.subr.bf16.mxu0 %v7419_v0  ;;  %6777 = vmatprep.subr.bf16.mxu1 %v7419_v0  ;;  %v114_v8 = vadd.f32 %v82_v5, %v50_v3  ;;  %v83_v11 = vld [vmem:[%s13156_s1 + $0xa0] sm:$0xff]  ;;  %v84_v12 = vld [vmem:[%s13156_s1 + $0xa8] sm:$0xff]  ;;  %v53_v16 = vld [vmem:[%s13155_s0 + $0xb0] sm:$0xff] }
  0x22   :  { %v6751_v6 = vpack.c.bf16 %v112_v1, %v111_v63  ;;  %v115_v14 = vadd.f32 %v83_v11, %v51_v9  ;;  %v116_v15 = vadd.f32 %v84_v12, %v52_v10  ;;  %v54_v17 = vld [vmem:[%s13155_s0 + $0xb8] sm:$0xff]  ;;  %v85_v18 = vld [vmem:[%s13156_s1 + $0xb0] sm:$0xff]  ;;  %v55_v23 = vld [vmem:[%s13155_s0 + $0xc0] sm:$0xff] }
  0x23   :  { %v6754_v13 = vpack.c.bf16 %v114_v8, %v113_v7  ;;  %v86_v19 = vld [vmem:[%s13156_s1 + $0xb8] sm:$0xff]  ;;  %v117_v21 = vadd.f32 %v85_v18, %v53_v16  ;;  %v56_v24 = vld [vmem:[%s13155_s0 + $0xc8] sm:$0xff]  ;;  %v87_v25 = vld [vmem:[%s13156_s1 + $0xc0] sm:$0xff] }
  0x24   :  { %6737 = vmatpush1.bf16.msra.mxu0 %v6736_v32  ;;  %6793 = vmatpush1.bf16.msra.mxu1 %v6736_v32  ;;  %v6757_v20 = vpack.c.bf16 %v116_v15, %v115_v14  ;;  %v118_v22 = vadd.f32 %v86_v19, %v54_v17  ;;  %v88_v26 = vld [vmem:[%s13156_s1 + $0xc8] sm:$0xff]  ;;  %v119_v28 = vadd.f32 %v87_v25, %v55_v23  ;;  %v57_v30 = vld [vmem:[%s13155_s0 + $0xd0] sm:$0xff]  ;;  %v58_v31 = vld [vmem:[%s13155_s0 + $0xd8] sm:$0xff] }
  0x25   :  { %6738 = vmatprep.subr.bf16.mxu0 %v7419_v0  ;;  %6778 = vmatprep.subr.bf16.mxu1 %v7419_v0  ;;  %v120_v29 = vadd.f32 %v88_v26, %v56_v24  ;;  %v89_v32 = vld [vmem:[%s13156_s1 + $0xd0] sm:$0xff]  ;;  %v90_v33 = vld [vmem:[%s13156_s1 + $0xd8] sm:$0xff]  ;;  %v59_v37 = vld [vmem:[%s13155_s0 + $0xe0] sm:$0xff] }
  0x26   :  { %v6760_v27 = vpack.c.bf16 %v118_v22, %v117_v21  ;;  %v121_v35 = vadd.f32 %v89_v32, %v57_v30  ;;  %v122_v36 = vadd.f32 %v90_v33, %v58_v31  ;;  %v60_v38 = vld [vmem:[%s13155_s0 + $0xe8] sm:$0xff]  ;;  %v61_v44 = vld [vmem:[%s13155_s0 + $0xf0] sm:$0xff]  ;;  %v62_v45 = vld [vmem:[%s13155_s0 + $0xf8] sm:$0xff] }
  0x27   :  { %v6763_v34 = vpack.c.bf16 %v120_v29, %v119_v28  ;;  %v92_v40 = vld [vmem:[%s13156_s1 + $0xe8] sm:$0xff]  ;;  %v93_v46 = vld [vmem:[%s13156_s1 + $0xf0] sm:$0xff]  ;;  %v94_v47 = vld [vmem:[%s13156_s1 + $0xf8] sm:$0xff] }
  0x28   :  { %6740 = vmatpush1.bf16.msra.mxu0 %v6739_v39  ;;  %6794 = vmatpush1.bf16.msra.mxu1 %v6739_v39  ;;  %v91_v39 = vld [vmem:[%s13156_s1 + $0xe0] sm:$0xff]  ;;  %v6766_v41 = vpack.c.bf16 %v122_v36, %v121_v35  ;;  %v124_v43 = vadd.f32 %v92_v40, %v60_v38  ;;  %v125_v49 = vadd.f32 %v93_v46, %v61_v44  ;;  %v130_v54 = vld [vmem:[#allocation2 + $0x18] sm:$0xff]  ;;  %v129_v56 = vld [vmem:[#allocation2 + $0x10] sm:$0xff] }
  0x29   :  { %6741 = vmatprep.subr.bf16.mxu0 %v7419_v0  ;;  %6779 = vmatprep.subr.bf16.mxu1 %v7419_v0  ;;  %v123_v42 = vadd.f32 %v91_v39, %v59_v37  ;;  %v126_v50 = vadd.f32 %v94_v47, %v62_v45  ;;  %v127_v52 = vld [vmem:[#allocation2] sm:$0xff]  ;;  %v321_v57 = vld [vmem:[#allocation2 + $0x610] sm:$0xff]  ;;  %v132_v58 = vld [vmem:[#allocation2 + $0x28] sm:$0xff] }
  0x2a   :  { %v319_v53 = vld [vmem:[#allocation2 + $0x600] sm:$0xff]  ;;  %v324_v59 = vld [vmem:[#allocation2 + $0x628] sm:$0xff]  ;;  %v134_v61 = vld [vmem:[#allocation2 + $0x38] sm:$0xff] }
  0x2b   :  { %v6772_v51 = vpack.c.bf16 %v126_v50, %v125_v49  ;;  %v131_v60 = vld [vmem:[#allocation2 + $0x20] sm:$0xff]  ;;  %v133_v63 = vld [vmem:[#allocation2 + $0x30] sm:$0xff]  ;;  %v136_v2 = vld [vmem:[#allocation2 + $0x48] sm:$0xff] }
  0x2c   :  { %6743 = vmatpush1.bf16.msra.mxu0 %v6742_v48  ;;  %6795 = vmatpush1.bf16.msra.mxu1 %v6742_v48  ;;  %v6769_v48 = vpack.c.bf16 %v124_v43, %v123_v42  ;;  %v325_v1 = vld [vmem:[#allocation2 + $0x630] sm:$0xff]  ;;  %v328_v3 = vld [vmem:[#allocation2 + $0x648] sm:$0xff]  ;;  %v135_v4 = vld [vmem:[#allocation2 + $0x40] sm:$0xff] }
  0x2d   :  { %6744 = vmatprep.subr.bf16.mxu0 %v7419_v0  ;;  %6780 = vmatprep.subr.bf16.mxu1 %v7419_v0  ;;  %v327_v5 = vld [vmem:[#allocation2 + $0x640] sm:$0xff]  ;;  %v330_v7 = vld [vmem:[#allocation2 + $0x658] sm:$0xff]  ;;  %v137_v8 = vld [vmem:[#allocation2 + $0x50] sm:$0xff] }
  0x2e   :  { %v329_v9 = vld [vmem:[#allocation2 + $0x650] sm:$0xff]  ;;  %v140_v10 = vld [vmem:[#allocation2 + $0x68] sm:$0xff]  ;;  %v139_v12 = vld [vmem:[#allocation2 + $0x60] sm:$0xff] }
  0x2f   :  { %v332_v11 = vld [vmem:[#allocation2 + $0x668] sm:$0xff]  ;;  %v142_v14 = vld [vmem:[#allocation2 + $0x78] sm:$0xff]  ;;  %v141_v16 = vld [vmem:[#allocation2 + $0x70] sm:$0xff] }
  0x30   :  { %6746 = vmatpush1.bf16.msra.mxu0 %v6745_v55  ;;  %6796 = vmatpush1.bf16.msra.mxu1 %v6745_v55  ;;  %v322_v55 = vld [vmem:[#allocation2 + $0x618] sm:$0xff]  ;;  %v333_v17 = vld [vmem:[#allocation2 + $0x670] sm:$0xff]  ;;  %v144_v18 = vld [vmem:[#allocation2 + $0x88] sm:$0xff] }
  0x31   :  { %6747 = vmatprep.subr.bf16.mxu0 %v7419_v0  ;;  %6781 = vmatprep.subr.bf16.mxu1 %v7419_v0  ;;  %v334_v15 = vld [vmem:[#allocation2 + $0x678] sm:$0xff]  ;;  %v336_v19 = vld [vmem:[#allocation2 + $0x688] sm:$0xff]  ;;  %v335_v21 = vld [vmem:[#allocation2 + $0x680] sm:$0xff] }
  0x32   :  { %v146_v22 = vld [vmem:[#allocation2 + $0x98] sm:$0xff]  ;;  %v145_v24 = vld [vmem:[#allocation2 + $0x90] sm:$0xff]  ;;  %v148_v26 = vld [vmem:[#allocation2 + $0xa8] sm:$0xff] }
  0x33   :  { %v338_v23 = vld [vmem:[#allocation2 + $0x698] sm:$0xff]  ;;  %v337_v25 = vld [vmem:[#allocation2 + $0x690] sm:$0xff]  ;;  %v147_v28 = vld [vmem:[#allocation2 + $0xa0] sm:$0xff] }
  0x34   :  { %6749 = vmatpush1.bf16.msra.mxu0 %v6748_v62  ;;  %6797 = vmatpush1.bf16.msra.mxu1 %v6748_v62  ;;  %v326_v62 = vld [vmem:[#allocation2 + $0x638] sm:$0xff]  ;;  %v339_v29 = vld [vmem:[#allocation2 + $0x6a0] sm:$0xff]  ;;  %v149_v32 = vld [vmem:[#allocation2 + $0xb0] sm:$0xff] }
  0x35   :  { %6750 = vmatprep.subr.bf16.mxu0 %v7419_v0  ;;  %6782 = vmatprep.subr.bf16.mxu1 %v7419_v0  ;;  %v150_v30 = vld [vmem:[#allocation2 + $0xb8] sm:$0xff]  ;;  %v341_v33 = vld [vmem:[#allocation2 + $0x6b0] sm:$0xff]  ;;  %v344_v35 = vld [vmem:[#allocation2 + $0x6c8] sm:$0xff] }
  0x36   :  { %v342_v31 = vld [vmem:[#allocation2 + $0x6b8] sm:$0xff]  ;;  %v151_v36 = vld [vmem:[#allocation2 + $0xc0] sm:$0xff]  ;;  %v153_v40 = vld [vmem:[#allocation2 + $0xd0] sm:$0xff] }
  0x37   :  { %v343_v37 = vld [vmem:[#allocation2 + $0x6c0] sm:$0xff]  ;;  %v154_v38 = vld [vmem:[#allocation2 + $0xd8] sm:$0xff]  ;;  %v156_v42 = vld [vmem:[#allocation2 + $0xe8] sm:$0xff] }
  0x38   :  { %6752 = vmatpush1.bf16.msra.mxu0 %v6751_v6  ;;  %6798 = vmatpush1.bf16.msra.mxu1 %v6751_v6  ;;  %v138_v6 = vld [vmem:[#allocation2 + $0x58] sm:$0xff]  ;;  %v348_v43 = vld [vmem:[#allocation2 + $0x6e8] sm:$0xff]  ;;  %v155_v44 = vld [vmem:[#allocation2 + $0xe0] sm:$0xff] }
  0x39   :  { %6753 = vmatprep.subr.bf16.mxu0 %v7419_v0  ;;  %6783 = vmatprep.subr.bf16.mxu1 %v7419_v0  ;;  %v346_v39 = vld [vmem:[#allocation2 + $0x6d8] sm:$0xff]  ;;  %v347_v45 = vld [vmem:[#allocation2 + $0x6e0] sm:$0xff]  ;;  %v349_v49 = vld [vmem:[#allocation2 + $0x6f0] sm:$0xff] }
  0x3a   :  { %v158_v46 = vld [vmem:[#allocation2 + $0xf8] sm:$0xff]  ;;  %v160_v50 = vld [vmem:[#allocation2 + $0x108] sm:$0xff] }
  0x3b   :  { %v350_v47 = vld [vmem:[#allocation2 + $0x6f8] sm:$0xff] }
  0x3c   :  { %6755 = vmatpush1.bf16.msra.mxu0 %v6754_v13  ;;  %6799 = vmatpush1.bf16.msra.mxu1 %v6754_v13  ;;  %v331_v13 = vld [vmem:[#allocation2 + $0x660] sm:$0xff] }
  0x3d   :  { %6756 = vmatprep.subr.bf16.mxu0 %v7419_v0  ;;  %6784 = vmatprep.subr.bf16.mxu1 %v7419_v0 }
  0x40   :  { %6758 = vmatpush1.bf16.msra.mxu0 %v6757_v20  ;;  %6800 = vmatpush1.bf16.msra.mxu1 %v6757_v20  ;;  %v143_v20 = vld [vmem:[#allocation2 + $0x80] sm:$0xff] }
  0x41   :  { %6759 = vmatprep.subr.bf16.mxu0 %v7419_v0  ;;  %6785 = vmatprep.subr.bf16.mxu1 %v7419_v0 }
  0x44   :  { %6761 = vmatpush1.bf16.msra.mxu0 %v6760_v27  ;;  %6801 = vmatpush1.bf16.msra.mxu1 %v6760_v27  ;;  %v340_v27 = vld [vmem:[#allocation2 + $0x6a8] sm:$0xff] }
  0x45   :  { %6762 = vmatprep.subr.bf16.mxu0 %v7419_v0  ;;  %6786 = vmatprep.subr.bf16.mxu1 %v7419_v0 }
  0x48   :  { %6764 = vmatpush1.bf16.msra.mxu0 %v6763_v34  ;;  %6802 = vmatpush1.bf16.msra.mxu1 %v6763_v34  ;;  %v152_v34 = vld [vmem:[#allocation2 + $0xc8] sm:$0xff] }
  0x49   :  { %6765 = vmatprep.subr.bf16.mxu0 %v7419_v0  ;;  %6787 = vmatprep.subr.bf16.mxu1 %v7419_v0 }
  0x4c   :  { %6767 = vmatpush1.bf16.msra.mxu0 %v6766_v41  ;;  %6803 = vmatpush1.bf16.msra.mxu1 %v6766_v41  ;;  %v345_v41 = vld [vmem:[#allocation2 + $0x6d0] sm:$0xff] }
  0x4d   :  { %6768 = vmatprep.subr.bf16.mxu0 %v7419_v0  ;;  %6788 = vmatprep.subr.bf16.mxu1 %v7419_v0 }
  0x50   :  { %6770 = vmatpush1.bf16.msra.mxu0 %v6769_v48  ;;  %6804 = vmatpush1.bf16.msra.mxu1 %v6769_v48  ;;  %v157_v48 = vld [vmem:[#allocation2 + $0xf0] sm:$0xff] }
  0x51   :  { %6771 = vmatprep.subr.bf16.mxu0 %v7419_v0  ;;  %6789 = vmatprep.subr.bf16.mxu1 %v7419_v0  ;;  %v323_v0 = vld [vmem:[#allocation2 + $0x620] sm:$0xff] }
  0x54   :  { %6773 = vmatpush1.bf16.msra.mxu0 %v6772_v51  ;;  %6805 = vmatpush1.bf16.msra.mxu1 %v6772_v51  ;;  %v352_v51 = vld [vmem:[#allocation2 + $0x708] sm:$0xff] }
  0x57   :  { %576 = vmatmul.mubr.f32.vlgmr.msra.gmra.mrb[0].mxu0 %v127_v52  ;;  %1056 = vmatmul.mubr.f32.vlgmr.msra.gmra.mrb[0].mxu1 %v319_v53  ;;  %v159_v52 = vld [vmem:[#allocation2 + $0x100] sm:$0xff] }
  0x58   :  { %580 = vmatprep.mubr.f32.mxu0 %v130_v54  ;;  %1060 = vmatprep.mubr.f32.mxu1 %v322_v55  ;;  %v351_v53 = vld [vmem:[#allocation2 + $0x700] sm:$0xff]  ;;  %v162_v54 = vld [vmem:[#allocation2 + $0x118] sm:$0xff] }
  0x59   :  { %v354_v55 = vld [vmem:[#allocation2 + $0x718] sm:$0xff] }
  0x5b   :  { %581 = vmatmul.mubr.f32.gmra.mrb[2].mxu0 %v129_v56  ;;  %1061 = vmatmul.mubr.f32.gmra.mrb[2].mxu1 %v321_v57  ;;  %v161_v56 = vld [vmem:[#allocation2 + $0x110] sm:$0xff] }
  0x5c   :  { %585 = vmatprep.mubr.f32.mxu0 %v132_v58  ;;  %1065 = vmatprep.mubr.f32.mxu1 %v324_v59  ;;  %v353_v57 = vld [vmem:[#allocation2 + $0x710] sm:$0xff]  ;;  %v164_v58 = vld [vmem:[#allocation2 + $0x128] sm:$0xff] }
  0x5d   :  { %v356_v59 = vld [vmem:[#allocation2 + $0x728] sm:$0xff] }
  0x5f   :  { %586 = vmatmul.mubr.f32.gmra.mrb[4].mxu0 %v131_v60  ;;  %1066 = vmatmul.mubr.f32.gmra.mrb[4].mxu1 %v323_v0  ;;  %v163_v60 = vld [vmem:[#allocation2 + $0x120] sm:$0xff] }
  0x60   :  { %590 = vmatprep.mubr.f32.mxu0 %v134_v61  ;;  %1070 = vmatprep.mubr.f32.mxu1 %v326_v62  ;;  %v355_v0 = vld [vmem:[#allocation2 + $0x720] sm:$0xff]  ;;  %v166_v61 = vld [vmem:[#allocation2 + $0x138] sm:$0xff] }
  0x61   :  { %v358_v62 = vld [vmem:[#allocation2 + $0x738] sm:$0xff] }
  0x63   :  { %591 = vmatmul.mubr.f32.gmra.mrb[6].mxu0 %v133_v63  ;;  %1071 = vmatmul.mubr.f32.gmra.mrb[6].mxu1 %v325_v1  ;;  %v165_v63 = vld [vmem:[#allocation2 + $0x130] sm:$0xff] }
  0x64   :  { %595 = vmatprep.mubr.f32.mxu0 %v136_v2  ;;  %1075 = vmatprep.mubr.f32.mxu1 %v328_v3  ;;  %v357_v1 = vld [vmem:[#allocation2 + $0x730] sm:$0xff]  ;;  %v168_v2 = vld [vmem:[#allocation2 + $0x148] sm:$0xff] }
  0x65   :  { %v360_v3 = vld [vmem:[#allocation2 + $0x748] sm:$0xff] }
  0x67   :  { %596 = vmatmul.mubr.f32.gmra.mrb[8].mxu0 %v135_v4  ;;  %1076 = vmatmul.mubr.f32.gmra.mrb[8].mxu1 %v327_v5  ;;  %v167_v4 = vld [vmem:[#allocation2 + $0x140] sm:$0xff] }
  0x68   :  { %600 = vmatprep.mubr.f32.mxu0 %v138_v6  ;;  %1080 = vmatprep.mubr.f32.mxu1 %v330_v7  ;;  %v359_v5 = vld [vmem:[#allocation2 + $0x740] sm:$0xff]  ;;  %v170_v6 = vld [vmem:[#allocation2 + $0x158] sm:$0xff] }
  0x69   :  { %v362_v7 = vld [vmem:[#allocation2 + $0x758] sm:$0xff] }
  0x6b   :  { %601 = vmatmul.mubr.f32.gmra.mrb[10].mxu0 %v137_v8  ;;  %1081 = vmatmul.mubr.f32.gmra.mrb[10].mxu1 %v329_v9  ;;  %v169_v8 = vld [vmem:[#allocation2 + $0x150] sm:$0xff] }
  0x6c   :  { %605 = vmatprep.mubr.f32.mxu0 %v140_v10  ;;  %1085 = vmatprep.mubr.f32.mxu1 %v332_v11  ;;  %v361_v9 = vld [vmem:[#allocation2 + $0x750] sm:$0xff]  ;;  %v172_v10 = vld [vmem:[#allocation2 + $0x168] sm:$0xff] }
  0x6d   :  { %v364_v11 = vld [vmem:[#allocation2 + $0x768] sm:$0xff] }
  0x6f   :  { %606 = vmatmul.mubr.f32.gmra.mrb[12].mxu0 %v139_v12  ;;  %1086 = vmatmul.mubr.f32.gmra.mrb[12].mxu1 %v331_v13  ;;  %v171_v12 = vld [vmem:[#allocation2 + $0x160] sm:$0xff] }
  0x70   :  { %610 = vmatprep.mubr.f32.mxu0 %v142_v14  ;;  %1090 = vmatprep.mubr.f32.mxu1 %v334_v15  ;;  %v363_v13 = vld [vmem:[#allocation2 + $0x760] sm:$0xff]  ;;  %v174_v14 = vld [vmem:[#allocation2 + $0x178] sm:$0xff] }
  0x71   :  { %v366_v15 = vld [vmem:[#allocation2 + $0x778] sm:$0xff] }
  0x73   :  { %611 = vmatmul.mubr.f32.gmra.mrb[14].mxu0 %v141_v16  ;;  %1091 = vmatmul.mubr.f32.gmra.mrb[14].mxu1 %v333_v17  ;;  %v173_v16 = vld [vmem:[#allocation2 + $0x170] sm:$0xff] }
  0x74   :  { %615 = vmatprep.mubr.f32.mxu0 %v144_v18  ;;  %1095 = vmatprep.mubr.f32.mxu1 %v336_v19  ;;  %v365_v17 = vld [vmem:[#allocation2 + $0x770] sm:$0xff]  ;;  %v176_v18 = vld [vmem:[#allocation2 + $0x188] sm:$0xff] }
  0x75   :  { %v368_v19 = vld [vmem:[#allocation2 + $0x788] sm:$0xff] }
  0x77   :  { %616 = vmatmul.mubr.f32.gmra.mrb[16].mxu0 %v143_v20  ;;  %1096 = vmatmul.mubr.f32.gmra.mrb[16].mxu1 %v335_v21  ;;  %v175_v20 = vld [vmem:[#allocation2 + $0x180] sm:$0xff] }
  0x78   :  { %620 = vmatprep.mubr.f32.mxu0 %v146_v22  ;;  %1100 = vmatprep.mubr.f32.mxu1 %v338_v23  ;;  %v367_v21 = vld [vmem:[#allocation2 + $0x780] sm:$0xff]  ;;  %v178_v22 = vld [vmem:[#allocation2 + $0x198] sm:$0xff] }
  0x79   :  { %v370_v23 = vld [vmem:[#allocation2 + $0x798] sm:$0xff] }
  0x7b   :  { %621 = vmatmul.mubr.f32.gmra.mrb[18].mxu0 %v145_v24  ;;  %1101 = vmatmul.mubr.f32.gmra.mrb[18].mxu1 %v337_v25  ;;  %v177_v24 = vld [vmem:[#allocation2 + $0x190] sm:$0xff] }
  0x7c   :  { %625 = vmatprep.mubr.f32.mxu0 %v148_v26  ;;  %1105 = vmatprep.mubr.f32.mxu1 %v340_v27  ;;  %v369_v25 = vld [vmem:[#allocation2 + $0x790] sm:$0xff]  ;;  %v180_v26 = vld [vmem:[#allocation2 + $0x1a8] sm:$0xff] }
  0x7d   :  { %v372_v27 = vld [vmem:[#allocation2 + $0x7a8] sm:$0xff] }
  0x7f   :  { %626 = vmatmul.mubr.f32.gmra.mrb[20].mxu0 %v147_v28  ;;  %1106 = vmatmul.mubr.f32.gmra.mrb[20].mxu1 %v339_v29  ;;  %v179_v28 = vld [vmem:[#allocation2 + $0x1a0] sm:$0xff] }
  0x80   :  { %630 = vmatprep.mubr.f32.mxu0 %v150_v30  ;;  %1110 = vmatprep.mubr.f32.mxu1 %v342_v31  ;;  %v371_v29 = vld [vmem:[#allocation2 + $0x7a0] sm:$0xff]  ;;  %v182_v30 = vld [vmem:[#allocation2 + $0x1b8] sm:$0xff] }
  0x81   :  { %v374_v31 = vld [vmem:[#allocation2 + $0x7b8] sm:$0xff] }
  0x83   :  { %631 = vmatmul.mubr.f32.gmra.mrb[22].mxu0 %v149_v32  ;;  %1111 = vmatmul.mubr.f32.gmra.mrb[22].mxu1 %v341_v33  ;;  %v181_v32 = vld [vmem:[#allocation2 + $0x1b0] sm:$0xff] }
  0x84   :  { %635 = vmatprep.mubr.f32.mxu0 %v152_v34  ;;  %1115 = vmatprep.mubr.f32.mxu1 %v344_v35  ;;  %v373_v33 = vld [vmem:[#allocation2 + $0x7b0] sm:$0xff]  ;;  %v184_v34 = vld [vmem:[#allocation2 + $0x1c8] sm:$0xff] }
  0x85   :  { %v376_v35 = vld [vmem:[#allocation2 + $0x7c8] sm:$0xff] }
  0x87   :  { %636 = vmatmul.mubr.f32.gmra.mrb[24].mxu0 %v151_v36  ;;  %1116 = vmatmul.mubr.f32.gmra.mrb[24].mxu1 %v343_v37  ;;  %v183_v36 = vld [vmem:[#allocation2 + $0x1c0] sm:$0xff] }
  0x88   :  { %640 = vmatprep.mubr.f32.mxu0 %v154_v38  ;;  %1120 = vmatprep.mubr.f32.mxu1 %v346_v39  ;;  %v375_v37 = vld [vmem:[#allocation2 + $0x7c0] sm:$0xff]  ;;  %v186_v38 = vld [vmem:[#allocation2 + $0x1d8] sm:$0xff] }
  0x89   :  { %v378_v39 = vld [vmem:[#allocation2 + $0x7d8] sm:$0xff] }
  0x8b   :  { %641 = vmatmul.mubr.f32.gmra.mrb[26].mxu0 %v153_v40  ;;  %1121 = vmatmul.mubr.f32.gmra.mrb[26].mxu1 %v345_v41  ;;  %v185_v40 = vld [vmem:[#allocation2 + $0x1d0] sm:$0xff] }
  0x8c   :  { %645 = vmatprep.mubr.f32.mxu0 %v156_v42  ;;  %1125 = vmatprep.mubr.f32.mxu1 %v348_v43  ;;  %v377_v41 = vld [vmem:[#allocation2 + $0x7d0] sm:$0xff]  ;;  %v188_v42 = vld [vmem:[#allocation2 + $0x1e8] sm:$0xff] }
  0x8d   :  { %v380_v43 = vld [vmem:[#allocation2 + $0x7e8] sm:$0xff] }
  0x8f   :  { %646 = vmatmul.mubr.f32.gmra.mrb[28].mxu0 %v155_v44  ;;  %1126 = vmatmul.mubr.f32.gmra.mrb[28].mxu1 %v347_v45  ;;  %v187_v44 = vld [vmem:[#allocation2 + $0x1e0] sm:$0xff] }
  0x90   :  { %650 = vmatprep.mubr.f32.mxu0 %v158_v46  ;;  %1130 = vmatprep.mubr.f32.mxu1 %v350_v47  ;;  %v379_v45 = vld [vmem:[#allocation2 + $0x7e0] sm:$0xff]  ;;  %v190_v46 = vld [vmem:[#allocation2 + $0x1f8] sm:$0xff] }
  0x91   :  { %v382_v47 = vld [vmem:[#allocation2 + $0x7f8] sm:$0xff] }
  0x93   :  { %651 = vmatmul.mubr.f32.gmra.mrb[30].mxu0 %v157_v48  ;;  %1131 = vmatmul.mubr.f32.gmra.mrb[30].mxu1 %v349_v49  ;;  %v189_v48 = vld [vmem:[#allocation2 + $0x1f0] sm:$0xff] }
  0x94   :  { %655 = vmatprep.mubr.f32.mxu0 %v160_v50  ;;  %1135 = vmatprep.mubr.f32.mxu1 %v352_v51  ;;  %v381_v49 = vld [vmem:[#allocation2 + $0x7f0] sm:$0xff]  ;;  %v192_v50 = vld [vmem:[#allocation2 + $0x208] sm:$0xff] }
  0x95   :  { %v384_v51 = vld [vmem:[#allocation2 + $0x808] sm:$0xff] }
  0x97   :  { %656 = vmatmul.mubr.f32.gmra.mrb[32].mxu0 %v159_v52  ;;  %1136 = vmatmul.mubr.f32.gmra.mrb[32].mxu1 %v351_v53  ;;  %v191_v52 = vld [vmem:[#allocation2 + $0x200] sm:$0xff] }
  0x98   :  { %660 = vmatprep.mubr.f32.mxu0 %v162_v54  ;;  %1140 = vmatprep.mubr.f32.mxu1 %v354_v55  ;;  %v383_v53 = vld [vmem:[#allocation2 + $0x800] sm:$0xff]  ;;  %v194_v54 = vld [vmem:[#allocation2 + $0x218] sm:$0xff] }
  0x99   :  { %v386_v55 = vld [vmem:[#allocation2 + $0x818] sm:$0xff] }
  0x9b   :  { %661 = vmatmul.mubr.f32.gmra.mrb[34].mxu0 %v161_v56  ;;  %1141 = vmatmul.mubr.f32.gmra.mrb[34].mxu1 %v353_v57  ;;  %v193_v56 = vld [vmem:[#allocation2 + $0x210] sm:$0xff] }
  0x9c   :  { %665 = vmatprep.mubr.f32.mxu0 %v164_v58  ;;  %1145 = vmatprep.mubr.f32.mxu1 %v356_v59  ;;  %v385_v57 = vld [vmem:[#allocation2 + $0x810] sm:$0xff]  ;;  %v196_v58 = vld [vmem:[#allocation2 + $0x228] sm:$0xff] }
  0x9d   :  { %v388_v59 = vld [vmem:[#allocation2 + $0x828] sm:$0xff] }
  0x9f   :  { %666 = vmatmul.mubr.f32.gmra.mrb[36].mxu0 %v163_v60  ;;  %1146 = vmatmul.mubr.f32.gmra.mrb[36].mxu1 %v355_v0  ;;  %v195_v60 = vld [vmem:[#allocation2 + $0x220] sm:$0xff] }
  0xa0   :  { %670 = vmatprep.mubr.f32.mxu0 %v166_v61  ;;  %1150 = vmatprep.mubr.f32.mxu1 %v358_v62  ;;  %v387_v0 = vld [vmem:[#allocation2 + $0x820] sm:$0xff]  ;;  %v198_v61 = vld [vmem:[#allocation2 + $0x238] sm:$0xff] }
  0xa1   :  { %v390_v62 = vld [vmem:[#allocation2 + $0x838] sm:$0xff] }
  0xa3   :  { %671 = vmatmul.mubr.f32.gmra.mrb[38].mxu0 %v165_v63  ;;  %1151 = vmatmul.mubr.f32.gmra.mrb[38].mxu1 %v357_v1  ;;  %v197_v63 = vld [vmem:[#allocation2 + $0x230] sm:$0xff] }
  0xa4   :  { %675 = vmatprep.mubr.f32.mxu0 %v168_v2  ;;  %1155 = vmatprep.mubr.f32.mxu1 %v360_v3  ;;  %v389_v1 = vld [vmem:[#allocation2 + $0x830] sm:$0xff]  ;;  %v200_v2 = vld [vmem:[#allocation2 + $0x248] sm:$0xff] }
  0xa5   :  { %v392_v3 = vld [vmem:[#allocation2 + $0x848] sm:$0xff] }
  0xa7   :  { %676 = vmatmul.mubr.f32.gmra.mrb[40].mxu0 %v167_v4  ;;  %1156 = vmatmul.mubr.f32.gmra.mrb[40].mxu1 %v359_v5  ;;  %v199_v4 = vld [vmem:[#allocation2 + $0x240] sm:$0xff] }
  0xa8   :  { %680 = vmatprep.mubr.f32.mxu0 %v170_v6  ;;  %1160 = vmatprep.mubr.f32.mxu1 %v362_v7  ;;  %v391_v5 = vld [vmem:[#allocation2 + $0x840] sm:$0xff]  ;;  %v202_v6 = vld [vmem:[#allocation2 + $0x258] sm:$0xff] }
  0xa9   :  { %v394_v7 = vld [vmem:[#allocation2 + $0x858] sm:$0xff] }
  0xab   :  { %681 = vmatmul.mubr.f32.gmra.mrb[42].mxu0 %v169_v8  ;;  %1161 = vmatmul.mubr.f32.gmra.mrb[42].mxu1 %v361_v9  ;;  %v201_v8 = vld [vmem:[#allocation2 + $0x250] sm:$0xff] }
  0xac   :  { %685 = vmatprep.mubr.f32.mxu0 %v172_v10  ;;  %1165 = vmatprep.mubr.f32.mxu1 %v364_v11  ;;  %v393_v9 = vld [vmem:[#allocation2 + $0x850] sm:$0xff]  ;;  %v204_v10 = vld [vmem:[#allocation2 + $0x268] sm:$0xff] }
  0xad   :  { %v396_v11 = vld [vmem:[#allocation2 + $0x868] sm:$0xff] }
  0xaf   :  { %686 = vmatmul.mubr.f32.gmra.mrb[44].mxu0 %v171_v12  ;;  %1166 = vmatmul.mubr.f32.gmra.mrb[44].mxu1 %v363_v13  ;;  %v203_v12 = vld [vmem:[#allocation2 + $0x260] sm:$0xff] }
  0xb0   :  { %690 = vmatprep.mubr.f32.mxu0 %v174_v14  ;;  %1170 = vmatprep.mubr.f32.mxu1 %v366_v15  ;;  %v395_v13 = vld [vmem:[#allocation2 + $0x860] sm:$0xff]  ;;  %v206_v14 = vld [vmem:[#allocation2 + $0x278] sm:$0xff] }
  0xb1   :  { %v398_v15 = vld [vmem:[#allocation2 + $0x878] sm:$0xff] }
  0xb3   :  { %691 = vmatmul.mubr.f32.gmra.mrb[46].mxu0 %v173_v16  ;;  %1171 = vmatmul.mubr.f32.gmra.mrb[46].mxu1 %v365_v17  ;;  %v205_v16 = vld [vmem:[#allocation2 + $0x270] sm:$0xff] }
  0xb4   :  { %695 = vmatprep.mubr.f32.mxu0 %v176_v18  ;;  %1175 = vmatprep.mubr.f32.mxu1 %v368_v19  ;;  %v397_v17 = vld [vmem:[#allocation2 + $0x870] sm:$0xff]  ;;  %v208_v18 = vld [vmem:[#allocation2 + $0x288] sm:$0xff] }
  0xb5   :  { %v400_v19 = vld [vmem:[#allocation2 + $0x888] sm:$0xff] }
  0xb7   :  { %696 = vmatmul.mubr.f32.gmra.mrb[48].mxu0 %v175_v20  ;;  %1176 = vmatmul.mubr.f32.gmra.mrb[48].mxu1 %v367_v21  ;;  %v207_v20 = vld [vmem:[#allocation2 + $0x280] sm:$0xff] }
  0xb8   :  { %700 = vmatprep.mubr.f32.mxu0 %v178_v22  ;;  %1180 = vmatprep.mubr.f32.mxu1 %v370_v23  ;;  %v399_v21 = vld [vmem:[#allocation2 + $0x880] sm:$0xff]  ;;  %v210_v22 = vld [vmem:[#allocation2 + $0x298] sm:$0xff] }
  0xb9   :  { %v402_v23 = vld [vmem:[#allocation2 + $0x898] sm:$0xff] }
  0xbb   :  { %701 = vmatmul.mubr.f32.gmra.mrb[50].mxu0 %v177_v24  ;;  %1181 = vmatmul.mubr.f32.gmra.mrb[50].mxu1 %v369_v25  ;;  %v209_v24 = vld [vmem:[#allocation2 + $0x290] sm:$0xff] }
  0xbc   :  { %705 = vmatprep.mubr.f32.mxu0 %v180_v26  ;;  %1185 = vmatprep.mubr.f32.mxu1 %v372_v27  ;;  %v401_v25 = vld [vmem:[#allocation2 + $0x890] sm:$0xff]  ;;  %v212_v26 = vld [vmem:[#allocation2 + $0x2a8] sm:$0xff] }
  0xbd   :  { %v404_v27 = vld [vmem:[#allocation2 + $0x8a8] sm:$0xff] }
  0xbf   :  { %706 = vmatmul.mubr.f32.gmra.mrb[52].mxu0 %v179_v28  ;;  %1186 = vmatmul.mubr.f32.gmra.mrb[52].mxu1 %v371_v29  ;;  %v211_v28 = vld [vmem:[#allocation2 + $0x2a0] sm:$0xff] }
  0xc0   :  { %710 = vmatprep.mubr.f32.mxu0 %v182_v30  ;;  %1190 = vmatprep.mubr.f32.mxu1 %v374_v31  ;;  %v403_v29 = vld [vmem:[#allocation2 + $0x8a0] sm:$0xff]  ;;  %v214_v30 = vld [vmem:[#allocation2 + $0x2b8] sm:$0xff] }
  0xc1   :  { %v406_v31 = vld [vmem:[#allocation2 + $0x8b8] sm:$0xff] }
  0xc3   :  { %711 = vmatmul.mubr.f32.gmra.mrb[54].mxu0 %v181_v32  ;;  %1191 = vmatmul.mubr.f32.gmra.mrb[54].mxu1 %v373_v33  ;;  %v213_v32 = vld [vmem:[#allocation2 + $0x2b0] sm:$0xff] }
  0xc4   :  { %715 = vmatprep.mubr.f32.mxu0 %v184_v34  ;;  %1195 = vmatprep.mubr.f32.mxu1 %v376_v35  ;;  %v405_v33 = vld [vmem:[#allocation2 + $0x8b0] sm:$0xff]  ;;  %v216_v34 = vld [vmem:[#allocation2 + $0x2c8] sm:$0xff] }
  0xc5   :  { %v408_v35 = vld [vmem:[#allocation2 + $0x8c8] sm:$0xff] }
  0xc7   :  { %716 = vmatmul.mubr.f32.gmra.mrb[56].mxu0 %v183_v36  ;;  %1196 = vmatmul.mubr.f32.gmra.mrb[56].mxu1 %v375_v37  ;;  %v215_v36 = vld [vmem:[#allocation2 + $0x2c0] sm:$0xff] }
  0xc8   :  { %720 = vmatprep.mubr.f32.mxu0 %v186_v38  ;;  %1200 = vmatprep.mubr.f32.mxu1 %v378_v39  ;;  %v407_v37 = vld [vmem:[#allocation2 + $0x8c0] sm:$0xff]  ;;  %v218_v38 = vld [vmem:[#allocation2 + $0x2d8] sm:$0xff] }
  0xc9   :  { %v410_v39 = vld [vmem:[#allocation2 + $0x8d8] sm:$0xff] }
  0xcb   :  { %721 = vmatmul.mubr.f32.gmra.mrb[58].mxu0 %v185_v40  ;;  %1201 = vmatmul.mubr.f32.gmra.mrb[58].mxu1 %v377_v41  ;;  %v217_v40 = vld [vmem:[#allocation2 + $0x2d0] sm:$0xff] }
  0xcc   :  { %725 = vmatprep.mubr.f32.mxu0 %v188_v42  ;;  %1205 = vmatprep.mubr.f32.mxu1 %v380_v43  ;;  %v409_v41 = vld [vmem:[#allocation2 + $0x8d0] sm:$0xff]  ;;  %v220_v42 = vld [vmem:[#allocation2 + $0x2e8] sm:$0xff] }
  0xcd   :  { %v412_v43 = vld [vmem:[#allocation2 + $0x8e8] sm:$0xff] }
  0xcf   :  { %726 = vmatmul.mubr.f32.gmra.mrb[60].mxu0 %v187_v44  ;;  %1206 = vmatmul.mubr.f32.gmra.mrb[60].mxu1 %v379_v45  ;;  %v219_v44 = vld [vmem:[#allocation2 + $0x2e0] sm:$0xff] }
  0xd0   :  { %730 = vmatprep.mubr.f32.mxu0 %v190_v46  ;;  %1210 = vmatprep.mubr.f32.mxu1 %v382_v47  ;;  %v411_v45 = vld [vmem:[#allocation2 + $0x8e0] sm:$0xff]  ;;  %v222_v46 = vld [vmem:[#allocation2 + $0x2f8] sm:$0xff] }
  0xd1   :  { %v414_v47 = vld [vmem:[#allocation2 + $0x8f8] sm:$0xff] }
  0xd3   :  { %731 = vmatmul.mubr.f32.gmra.mrb[62].mxu0 %v189_v48  ;;  %1211 = vmatmul.mubr.f32.gmra.mrb[62].mxu1 %v381_v49  ;;  %v221_v48 = vld [vmem:[#allocation2 + $0x2f0] sm:$0xff] }
  0xd4   :  { %735 = vmatprep.mubr.f32.mxu0 %v192_v50  ;;  %1215 = vmatprep.mubr.f32.mxu1 %v384_v51  ;;  %v413_v49 = vld [vmem:[#allocation2 + $0x8f0] sm:$0xff]  ;;  %v224_v50 = vld [vmem:[#allocation2 + $0x308] sm:$0xff] }
  0xd5   :  { %v416_v51 = vld [vmem:[#allocation2 + $0x908] sm:$0xff] }
  0xd7   :  { %736 = vmatmul.mubr.f32.gmra.mrb[64].mxu0 %v191_v52  ;;  %1216 = vmatmul.mubr.f32.gmra.mrb[64].mxu1 %v383_v53  ;;  %v223_v52 = vld [vmem:[#allocation2 + $0x300] sm:$0xff] }
  0xd8   :  { %740 = vmatprep.mubr.f32.mxu0 %v194_v54  ;;  %1220 = vmatprep.mubr.f32.mxu1 %v386_v55  ;;  %v415_v53 = vld [vmem:[#allocation2 + $0x900] sm:$0xff]  ;;  %v226_v54 = vld [vmem:[#allocation2 + $0x318] sm:$0xff] }
  0xd9   :  { %v418_v55 = vld [vmem:[#allocation2 + $0x918] sm:$0xff] }
  0xdb   :  { %741 = vmatmul.mubr.f32.gmra.mrb[66].mxu0 %v193_v56  ;;  %1221 = vmatmul.mubr.f32.gmra.mrb[66].mxu1 %v385_v57  ;;  %v225_v56 = vld [vmem:[#allocation2 + $0x310] sm:$0xff] }
  0xdc   :  { %745 = vmatprep.mubr.f32.mxu0 %v196_v58  ;;  %1225 = vmatprep.mubr.f32.mxu1 %v388_v59  ;;  %v417_v57 = vld [vmem:[#allocation2 + $0x910] sm:$0xff]  ;;  %v228_v58 = vld [vmem:[#allocation2 + $0x328] sm:$0xff] }
  0xdd   :  { %v420_v59 = vld [vmem:[#allocation2 + $0x928] sm:$0xff] }
  0xdf   :  { %746 = vmatmul.mubr.f32.gmra.mrb[68].mxu0 %v195_v60  ;;  %1226 = vmatmul.mubr.f32.gmra.mrb[68].mxu1 %v387_v0  ;;  %v227_v60 = vld [vmem:[#allocation2 + $0x320] sm:$0xff] }
  0xe0   :  { %750 = vmatprep.mubr.f32.mxu0 %v198_v61  ;;  %1230 = vmatprep.mubr.f32.mxu1 %v390_v62  ;;  %v419_v0 = vld [vmem:[#allocation2 + $0x920] sm:$0xff]  ;;  %v230_v61 = vld [vmem:[#allocation2 + $0x338] sm:$0xff] }
  0xe1   :  { %v422_v62 = vld [vmem:[#allocation2 + $0x938] sm:$0xff] }
  0xe3   :  { %751 = vmatmul.mubr.f32.gmra.mrb[70].mxu0 %v197_v63  ;;  %1231 = vmatmul.mubr.f32.gmra.mrb[70].mxu1 %v389_v1  ;;  %v229_v63 = vld [vmem:[#allocation2 + $0x330] sm:$0xff] }
  0xe4   :  { %755 = vmatprep.mubr.f32.mxu0 %v200_v2  ;;  %1235 = vmatprep.mubr.f32.mxu1 %v392_v3  ;;  %v421_v1 = vld [vmem:[#allocation2 + $0x930] sm:$0xff]  ;;  %v232_v2 = vld [vmem:[#allocation2 + $0x348] sm:$0xff] }
  0xe5   :  { %v424_v3 = vld [vmem:[#allocation2 + $0x948] sm:$0xff] }
  0xe7   :  { %756 = vmatmul.mubr.f32.gmra.mrb[72].mxu0 %v199_v4  ;;  %1236 = vmatmul.mubr.f32.gmra.mrb[72].mxu1 %v391_v5  ;;  %v231_v4 = vld [vmem:[#allocation2 + $0x340] sm:$0xff] }
  0xe8   :  { %760 = vmatprep.mubr.f32.mxu0 %v202_v6  ;;  %1240 = vmatprep.mubr.f32.mxu1 %v394_v7  ;;  %v423_v5 = vld [vmem:[#allocation2 + $0x940] sm:$0xff]  ;;  %v234_v6 = vld [vmem:[#allocation2 + $0x358] sm:$0xff] }
  0xe9   :  { %v426_v7 = vld [vmem:[#allocation2 + $0x958] sm:$0xff] }
  0xeb   :  { %761 = vmatmul.mubr.f32.gmra.mrb[74].mxu0 %v201_v8  ;;  %1241 = vmatmul.mubr.f32.gmra.mrb[74].mxu1 %v393_v9  ;;  %v233_v8 = vld [vmem:[#allocation2 + $0x350] sm:$0xff] }
  0xec   :  { %765 = vmatprep.mubr.f32.mxu0 %v204_v10  ;;  %1245 = vmatprep.mubr.f32.mxu1 %v396_v11  ;;  %v425_v9 = vld [vmem:[#allocation2 + $0x950] sm:$0xff]  ;;  %v236_v10 = vld [vmem:[#allocation2 + $0x368] sm:$0xff] }
  0xef   :  { %766 = vmatmul.mubr.f32.gmra.mrb[76].mxu0 %v203_v12  ;;  %1246 = vmatmul.mubr.f32.gmra.mrb[76].mxu1 %v395_v13  ;;  %v428_v13 = vld [vmem:[#allocation2 + $0x968] sm:$0xff] }
  0xf0   :  { %770 = vmatprep.mubr.f32.mxu0 %v206_v14  ;;  %1250 = vmatprep.mubr.f32.mxu1 %v398_v15 }
  0xf3   :  { %771 = vmatmul.mubr.f32.gmra.mrb[78].mxu0 %v205_v16  ;;  %1251 = vmatmul.mubr.f32.gmra.mrb[78].mxu1 %v397_v17  ;;  %v235_v17 = vld [vmem:[#allocation2 + $0x360] sm:$0xff] }
  0xf4   :  { %775 = vmatprep.mubr.f32.mxu0 %v208_v18  ;;  %1255 = vmatprep.mubr.f32.mxu1 %v400_v19  ;;  %v427_v18 = vld [vmem:[#allocation2 + $0x960] sm:$0xff] }
  0xf7   :  { %776 = vmatmul.mubr.f32.gmra.mrb[80].mxu0 %v207_v20  ;;  %1256 = vmatmul.mubr.f32.gmra.mrb[80].mxu1 %v399_v21  ;;  %v238_v21 = vld [vmem:[#allocation2 + $0x378] sm:$0xff] }
  0xf8   :  { %780 = vmatprep.mubr.f32.mxu0 %v210_v22  ;;  %1260 = vmatprep.mubr.f32.mxu1 %v402_v23  ;;  %v430_v22 = vld [vmem:[#allocation2 + $0x978] sm:$0xff] }
  0xfb   :  { %781 = vmatmul.mubr.f32.gmra.mrb[82].mxu0 %v209_v24  ;;  %1261 = vmatmul.mubr.f32.gmra.mrb[82].mxu1 %v401_v25 }
  0xfc   :  { %785 = vmatprep.mubr.f32.mxu0 %v212_v26  ;;  %1265 = vmatprep.mubr.f32.mxu1 %v404_v27  ;;  %v237_v27 = vld [vmem:[#allocation2 + $0x370] sm:$0xff] }
  0xff   :  { %786 = vmatmul.mubr.f32.gmra.mrb[84].mxu0 %v211_v28  ;;  %1266 = vmatmul.mubr.f32.gmra.mrb[84].mxu1 %v403_v29  ;;  %v429_v28 = vld [vmem:[#allocation2 + $0x970] sm:$0xff] }
 0x100   :  { %790 = vmatprep.mubr.f32.mxu0 %v214_v30  ;;  %1270 = vmatprep.mubr.f32.mxu1 %v406_v31  ;;  %v240_v31 = vld [vmem:[#allocation2 + $0x388] sm:$0xff] }
 0x103   :  { %791 = vmatmul.mubr.f32.gmra.mrb[86].mxu0 %v213_v32  ;;  %1271 = vmatmul.mubr.f32.gmra.mrb[86].mxu1 %v405_v33  ;;  %v432_v32 = vld [vmem:[#allocation2 + $0x988] sm:$0xff] }
 0x104   :  { %795 = vmatprep.mubr.f32.mxu0 %v216_v34  ;;  %1275 = vmatprep.mubr.f32.mxu1 %v408_v35 }
 0x107   :  { %796 = vmatmul.mubr.f32.gmra.mrb[88].mxu0 %v215_v36  ;;  %1276 = vmatmul.mubr.f32.gmra.mrb[88].mxu1 %v407_v37  ;;  %v239_v37 = vld [vmem:[#allocation2 + $0x380] sm:$0xff] }
 0x108   :  { %800 = vmatprep.mubr.f32.mxu0 %v218_v38  ;;  %1280 = vmatprep.mubr.f32.mxu1 %v410_v39  ;;  %v431_v38 = vld [vmem:[#allocation2 + $0x980] sm:$0xff] }
 0x10b   :  { %801 = vmatmul.mubr.f32.gmra.mrb[90].mxu0 %v217_v40  ;;  %1281 = vmatmul.mubr.f32.gmra.mrb[90].mxu1 %v409_v41 }
 0x10c   :  { %805 = vmatprep.mubr.f32.mxu0 %v220_v42  ;;  %1285 = vmatprep.mubr.f32.mxu1 %v412_v43  ;;  %v242_v42 = vld [vmem:[#allocation2 + $0x398] sm:$0xff] }
 0x10d   :  { %v434_v43 = vld [vmem:[#allocation2 + $0x998] sm:$0xff] }
 0x10f   :  { %806 = vmatmul.mubr.f32.gmra.mrb[92].mxu0 %v219_v44  ;;  %1286 = vmatmul.mubr.f32.gmra.mrb[92].mxu1 %v411_v45 }
 0x110   :  { %810 = vmatprep.mubr.f32.mxu0 %v222_v46  ;;  %1290 = vmatprep.mubr.f32.mxu1 %v414_v47  ;;  %v241_v47 = vld [vmem:[#allocation2 + $0x390] sm:$0xff] }
 0x113   :  { %811 = vmatmul.mubr.f32.gmra.mrb[94].mxu0 %v221_v48  ;;  %1291 = vmatmul.mubr.f32.gmra.mrb[94].mxu1 %v413_v49  ;;  %v433_v48 = vld [vmem:[#allocation2 + $0x990] sm:$0xff] }
 0x114   :  { %815 = vmatprep.mubr.f32.mxu0 %v224_v50  ;;  %1295 = vmatprep.mubr.f32.mxu1 %v416_v51 }
 0x117   :  { %816 = vmatmul.mubr.f32.gmra.mrb[96].mxu0 %v223_v52  ;;  %1296 = vmatmul.mubr.f32.gmra.mrb[96].mxu1 %v415_v53  ;;  %v244_v52 = vld [vmem:[#allocation2 + $0x3a8] sm:$0xff] }
 0x118   :  { %820 = vmatprep.mubr.f32.mxu0 %v226_v54  ;;  %1300 = vmatprep.mubr.f32.mxu1 %v418_v55  ;;  %v436_v53 = vld [vmem:[#allocation2 + $0x9a8] sm:$0xff] }
 0x11b   :  { %821 = vmatmul.mubr.f32.gmra.mrb[98].mxu0 %v225_v56  ;;  %1301 = vmatmul.mubr.f32.gmra.mrb[98].mxu1 %v417_v57  ;;  %v243_v57 = vld [vmem:[#allocation2 + $0x3a0] sm:$0xff] }
 0x11c   :  { %825 = vmatprep.mubr.f32.mxu0 %v228_v58  ;;  %1305 = vmatprep.mubr.f32.mxu1 %v420_v59  ;;  %v435_v58 = vld [vmem:[#allocation2 + $0x9a0] sm:$0xff] }
 0x11f   :  { %826 = vmatmul.mubr.f32.gmra.mrb[100].mxu0 %v227_v60  ;;  %1306 = vmatmul.mubr.f32.gmra.mrb[100].mxu1 %v419_v0 }
 0x120   :  { %830 = vmatprep.mubr.f32.mxu0 %v230_v61  ;;  %1310 = vmatprep.mubr.f32.mxu1 %v422_v62  ;;  %v246_v61 = vld [vmem:[#allocation2 + $0x3b8] sm:$0xff] }
 0x121   :  { %v438_v62 = vld [vmem:[#allocation2 + $0x9b8] sm:$0xff] }
 0x123   :  { %831 = vmatmul.mubr.f32.gmra.mrb[102].mxu0 %v229_v63  ;;  %1311 = vmatmul.mubr.f32.gmra.mrb[102].mxu1 %v421_v1 }
 0x124   :  { %835 = vmatprep.mubr.f32.mxu0 %v232_v2  ;;  %1315 = vmatprep.mubr.f32.mxu1 %v424_v3  ;;  %v245_v3 = vld [vmem:[#allocation2 + $0x3b0] sm:$0xff] }
 0x127   :  { %836 = vmatmul.mubr.f32.gmra.mrb[104].mxu0 %v231_v4  ;;  %1316 = vmatmul.mubr.f32.gmra.mrb[104].mxu1 %v423_v5  ;;  %v437_v4 = vld [vmem:[#allocation2 + $0x9b0] sm:$0xff] }
 0x128   :  { %840 = vmatprep.mubr.f32.mxu0 %v234_v6  ;;  %1320 = vmatprep.mubr.f32.mxu1 %v426_v7 }
 0x12a   :  { %v7683_v11 = vpop.f32.mrb[0].mxu0  ;;  %v7685_v12 = vpop.f32.mrb[0].mxu1 }
 0x12b   :  { %v579_v14 = vpop.f32.mrb[1].mxu0  ;;  %v1059_v15 = vpop.f32.mrb[1].mxu1  ;;  %v1537_v16 = vsel %vm1536_vm0, %v7683_v11, 0.0  ;;  %841 = vmatmul.mubr.f32.gmra.mrb[106].mxu0 %v233_v8  ;;  %1321 = vmatmul.mubr.f32.gmra.mrb[106].mxu1 %v425_v9  ;;  %v1825_v26 = vsel %vm1536_vm0, %v7685_v12, 0.0  ;;  %v248_v8 = vld [vmem:[#allocation2 + $0x3c8] sm:$0xff] }
 0x12c   :  { %1538 = vadd.xlane.f32.xlu0 %v1537_v16  ;;  %845 = vmatprep.mubr.f32.mxu0 %v236_v10  ;;  %v440_v9 = vld [vmem:[#allocation2 + $0x9c8] sm:$0xff]  ;;  %v247_v15 = vld [vmem:[#allocation2 + $0x3c0] sm:$0xff] }
 0x12d   :  { %1325 = vmatprep.mubr.f32.mxu1 %v428_v13  ;;  %v439_v16 = vld [vmem:[#allocation2 + $0x9c0] sm:$0xff] }
 0x12e   :  { %v7689_v19 = vpop.f32.mrb[2].mxu0  ;;  %v7691_v20 = vpop.f32.mrb[2].mxu1 }
 0x12f   :  { %v584_v23 = vpop.f32.mrb[3].mxu0  ;;  %v1064_v24 = vpop.f32.mrb[3].mxu1  ;;  %v1828_v25 = vsel %vm1536_vm0, %v7691_v20, 0.0  ;;  %846 = vmatmul.mubr.f32.gmra.mrb[108].mxu0 %v235_v17  ;;  %1326 = vmatmul.mubr.f32.gmra.mrb[108].mxu1 %v427_v18  ;;  %v1540_v34 = vsel %vm1536_vm0, %v7689_v19, 0.0 }
 0x130   :  { %1829 = vadd.xlane.f32.xlu1 %v1828_v25  ;;  %1826 = vadd.xlane.f32.xlu0 %v1825_v26  ;;  %v442_v23 = vld [vmem:[#allocation2 + $0x9d8] sm:$0xff] }
 0x131   :  { %850 = vmatprep.mubr.f32.mxu0 %v238_v21  ;;  %1330 = vmatprep.mubr.f32.mxu1 %v430_v22  ;;  %v250_v22 = vld [vmem:[#allocation2 + $0x3d8] sm:$0xff] }
 0x132   :  { %v7697_v29 = vpop.f32.mrb[4].mxu0  ;;  %v7699_v30 = vpop.f32.mrb[4].mxu1 }
 0x133   :  { %v589_v33 = vpop.f32.mrb[5].mxu0  ;;  %v1543_v35 = vsel %vm1536_vm0, %v7697_v29, 0.0  ;;  %v1069_v36 = vpop.f32.mrb[5].mxu1  ;;  %851 = vmatmul.mubr.f32.gmra.mrb[110].mxu0 %v237_v27  ;;  %1331 = vmatmul.mubr.f32.gmra.mrb[110].mxu1 %v429_v28  ;;  %v1831_v39 = vsel %vm1536_vm0, %v7699_v30, 0.0  ;;  %v249_v27 = vld [vmem:[#allocation2 + $0x3d0] sm:$0xff] }
 0x134   :  { %1541 = vadd.xlane.f32.xlu0 %v1540_v34  ;;  %1544 = vadd.xlane.f32.xlu1 %v1543_v35  ;;  %v441_v28 = vld [vmem:[#allocation2 + $0x9d0] sm:$0xff]  ;;  %v252_v34 = vld [vmem:[#allocation2 + $0x3e8] sm:$0xff] }
 0x135   :  { %855 = vmatprep.mubr.f32.mxu0 %v240_v31  ;;  %1335 = vmatprep.mubr.f32.mxu1 %v432_v32  ;;  %v444_v35 = vld [vmem:[#allocation2 + $0x9e8] sm:$0xff] }
 0x136   :  { %v7707_v40 = vpop.f32.mrb[6].mxu0  ;;  %v7709_v41 = vpop.f32.mrb[6].mxu1 }
 0x137   :  { %v594_v44 = vpop.f32.mrb[7].mxu0  ;;  %v1546_v45 = vsel %vm1536_vm0, %v7707_v40, 0.0  ;;  %v1074_v46 = vpop.f32.mrb[7].mxu1  ;;  %856 = vmatmul.mubr.f32.gmra.mrb[112].mxu0 %v239_v37  ;;  %1336 = vmatmul.mubr.f32.gmra.mrb[112].mxu1 %v431_v38  ;;  %v1834_v49 = vsel %vm1536_vm0, %v7709_v41, 0.0 }
 0x138   :  { %1832 = vadd.xlane.f32.xlu0 %v1831_v39  ;;  %1547 = vadd.xlane.f32.xlu1 %v1546_v45  ;;  %v251_v39 = vld [vmem:[#allocation2 + $0x3e0] sm:$0xff]  ;;  %v254_v46 = vld [vmem:[#allocation2 + $0x3f8] sm:$0xff] }
 0x139   :  { %860 = vmatprep.mubr.f32.mxu0 %v242_v42  ;;  %1340 = vmatprep.mubr.f32.mxu1 %v434_v43  ;;  %v443_v42 = vld [vmem:[#allocation2 + $0x9e0] sm:$0xff] }
 0x13a   :  { %v7715_v50 = vpop.f32.mrb[8].mxu0  ;;  %v7717_v51 = vpop.f32.mrb[8].mxu1 }
 0x13b   :  { %v599_v54 = vpop.f32.mrb[9].mxu0  ;;  %v1549_v55 = vsel %vm1536_vm0, %v7715_v50, 0.0  ;;  %v1079_v56 = vpop.f32.mrb[9].mxu1  ;;  %861 = vmatmul.mubr.f32.gmra.mrb[114].mxu0 %v241_v47  ;;  %1341 = vmatmul.mubr.f32.gmra.mrb[114].mxu1 %v433_v48  ;;  %v1837_v59 = vsel %vm1536_vm0, %v7717_v51, 0.0  ;;  %v446_v47 = vld [vmem:[#allocation2 + $0x9f8] sm:$0xff] }
 0x13c   :  { %1835 = vadd.xlane.f32.xlu1 %v1834_v49  ;;  %1550 = vadd.xlane.f32.xlu0 %v1549_v55  ;;  %v445_v54 = vld [vmem:[#allocation2 + $0x9f0] sm:$0xff] }
 0x13d   :  { %865 = vmatprep.mubr.f32.mxu0 %v244_v52  ;;  %1345 = vmatprep.mubr.f32.mxu1 %v436_v53  ;;  %v253_v53 = vld [vmem:[#allocation2 + $0x3f0] sm:$0xff] }
 0x13e   :  { %v7723_v60 = vpop.f32.mrb[10].mxu0  ;;  %v7725_v0 = vpop.f32.mrb[10].mxu1 }
 0x13f   :  { %v604_v63 = vpop.f32.mrb[11].mxu0  ;;  %v1552_v1 = vsel %vm1536_vm0, %v7723_v60, 0.0  ;;  %v1084_v2 = vpop.f32.mrb[11].mxu1  ;;  %866 = vmatmul.mubr.f32.gmra.mrb[116].mxu0 %v243_v57  ;;  %1346 = vmatmul.mubr.f32.gmra.mrb[116].mxu1 %v435_v58  ;;  %v1840_v5 = vsel %vm1536_vm0, %v7725_v0, 0.0  ;;  %v256_v58 = vld [vmem:[#allocation2 + $0x408] sm:$0xff] }
 0x140   :  { %1838 = vadd.xlane.f32.xlu0 %v1837_v59  ;;  %1553 = vadd.xlane.f32.xlu1 %v1552_v1  ;;  %v448_v59 = vld [vmem:[#allocation2 + $0xa08] sm:$0xff]  ;;  %v255_v1 = vld [vmem:[#allocation2 + $0x400] sm:$0xff] }
 0x141   :  { %870 = vmatprep.mubr.f32.mxu0 %v246_v61  ;;  %1350 = vmatprep.mubr.f32.mxu1 %v438_v62  ;;  %v447_v2 = vld [vmem:[#allocation2 + $0xa00] sm:$0xff] }
 0x142   :  { %v7731_v6 = vpop.f32.mrb[12].mxu0  ;;  %v7733_v7 = vpop.f32.mrb[12].mxu1 }
 0x143   :  { %v609_v10 = vpop.f32.mrb[13].mxu0  ;;  %v1555_v13 = vsel %vm1536_vm0, %v7731_v6, 0.0  ;;  %v1089_v14 = vpop.f32.mrb[13].mxu1  ;;  %871 = vmatmul.mubr.f32.gmra.mrb[118].mxu0 %v245_v3  ;;  %1351 = vmatmul.mubr.f32.gmra.mrb[118].mxu1 %v437_v4  ;;  %v1843_v17 = vsel %vm1536_vm0, %v7733_v7, 0.0 }
 0x144   :  { %1841 = vadd.xlane.f32.xlu1 %v1840_v5  ;;  %1556 = vadd.xlane.f32.xlu0 %v1555_v13 }
 0x145   :  { %875 = vmatprep.mubr.f32.mxu0 %v248_v8  ;;  %1355 = vmatprep.mubr.f32.mxu1 %v440_v9  ;;  %v258_v8 = vld [vmem:[#allocation2 + $0x418] sm:$0xff] }
 0x146   :  { %v7739_v18 = vpop.f32.mrb[14].mxu0  ;;  %v7741_v21 = vpop.f32.mrb[14].mxu1  ;;  %v450_v9 = vld [vmem:[#allocation2 + $0xa18] sm:$0xff] }
 0x147   :  { %v614_v24 = vpop.f32.mrb[15].mxu0  ;;  %v1558_v25 = vsel %vm1536_vm0, %v7739_v18, 0.0  ;;  %v1094_v26 = vpop.f32.mrb[15].mxu1  ;;  %876 = vmatmul.mubr.f32.gmra.mrb[120].mxu0 %v247_v15  ;;  %1356 = vmatmul.mubr.f32.gmra.mrb[120].mxu1 %v439_v16  ;;  %v1846_v31 = vsel %vm1536_vm0, %v7741_v21, 0.0  ;;  %v257_v15 = vld [vmem:[#allocation2 + $0x410] sm:$0xff] }
 0x148   :  { %1844 = vadd.xlane.f32.xlu0 %v1843_v17  ;;  %1559 = vadd.xlane.f32.xlu1 %v1558_v25  ;;  %v449_v16 = vld [vmem:[#allocation2 + $0xa10] sm:$0xff]  ;;  %v260_v24 = vld [vmem:[#allocation2 + $0x428] sm:$0xff] }
 0x149   :  { %880 = vmatprep.mubr.f32.mxu0 %v250_v22  ;;  %1360 = vmatprep.mubr.f32.mxu1 %v442_v23  ;;  %v452_v25 = vld [vmem:[#allocation2 + $0xa28] sm:$0xff] }
 0x14a   :  { %v7747_v32 = vpop.f32.mrb[16].mxu0  ;;  %v7749_v33 = vpop.f32.mrb[16].mxu1 }
 0x14b   :  { %v619_v36 = vpop.f32.mrb[17].mxu0  ;;  %v1561_v37 = vsel %vm1536_vm0, %v7747_v32, 0.0  ;;  %v1099_v38 = vpop.f32.mrb[17].mxu1  ;;  %881 = vmatmul.mubr.f32.gmra.mrb[122].mxu0 %v249_v27  ;;  %1361 = vmatmul.mubr.f32.gmra.mrb[122].mxu1 %v441_v28  ;;  %v1849_v43 = vsel %vm1536_vm0, %v7749_v33, 0.0 }
 0x14c   :  { %1847 = vadd.xlane.f32.xlu1 %v1846_v31  ;;  %1562 = vadd.xlane.f32.xlu0 %v1561_v37  ;;  %v259_v31 = vld [vmem:[#allocation2 + $0x420] sm:$0xff]  ;;  %v262_v38 = vld [vmem:[#allocation2 + $0x438] sm:$0xff] }
 0x14d   :  { %885 = vmatprep.mubr.f32.mxu0 %v252_v34  ;;  %1365 = vmatprep.mubr.f32.mxu1 %v444_v35  ;;  %v451_v34 = vld [vmem:[#allocation2 + $0xa20] sm:$0xff] }
 0x14e   :  { %v7755_v44 = vpop.f32.mrb[18].mxu0  ;;  %v7757_v45 = vpop.f32.mrb[18].mxu1 }
 0x14f   :  { %v624_v48 = vpop.f32.mrb[19].mxu0  ;;  %v1564_v49 = vsel %vm1536_vm0, %v7755_v44, 0.0  ;;  %v1104_v52 = vpop.f32.mrb[19].mxu1  ;;  %886 = vmatmul.mubr.f32.gmra.mrb[124].mxu0 %v251_v39  ;;  %1366 = vmatmul.mubr.f32.gmra.mrb[124].mxu1 %v443_v42  ;;  %v1852_v55 = vsel %vm1536_vm0, %v7757_v45, 0.0  ;;  %v454_v39 = vld [vmem:[#allocation2 + $0xa38] sm:$0xff] }
 0x150   :  { %1850 = vadd.xlane.f32.xlu0 %v1849_v43  ;;  %1565 = vadd.xlane.f32.xlu1 %v1564_v49  ;;  %v453_v48 = vld [vmem:[#allocation2 + $0xa30] sm:$0xff] }
 0x151   :  { %890 = vmatprep.mubr.f32.mxu0 %v254_v46  ;;  %1370 = vmatprep.mubr.f32.mxu1 %v446_v47  ;;  %v261_v47 = vld [vmem:[#allocation2 + $0x430] sm:$0xff] }
 0x152   :  { %v7763_v56 = vpop.f32.mrb[20].mxu0  ;;  %v7765_v57 = vpop.f32.mrb[20].mxu1 }
 0x153   :  { %v629_v61 = vpop.f32.mrb[21].mxu0  ;;  %v1567_v62 = vsel %vm1536_vm0, %v7763_v56, 0.0  ;;  %v1109_v63 = vpop.f32.mrb[21].mxu1  ;;  %891 = vmatmul.mubr.f32.gmra.mrb[126].mxu0 %v253_v53  ;;  %1371 = vmatmul.mubr.f32.gmra.mrb[126].mxu1 %v445_v54  ;;  %v1855_v3 = vsel %vm1536_vm0, %v7765_v57, 0.0 }
 0x154   :  { %1853 = vadd.xlane.f32.xlu1 %v1852_v55  ;;  %1568 = vadd.xlane.f32.xlu0 %v1567_v62  ;;  %v264_v61 = vld [vmem:[#allocation2 + $0x448] sm:$0xff] }
 0x155   :  { %895 = vmatprep.mubr.f32.mxu0 %v256_v58  ;;  %1375 = vmatprep.mubr.f32.mxu1 %v448_v59 }
 0x156   :  { %v7771_v4 = vpop.f32.mrb[22].mxu0  ;;  %v7773_v5 = vpop.f32.mrb[22].mxu1 }
 0x157   :  { %v634_v10 = vpop.f32.mrb[23].mxu0  ;;  %v1570_v13 = vsel %vm1536_vm0, %v7771_v4, 0.0  ;;  %v1114_v14 = vpop.f32.mrb[23].mxu1  ;;  %896 = vmatmul.mubr.f32.gmra.mrb[128].mxu0 %v255_v1  ;;  %1376 = vmatmul.mubr.f32.gmra.mrb[128].mxu1 %v447_v2  ;;  %v1858_v17 = vsel %vm1536_vm0, %v7773_v5, 0.0  ;;  %v263_v1 = vld [vmem:[#allocation2 + $0x440] sm:$0xff] }
 0x158   :  { %1856 = vadd.xlane.f32.xlu0 %v1855_v3  ;;  %1571 = vadd.xlane.f32.xlu1 %v1570_v13  ;;  %v266_v10 = vld [vmem:[#allocation2 + $0x458] sm:$0xff]  ;;  %v456_v13 = vld [vmem:[#allocation2 + $0xa48] sm:$0xff] }
 0x159   :  { %900 = vmatprep.mubr.f32.mxu0 %v258_v8  ;;  %1380 = vmatprep.mubr.f32.mxu1 %v450_v9 }
 0x15a   :  { %v7779_v22 = vpop.f32.mrb[24].mxu0  ;;  %v7781_v23 = vpop.f32.mrb[24].mxu1 }
 0x15b   :  { %v639_v26 = vpop.f32.mrb[25].mxu0  ;;  %v1573_v27 = vsel %vm1536_vm0, %v7779_v22, 0.0  ;;  %v1119_v28 = vpop.f32.mrb[25].mxu1  ;;  %901 = vmatmul.mubr.f32.gmra.mrb[130].mxu0 %v257_v15  ;;  %1381 = vmatmul.mubr.f32.gmra.mrb[130].mxu1 %v449_v16  ;;  %v1861_v35 = vsel %vm1536_vm0, %v7781_v23, 0.0  ;;  %v265_v16 = vld [vmem:[#allocation2 + $0x450] sm:$0xff] }
 0x15c   :  { %1859 = vadd.xlane.f32.xlu1 %v1858_v17  ;;  %1574 = vadd.xlane.f32.xlu0 %v1573_v27  ;;  %v455_v17 = vld [vmem:[#allocation2 + $0xa40] sm:$0xff]  ;;  %v458_v28 = vld [vmem:[#allocation2 + $0xa58] sm:$0xff] }
 0x15d   :  { %905 = vmatprep.mubr.f32.mxu0 %v260_v24  ;;  %1385 = vmatprep.mubr.f32.mxu1 %v452_v25 }
 0x15e   :  { %v7787_v36 = vpop.f32.mrb[26].mxu0  ;;  %v7789_v37 = vpop.f32.mrb[26].mxu1 }
 0x15f   :  { %v644_v42 = vpop.f32.mrb[27].mxu0  ;;  %v1576_v43 = vsel %vm1536_vm0, %v7787_v36, 0.0  ;;  %v1124_v46 = vpop.f32.mrb[27].mxu1  ;;  %906 = vmatmul.mubr.f32.gmra.mrb[132].mxu0 %v259_v31  ;;  %1386 = vmatmul.mubr.f32.gmra.mrb[132].mxu1 %v451_v34  ;;  %v1864_v49 = vsel %vm1536_vm0, %v7789_v37, 0.0 }
 0x160   :  { %1862 = vadd.xlane.f32.xlu0 %v1861_v35  ;;  %1577 = vadd.xlane.f32.xlu1 %v1576_v43  ;;  %v457_v35 = vld [vmem:[#allocation2 + $0xa50] sm:$0xff] }
 0x161   :  { %910 = vmatprep.mubr.f32.mxu0 %v262_v38  ;;  %1390 = vmatprep.mubr.f32.mxu1 %v454_v39 }
 0x162   :  { %v7795_v52 = vpop.f32.mrb[28].mxu0  ;;  %v7797_v53 = vpop.f32.mrb[28].mxu1 }
 0x163   :  { %v649_v54 = vpop.f32.mrb[29].mxu0  ;;  %v1579_v55 = vsel %vm1536_vm0, %v7795_v52, 0.0  ;;  %v1129_v58 = vpop.f32.mrb[29].mxu1  ;;  %911 = vmatmul.mubr.f32.gmra.mrb[134].mxu0 %v261_v47  ;;  %1391 = vmatmul.mubr.f32.gmra.mrb[134].mxu1 %v453_v48  ;;  %v1867_v59 = vsel %vm1536_vm0, %v7797_v53, 0.0 }
 0x164   :  { %1865 = vadd.xlane.f32.xlu1 %v1864_v49  ;;  %1580 = vadd.xlane.f32.xlu0 %v1579_v55  ;;  %v268_v58 = vld [vmem:[#allocation2 + $0x468] sm:$0xff] }
 0x165   :  { %915 = vmatprep.mubr.f32.mxu0 %v264_v61  ;;  %1395 = vmatprep.mubr.f32.mxu1 %v456_v13  ;;  %v460_v13 = vld [vmem:[#allocation2 + $0xa68] sm:$0xff] }
 0x166   :  { %v7803_v62 = vpop.f32.mrb[30].mxu0  ;;  %v7805_v63 = vpop.f32.mrb[30].mxu1 }
 0x167   :  { %v654_v2 = vpop.f32.mrb[31].mxu0  ;;  %v1582_v3 = vsel %vm1536_vm0, %v7803_v62, 0.0  ;;  %v1134_v8 = vpop.f32.mrb[31].mxu1  ;;  %916 = vmatmul.mubr.f32.gmra.mrb[136].mxu0 %v263_v1  ;;  %v1870_v9 = vsel %vm1536_vm0, %v7805_v63, 0.0  ;;  %1396 = vmatmul.mubr.f32.gmra.mrb[136].mxu1 %v455_v17  ;;  %v267_v1 = vld [vmem:[#allocation2 + $0x460] sm:$0xff] }
 0x168   :  { %1868 = vadd.xlane.f32.xlu0 %v1867_v59  ;;  %1583 = vadd.xlane.f32.xlu1 %v1582_v3 }
 0x169   :  { %920 = vmatprep.mubr.f32.mxu0 %v266_v10  ;;  %1400 = vmatprep.mubr.f32.mxu1 %v458_v28  ;;  %v270_v10 = vld [vmem:[#allocation2 + $0x478] sm:$0xff] }
 0x16a   :  { %v7811_v14 = vpop.f32.mrb[32].mxu0  ;;  %v7813_v15 = vpop.f32.mrb[32].mxu1 }
 0x16b   :  { %13489 = vst [vmem:[#allocation5_spill] sm:$0xff] %v7811_v14  ;;  %13490 = vst [vmem:[#allocation6_spill] sm:$0xff] %v7813_v15  ;;  %v659_v24 = vpop.f32.mrb[33].mxu0  ;;  %v1585_v25 = vsel %vm1536_vm0, %v7811_v14, 0.0  ;;  %v1139_v26 = vpop.f32.mrb[33].mxu1  ;;  %921 = vmatmul.mubr.f32.gmra.mrb[138].mxu0 %v265_v16  ;;  %v1873_v27 = vsel %vm1536_vm0, %v7813_v15, 0.0  ;;  %1401 = vmatmul.mubr.f32.gmra.mrb[138].mxu1 %v457_v35 }
 0x16c   :  { %1871 = vadd.xlane.f32.xlu1 %v1870_v9  ;;  %1586 = vadd.xlane.f32.xlu0 %v1585_v25  ;;  %v269_v24 = vld [vmem:[#allocation2 + $0x470] sm:$0xff]  ;;  %v459_v25 = vld [vmem:[#allocation2 + $0xa60] sm:$0xff] }
 0x16d   :  { %925 = vmatprep.mubr.f32.mxu0 %v268_v58  ;;  %1405 = vmatprep.mubr.f32.mxu1 %v460_v13  ;;  %v479_v14 = vld [vmem:[#allocation2 + $0xb00] sm:$0xff] }
 0x16e   :  { %v7819_v31 = vpop.f32.mrb[34].mxu0  ;;  %v7821_v34 = vpop.f32.mrb[34].mxu1 }
 0x16f   :  { %13491 = vst [vmem:[#allocation7_spill] sm:$0xff] %v7819_v31  ;;  %13492 = vst [vmem:[#allocation8_spill] sm:$0xff] %v7821_v34  ;;  %v664_v38 = vpop.f32.mrb[35].mxu0  ;;  %v1588_v39 = vsel %vm1536_vm0, %v7819_v31, 0.0  ;;  %v1144_v42 = vpop.f32.mrb[35].mxu1  ;;  %v1876_v43 = vsel %vm1536_vm0, %v7821_v34, 0.0  ;;  %926 = vmatmul.mubr.f32.gmra.mrb[140].mxu0 %v267_v1  ;;  %1406 = vmatmul.mubr.f32.gmra.mrb[140].mxu1 %v459_v25 }
 0x170   :  { %1874 = vadd.xlane.f32.xlu0 %v1873_v27  ;;  %1589 = vadd.xlane.f32.xlu1 %v1588_v39  ;;  %v462_v38 = vld [vmem:[#allocation2 + $0xa78] sm:$0xff]  ;;  %v271_v25 = vld [vmem:[#allocation2 + $0x480] sm:$0xff]  ;;  %v476_v31 = vld [vmem:[#allocation2 + $0xae8] sm:$0xff] }
 0x171   :  { %930 = vmatprep.mubr.f32.mxu0 %v270_v10  ;;  %1410 = vmatprep.mubr.f32.mxu1 %v462_v38  ;;  %v272_v10 = vld [vmem:[#allocation2 + $0x488] sm:$0xff]  ;;  %v274_v38 = vld [vmem:[#allocation2 + $0x498] sm:$0xff] }
 0x172   :  { %v7827_v46 = vpop.f32.mrb[36].mxu0  ;;  %v7829_v47 = vpop.f32.mrb[36].mxu1 }
 0x173   :  { %13493 = vst [vmem:[#allocation9_spill] sm:$0xff] %v7827_v46  ;;  %13494 = vst [vmem:[#allocation10_spill] sm:$0xff] %v7829_v47  ;;  %v669_v48 = vpop.f32.mrb[37].mxu0  ;;  %v1591_v49 = vsel %vm1536_vm0, %v7827_v46, 0.0  ;;  %v1149_v54 = vpop.f32.mrb[37].mxu1  ;;  %v1879_v55 = vsel %vm1536_vm0, %v7829_v47, 0.0  ;;  %931 = vmatmul.mubr.f32.gmra.mrb[142].mxu0 %v269_v24 }
 0x174   :  { %1877 = vadd.xlane.f32.xlu1 %v1876_v43  ;;  %1592 = vadd.xlane.f32.xlu0 %v1591_v49  ;;  %v461_v43 = vld [vmem:[#allocation2 + $0xa70] sm:$0xff] }
 0x175   :  { %1411 = vmatmul.mubr.f32.gmra.mrb[142].mxu1 %v461_v43  ;;  %935 = vmatprep.mubr.f32.mxu0 %v272_v10  ;;  %v464_v43 = vld [vmem:[#allocation2 + $0xa88] sm:$0xff]  ;;  %v466_v10 = vld [vmem:[#allocation2 + $0xa98] sm:$0xff] }
 0x176   :  { %v7835_v59 = vpop.f32.mrb[38].mxu0  ;;  %v7837_v61 = vpop.f32.mrb[38].mxu1  ;;  %1415 = vmatprep.mubr.f32.mxu1 %v464_v43 }
 0x177   :  { %13495 = vst [vmem:[#allocation11_spill] sm:$0xff] %v7835_v59  ;;  %13496 = vst [vmem:[#allocation12_spill] sm:$0xff] %v7837_v61  ;;  %v674_v2 = vpop.f32.mrb[39].mxu0  ;;  %v1594_v3 = vsel %vm1536_vm0, %v7835_v59, 0.0  ;;  %v1154_v8 = vpop.f32.mrb[39].mxu1  ;;  %v1882_v9 = vsel %vm1536_vm0, %v7837_v61, 0.0  ;;  %936 = vmatmul.mubr.f32.gmra.mrb[144].mxu0 %v271_v25 }
 0x178   :  { %1880 = vadd.xlane.f32.xlu0 %v1879_v55  ;;  %1595 = vadd.xlane.f32.xlu1 %v1594_v3 }
 0x179   :  { %940 = vmatprep.mubr.f32.mxu0 %v274_v38 }
 0x17a   :  { %v7843_v16 = vpop.f32.mrb[40].mxu0  ;;  %v7845_v17 = vpop.f32.mrb[40].mxu1 }
 0x17b   :  { %13497 = vst [vmem:[#allocation13_spill] sm:$0xff] %v7843_v16  ;;  %13498 = vst [vmem:[#allocation14_spill] sm:$0xff] %v7845_v17  ;;  %v679_v26 = vpop.f32.mrb[41].mxu0  ;;  %v1597_v27 = vsel %vm1536_vm0, %v7843_v16, 0.0  ;;  %v1159_v28 = vpop.f32.mrb[41].mxu1  ;;  %v1885_v35 = vsel %vm1536_vm0, %v7845_v17, 0.0 }
 0x17c   :  { %1883 = vadd.xlane.f32.xlu1 %v1882_v9  ;;  %1598 = vadd.xlane.f32.xlu0 %v1597_v27 }
 0x17e   :  { %v7851_v39 = vpop.f32.mrb[42].mxu0  ;;  %v7853_v42 = vpop.f32.mrb[42].mxu1 }
 0x17f   :  { %13499 = vst [vmem:[#allocation15_spill] sm:$0xff] %v7851_v39  ;;  %13500 = vst [vmem:[#allocation16_spill] sm:$0xff] %v7853_v42  ;;  %v684_v48 = vpop.f32.mrb[43].mxu0  ;;  %v1600_v49 = vsel %vm1536_vm0, %v7851_v39, 0.0  ;;  %v1164_v54 = vpop.f32.mrb[43].mxu1  ;;  %v1888_v55 = vsel %vm1536_vm0, %v7853_v42, 0.0 }
 0x180   :  { %1886 = vadd.xlane.f32.xlu0 %v1885_v35  ;;  %1601 = vadd.xlane.f32.xlu1 %v1600_v49  ;;  %v273_v54 = vld [vmem:[#allocation2 + $0x490] sm:$0xff] }
 0x181   :  { %941 = vmatmul.mubr.f32.gmra.mrb[146].mxu0 %v273_v54 }
 0x182   :  { %v7859_v58 = vpop.f32.mrb[44].mxu0  ;;  %v7861_v1 = vpop.f32.mrb[44].mxu1 }
 0x183   :  { %13501 = vst [vmem:[#allocation17_spill] sm:$0xff] %v7859_v58  ;;  %13502 = vst [vmem:[#allocation18_spill] sm:$0xff] %v7861_v1  ;;  %v689_v2 = vpop.f32.mrb[45].mxu0  ;;  %v1603_v3 = vsel %vm1536_vm0, %v7859_v58, 0.0  ;;  %v1169_v8 = vpop.f32.mrb[45].mxu1  ;;  %v1891_v9 = vsel %vm1536_vm0, %v7861_v1, 0.0 }
 0x184   :  { %1889 = vadd.xlane.f32.xlu1 %v1888_v55  ;;  %1604 = vadd.xlane.f32.xlu0 %v1603_v3  ;;  %v463_v55 = vld [vmem:[#allocation2 + $0xa80] sm:$0xff] }
 0x185   :  { %1416 = vmatmul.mubr.f32.gmra.mrb[144].mxu1 %v463_v55 }
 0x186   :  { %v7867_v13 = vpop.f32.mrb[46].mxu0  ;;  %v7869_v24 = vpop.f32.mrb[46].mxu1  ;;  %1420 = vmatprep.mubr.f32.mxu1 %v466_v10 }
 0x187   :  { %13503 = vst [vmem:[#allocation19_spill] sm:$0xff] %v7867_v13  ;;  %13504 = vst [vmem:[#allocation20_spill] sm:$0xff] %v7869_v24  ;;  %v694_v26 = vpop.f32.mrb[47].mxu0  ;;  %v1606_v27 = vsel %vm1536_vm0, %v7867_v13, 0.0  ;;  %v1174_v28 = vpop.f32.mrb[47].mxu1  ;;  %v1894_v35 = vsel %vm1536_vm0, %v7869_v24, 0.0 }
 0x188   :  { %1892 = vadd.xlane.f32.xlu0 %v1891_v9  ;;  %1607 = vadd.xlane.f32.xlu1 %v1606_v27  ;;  %v465_v27 = vld [vmem:[#allocation2 + $0xa90] sm:$0xff] }
 0x189   :  { %1421 = vmatmul.mubr.f32.gmra.mrb[146].mxu1 %v465_v27  ;;  %v276_v27 = vld [vmem:[#allocation2 + $0x4a8] sm:$0xff] }
 0x18a   :  { %v7875_v48 = vpop.f32.mrb[48].mxu0  ;;  %v7877_v49 = vpop.f32.mrb[48].mxu1  ;;  %945 = vmatprep.mubr.f32.mxu0 %v276_v27  ;;  %v277_v27 = vld [vmem:[#allocation2 + $0x4b0] sm:$0xff] }
 0x18b   :  { %13505 = vst [vmem:[#allocation21_spill] sm:$0xff] %v7875_v48  ;;  %13506 = vst [vmem:[#allocation22_spill] sm:$0xff] %v7877_v49  ;;  %v699_v2 = vpop.f32.mrb[49].mxu0  ;;  %v1609_v3 = vsel %vm1536_vm0, %v7875_v48, 0.0  ;;  %v1179_v8 = vpop.f32.mrb[49].mxu1  ;;  %v1897_v9 = vsel %vm1536_vm0, %v7877_v49, 0.0 }
 0x18c   :  { %1895 = vadd.xlane.f32.xlu1 %v1894_v35  ;;  %1610 = vadd.xlane.f32.xlu0 %v1609_v3 }
 0x18e   :  { %v7883_v25 = vpop.f32.mrb[50].mxu0  ;;  %v7885_v26 = vpop.f32.mrb[50].mxu1 }
 0x18f   :  { %13507 = vst [vmem:[#allocation23_spill] sm:$0xff] %v7883_v25  ;;  %13508 = vst [vmem:[#allocation24_spill] sm:$0xff] %v7885_v26  ;;  %v704_v28 = vpop.f32.mrb[51].mxu0  ;;  %v1612_v38 = vsel %vm1536_vm0, %v7883_v25, 0.0  ;;  %v1184_v43 = vpop.f32.mrb[51].mxu1  ;;  %v1900_v35 = vsel %vm1536_vm0, %v7885_v26, 0.0 }
 0x190   :  { %1898 = vadd.xlane.f32.xlu0 %v1897_v9  ;;  %1613 = vadd.xlane.f32.xlu1 %v1612_v38  ;;  %v275_v38 = vld [vmem:[#allocation2 + $0x4a0] sm:$0xff] }
 0x191   :  { %946 = vmatmul.mubr.f32.gmra.mrb[148].mxu0 %v275_v38 }
 0x192   :  { %v7891_v54 = vpop.f32.mrb[52].mxu0  ;;  %v7893_v55 = vpop.f32.mrb[52].mxu1 }
 0x193   :  { %13509 = vst [vmem:[#allocation25_spill] sm:$0xff] %v7891_v54  ;;  %13510 = vst [vmem:[#allocation26_spill] sm:$0xff] %v7893_v55  ;;  %v709_v2 = vpop.f32.mrb[53].mxu0  ;;  %v1615_v3 = vsel %vm1536_vm0, %v7891_v54, 0.0  ;;  %v1189_v8 = vpop.f32.mrb[53].mxu1  ;;  %v1903_v10 = vsel %vm1536_vm0, %v7893_v55, 0.0 }
 0x194   :  { %1901 = vadd.xlane.f32.xlu1 %v1900_v35  ;;  %1616 = vadd.xlane.f32.xlu0 %v1615_v3  ;;  %v278_v3 = vld [vmem:[#allocation2 + $0x4b8] sm:$0xff]  ;;  %v468_v8 = vld [vmem:[#allocation2 + $0xaa8] sm:$0xff] }
 0x195   :  { %950 = vmatprep.mubr.f32.mxu0 %v278_v3  ;;  %1425 = vmatprep.mubr.f32.mxu1 %v468_v8  ;;  %v469_v3 = vld [vmem:[#allocation2 + $0xab0] sm:$0xff] }
 0x196   :  { %v7899_v9 = vpop.f32.mrb[54].mxu0  ;;  %v7901_v28 = vpop.f32.mrb[54].mxu1  ;;  %951 = vmatmul.mubr.f32.gmra.mrb[150].mxu0 %v277_v27 }
 0x197   :  { %13511 = vst [vmem:[#allocation27_spill] sm:$0xff] %v7899_v9  ;;  %13512 = vst [vmem:[#allocation28_spill] sm:$0xff] %v7901_v28  ;;  %v714_v43 = vpop.f32.mrb[55].mxu0  ;;  %v1618_v2 = vsel %vm1536_vm0, %v7899_v9, 0.0  ;;  %v1194_v26 = vpop.f32.mrb[55].mxu1  ;;  %v1906_v35 = vsel %vm1536_vm0, %v7901_v28, 0.0 }
 0x198   :  { %1904 = vadd.xlane.f32.xlu0 %v1903_v10  ;;  %1619 = vadd.xlane.f32.xlu1 %v1618_v2  ;;  %v467_v43 = vld [vmem:[#allocation2 + $0xaa0] sm:$0xff]  ;;  %v470_v2 = vld [vmem:[#allocation2 + $0xab8] sm:$0xff] }
 0x199   :  { %1426 = vmatmul.mubr.f32.gmra.mrb[148].mxu1 %v467_v43 }
 0x19a   :  { %v7907_v55 = vpop.f32.mrb[56].mxu0  ;;  %v7909_v54 = vpop.f32.mrb[56].mxu1  ;;  %1430 = vmatprep.mubr.f32.mxu1 %v470_v2 }
 0x19b   :  { %13513 = vst [vmem:[#allocation29_spill] sm:$0xff] %v7907_v55  ;;  %13514 = vst [vmem:[#allocation30_spill] sm:$0xff] %v7909_v54  ;;  %v719_v25 = vpop.f32.mrb[57].mxu0  ;;  %v1621_v26 = vsel %vm1536_vm0, %v7907_v55, 0.0  ;;  %v1199_v38 = vpop.f32.mrb[57].mxu1  ;;  %v1909_v10 = vsel %vm1536_vm0, %v7909_v54, 0.0 }
 0x19c   :  { %1907 = vadd.xlane.f32.xlu1 %v1906_v35  ;;  %1622 = vadd.xlane.f32.xlu0 %v1621_v26 }
 0x19d   :  { %1431 = vmatmul.mubr.f32.gmra.mrb[150].mxu1 %v469_v3  ;;  %v280_v3 = vld [vmem:[#allocation2 + $0x4c8] sm:$0xff] }
 0x19e   :  { %v7915_v28 = vpop.f32.mrb[58].mxu0  ;;  %v7917_v9 = vpop.f32.mrb[58].mxu1  ;;  %955 = vmatprep.mubr.f32.mxu0 %v280_v3  ;;  %v281_v3 = vld [vmem:[#allocation2 + $0x4d0] sm:$0xff] }
 0x19f   :  { %13515 = vst [vmem:[#allocation31_spill] sm:$0xff] %v7915_v28  ;;  %13516 = vst [vmem:[#allocation32_spill] sm:$0xff] %v7917_v9  ;;  %v724_v8 = vpop.f32.mrb[59].mxu0  ;;  %v1624_v25 = vsel %vm1536_vm0, %v7915_v28, 0.0  ;;  %v1204_v55 = vpop.f32.mrb[59].mxu1  ;;  %v1912_v35 = vsel %vm1536_vm0, %v7917_v9, 0.0 }
 0x1a0   :  { %1910 = vadd.xlane.f32.xlu0 %v1909_v10  ;;  %1625 = vadd.xlane.f32.xlu1 %v1624_v25  ;;  %v279_v25 = vld [vmem:[#allocation2 + $0x4c0] sm:$0xff] }
 0x1a1   :  { %956 = vmatmul.mubr.f32.gmra.mrb[152].mxu0 %v279_v25 }
 0x1a2   :  { %v7923_v27 = vpop.f32.mrb[60].mxu0  ;;  %v7925_v43 = vpop.f32.mrb[60].mxu1 }
 0x1a3   :  { %v729_v26 = vpop.f32.mrb[61].mxu0  ;;  %v1627_v38 = vsel %vm1536_vm0, %v7923_v27, 0.0  ;;  %v1209_v2 = vpop.f32.mrb[61].mxu1  ;;  %v1915_v55 = vsel %vm1536_vm0, %v7925_v43, 0.0 }
 0x1a4   :  { %1913 = vadd.xlane.f32.xlu1 %v1912_v35  ;;  %1628 = vadd.xlane.f32.xlu0 %v1627_v38  ;;  %v282_v38 = vld [vmem:[#allocation2 + $0x4d8] sm:$0xff]  ;;  %v472_v2 = vld [vmem:[#allocation2 + $0xac8] sm:$0xff] }
 0x1a5   :  { %960 = vmatprep.mubr.f32.mxu0 %v282_v38  ;;  %1435 = vmatprep.mubr.f32.mxu1 %v472_v2  ;;  %v473_v38 = vld [vmem:[#allocation2 + $0xad0] sm:$0xff] }
 0x1a6   :  { %v7931_v10 = vpop.f32.mrb[62].mxu0  ;;  %v7933_v8 = vpop.f32.mrb[62].mxu1  ;;  %961 = vmatmul.mubr.f32.gmra.mrb[154].mxu0 %v281_v3 }
 0x1a7   :  { %13517 = vst [vmem:[#allocation33_spill] sm:$0xff] %v7931_v10  ;;  %13518 = vst [vmem:[#allocation34_spill] sm:$0xff] %v7933_v8  ;;  %v734_v9 = vpop.f32.mrb[63].mxu0  ;;  %v1630_v26 = vsel %vm1536_vm0, %v7931_v10, 0.0  ;;  %v1214_v28 = vpop.f32.mrb[63].mxu1  ;;  %v1918_v35 = vsel %vm1536_vm0, %v7933_v8, 0.0 }
 0x1a8   :  { %1916 = vadd.xlane.f32.xlu0 %v1915_v55  ;;  %1631 = vadd.xlane.f32.xlu1 %v1630_v26  ;;  %v471_v9 = vld [vmem:[#allocation2 + $0xac0] sm:$0xff]  ;;  %v474_v26 = vld [vmem:[#allocation2 + $0xad8] sm:$0xff] }
 0x1a9   :  { %1436 = vmatmul.mubr.f32.gmra.mrb[152].mxu1 %v471_v9 }
 0x1aa   :  { %v7939_v54 = vpop.f32.mrb[64].mxu0  ;;  %v7941_v49 = vpop.f32.mrb[64].mxu1  ;;  %1440 = vmatprep.mubr.f32.mxu1 %v474_v26 }
 0x1ab   :  { %13519 = vst [vmem:[#allocation35_spill] sm:$0xff] %v7939_v54  ;;  %13520 = vst [vmem:[#allocation36_spill] sm:$0xff] %v7941_v49  ;;  %v739_v48 = vpop.f32.mrb[65].mxu0  ;;  %v1633_v28 = vsel %vm1536_vm0, %v7939_v54, 0.0  ;;  %v1219_v25 = vpop.f32.mrb[65].mxu1  ;;  %v1921_v55 = vsel %vm1536_vm0, %v7941_v49, 0.0 }
 0x1ac   :  { %1919 = vadd.xlane.f32.xlu1 %v1918_v35  ;;  %1634 = vadd.xlane.f32.xlu0 %v1633_v28 }
 0x1ad   :  { %1441 = vmatmul.mubr.f32.gmra.mrb[154].mxu1 %v473_v38 }
 0x1ae   :  { %v7947_v24 = vpop.f32.mrb[66].mxu0  ;;  %v7949_v13 = vpop.f32.mrb[66].mxu1  ;;  %1445 = vmatprep.mubr.f32.mxu1 %v476_v31 }
 0x1af   :  { %13521 = vst [vmem:[#allocation37_spill] sm:$0xff] %v7947_v24  ;;  %13522 = vst [vmem:[#allocation38_spill] sm:$0xff] %v7949_v13  ;;  %v744_v2 = vpop.f32.mrb[67].mxu0  ;;  %v1636_v48 = vsel %vm1536_vm0, %v7947_v24, 0.0  ;;  %v1224_v1 = vpop.f32.mrb[67].mxu1  ;;  %v1924_v35 = vsel %vm1536_vm0, %v7949_v13, 0.0 }
 0x1b0   :  { %1922 = vadd.xlane.f32.xlu0 %v1921_v55  ;;  %1637 = vadd.xlane.f32.xlu1 %v1636_v48 }
 0x1b2   :  { %v7955_v3 = vpop.f32.mrb[68].mxu0  ;;  %v7957_v9 = vpop.f32.mrb[68].mxu1 }
 0x1b3   :  { %13523 = vst [vmem:[#allocation39_spill] sm:$0xff] %v7955_v3  ;;  %13524 = vst [vmem:[#allocation40_spill] sm:$0xff] %v7957_v9  ;;  %v749_v28 = vpop.f32.mrb[69].mxu0  ;;  %v1639_v25 = vsel %vm1536_vm0, %v7955_v3, 0.0  ;;  %v1229_v26 = vpop.f32.mrb[69].mxu1  ;;  %v1927_v1 = vsel %vm1536_vm0, %v7957_v9, 0.0 }
 0x1b4   :  { %1925 = vadd.xlane.f32.xlu1 %v1924_v35  ;;  %1640 = vadd.xlane.f32.xlu0 %v1639_v25 }
 0x1b6   :  { %v7963_v38 = vpop.f32.mrb[70].mxu0  ;;  %v7965_v55 = vpop.f32.mrb[70].mxu1 }
 0x1b7   :  { %13525 = vst [vmem:[#allocation41_spill] sm:$0xff] %v7963_v38  ;;  %13526 = vst [vmem:[#allocation42_spill] sm:$0xff] %v7965_v55  ;;  %v754_v2 = vpop.f32.mrb[71].mxu0  ;;  %v1642_v48 = vsel %vm1536_vm0, %v7963_v38, 0.0  ;;  %v1234_v58 = vpop.f32.mrb[71].mxu1  ;;  %v1930_v26 = vsel %vm1536_vm0, %v7965_v55, 0.0 }
 0x1b8   :  { %1928 = vadd.xlane.f32.xlu0 %v1927_v1  ;;  %1643 = vadd.xlane.f32.xlu1 %v1642_v48 }
 0x1b9   :  { %v1539_v28 = vpop.xlane.xlu0 %1538 }
 0x1ba   :  { %v2113_v35 = vmul.f32 0.020408163, %v1539_v28  ;;  %v7971_v25 = vpop.f32.mrb[72].mxu0  ;;  %v7973_v42 = vpop.f32.mrb[72].mxu1 }
 0x1bb   :  { %13527 = vst [vmem:[#allocation43_spill] sm:$0xff] %v7971_v25  ;;  %13528 = vst [vmem:[#allocation44_spill] sm:$0xff] %v7973_v42  ;;  %v759_v39 = vpop.f32.mrb[73].mxu0  ;;  %v1645_v17 = vsel %vm1536_vm0, %v7971_v25, 0.0  ;;  %v1239_v2 = vpop.f32.mrb[73].mxu1  ;;  %v1933_v48 = vsel %vm1536_vm0, %v7973_v42, 0.0 }
 0x1bc   :  { %v7978_v16 = vsub.f32 %v7683_v11, %v2113_v35  ;;  %1931 = vadd.xlane.f32.xlu1 %v1930_v26  ;;  %1646 = vadd.xlane.f32.xlu0 %v1645_v17 }
 0x1bd   :  { %v1830_v58 = vpop.xlane.xlu1 %1829  ;;  %v1827_v1 = vpop.xlane.xlu0 %1826 }
 0x1be   :  { %13529 = vst [vmem:[#allocation45_spill] sm:$0xff] %v7978_v16  ;;  %v2209_v28 = vmul.f32 0.020408163, %v1827_v1  ;;  %v7982_v61 = vpop.f32.mrb[74].mxu0  ;;  %v7984_v59 = vpop.f32.mrb[74].mxu1  ;;  %v2497_v11 = vmul.f32 %v7978_v16, %v7978_v16 }
 0x1bf   :  { %13530 = vst [vmem:[#allocation46_spill] sm:$0xff] %v7982_v61  ;;  %13531 = vst [vmem:[#allocation47_spill] sm:$0xff] %v7984_v59  ;;  %v764_v39 = vpop.f32.mrb[75].mxu0  ;;  %v1648_v47 = vsel %vm1536_vm0, %v7982_v61, 0.0  ;;  %v1244_v2 = vpop.f32.mrb[75].mxu1  ;;  %v1936_v42 = vsel %vm1536_vm0, %v7984_v59, 0.0 }
 0x1c0   :  { %v2210_v26 = vmul.f32 0.020408163, %v1830_v58  ;;  %v7991_v17 = vsub.f32 %v7685_v12, %v2209_v28  ;;  %1934 = vadd.xlane.f32.xlu0 %v1933_v48  ;;  %1649 = vadd.xlane.f32.xlu1 %v1648_v47  ;;  %v2689_v2 = vsel %vm1536_vm0, %v2497_v11, 0.0 }
 0x1c1   :  { %v1542_v35 = vpop.xlane.xlu0 %1541  ;;  %v1545_v1 = vpop.xlane.xlu1 %1544 }
 0x1c2   :  { %13532 = vst [vmem:[#allocation48_spill] sm:$0xff] %v7991_v17  ;;  %v2114_v25 = vmul.f32 0.020408163, %v1542_v35  ;;  %v7995_v39 = vpop.f32.mrb[76].mxu0  ;;  %v7997_v55 = vpop.f32.mrb[76].mxu1  ;;  %v2593_v58 = vmul.f32 %v7991_v17, %v7991_v17  ;;  %v8003_v48 = vsub.f32 %v7691_v20, %v2210_v26 }
 0x1c3   :  { %13533 = vst [vmem:[#allocation49_spill] sm:$0xff] %v7995_v39  ;;  %13534 = vst [vmem:[#allocation50_spill] sm:$0xff] %v7997_v55  ;;  %v769_v16 = vpop.f32.mrb[77].mxu0  ;;  %v1249_v12 = vpop.f32.mrb[77].mxu1  ;;  %v2115_v17 = vmul.f32 0.020408163, %v1545_v1 }
 0x1c4   :  { %13535 = vst [vmem:[#allocation51_spill] sm:$0xff] %v8003_v48  ;;  %v8006_v47 = vsub.f32 %v7689_v19, %v2114_v25  ;;  %2690 = vadd.xlane.f32.xlu0 %v2689_v2  ;;  %1937 = vadd.xlane.f32.xlu1 %v1936_v42  ;;  %v2977_v16 = vsel %vm1536_vm0, %v2593_v58, 0.0  ;;  %v2594_v42 = vmul.f32 %v8003_v48, %v8003_v48  ;;  %v1651_v2 = vsel %vm1536_vm0, %v7995_v39, 0.0 }
 0x1c5   :  { %v1833_v28 = vpop.xlane.xlu0 %1832  ;;  %v1548_v35 = vpop.xlane.xlu1 %1547  ;;  %v8025_v1 = vsub.f32 %v7697_v29, %v2115_v17 }
 0x1c6   :  { %13536 = vst [vmem:[#allocation52_spill] sm:$0xff] %v8006_v47  ;;  %v2498_v59 = vmul.f32 %v8006_v47, %v8006_v47  ;;  %v8010_v61 = vpop.f32.mrb[78].mxu0  ;;  %v8012_v11 = vpop.f32.mrb[78].mxu1  ;;  %v2211_v58 = vmul.f32 0.020408163, %v1833_v28 }
 0x1c7   :  { %13537 = vst [vmem:[#allocation53_spill] sm:$0xff] %v8010_v61  ;;  %13538 = vst [vmem:[#allocation54_spill] sm:$0xff] %v8012_v11  ;;  %v774_v12 = vpop.f32.mrb[79].mxu0  ;;  %v1254_v20 = vpop.f32.mrb[79].mxu1  ;;  %v1654_v39 = vsel %vm1536_vm0, %v8010_v61, 0.0  ;;  %v2499_v28 = vmul.f32 %v8025_v1, %v8025_v1  ;;  %v1942_v61 = vsel %vm1536_vm0, %v8012_v11, 0.0 }
 0x1c8   :  { %2978 = vadd.xlane.f32.xlu0 %v2977_v16  ;;  %v2692_v19 = vsel %vm1536_vm0, %v2498_v59, 0.0  ;;  %13541 = vst [vmem:[#allocation57_spill] sm:$0xff] %v8025_v1  ;;  %v2116_v59 = vmul.f32 0.020408163, %v1548_v35  ;;  %v2980_v20 = vsel %vm1536_vm0, %v2594_v42, 0.0  ;;  %v8037_v17 = vsub.f32 %v7699_v30, %v2211_v58 }
 0x1c9   :  { %v1836_v25 = vpop.xlane.xlu1 %1835  ;;  %v1551_v26 = vpop.xlane.xlu0 %1550  ;;  %2693 = vadd.xlane.f32.xlu1 %v2692_v19  ;;  %v1939_v19 = vsel %vm1536_vm0, %v7997_v55, 0.0  ;;  %v2695_v58 = vsel %vm1536_vm0, %v2499_v28, 0.0 }
 0x1ca   :  { %v8020_v47 = vpop.f32.mrb[80].mxu0  ;;  %v8022_v46 = vpop.f32.mrb[80].mxu1  ;;  %13544 = vst [vmem:[#allocation60_spill] sm:$0xff] %v8037_v17  ;;  %v2117_v11 = vmul.f32 0.020408163, %v1551_v26 }
 0x1cb   :  { %13539 = vst [vmem:[#allocation55_spill] sm:$0xff] %v8020_v47  ;;  %13540 = vst [vmem:[#allocation56_spill] sm:$0xff] %v8022_v46  ;;  %v779_v16 = vpop.f32.mrb[81].mxu0  ;;  %v1259_v12 = vpop.f32.mrb[81].mxu1 }
 0x1cc   :  { %1652 = vadd.xlane.f32.xlu0 %v1651_v2  ;;  %v8042_v2 = vsub.f32 %v7707_v40, %v2116_v59  ;;  %v2212_v16 = vmul.f32 0.020408163, %v1836_v25 }
 0x1cd   :  { %v1839_v48 = vpop.xlane.xlu0 %1838  ;;  %v1554_v38 = vpop.xlane.xlu1 %1553  ;;  %2981 = vadd.xlane.f32.xlu1 %v2980_v20 }
 0x1ce   :  { %v8032_v9 = vpop.f32.mrb[82].mxu0  ;;  %v8034_v29 = vpop.f32.mrb[82].mxu1  ;;  %13545 = vst [vmem:[#allocation61_spill] sm:$0xff] %v8042_v2  ;;  %v8056_v25 = vsub.f32 %v7709_v41, %v2212_v16 }
 0x1cf   :  { %13542 = vst [vmem:[#allocation58_spill] sm:$0xff] %v8032_v9  ;;  %13543 = vst [vmem:[#allocation59_spill] sm:$0xff] %v8034_v29  ;;  %v784_v35 = vpop.f32.mrb[83].mxu0  ;;  %v1264_v42 = vpop.f32.mrb[83].mxu1  ;;  %v1660_v34 = vsel %vm1536_vm0, %v8032_v9, 0.0 }
 0x1d0   :  { %1940 = vadd.xlane.f32.xlu0 %v1939_v19  ;;  %v2595_v35 = vmul.f32 %v8037_v17, %v8037_v17  ;;  %13548 = vst [vmem:[#allocation64_spill] sm:$0xff] %v8056_v25  ;;  %v2596_v16 = vmul.f32 %v8056_v25, %v8056_v25 }
 0x1d1   :  { %v1842_v12 = vpop.xlane.xlu1 %1841  ;;  %v8044_v20 = vpop.xlane.xlu0 %1556  ;;  %1655 = vadd.xlane.f32.xlu1 %v1654_v39  ;;  %v2500_v39 = vmul.f32 %v8042_v2, %v8042_v2 }
 0x1d2   :  { %v8048_v55 = vpop.f32.mrb[84].mxu0  ;;  %v8050_v30 = vpop.f32.mrb[84].mxu1  ;;  %v2986_v25 = vsel %vm1536_vm0, %v2596_v16, 0.0 }
 0x1d3   :  { %13546 = vst [vmem:[#allocation62_spill] sm:$0xff] %v8048_v55  ;;  %13547 = vst [vmem:[#allocation63_spill] sm:$0xff] %v8050_v30  ;;  %v789_v40 = vpop.f32.mrb[85].mxu0  ;;  %v1269_v59 = vpop.f32.mrb[85].mxu1  ;;  %v2698_v41 = vsel %vm1536_vm0, %v2500_v39, 0.0  ;;  %v1663_v49 = vsel %vm1536_vm0, %v8048_v55, 0.0 }
 0x1d4   :  { %2696 = vadd.xlane.f32.xlu0 %v2695_v58  ;;  %v2983_v40 = vsel %vm1536_vm0, %v2595_v35, 0.0  ;;  %v2213_v35 = vmul.f32 0.020408163, %v1839_v48  ;;  %v475_v55 = vld [vmem:[#allocation2 + $0xae0] sm:$0xff] }
 0x1d5   :  { %v8060_v19 = vpop.xlane.xlu0 %1844  ;;  %v8062_v42 = vpop.xlane.xlu1 %1559  ;;  %1943 = vadd.xlane.f32.xlu1 %v1942_v61  ;;  %v1657_v61 = vsel %vm1536_vm0, %v8020_v47, 0.0  ;;  %v1945_v47 = vsel %vm1536_vm0, %v8022_v46, 0.0  ;;  %v1948_v46 = vsel %vm1536_vm0, %v8034_v29, 0.0  ;;  %v2119_v29 = vmul.f32 0.020408163, %v8044_v20  ;;  %1446 = vmatmul.mubr.f32.gmra.mrb[156].mxu1 %v475_v55 }
 0x1d6   :  { %v8064_v1 = vpop.f32.mrb[86].mxu0  ;;  %v8066_v28 = vpop.f32.mrb[86].mxu1  ;;  %v2120_v15 = vmul.f32 0.020408163, %v8062_v42 }
 0x1d7   :  { %13549 = vst [vmem:[#allocation65_spill] sm:$0xff] %v8064_v1  ;;  %13550 = vst [vmem:[#allocation66_spill] sm:$0xff] %v8066_v28  ;;  %v794_v59 = vpop.f32.mrb[87].mxu0  ;;  %v1274_v17 = vpop.f32.mrb[87].mxu1 }
 0x1d8   :  { %2984 = vadd.xlane.f32.xlu0 %v2983_v40  ;;  %v8083_v17 = vsub.f32 %v7715_v50, %v2117_v11  ;;  %v2118_v59 = vmul.f32 0.020408163, %v1554_v38  ;;  %v8099_v38 = vsub.f32 %v7717_v51, %v2213_v35  ;;  %v8171_v31 = vsub.f32 %v7739_v18, %v2120_v15 }
 0x1d9   :  { %v8072_v58 = vpop.xlane.xlu1 %1847  ;;  %v8074_v2 = vpop.xlane.xlu0 %1562  ;;  %2699 = vadd.xlane.f32.xlu1 %v2698_v41 }
 0x1da   :  { %v8078_v3 = vpop.f32.mrb[88].mxu0  ;;  %v8080_v26 = vpop.f32.mrb[88].mxu1  ;;  %13553 = vst [vmem:[#allocation69_spill] sm:$0xff] %v8083_v17  ;;  %13556 = vst [vmem:[#allocation72_spill] sm:$0xff] %v8099_v38  ;;  %v2501_v11 = vmul.f32 %v8083_v17, %v8083_v17 }
 0x1db   :  { %13551 = vst [vmem:[#allocation67_spill] sm:$0xff] %v8078_v3  ;;  %13552 = vst [vmem:[#allocation68_spill] sm:$0xff] %v8080_v26  ;;  %v799_v39 = vpop.f32.mrb[89].mxu0  ;;  %v1279_v40 = vpop.f32.mrb[89].mxu1 }
 0x1dc   :  { %1658 = vadd.xlane.f32.xlu0 %v1657_v61  ;;  %v2214_v39 = vmul.f32 0.020408163, %v1842_v12  ;;  %13569 = vst [vmem:[#allocation85_spill] sm:$0xff] %v8171_v31 }
 0x1dd   :  { %v8086_v13 = vpop.xlane.xlu0 %1850  ;;  %v8088_v41 = vpop.xlane.xlu1 %1565  ;;  %2987 = vadd.xlane.f32.xlu1 %v2986_v25  ;;  %v8104_v25 = vsub.f32 %v7723_v60, %v2118_v59  ;;  %v2597_v60 = vmul.f32 %v8099_v38, %v8099_v38 }
 0x1de   :  { %v8094_v50 = vpop.f32.mrb[90].mxu0  ;;  %v8096_v48 = vpop.f32.mrb[90].mxu1  ;;  %v2122_v10 = vmul.f32 0.020408163, %v8088_v41 }
 0x1df   :  { %13554 = vst [vmem:[#allocation70_spill] sm:$0xff] %v8094_v50  ;;  %13555 = vst [vmem:[#allocation71_spill] sm:$0xff] %v8096_v48  ;;  %v804_v16 = vpop.f32.mrb[91].mxu0  ;;  %v1284_v61 = vpop.f32.mrb[91].mxu1 }
 0x1e0   :  { %13557 = vst [vmem:[#allocation73_spill] sm:$0xff] %v8104_v25  ;;  %1946 = vadd.xlane.f32.xlu0 %v1945_v47  ;;  %v2701_v16 = vsel %vm1536_vm0, %v2501_v11, 0.0  ;;  %v8120_v47 = vsub.f32 %v7725_v0, %v2214_v39  ;;  %v284_v39 = vld [vmem:[#allocation2 + $0x4e8] sm:$0xff] }
 0x1e1   :  { %v8106_v40 = vpop.xlane.xlu1 %1853  ;;  %v8108_v9 = vpop.xlane.xlu0 %1568  ;;  %1661 = vadd.xlane.f32.xlu1 %v1660_v34  ;;  %v2502_v34 = vmul.f32 %v8104_v25, %v8104_v25  ;;  %965 = vmatprep.mubr.f32.mxu0 %v284_v39 }
 0x1e2   :  { %v8112_v51 = vpop.f32.mrb[92].mxu0  ;;  %v8114_v35 = vpop.f32.mrb[92].mxu1  ;;  %13560 = vst [vmem:[#allocation76_spill] sm:$0xff] %v8120_v47  ;;  %v2598_v25 = vmul.f32 %v8120_v47, %v8120_v47  ;;  %v286_v47 = vld [vmem:[#allocation2 + $0x4f8] sm:$0xff] }
 0x1e3   :  { %13558 = vst [vmem:[#allocation74_spill] sm:$0xff] %v8112_v51  ;;  %13559 = vst [vmem:[#allocation75_spill] sm:$0xff] %v8114_v35  ;;  %v809_v59 = vpop.f32.mrb[93].mxu0  ;;  %v1289_v12 = vpop.f32.mrb[93].mxu1  ;;  %v2704_v38 = vsel %vm1536_vm0, %v2502_v34, 0.0 }
 0x1e4   :  { %2702 = vadd.xlane.f32.xlu0 %v2701_v16  ;;  %v2989_v59 = vsel %vm1536_vm0, %v2597_v60, 0.0  ;;  %v283_v16 = vld [vmem:[#allocation2 + $0x4e0] sm:$0xff]  ;;  %v2215_v34 = vmul.f32 0.020408163, %v8060_v19 }
 0x1e5   :  { %v8124_v61 = vpop.xlane.xlu0 %1856  ;;  %v8126_v17 = vpop.xlane.xlu1 %1571  ;;  %1949 = vadd.xlane.f32.xlu1 %v1948_v46  ;;  %966 = vmatmul.mubr.f32.gmra.mrb[156].mxu0 %v283_v16  ;;  %v285_v16 = vld [vmem:[#allocation2 + $0x4f0] sm:$0xff] }
 0x1e6   :  { %v8129_v11 = vpop.f32.mrb[94].mxu0  ;;  %v8131_v24 = vpop.f32.mrb[94].mxu1  ;;  %970 = vmatprep.mubr.f32.mxu0 %v286_v47  ;;  %v8166_v42 = vsub.f32 %v7733_v7, %v2215_v34  ;;  %v1954_v7 = vsel %vm1536_vm0, %v8066_v28, 0.0  ;;  %v1669_v28 = vsel %vm1536_vm0, %v8078_v3, 0.0 }
 0x1e7   :  { %13561 = vst [vmem:[#allocation77_spill] sm:$0xff] %v8129_v11  ;;  %13562 = vst [vmem:[#allocation78_spill] sm:$0xff] %v8131_v24  ;;  %v814_v12 = vpop.f32.mrb[95].mxu0  ;;  %v1294_v0 = vpop.f32.mrb[95].mxu1 }
 0x1e8   :  { %2990 = vadd.xlane.f32.xlu0 %v2989_v59  ;;  %v8148_v59 = vsub.f32 %v7731_v6, %v2119_v29  ;;  %v1951_v6 = vsel %vm1536_vm0, %v8050_v30, 0.0  ;;  %v1666_v29 = vsel %vm1536_vm0, %v8064_v1, 0.0  ;;  %13568 = vst [vmem:[#allocation84_spill] sm:$0xff] %v8166_v42  ;;  %v2216_v1 = vmul.f32 0.020408163, %v8072_v58 }
 0x1e9   :  { %v8137_v46 = vpop.xlane.xlu1 %1859  ;;  %v8139_v20 = vpop.xlane.xlu0 %1574  ;;  %2705 = vadd.xlane.f32.xlu1 %v2704_v38  ;;  %v2992_v38 = vsel %vm1536_vm0, %v2598_v25, 0.0  ;;  %971 = vmatmul.mubr.f32.gmra.mrb[158].mxu0 %v285_v16  ;;  %v2599_v15 = vmul.f32 %v8166_v42, %v8166_v42 }
 0x1ea   :  { %v8143_v60 = vpop.f32.mrb[96].mxu0  ;;  %v8145_v12 = vpop.f32.mrb[96].mxu1  ;;  %13565 = vst [vmem:[#allocation81_spill] sm:$0xff] %v8148_v59  ;;  %v2503_v25 = vmul.f32 %v8148_v59, %v8148_v59 }
 0x1eb   :  { %13563 = vst [vmem:[#allocation79_spill] sm:$0xff] %v8143_v60  ;;  %13564 = vst [vmem:[#allocation80_spill] sm:$0xff] %v8145_v12  ;;  %v819_v0 = vpop.f32.mrb[97].mxu0  ;;  %v1299_v39 = vpop.f32.mrb[97].mxu1 }
 0x1ec   :  { %1664 = vadd.xlane.f32.xlu0 %v1663_v49  ;;  %v478_v39 = vld [vmem:[#allocation2 + $0xaf8] sm:$0xff]  ;;  %v2707_v18 = vsel %vm1536_vm0, %v2503_v25, 0.0 }
 0x1ed   :  { %v8153_v54 = vpop.xlane.xlu0 %1862  ;;  %v8155_v8 = vpop.xlane.xlu1 %1577  ;;  %2993 = vadd.xlane.f32.xlu1 %v2992_v38  ;;  %v477_v38 = vld [vmem:[#allocation2 + $0xaf0] sm:$0xff]  ;;  %1450 = vmatprep.mubr.f32.mxu1 %v478_v39 }
 0x1ee   :  { %v8161_v19 = vpop.f32.mrb[98].mxu0  ;;  %v8163_v49 = vpop.f32.mrb[98].mxu1  ;;  %1451 = vmatmul.mubr.f32.gmra.mrb[158].mxu1 %v477_v38  ;;  %v2121_v38 = vmul.f32 0.020408163, %v8074_v2 }
 0x1ef   :  { %13566 = vst [vmem:[#allocation82_spill] sm:$0xff] %v8161_v19  ;;  %13567 = vst [vmem:[#allocation83_spill] sm:$0xff] %v8163_v49  ;;  %v824_v47 = vpop.f32.mrb[99].mxu0  ;;  %v1304_v0 = vpop.f32.mrb[99].mxu1 }
 0x1f0   :  { %1952 = vadd.xlane.f32.xlu0 %v1951_v6  ;;  %v8188_v47 = vsub.f32 %v7741_v21, %v2216_v1  ;;  %v288_v1 = vld [vmem:[#allocation2 + $0x508] sm:$0xff] }
 0x1f1   :  { %v8174_v30 = vpop.xlane.xlu1 %1865  ;;  %v8176_v55 = vpop.xlane.xlu0 %1580  ;;  %1667 = vadd.xlane.f32.xlu1 %v1666_v29  ;;  %v2504_v29 = vmul.f32 %v8171_v31, %v8171_v31  ;;  %975 = vmatprep.mubr.f32.mxu0 %v288_v1 }
 0x1f2   :  { %v8180_v34 = vpop.f32.mrb[100].mxu0  ;;  %v8182_v16 = vpop.f32.mrb[100].mxu1  ;;  %13572 = vst [vmem:[#allocation88_spill] sm:$0xff] %v8188_v47  ;;  %v2600_v31 = vmul.f32 %v8188_v47, %v8188_v47  ;;  %v480_v47 = vld [vmem:[#allocation2 + $0xb08] sm:$0xff] }
 0x1f3   :  { %13570 = vst [vmem:[#allocation86_spill] sm:$0xff] %v8180_v34  ;;  %13571 = vst [vmem:[#allocation87_spill] sm:$0xff] %v8182_v16  ;;  %v829_v58 = vpop.f32.mrb[101].mxu0  ;;  %v1309_v6 = vpop.f32.mrb[101].mxu1  ;;  %v2710_v42 = vsel %vm1536_vm0, %v2504_v29, 0.0  ;;  %1455 = vmatprep.mubr.f32.mxu1 %v480_v47 }
 0x1f4   :  { %2708 = vadd.xlane.f32.xlu0 %v2707_v18  ;;  %v2995_v58 = vsel %vm1536_vm0, %v2599_v15, 0.0  ;;  %v287_v18 = vld [vmem:[#allocation2 + $0x500] sm:$0xff]  ;;  %v2217_v29 = vmul.f32 0.020408163, %v8086_v13  ;;  %1456 = vmatmul.mubr.f32.gmra.mrb[160].mxu1 %v479_v14  ;;  %v1672_v13 = vsel %vm1536_vm0, %v8094_v50, 0.0 }
 0x1f5   :  { %v8192_v0 = vpop.xlane.xlu0 %1868  ;;  %v8194_v39 = vpop.xlane.xlu1 %1583  ;;  %1955 = vadd.xlane.f32.xlu1 %v1954_v7  ;;  %976 = vmatmul.mubr.f32.gmra.mrb[160].mxu0 %v287_v18  ;;  %v2218_v14 = vmul.f32 0.020408163, %v8106_v40 }
 0x1f6   :  { %v8197_v25 = vpop.f32.mrb[102].mxu0  ;;  %v8199_v59 = vpop.f32.mrb[102].mxu1 }
 0x1f7   :  { %13573 = vst [vmem:[#allocation89_spill] sm:$0xff] %v8197_v25  ;;  %13574 = vst [vmem:[#allocation90_spill] sm:$0xff] %v8199_v59  ;;  %v834_v6 = vpop.f32.mrb[103].mxu0  ;;  %v1314_v21 = vpop.f32.mrb[103].mxu1 }
 0x1f8   :  { %2996 = vadd.xlane.f32.xlu0 %v2995_v58  ;;  %v8216_v58 = vsub.f32 %v7747_v32, %v2121_v38  ;;  %v1957_v32 = vsel %vm1536_vm0, %v8080_v26, 0.0 }
 0x1f9   :  { %v8205_v7 = vpop.xlane.xlu1 %1871  ;;  %v8207_v2 = vpop.xlane.xlu0 %1586  ;;  %2711 = vadd.xlane.f32.xlu1 %v2710_v42  ;;  %v2998_v42 = vsel %vm1536_vm0, %v2600_v31, 0.0 }
 0x1fa   :  { %v8211_v15 = vpop.f32.mrb[104].mxu0  ;;  %v8213_v6 = vpop.f32.mrb[104].mxu1  ;;  %13577 = vst [vmem:[#allocation93_spill] sm:$0xff] %v8216_v58  ;;  %v2505_v41 = vmul.f32 %v8216_v58, %v8216_v58  ;;  %v8256_v58 = vsub.f32 %v7757_v45, %v2218_v14 }
 0x1fb   :  { %13575 = vst [vmem:[#allocation91_spill] sm:$0xff] %v8211_v15  ;;  %13576 = vst [vmem:[#allocation92_spill] sm:$0xff] %v8213_v6  ;;  %v839_v21 = vpop.f32.mrb[105].mxu0  ;;  %v1319_v1 = vpop.f32.mrb[105].mxu1 }
 0x1fc   :  { %1670 = vadd.xlane.f32.xlu0 %v1669_v28  ;;  %v8234_v28 = vsub.f32 %v7749_v33, %v2217_v29  ;;  %v8239_v1 = vsub.f32 %v7755_v44, %v2122_v10  ;;  %v1960_v33 = vsel %vm1536_vm0, %v8096_v48, 0.0  ;;  %13584 = vst [vmem:[#allocation100_spill] sm:$0xff] %v8256_v58 }
 0x1fd   :  { %v8221_v18 = vpop.xlane.xlu0 %1874  ;;  %v8223_v3 = vpop.xlane.xlu1 %1589  ;;  %2999 = vadd.xlane.f32.xlu1 %v2998_v42 }
 0x1fe   :  { %v8229_v38 = vpop.f32.mrb[106].mxu0  ;;  %v8231_v21 = vpop.f32.mrb[106].mxu1  ;;  %13580 = vst [vmem:[#allocation96_spill] sm:$0xff] %v8234_v28  ;;  %13581 = vst [vmem:[#allocation97_spill] sm:$0xff] %v8239_v1  ;;  %v2601_v44 = vmul.f32 %v8234_v28, %v8234_v28  ;;  %v292_v28 = vld [vmem:[#allocation2 + $0x528] sm:$0xff] }
 0x1ff   :  { %13578 = vst [vmem:[#allocation94_spill] sm:$0xff] %v8229_v38  ;;  %13579 = vst [vmem:[#allocation95_spill] sm:$0xff] %v8231_v21  ;;  %v844_v31 = vpop.f32.mrb[107].mxu0  ;;  %v1324_v47 = vpop.f32.mrb[107].mxu1 }
 0x200   :  { %1958 = vadd.xlane.f32.xlu0 %v1957_v32  ;;  %v2713_v31 = vsel %vm1536_vm0, %v2505_v41, 0.0  ;;  %v290_v32 = vld [vmem:[#allocation2 + $0x518] sm:$0xff]  ;;  %v289_v47 = vld [vmem:[#allocation2 + $0x510] sm:$0xff]  ;;  %v2123_v41 = vmul.f32 0.020408163, %v8108_v9  ;;  %v3001_v45 = vsel %vm1536_vm0, %v2601_v44, 0.0 }
 0x201   :  { %v8242_v42 = vpop.xlane.xlu1 %1877  ;;  %v8244_v50 = vpop.xlane.xlu0 %1592  ;;  %1673 = vadd.xlane.f32.xlu1 %v1672_v13  ;;  %v2506_v13 = vmul.f32 %v8239_v1, %v8239_v1  ;;  %980 = vmatprep.mubr.f32.mxu0 %v290_v32  ;;  %v2602_v1 = vmul.f32 %v8256_v58, %v8256_v58  ;;  %v1675_v44 = vsel %vm1536_vm0, %v8112_v51, 0.0 }
 0x202   :  { %v8248_v29 = vpop.f32.mrb[108].mxu0  ;;  %v8250_v26 = vpop.f32.mrb[108].mxu1  ;;  %981 = vmatmul.mubr.f32.gmra.mrb[162].mxu0 %v289_v47  ;;  %v481_v47 = vld [vmem:[#allocation2 + $0xb10] sm:$0xff] }
 0x203   :  { %13582 = vst [vmem:[#allocation98_spill] sm:$0xff] %v8248_v29  ;;  %13583 = vst [vmem:[#allocation99_spill] sm:$0xff] %v8250_v26  ;;  %v849_v10 = vpop.f32.mrb[109].mxu0  ;;  %v1329_v40 = vpop.f32.mrb[109].mxu1  ;;  %v482_v29 = vld [vmem:[#allocation2 + $0xb18] sm:$0xff]  ;;  %v2716_v32 = vsel %vm1536_vm0, %v2506_v13, 0.0  ;;  %985 = vmatprep.mubr.f32.mxu0 %v292_v28  ;;  %v8284_v13 = vsub.f32 %v7763_v56, %v2123_v41 }
 0x204   :  { %2714 = vadd.xlane.f32.xlu0 %v2713_v31  ;;  %1460 = vmatprep.mubr.f32.mxu1 %v482_v29  ;;  %v2219_v28 = vmul.f32 0.020408163, %v8124_v61  ;;  %v3004_v29 = vsel %vm1536_vm0, %v2602_v1, 0.0  ;;  %v1963_v56 = vsel %vm1536_vm0, %v8114_v35, 0.0  ;;  %v1678_v61 = vsel %vm1536_vm0, %v8129_v11, 0.0  ;;  %v486_v35 = vld [vmem:[#allocation2 + $0xb38] sm:$0xff] }
 0x205   :  { %v8260_v48 = vpop.xlane.xlu0 %1880  ;;  %v8262_v26 = vpop.xlane.xlu1 %1595  ;;  %1961 = vadd.xlane.f32.xlu1 %v1960_v33  ;;  %v291_v33 = vld [vmem:[#allocation2 + $0x520] sm:$0xff]  ;;  %1461 = vmatmul.mubr.f32.gmra.mrb[162].mxu1 %v481_v47  ;;  %13590 = vst [vmem:[#allocation106_spill] sm:$0xff] %v8284_v13  ;;  %v2507_v1 = vmul.f32 %v8284_v13, %v8284_v13 }
 0x206   :  { %v8265_v10 = vpop.f32.mrb[110].mxu0  ;;  %v8267_v40 = vpop.f32.mrb[110].mxu1  ;;  %986 = vmatmul.mubr.f32.gmra.mrb[164].mxu0 %v291_v33 }
 0x207   :  { %13585 = vst [vmem:[#allocation101_spill] sm:$0xff] %v8265_v10  ;;  %13586 = vst [vmem:[#allocation102_spill] sm:$0xff] %v8267_v40  ;;  %v854_v14 = vpop.f32.mrb[111].mxu0  ;;  %v1334_v31 = vpop.f32.mrb[111].mxu1  ;;  %v484_v40 = vld [vmem:[#allocation2 + $0xb28] sm:$0xff] }
 0x208   :  { %3002 = vadd.xlane.f32.xlu0 %v3001_v45  ;;  %1465 = vmatprep.mubr.f32.mxu1 %v484_v40 }
 0x209   :  { %v8273_v9 = vpop.xlane.xlu1 %1883  ;;  %v8275_v10 = vpop.xlane.xlu0 %1598  ;;  %2717 = vadd.xlane.f32.xlu1 %v2716_v32  ;;  %v2124_v32 = vmul.f32 0.020408163, %v8126_v17  ;;  %v8302_v17 = vsub.f32 %v7765_v57, %v2219_v28  ;;  %v1966_v57 = vsel %vm1536_vm0, %v8131_v24, 0.0 }
 0x20a   :  { %13587 = vst [vmem:[#allocation103_spill] sm:$0xff] %v8275_v10  ;;  %v8279_v14 = vpop.f32.mrb[112].mxu0  ;;  %v8281_v45 = vpop.f32.mrb[112].mxu1  ;;  %v483_v10 = vld [vmem:[#allocation2 + $0xb20] sm:$0xff] }
 0x20b   :  { %13588 = vst [vmem:[#allocation104_spill] sm:$0xff] %v8279_v14  ;;  %13589 = vst [vmem:[#allocation105_spill] sm:$0xff] %v8281_v45  ;;  %v859_v31 = vpop.f32.mrb[113].mxu0  ;;  %v1339_v58 = vpop.f32.mrb[113].mxu1  ;;  %1466 = vmatmul.mubr.f32.gmra.mrb[164].mxu1 %v483_v10  ;;  %v8307_v47 = vsub.f32 %v7771_v4, %v2124_v32  ;;  %v2603_v4 = vmul.f32 %v8302_v17, %v8302_v17 }
 0x20c   :  { %1676 = vadd.xlane.f32.xlu0 %v1675_v44  ;;  %13593 = vst [vmem:[#allocation109_spill] sm:$0xff] %v8302_v17  ;;  %v2220_v44 = vmul.f32 0.020408163, %v8137_v46  ;;  %v296_v17 = vld [vmem:[#allocation2 + $0x548] sm:$0xff]  ;;  %1470 = vmatprep.mubr.f32.mxu1 %v486_v35 }
 0x20d   :  { %v8289_v51 = vpop.xlane.xlu0 %1886  ;;  %v8291_v45 = vpop.xlane.xlu1 %1601  ;;  %3005 = vadd.xlane.f32.xlu1 %v3004_v29  ;;  %13594 = vst [vmem:[#allocation110_spill] sm:$0xff] %v8307_v47 }
 0x20e   :  { %v8297_v58 = vpop.f32.mrb[114].mxu0  ;;  %v8299_v41 = vpop.f32.mrb[114].mxu1  ;;  %v8324_v13 = vsub.f32 %v7773_v5, %v2220_v44  ;;  %v3007_v5 = vsel %vm1536_vm0, %v2603_v4, 0.0  ;;  %v1681_v4 = vsel %vm1536_vm0, %v8143_v60, 0.0 }
 0x20f   :  { %13591 = vst [vmem:[#allocation107_spill] sm:$0xff] %v8297_v58  ;;  %13592 = vst [vmem:[#allocation108_spill] sm:$0xff] %v8299_v41  ;;  %v864_v40 = vpop.f32.mrb[115].mxu0  ;;  %v1344_v33 = vpop.f32.mrb[115].mxu1 }
 0x210   :  { %1964 = vadd.xlane.f32.xlu0 %v1963_v56  ;;  %v2719_v40 = vsel %vm1536_vm0, %v2507_v1, 0.0  ;;  %v294_v56 = vld [vmem:[#allocation2 + $0x538] sm:$0xff]  ;;  %v293_v33 = vld [vmem:[#allocation2 + $0x530] sm:$0xff]  ;;  %13597 = vst [vmem:[#allocation113_spill] sm:$0xff] %v8324_v13  ;;  %v2125_v1 = vmul.f32 0.020408163, %v8139_v20 }
 0x211   :  { %v8310_v31 = vpop.xlane.xlu1 %1889  ;;  %v8312_v29 = vpop.xlane.xlu0 %1604  ;;  %1679 = vadd.xlane.f32.xlu1 %v1678_v61  ;;  %v2508_v61 = vmul.f32 %v8307_v47, %v8307_v47  ;;  %990 = vmatprep.mubr.f32.mxu0 %v294_v56  ;;  %v2604_v47 = vmul.f32 %v8324_v13, %v8324_v13 }
 0x212   :  { %v8316_v10 = vpop.f32.mrb[116].mxu0  ;;  %v8318_v28 = vpop.f32.mrb[116].mxu1  ;;  %991 = vmatmul.mubr.f32.gmra.mrb[166].mxu0 %v293_v33  ;;  %v485_v33 = vld [vmem:[#allocation2 + $0xb30] sm:$0xff] }
 0x213   :  { %13595 = vst [vmem:[#allocation111_spill] sm:$0xff] %v8316_v10  ;;  %13596 = vst [vmem:[#allocation112_spill] sm:$0xff] %v8318_v28  ;;  %v869_v32 = vpop.f32.mrb[117].mxu0  ;;  %v1349_v46 = vpop.f32.mrb[117].mxu1  ;;  %v2722_v56 = vsel %vm1536_vm0, %v2508_v61, 0.0  ;;  %995 = vmatprep.mubr.f32.mxu0 %v296_v17  ;;  %1471 = vmatmul.mubr.f32.gmra.mrb[166].mxu1 %v485_v33  ;;  %v8352_v61 = vsub.f32 %v7779_v22, %v2125_v1  ;;  %v3010_v35 = vsel %vm1536_vm0, %v2604_v47, 0.0 }
 0x214   :  { %2720 = vadd.xlane.f32.xlu0 %v2719_v40  ;;  %v2221_v17 = vmul.f32 0.020408163, %v8153_v54  ;;  %v1969_v22 = vsel %vm1536_vm0, %v8145_v12, 0.0  ;;  %v1684_v54 = vsel %vm1536_vm0, %v8161_v19, 0.0  ;;  %v490_v12 = vld [vmem:[#allocation2 + $0xb58] sm:$0xff] }
 0x215   :  { %v8328_v24 = vpop.xlane.xlu0 %1892  ;;  %v8330_v11 = vpop.xlane.xlu1 %1607  ;;  %1967 = vadd.xlane.f32.xlu1 %v1966_v57  ;;  %v295_v57 = vld [vmem:[#allocation2 + $0x540] sm:$0xff]  ;;  %13603 = vst [vmem:[#allocation119_spill] sm:$0xff] %v8352_v61  ;;  %v2509_v47 = vmul.f32 %v8352_v61, %v8352_v61 }
 0x216   :  { %v8333_v32 = vpop.f32.mrb[118].mxu0  ;;  %v8335_v46 = vpop.f32.mrb[118].mxu1  ;;  %996 = vmatmul.mubr.f32.gmra.mrb[168].mxu0 %v295_v57 }
 0x217   :  { %13598 = vst [vmem:[#allocation114_spill] sm:$0xff] %v8333_v32  ;;  %13599 = vst [vmem:[#allocation115_spill] sm:$0xff] %v8335_v46  ;;  %v874_v44 = vpop.f32.mrb[119].mxu0  ;;  %v1354_v40 = vpop.f32.mrb[119].mxu1  ;;  %v488_v46 = vld [vmem:[#allocation2 + $0xb48] sm:$0xff] }
 0x218   :  { %3008 = vadd.xlane.f32.xlu0 %v3007_v5  ;;  %1475 = vmatprep.mubr.f32.mxu1 %v488_v46 }
 0x219   :  { %v8341_v20 = vpop.xlane.xlu1 %1895  ;;  %v8343_v32 = vpop.xlane.xlu0 %1610  ;;  %2723 = vadd.xlane.f32.xlu1 %v2722_v56  ;;  %v2126_v56 = vmul.f32 0.020408163, %v8155_v8  ;;  %v8370_v8 = vsub.f32 %v7781_v23, %v2221_v17  ;;  %v1972_v23 = vsel %vm1536_vm0, %v8163_v49, 0.0 }
 0x21a   :  { %13600 = vst [vmem:[#allocation116_spill] sm:$0xff] %v8343_v32  ;;  %v8347_v44 = vpop.f32.mrb[120].mxu0  ;;  %v8349_v5 = vpop.f32.mrb[120].mxu1  ;;  %v487_v32 = vld [vmem:[#allocation2 + $0xb40] sm:$0xff] }
 0x21b   :  { %13601 = vst [vmem:[#allocation117_spill] sm:$0xff] %v8347_v44  ;;  %13602 = vst [vmem:[#allocation118_spill] sm:$0xff] %v8349_v5  ;;  %v879_v40 = vpop.f32.mrb[121].mxu0  ;;  %v1359_v13 = vpop.f32.mrb[121].mxu1  ;;  %1476 = vmatmul.mubr.f32.gmra.mrb[168].mxu1 %v487_v32  ;;  %v8375_v33 = vsub.f32 %v7787_v36, %v2126_v56  ;;  %v2605_v36 = vmul.f32 %v8370_v8, %v8370_v8 }
 0x21c   :  { %1682 = vadd.xlane.f32.xlu0 %v1681_v4  ;;  %13606 = vst [vmem:[#allocation122_spill] sm:$0xff] %v8370_v8  ;;  %v2222_v4 = vmul.f32 0.020408163, %v8174_v30  ;;  %v300_v8 = vld [vmem:[#allocation2 + $0x568] sm:$0xff]  ;;  %1480 = vmatprep.mubr.f32.mxu1 %v490_v12 }
 0x21d   :  { %v8357_v60 = vpop.xlane.xlu0 %1898  ;;  %v8359_v5 = vpop.xlane.xlu1 %1613  ;;  %3011 = vadd.xlane.f32.xlu1 %v3010_v35  ;;  %13607 = vst [vmem:[#allocation123_spill] sm:$0xff] %v8375_v33 }
 0x21e   :  { %v8365_v13 = vpop.f32.mrb[122].mxu0  ;;  %v8367_v1 = vpop.f32.mrb[122].mxu1  ;;  %v8392_v61 = vsub.f32 %v7789_v37, %v2222_v4  ;;  %v3013_v37 = vsel %vm1536_vm0, %v2605_v36, 0.0  ;;  %v1687_v36 = vsel %vm1536_vm0, %v8180_v34, 0.0 }
 0x21f   :  { %13604 = vst [vmem:[#allocation120_spill] sm:$0xff] %v8365_v13  ;;  %13605 = vst [vmem:[#allocation121_spill] sm:$0xff] %v8367_v1  ;;  %v884_v46 = vpop.f32.mrb[123].mxu0  ;;  %v1364_v57 = vpop.f32.mrb[123].mxu1 }
 0x220   :  { %1970 = vadd.xlane.f32.xlu0 %v1969_v22  ;;  %v2725_v46 = vsel %vm1536_vm0, %v2509_v47, 0.0  ;;  %v298_v22 = vld [vmem:[#allocation2 + $0x558] sm:$0xff]  ;;  %v297_v57 = vld [vmem:[#allocation2 + $0x550] sm:$0xff]  ;;  %13610 = vst [vmem:[#allocation126_spill] sm:$0xff] %v8392_v61  ;;  %v2127_v47 = vmul.f32 0.020408163, %v8176_v55 }
 0x221   :  { %v8378_v40 = vpop.xlane.xlu1 %1901  ;;  %v8380_v35 = vpop.xlane.xlu0 %1616  ;;  %1685 = vadd.xlane.f32.xlu1 %v1684_v54  ;;  %v2510_v54 = vmul.f32 %v8375_v33, %v8375_v33  ;;  %1000 = vmatprep.mubr.f32.mxu0 %v298_v22  ;;  %v2606_v33 = vmul.f32 %v8392_v61, %v8392_v61 }
 0x222   :  { %v8384_v32 = vpop.f32.mrb[124].mxu0  ;;  %v8386_v17 = vpop.f32.mrb[124].mxu1  ;;  %1001 = vmatmul.mubr.f32.gmra.mrb[170].mxu0 %v297_v57  ;;  %v489_v57 = vld [vmem:[#allocation2 + $0xb50] sm:$0xff] }
 0x223   :  { %13608 = vst [vmem:[#allocation124_spill] sm:$0xff] %v8384_v32  ;;  %13609 = vst [vmem:[#allocation125_spill] sm:$0xff] %v8386_v17  ;;  %v889_v56 = vpop.f32.mrb[125].mxu0  ;;  %v1369_v30 = vpop.f32.mrb[125].mxu1  ;;  %v2728_v22 = vsel %vm1536_vm0, %v2510_v54, 0.0  ;;  %1005 = vmatprep.mubr.f32.mxu0 %v300_v8  ;;  %1481 = vmatmul.mubr.f32.gmra.mrb[170].mxu1 %v489_v57  ;;  %v8420_v54 = vsub.f32 %v7795_v52, %v2127_v47  ;;  %v3016_v12 = vsel %vm1536_vm0, %v2606_v33, 0.0 }
 0x224   :  { %2726 = vadd.xlane.f32.xlu0 %v2725_v46  ;;  %v2223_v8 = vmul.f32 0.020408163, %v8192_v0  ;;  %v1975_v52 = vsel %vm1536_vm0, %v8182_v16, 0.0  ;;  %v1690_v0 = vsel %vm1536_vm0, %v8197_v25, 0.0 }
 0x225   :  { %v8396_v49 = vpop.xlane.xlu0 %1904  ;;  %v8398_v19 = vpop.xlane.xlu1 %1619  ;;  %1973 = vadd.xlane.f32.xlu1 %v1972_v23  ;;  %v299_v23 = vld [vmem:[#allocation2 + $0x560] sm:$0xff]  ;;  %13616 = vst [vmem:[#allocation132_spill] sm:$0xff] %v8420_v54  ;;  %v2511_v33 = vmul.f32 %v8420_v54, %v8420_v54 }
 0x226   :  { %v8401_v56 = vpop.f32.mrb[126].mxu0  ;;  %v8403_v30 = vpop.f32.mrb[126].mxu1  ;;  %1006 = vmatmul.mubr.f32.gmra.mrb[172].mxu0 %v299_v23 }
 0x227   :  { %13611 = vst [vmem:[#allocation127_spill] sm:$0xff] %v8401_v56  ;;  %13612 = vst [vmem:[#allocation128_spill] sm:$0xff] %v8403_v30  ;;  %v894_v4 = vpop.f32.mrb[127].mxu0  ;;  %v1374_v46 = vpop.f32.mrb[127].mxu1  ;;  %v492_v30 = vld [vmem:[#allocation2 + $0xb68] sm:$0xff] }
 0x228   :  { %3014 = vadd.xlane.f32.xlu0 %v3013_v37  ;;  %1485 = vmatprep.mubr.f32.mxu1 %v492_v30 }
 0x229   :  { %v8409_v55 = vpop.xlane.xlu1 %1907  ;;  %v8411_v56 = vpop.xlane.xlu0 %1622  ;;  %2729 = vadd.xlane.f32.xlu1 %v2728_v22  ;;  %v2128_v22 = vmul.f32 0.020408163, %v8194_v39  ;;  %v8438_v39 = vsub.f32 %v7797_v53, %v2223_v8  ;;  %v1978_v53 = vsel %vm1536_vm0, %v8199_v59, 0.0 }
 0x22a   :  { %13613 = vst [vmem:[#allocation129_spill] sm:$0xff] %v8411_v56  ;;  %v8415_v4 = vpop.f32.mrb[128].mxu0  ;;  %v8417_v37 = vpop.f32.mrb[128].mxu1  ;;  %v491_v56 = vld [vmem:[#allocation2 + $0xb60] sm:$0xff] }
 0x22b   :  { %13614 = vst [vmem:[#allocation130_spill] sm:$0xff] %v8415_v4  ;;  %13615 = vst [vmem:[#allocation131_spill] sm:$0xff] %v8417_v37  ;;  %v899_v46 = vpop.f32.mrb[129].mxu0  ;;  %v1379_v61 = vpop.f32.mrb[129].mxu1  ;;  %1486 = vmatmul.mubr.f32.gmra.mrb[172].mxu1 %v491_v56  ;;  %v8443_v57 = vsub.f32 %v7803_v62, %v2128_v22  ;;  %v2607_v62 = vmul.f32 %v8438_v39, %v8438_v39 }
 0x22c   :  { %1688 = vadd.xlane.f32.xlu0 %v1687_v36  ;;  %13619 = vst [vmem:[#allocation135_spill] sm:$0xff] %v8438_v39  ;;  %v2224_v36 = vmul.f32 0.020408163, %v8205_v7 }
 0x22d   :  { %v8425_v34 = vpop.xlane.xlu0 %1910  ;;  %v8427_v37 = vpop.xlane.xlu1 %1625  ;;  %3017 = vadd.xlane.f32.xlu1 %v3016_v12  ;;  %13620 = vst [vmem:[#allocation136_spill] sm:$0xff] %v8443_v57 }
 0x22e   :  { %v8433_v61 = vpop.f32.mrb[130].mxu0  ;;  %v8435_v47 = vpop.f32.mrb[130].mxu1 }
 0x22f   :  { %13617 = vst [vmem:[#allocation133_spill] sm:$0xff] %v8433_v61  ;;  %13618 = vst [vmem:[#allocation134_spill] sm:$0xff] %v8435_v47  ;;  %v904_v30 = vpop.f32.mrb[131].mxu0  ;;  %v1384_v23 = vpop.f32.mrb[131].mxu1 }
 0x230   :  { %1976 = vadd.xlane.f32.xlu0 %v1975_v52  ;;  %v2731_v30 = vsel %vm1536_vm0, %v2511_v33, 0.0  ;;  %v8458_v52 = vsub.f32 %v7805_v63, %v2224_v36  ;;  %v2512_v23 = vmul.f32 %v8443_v57, %v8443_v57  ;;  %v3019_v63 = vsel %vm1536_vm0, %v2607_v62, 0.0 }
 0x231   :  { %v8446_v46 = vpop.xlane.xlu1 %1913  ;;  %v1629_v12 = vpop.xlane.xlu0 %1628  ;;  %1691 = vadd.xlane.f32.xlu1 %v1690_v0 }
 0x232   :  { %v2143_v25 = vmul.f32 0.020408163, %v1629_v12  ;;  %v8450_v56 = vpop.f32.mrb[132].mxu0  ;;  %v8452_v8 = vpop.f32.mrb[132].mxu1  ;;  %13621 = vst [vmem:[#allocation137_spill] sm:$0xff] %v8458_v52 }
 0x233   :  { %v909_v22 = vpop.f32.mrb[133].mxu0  ;;  %v1389_v7 = vpop.f32.mrb[133].mxu1 }
 0x234   :  { %v8461_v0 = vsub.f32 %v7923_v27, %v2143_v25  ;;  %2732 = vadd.xlane.f32.xlu0 %v2731_v30  ;;  %v2129_v22 = vmul.f32 0.020408163, %v8207_v2  ;;  %v13626_v30 = vld [vmem:[#allocation33_spill] sm:$0xff]  ;;  %v1693_v2 = vsel %vm1536_vm0, %v8211_v15, 0.0 }
 0x235   :  { %v1917_v12 = vpop.xlane.xlu0 %1916  ;;  %v1632_v54 = vpop.xlane.xlu1 %1631  ;;  %1979 = vadd.xlane.f32.xlu1 %v1978_v53  ;;  %v2734_v53 = vsel %vm1536_vm0, %v2512_v23, 0.0  ;;  %v2130_v23 = vmul.f32 0.020408163, %v8223_v3 }
 0x236   :  { %13622 = vst [vmem:[#allocation138_spill] sm:$0xff] %v8461_v0  ;;  %v2239_v59 = vmul.f32 0.020408163, %v1917_v12  ;;  %v2144_v33 = vmul.f32 0.020408163, %v1632_v54  ;;  %v8465_v16 = vpop.f32.mrb[134].mxu0  ;;  %v2608_v54 = vmul.f32 %v8458_v52, %v8458_v52 }
 0x237   :  { %13623 = vst [vmem:[#allocation139_spill] sm:$0xff] %v8465_v16  ;;  %v8467_v39 = vpop.f32.mrb[134].mxu1  ;;  %v914_v36 = vpop.f32.mrb[135].mxu0 }
 0x238   :  { %13624 = vst [vmem:[#allocation140_spill] sm:$0xff] %v8467_v39  ;;  %v1394_v27 = vpop.f32.mrb[135].mxu1  ;;  %v8472_v25 = vsub.f32 %v7925_v43, %v2239_v59  ;;  %v8475_v7 = vsub.f32 %v13626_v30, %v2144_v33  ;;  %3020 = vadd.xlane.f32.xlu0 %v3019_v63  ;;  %v13629_v43 = vld [vmem:[#allocation5_spill] sm:$0xff]  ;;  %v2225_v33 = vmul.f32 0.020408163, %v8221_v18  ;;  %v13631_v30 = vld [vmem:[#allocation34_spill] sm:$0xff] }
 0x239   :  { %v1920_v12 = vpop.xlane.xlu1 %1919  ;;  %v1635_v57 = vpop.xlane.xlu0 %1634  ;;  %2735 = vadd.xlane.f32.xlu1 %v2734_v53  ;;  %v8485_v59 = vsub.f32 %v13629_v43, %v2129_v22  ;;  %v1981_v22 = vsel %vm1536_vm0, %v8213_v6, 0.0  ;;  %v1696_v18 = vsel %vm1536_vm0, %v8229_v38, 0.0  ;;  %v2226_v6 = vmul.f32 0.020408163, %v8242_v42  ;;  %v13641_v38 = vld [vmem:[#allocation36_spill] sm:$0xff] }
 0x23a   :  { %13625 = vst [vmem:[#allocation141_spill] sm:$0xff] %v8472_v25  ;;  %13627 = vst [vmem:[#allocation33_spill] sm:$0xff] %v8475_v7  ;;  %v2240_v62 = vmul.f32 0.020408163, %v1920_v12  ;;  %v2145_v36 = vmul.f32 0.020408163, %v1635_v57 }
 0x23b   :  { %v8482_v27 = vpop.f32.mrb[136].mxu0  ;;  %13630 = vst [vmem:[#allocation5_spill] sm:$0xff] %v8485_v59  ;;  %v13633_v7 = vld [vmem:[#allocation35_spill] sm:$0xff]  ;;  %v3022_v12 = vsel %vm1536_vm0, %v2608_v54, 0.0  ;;  %v2513_v54 = vmul.f32 %v8485_v59, %v8485_v59 }
 0x23c   :  { %13628 = vst [vmem:[#allocation142_spill] sm:$0xff] %v8482_v27  ;;  %v919_v63 = vpop.f32.mrb[137].mxu0  ;;  %v8490_v52 = vsub.f32 %v13631_v30, %v2240_v62  ;;  %v8493_v53 = vsub.f32 %v13633_v7, %v2145_v36  ;;  %1694 = vadd.xlane.f32.xlu0 %v1693_v2  ;;  %v13637_v7 = vld [vmem:[#allocation6_spill] sm:$0xff] }
 0x23d   :  { %v1923_v57 = vpop.xlane.xlu0 %1922  ;;  %v1638_v15 = vpop.xlane.xlu1 %1637  ;;  %3023 = vadd.xlane.f32.xlu1 %v3022_v12  ;;  %v8505_v36 = vsub.f32 %v13637_v7, %v2225_v33  ;;  %v13639_v12 = vld [vmem:[#allocation7_spill] sm:$0xff] }
 0x23e   :  { %13632 = vst [vmem:[#allocation34_spill] sm:$0xff] %v8490_v52  ;;  %13634 = vst [vmem:[#allocation35_spill] sm:$0xff] %v8493_v53  ;;  %v2241_v43 = vmul.f32 0.020408163, %v1923_v57  ;;  %v2146_v3 = vmul.f32 0.020408163, %v1638_v15  ;;  %v8510_v53 = vsub.f32 %v13639_v12, %v2130_v23 }
 0x23f   :  { %v8500_v63 = vpop.f32.mrb[136].mxu1  ;;  %v8502_v62 = vpop.f32.mrb[138].mxu0  ;;  %13638 = vst [vmem:[#allocation6_spill] sm:$0xff] %v8505_v36  ;;  %v13643_v15 = vld [vmem:[#allocation37_spill] sm:$0xff]  ;;  %v2737_v23 = vsel %vm1536_vm0, %v2513_v54, 0.0 }
 0x240   :  { %13635 = vst [vmem:[#allocation143_spill] sm:$0xff] %v8500_v63  ;;  %13636 = vst [vmem:[#allocation144_spill] sm:$0xff] %v8502_v62  ;;  %v924_v2 = vpop.f32.mrb[139].mxu0  ;;  %v1399_v30 = vpop.f32.mrb[137].mxu1  ;;  %v8514_v57 = vsub.f32 %v13641_v38, %v2241_v43  ;;  %v8517_v63 = vsub.f32 %v13643_v15, %v2146_v3  ;;  %1982 = vadd.xlane.f32.xlu0 %v1981_v22  ;;  %v2609_v38 = vmul.f32 %v8505_v36, %v8505_v36  ;;  %v13646_v43 = vld [vmem:[#allocation8_spill] sm:$0xff]  ;;  %v13648_v22 = vld [vmem:[#allocation38_spill] sm:$0xff] }
 0x241   :  { %13640 = vst [vmem:[#allocation7_spill] sm:$0xff] %v8510_v53  ;;  %v1926_v62 = vpop.xlane.xlu1 %1925  ;;  %v1641_v33 = vpop.xlane.xlu0 %1640  ;;  %1697 = vadd.xlane.f32.xlu1 %v1696_v18  ;;  %v1984_v2 = vsel %vm1536_vm0, %v8231_v21, 0.0  ;;  %v8527_v3 = vsub.f32 %v13646_v43, %v2226_v6  ;;  %v13650_v18 = vld [vmem:[#allocation39_spill] sm:$0xff]  ;;  %v2514_v15 = vmul.f32 %v8510_v53, %v8510_v53  ;;  %v13652_v43 = vld [vmem:[#allocation40_spill] sm:$0xff]  ;;  %v13657_v53 = vld [vmem:[#allocation9_spill] sm:$0xff] }
 0x242   :  { %13642 = vst [vmem:[#allocation36_spill] sm:$0xff] %v8514_v57  ;;  %13644 = vst [vmem:[#allocation37_spill] sm:$0xff] %v8517_v63  ;;  %v2242_v7 = vmul.f32 0.020408163, %v1926_v62  ;;  %v2147_v27 = vmul.f32 0.020408163, %v1641_v33 }
 0x243   :  { %v8521_v30 = vpop.f32.mrb[138].mxu1  ;;  %13647 = vst [vmem:[#allocation8_spill] sm:$0xff] %v8527_v3  ;;  %v3025_v6 = vsel %vm1536_vm0, %v2609_v38, 0.0 }
 0x244   :  { %13645 = vst [vmem:[#allocation145_spill] sm:$0xff] %v8521_v30  ;;  %v1404_v42 = vpop.f32.mrb[139].mxu1  ;;  %v8530_v12 = vsub.f32 %v13648_v22, %v2242_v7  ;;  %v8533_v62 = vsub.f32 %v13650_v18, %v2147_v27  ;;  %2738 = vadd.xlane.f32.xlu0 %v2737_v23  ;;  %v13654_v7 = vld [vmem:[#allocation41_spill] sm:$0xff]  ;;  %v2740_v27 = vsel %vm1536_vm0, %v2514_v15, 0.0  ;;  %v2610_v23 = vmul.f32 %v8527_v3, %v8527_v3  ;;  %v13662_v3 = vld [vmem:[#allocation43_spill] sm:$0xff] }
 0x245   :  { %v1929_v33 = vpop.xlane.xlu0 %1928  ;;  %v1644_v59 = vpop.xlane.xlu1 %1643  ;;  %1985 = vadd.xlane.f32.xlu1 %v1984_v2  ;;  %v2131_v42 = vmul.f32 0.020408163, %v8244_v50  ;;  %v2132_v15 = vmul.f32 0.020408163, %v8262_v26 }
 0x246   :  { %13649 = vst [vmem:[#allocation38_spill] sm:$0xff] %v8530_v12  ;;  %13651 = vst [vmem:[#allocation39_spill] sm:$0xff] %v8533_v62  ;;  %v2243_v54 = vmul.f32 0.020408163, %v1929_v33  ;;  %v2148_v21 = vmul.f32 0.020408163, %v1644_v59 }
 0x247   :  { %v13656_v59 = vld [vmem:[#allocation98_spill] sm:$0xff]  ;;  %v13665_v62 = vld [vmem:[#allocation101_spill] sm:$0xff] }
 0x248   :  { %v8540_v36 = vsub.f32 %v13652_v43, %v2243_v54  ;;  %v8543_v22 = vsub.f32 %v13654_v7, %v2148_v21  ;;  %3026 = vadd.xlane.f32.xlu0 %v3025_v6  ;;  %v1699_v50 = vsel %vm1536_vm0, %v13656_v59, 0.0  ;;  %v8551_v54 = vsub.f32 %v13657_v53, %v2131_v42  ;;  %v8554_v43 = vpop.f32.mrb[140].mxu0  ;;  %v13660_v6 = vld [vmem:[#allocation42_spill] sm:$0xff]  ;;  %v13664_v53 = vld [vmem:[#allocation99_spill] sm:$0xff] }
 0x249   :  { %v1932_v18 = vpop.xlane.xlu1 %1931  ;;  %v1647_v2 = vpop.xlane.xlu0 %1646  ;;  %2741 = vadd.xlane.f32.xlu1 %v2740_v27  ;;  %v2227_v21 = vmul.f32 0.020408163, %v8260_v48  ;;  %13659 = vst [vmem:[#allocation146_spill] sm:$0xff] %v8554_v43  ;;  %v3028_v27 = vsel %vm1536_vm0, %v2610_v23, 0.0  ;;  %v1987_v48 = vsel %vm1536_vm0, %v13664_v53, 0.0  ;;  %v1702_v26 = vsel %vm1536_vm0, %v13665_v62, 0.0 }
 0x24a   :  { %13653 = vst [vmem:[#allocation40_spill] sm:$0xff] %v8540_v36  ;;  %13655 = vst [vmem:[#allocation41_spill] sm:$0xff] %v8543_v22  ;;  %v2244_v33 = vmul.f32 0.020408163, %v1932_v18  ;;  %v2149_v38 = vmul.f32 0.020408163, %v1647_v2 }
 0x24b   :  { %13658 = vst [vmem:[#allocation9_spill] sm:$0xff] %v8551_v54  ;;  %v929_v18 = vpop.f32.mrb[141].mxu0  ;;  %v13674_v53 = vld [vmem:[#allocation46_spill] sm:$0xff] }
 0x24c   :  { %v8558_v7 = vsub.f32 %v13660_v6, %v2244_v33  ;;  %v8561_v22 = vsub.f32 %v13662_v3, %v2149_v38  ;;  %1700 = vadd.xlane.f32.xlu0 %v1699_v50  ;;  %v13666_v33 = vld [vmem:[#allocation10_spill] sm:$0xff]  ;;  %v2515_v3 = vmul.f32 %v8551_v54, %v8551_v54  ;;  %v8573_v50 = vpop.f32.mrb[140].mxu1  ;;  %v8575_v23 = vpop.f32.mrb[142].mxu0  ;;  %v13670_v38 = vld [vmem:[#allocation11_spill] sm:$0xff]  ;;  %v2228_v18 = vmul.f32 0.020408163, %v8273_v9 }
 0x24d   :  { %v1935_v2 = vpop.xlane.xlu0 %1934  ;;  %v1650_v59 = vpop.xlane.xlu1 %1649  ;;  %3029 = vadd.xlane.f32.xlu1 %v3028_v27  ;;  %v8569_v6 = vsub.f32 %v13666_v33, %v2227_v21  ;;  %13668 = vst [vmem:[#allocation147_spill] sm:$0xff] %v8573_v50  ;;  %13669 = vst [vmem:[#allocation148_spill] sm:$0xff] %v8575_v23  ;;  %v8578_v27 = vsub.f32 %v13670_v38, %v2132_v15  ;;  %v13677_v23 = vld [vmem:[#allocation102_spill] sm:$0xff] }
 0x24e   :  { %13661 = vst [vmem:[#allocation42_spill] sm:$0xff] %v8558_v7  ;;  %13663 = vst [vmem:[#allocation43_spill] sm:$0xff] %v8561_v22  ;;  %v2245_v42 = vmul.f32 0.020408163, %v1935_v2  ;;  %v2150_v36 = vmul.f32 0.020408163, %v1650_v59 }
 0x24f   :  { %13667 = vst [vmem:[#allocation10_spill] sm:$0xff] %v8569_v6  ;;  %13671 = vst [vmem:[#allocation11_spill] sm:$0xff] %v8578_v27  ;;  %v13672_v2 = vld [vmem:[#allocation44_spill] sm:$0xff]  ;;  %v934_v21 = vpop.f32.mrb[143].mxu0  ;;  %v1409_v33 = vpop.f32.mrb[141].mxu1  ;;  %v1990_v15 = vsel %vm1536_vm0, %v13677_v23, 0.0  ;;  %v2611_v9 = vmul.f32 %v8569_v6, %v8569_v6 }
 0x250   :  { %v8582_v59 = vsub.f32 %v13672_v2, %v2245_v42  ;;  %v8585_v62 = vsub.f32 %v13674_v53, %v2150_v36  ;;  %1988 = vadd.xlane.f32.xlu0 %v1987_v48  ;;  %v2743_v38 = vsel %vm1536_vm0, %v2515_v3, 0.0  ;;  %v8594_v42 = vpop.f32.mrb[142].mxu1  ;;  %v13679_v36 = vld [vmem:[#allocation12_spill] sm:$0xff]  ;;  %v13681_v48 = vld [vmem:[#allocation47_spill] sm:$0xff] }
 0x251   :  { %v8587_v22 = vpop.xlane.xlu0 %2690  ;;  %v1938_v54 = vpop.xlane.xlu1 %1937  ;;  %1703 = vadd.xlane.f32.xlu1 %v1702_v26  ;;  %13678 = vst [vmem:[#allocation150_spill] sm:$0xff] %v8594_v42  ;;  %v8597_v53 = vsub.f32 %v13679_v36, %v2228_v18  ;;  %v13685_v33 = vld [vmem:[#allocation103_spill] sm:$0xff]  ;;  %v3031_v23 = vsel %vm1536_vm0, %v2611_v9, 0.0  ;;  %v1705_v36 = vsel %vm1536_vm0, %v8279_v14, 0.0 }
 0x252   :  { %13673 = vst [vmem:[#allocation44_spill] sm:$0xff] %v8582_v59  ;;  %13675 = vst [vmem:[#allocation46_spill] sm:$0xff] %v8585_v62  ;;  %v2246_v7 = vmul.f32 0.020408163, %v1938_v54  ;;  %v2516_v54 = vmul.f32 %v8578_v27, %v8578_v27  ;;  %v1414_v26 = vpop.f32.mrb[143].mxu1  ;;  %v8621_v9 = vpop.f32.mrb[144].mxu0 }
 0x253   :  { %13676 = vst [vmem:[#allocation149_spill] sm:$0xff] %v8587_v22  ;;  %13680 = vst [vmem:[#allocation12_spill] sm:$0xff] %v8597_v53  ;;  %v2133_v6 = vmul.f32 0.020408163, %v13685_v33  ;;  %v2229_v33 = vmul.f32 0.020408163, %v8289_v51 }
 0x254   :  { %v8600_v2 = vsub.f32 %v13681_v48, %v2246_v7  ;;  %2744 = vadd.xlane.f32.xlu0 %v2743_v38  ;;  %v2746_v18 = vsel %vm1536_vm0, %v2516_v54, 0.0  ;;  %v2612_v7 = vmul.f32 %v8597_v53, %v8597_v53  ;;  %13689 = vst [vmem:[#allocation153_spill] sm:$0xff] %v8621_v9  ;;  %v13690_v54 = vld [vmem:[#allocation49_spill] sm:$0xff]  ;;  %v939_v53 = vpop.f32.mrb[145].mxu0  ;;  %v1708_v51 = vsel %vm1536_vm0, %v8297_v58, 0.0 }
 0x255   :  { %v8604_v21 = vpop.xlane.xlu0 %2978  ;;  %1991 = vadd.xlane.f32.xlu1 %v1990_v15  ;;  %v13687_v15 = vld [vmem:[#allocation13_spill] sm:$0xff]  ;;  %v8639_v53 = vpop.f32.mrb[146].mxu0 }
 0x256   :  { %13682 = vst [vmem:[#allocation47_spill] sm:$0xff] %v8600_v2  ;;  %13683 = vst [vmem:[#allocation151_spill] sm:$0xff] %v8604_v21  ;;  %v8606_v3 = vpop.xlane.xlu1 %2693  ;;  %v8618_v27 = vsub.f32 %v13687_v15, %v2133_v6  ;;  %v944_v58 = vpop.f32.mrb[147].mxu0  ;;  %v1996_v2 = vsel %vm1536_vm0, %v8299_v41, 0.0  ;;  %v13715_v41 = vld [vmem:[#allocation55_spill] sm:$0xff] }
 0x257   :  { %13684 = vst [vmem:[#allocation152_spill] sm:$0xff] %v8606_v3  ;;  %v13693_v3 = vld [vmem:[#allocation14_spill] sm:$0xff]  ;;  %13696 = vst [vmem:[#allocation155_spill] sm:$0xff] %v8639_v53  ;;  %v13705_v58 = vld [vmem:[#allocation16_spill] sm:$0xff] }
 0x258   :  { %3032 = vadd.xlane.f32.xlu0 %v3031_v23  ;;  %13688 = vst [vmem:[#allocation13_spill] sm:$0xff] %v8618_v27  ;;  %v2134_v23 = vmul.f32 0.020408163, %v8291_v45  ;;  %v8633_v22 = vsub.f32 %v13693_v3, %v2229_v33  ;;  %v13701_v33 = vld [vmem:[#allocation53_spill] sm:$0xff] }
 0x259   :  { %v1653_v38 = vpop.xlane.xlu0 %1652  ;;  %2747 = vadd.xlane.f32.xlu1 %v2746_v18  ;;  %v3034_v18 = vsel %vm1536_vm0, %v2612_v7, 0.0  ;;  %v13697_v7 = vld [vmem:[#allocation15_spill] sm:$0xff] }
 0x25a   :  { %v2151_v48 = vmul.f32 0.020408163, %v1653_v38  ;;  %v8615_v26 = vpop.xlane.xlu1 %2981  ;;  %v13692_v38 = vld [vmem:[#allocation105_spill] sm:$0xff]  ;;  %13694 = vst [vmem:[#allocation14_spill] sm:$0xff] %v8633_v22 }
 0x25b   :  { %13686 = vst [vmem:[#allocation103_spill] sm:$0xff] %v8615_v26  ;;  %v1993_v26 = vsel %vm1536_vm0, %v13692_v38, 0.0 }
 0x25c   :  { %v8625_v21 = vsub.f32 %v13690_v54, %v2151_v48  ;;  %1706 = vadd.xlane.f32.xlu0 %v1705_v36  ;;  %v2517_v36 = vmul.f32 %v8618_v27, %v8618_v27  ;;  %v8637_v48 = vpop.f32.mrb[144].mxu1  ;;  %v8642_v54 = vsub.f32 %v13697_v7, %v2134_v23 }
 0x25d   :  { %v1941_v14 = vpop.xlane.xlu0 %1940  ;;  %3035 = vadd.xlane.f32.xlu1 %v3034_v18  ;;  %13695 = vst [vmem:[#allocation154_spill] sm:$0xff] %v8637_v48  ;;  %v13699_v18 = vld [vmem:[#allocation50_spill] sm:$0xff]  ;;  %v1419_v3 = vpop.f32.mrb[145].mxu1 }
 0x25e   :  { %13691 = vst [vmem:[#allocation49_spill] sm:$0xff] %v8625_v21  ;;  %v2247_v6 = vmul.f32 0.020408163, %v1941_v14  ;;  %v1656_v15 = vpop.xlane.xlu1 %1655  ;;  %13698 = vst [vmem:[#allocation15_spill] sm:$0xff] %v8642_v54  ;;  %v2230_v14 = vmul.f32 0.020408163, %v8310_v31  ;;  %v2613_v31 = vmul.f32 %v8633_v22, %v8633_v22 }
 0x25f   :  { %v2152_v45 = vmul.f32 0.020408163, %v1656_v15  ;;  %v2749_v7 = vsel %vm1536_vm0, %v2517_v36, 0.0  ;;  %v13707_v3 = vld [vmem:[#allocation54_spill] sm:$0xff]  ;;  %v301_v36 = vld [vmem:[#allocation2 + $0x570] sm:$0xff] }
 0x260   :  { %v8646_v38 = vsub.f32 %v13699_v18, %v2247_v6  ;;  %1994 = vadd.xlane.f32.xlu0 %v1993_v26  ;;  %v8658_v6 = vpop.f32.mrb[146].mxu1  ;;  %v8661_v26 = vsub.f32 %v13705_v58, %v2230_v14  ;;  %v302_v18 = vld [vmem:[#allocation2 + $0x578] sm:$0xff]  ;;  %v2135_v14 = vmul.f32 0.020408163, %v8312_v29 }
 0x261   :  { %v8649_v15 = vsub.f32 %v13701_v33, %v2152_v45  ;;  %v8651_v21 = vpop.xlane.xlu0 %2696  ;;  %1709 = vadd.xlane.f32.xlu1 %v1708_v51  ;;  %13704 = vst [vmem:[#allocation157_spill] sm:$0xff] %v8658_v6  ;;  %v2518_v45 = vmul.f32 %v8642_v54, %v8642_v54  ;;  %v1424_v51 = vpop.f32.mrb[147].mxu1  ;;  %1010 = vmatprep.mubr.f32.mxu0 %v302_v18  ;;  %v303_v18 = vld [vmem:[#allocation2 + $0x580] sm:$0xff] }
 0x262   :  { %13700 = vst [vmem:[#allocation50_spill] sm:$0xff] %v8646_v38  ;;  %13703 = vst [vmem:[#allocation156_spill] sm:$0xff] %v8651_v21  ;;  %v1944_v27 = vpop.xlane.xlu1 %1943  ;;  %1011 = vmatmul.mubr.f32.gmra.mrb[174].mxu0 %v301_v36  ;;  %v2614_v51 = vmul.f32 %v8661_v26, %v8661_v26  ;;  %v493_v36 = vld [vmem:[#allocation2 + $0xb70] sm:$0xff] }
 0x263   :  { %13702 = vst [vmem:[#allocation53_spill] sm:$0xff] %v8649_v15  ;;  %v2248_v23 = vmul.f32 0.020408163, %v1944_v27  ;;  %13706 = vst [vmem:[#allocation16_spill] sm:$0xff] %v8661_v26  ;;  %v2752_v58 = vsel %vm1536_vm0, %v2518_v45, 0.0 }
 0x264   :  { %2750 = vadd.xlane.f32.xlu0 %v2749_v7  ;;  %v3037_v7 = vsel %vm1536_vm0, %v2613_v31, 0.0  ;;  %v13712_v31 = vld [vmem:[#allocation17_spill] sm:$0xff]  ;;  %v8685_v26 = vpop.f32.mrb[148].mxu0 }
 0x265   :  { %v8666_v33 = vsub.f32 %v13707_v3, %v2248_v23  ;;  %v8668_v27 = vpop.xlane.xlu0 %2984  ;;  %1997 = vadd.xlane.f32.xlu1 %v1996_v2  ;;  %v304_v23 = vld [vmem:[#allocation2 + $0x588] sm:$0xff]  ;;  %v494_v3 = vld [vmem:[#allocation2 + $0xb78] sm:$0xff]  ;;  %v1711_v2 = vsel %vm1536_vm0, %v8316_v10, 0.0  ;;  %v8682_v45 = vsub.f32 %v13712_v31, %v2135_v14  ;;  %13714 = vst [vmem:[#allocation161_spill] sm:$0xff] %v8685_v26  ;;  %v1999_v14 = vsel %vm1536_vm0, %v8318_v28, 0.0 }
 0x266   :  { %13709 = vst [vmem:[#allocation158_spill] sm:$0xff] %v8668_v27  ;;  %v8670_v22 = vpop.xlane.xlu1 %2699  ;;  %1015 = vmatprep.mubr.f32.mxu0 %v304_v23  ;;  %1490 = vmatprep.mubr.f32.mxu1 %v494_v3  ;;  %v949_v23 = vpop.f32.mrb[149].mxu0  ;;  %v13717_v31 = vld [vmem:[#allocation114_spill] sm:$0xff]  ;;  %v13724_v28 = vld [vmem:[#allocation56_spill] sm:$0xff] }
 0x267   :  { %13708 = vst [vmem:[#allocation54_spill] sm:$0xff] %v8666_v33  ;;  %13710 = vst [vmem:[#allocation159_spill] sm:$0xff] %v8670_v22  ;;  %1016 = vmatmul.mubr.f32.gmra.mrb[176].mxu0 %v303_v18  ;;  %1491 = vmatmul.mubr.f32.gmra.mrb[174].mxu1 %v493_v36  ;;  %v13718_v22 = vld [vmem:[#allocation18_spill] sm:$0xff]  ;;  %v13722_v23 = vld [vmem:[#allocation19_spill] sm:$0xff] }
 0x268   :  { %3038 = vadd.xlane.f32.xlu0 %v3037_v7  ;;  %13713 = vst [vmem:[#allocation17_spill] sm:$0xff] %v8682_v45  ;;  %v2231_v7 = vmul.f32 0.020408163, %v8328_v24  ;;  %v495_v24 = vld [vmem:[#allocation2 + $0xb80] sm:$0xff] }
 0x269   :  { %v1659_v54 = vpop.xlane.xlu0 %1658  ;;  %2753 = vadd.xlane.f32.xlu1 %v2752_v58  ;;  %v2136_v58 = vmul.f32 0.020408163, %v8330_v11  ;;  %v1714_v11 = vsel %vm1536_vm0, %v13717_v31, 0.0 }
 0x26a   :  { %v2153_v27 = vmul.f32 0.020408163, %v1659_v54  ;;  %v8679_v29 = vpop.xlane.xlu1 %2987  ;;  %v3040_v54 = vsel %vm1536_vm0, %v2614_v51, 0.0  ;;  %v2519_v51 = vmul.f32 %v8682_v45, %v8682_v45 }
 0x26b   :  { %13711 = vst [vmem:[#allocation160_spill] sm:$0xff] %v8679_v29  ;;  %v496_v29 = vld [vmem:[#allocation2 + $0xb88] sm:$0xff] }
 0x26c   :  { %v8689_v10 = vsub.f32 %v13715_v41, %v2153_v27  ;;  %1712 = vadd.xlane.f32.xlu0 %v1711_v2  ;;  %1495 = vmatprep.mubr.f32.mxu1 %v496_v29  ;;  %v8697_v41 = vsub.f32 %v13718_v22, %v2231_v7  ;;  %v8701_v2 = vpop.f32.mrb[148].mxu1  ;;  %v8706_v29 = vsub.f32 %v13722_v23, %v2136_v58  ;;  %v2755_v23 = vsel %vm1536_vm0, %v2519_v51, 0.0  ;;  %v305_v51 = vld [vmem:[#allocation2 + $0x590] sm:$0xff] }
 0x26d   :  { %v1947_v3 = vpop.xlane.xlu0 %1946  ;;  %3041 = vadd.xlane.f32.xlu1 %v3040_v54  ;;  %1496 = vmatmul.mubr.f32.gmra.mrb[176].mxu1 %v495_v24  ;;  %13720 = vst [vmem:[#allocation162_spill] sm:$0xff] %v8701_v2  ;;  %v8703_v54 = vpop.f32.mrb[150].mxu0 }
 0x26e   :  { %13716 = vst [vmem:[#allocation55_spill] sm:$0xff] %v8689_v10  ;;  %v2249_v18 = vmul.f32 0.020408163, %v1947_v3  ;;  %v1662_v36 = vpop.xlane.xlu1 %1661  ;;  %13719 = vst [vmem:[#allocation18_spill] sm:$0xff] %v8697_v41  ;;  %v2232_v3 = vmul.f32 0.020408163, %v8341_v20 }
 0x26f   :  { %v2154_v27 = vmul.f32 0.020408163, %v1662_v36  ;;  %13721 = vst [vmem:[#allocation163_spill] sm:$0xff] %v8703_v54  ;;  %13723 = vst [vmem:[#allocation19_spill] sm:$0xff] %v8706_v29  ;;  %v954_v22 = vpop.f32.mrb[151].mxu0  ;;  %v1429_v7 = vpop.f32.mrb[149].mxu1 }
 0x270   :  { %v8710_v21 = vsub.f32 %v13724_v28, %v2249_v18  ;;  %2000 = vadd.xlane.f32.xlu0 %v1999_v14  ;;  %v13726_v36 = vld [vmem:[#allocation58_spill] sm:$0xff]  ;;  %v13729_v10 = vld [vmem:[#allocation115_spill] sm:$0xff]  ;;  %v2615_v28 = vmul.f32 %v8697_v41, %v8697_v41  ;;  %v8722_v20 = vpop.f32.mrb[150].mxu1  ;;  %v13731_v14 = vld [vmem:[#allocation20_spill] sm:$0xff] }
 0x271   :  { %v8713_v31 = vsub.f32 %v13726_v36, %v2154_v27  ;;  %v8715_v45 = vpop.xlane.xlu0 %2702  ;;  %1715 = vadd.xlane.f32.xlu1 %v1714_v11  ;;  %v2002_v33 = vsel %vm1536_vm0, %v13729_v10, 0.0  ;;  %13730 = vst [vmem:[#allocation165_spill] sm:$0xff] %v8722_v20  ;;  %v8725_v18 = vsub.f32 %v13731_v14, %v2232_v3  ;;  %v2520_v27 = vmul.f32 %v8706_v29, %v8706_v29  ;;  %v1434_v11 = vpop.f32.mrb[151].mxu1  ;;  %v306_v22 = vld [vmem:[#allocation2 + $0x598] sm:$0xff]  ;;  %v13733_v7 = vld [vmem:[#allocation59_spill] sm:$0xff] }
 0x272   :  { %13725 = vst [vmem:[#allocation56_spill] sm:$0xff] %v8710_v21  ;;  %13728 = vst [vmem:[#allocation164_spill] sm:$0xff] %v8715_v45  ;;  %v1950_v24 = vpop.xlane.xlu1 %1949  ;;  %1020 = vmatprep.mubr.f32.mxu0 %v306_v22  ;;  %v13737_v10 = vld [vmem:[#allocation116_spill] sm:$0xff]  ;;  %v307_v22 = vld [vmem:[#allocation2 + $0x5a0] sm:$0xff] }
 0x273   :  { %13727 = vst [vmem:[#allocation58_spill] sm:$0xff] %v8713_v31  ;;  %v2250_v58 = vmul.f32 0.020408163, %v1950_v24  ;;  %13732 = vst [vmem:[#allocation20_spill] sm:$0xff] %v8725_v18  ;;  %1021 = vmatmul.mubr.f32.gmra.mrb[178].mxu0 %v305_v51  ;;  %v2137_v3 = vmul.f32 0.020408163, %v13737_v10  ;;  %v2616_v11 = vmul.f32 %v8725_v18, %v8725_v18 }
 0x274   :  { %2756 = vadd.xlane.f32.xlu0 %v2755_v23  ;;  %v3043_v23 = vsel %vm1536_vm0, %v2615_v28, 0.0  ;;  %v2758_v14 = vsel %vm1536_vm0, %v2520_v27, 0.0  ;;  %v497_v51 = vld [vmem:[#allocation2 + $0xb90] sm:$0xff]  ;;  %v13739_v28 = vld [vmem:[#allocation21_spill] sm:$0xff]  ;;  %v8749_v18 = vpop.f32.mrb[152].mxu0  ;;  %v13745_v45 = vld [vmem:[#allocation22_spill] sm:$0xff] }
 0x275   :  { %v8730_v36 = vsub.f32 %v13733_v7, %v2250_v58  ;;  %v8732_v24 = vpop.xlane.xlu0 %2990  ;;  %2003 = vadd.xlane.f32.xlu1 %v2002_v33  ;;  %v308_v58 = vld [vmem:[#allocation2 + $0x5a8] sm:$0xff]  ;;  %v498_v7 = vld [vmem:[#allocation2 + $0xb98] sm:$0xff]  ;;  %v1717_v33 = vsel %vm1536_vm0, %v8347_v44, 0.0  ;;  %v8746_v27 = vsub.f32 %v13739_v28, %v2137_v3  ;;  %13741 = vst [vmem:[#allocation168_spill] sm:$0xff] %v8749_v18 }
 0x276   :  { %13735 = vst [vmem:[#allocation166_spill] sm:$0xff] %v8732_v24  ;;  %v8734_v41 = vpop.xlane.xlu1 %2705  ;;  %1025 = vmatprep.mubr.f32.mxu0 %v308_v58  ;;  %1500 = vmatprep.mubr.f32.mxu1 %v498_v7  ;;  %v959_v58 = vpop.f32.mrb[153].mxu0 }
 0x277   :  { %13734 = vst [vmem:[#allocation59_spill] sm:$0xff] %v8730_v36  ;;  %13736 = vst [vmem:[#allocation167_spill] sm:$0xff] %v8734_v41  ;;  %1026 = vmatmul.mubr.f32.gmra.mrb[180].mxu0 %v307_v22  ;;  %1501 = vmatmul.mubr.f32.gmra.mrb[178].mxu1 %v497_v51  ;;  %v13742_v41 = vld [vmem:[#allocation62_spill] sm:$0xff]  ;;  %v13749_v58 = vld [vmem:[#allocation23_spill] sm:$0xff]  ;;  %v2008_v36 = vsel %vm1536_vm0, %v8367_v1, 0.0 }
 0x278   :  { %3044 = vadd.xlane.f32.xlu0 %v3043_v23  ;;  %13740 = vst [vmem:[#allocation21_spill] sm:$0xff] %v8746_v27  ;;  %v2233_v23 = vmul.f32 0.020408163, %v8357_v60  ;;  %v13744_v22 = vld [vmem:[#allocation118_spill] sm:$0xff]  ;;  %v499_v60 = vld [vmem:[#allocation2 + $0xba0] sm:$0xff] }
 0x279   :  { %v1665_v29 = vpop.xlane.xlu0 %1664  ;;  %2759 = vadd.xlane.f32.xlu1 %v2758_v14  ;;  %v2138_v14 = vmul.f32 0.020408163, %v8359_v5  ;;  %v2005_v3 = vsel %vm1536_vm0, %v13744_v22, 0.0  ;;  %v1720_v5 = vsel %vm1536_vm0, %v8365_v13, 0.0  ;;  %v13751_v22 = vld [vmem:[#allocation63_spill] sm:$0xff] }
 0x27a   :  { %v2155_v24 = vmul.f32 0.020408163, %v1665_v29  ;;  %v8743_v10 = vpop.xlane.xlu1 %2993  ;;  %v3046_v29 = vsel %vm1536_vm0, %v2616_v11, 0.0  ;;  %v2521_v11 = vmul.f32 %v8746_v27, %v8746_v27 }
 0x27b   :  { %13738 = vst [vmem:[#allocation116_spill] sm:$0xff] %v8743_v10  ;;  %v500_v10 = vld [vmem:[#allocation2 + $0xba8] sm:$0xff] }
 0x27c   :  { %v8753_v44 = vsub.f32 %v13742_v41, %v2155_v24  ;;  %1718 = vadd.xlane.f32.xlu0 %v1717_v33  ;;  %1505 = vmatprep.mubr.f32.mxu1 %v500_v10  ;;  %v8761_v41 = vsub.f32 %v13745_v45, %v2233_v23  ;;  %v8765_v33 = vpop.f32.mrb[152].mxu1  ;;  %v8770_v10 = vsub.f32 %v13749_v58, %v2138_v14  ;;  %v2761_v58 = vsel %vm1536_vm0, %v2521_v11, 0.0  ;;  %v309_v11 = vld [vmem:[#allocation2 + $0x5b0] sm:$0xff] }
 0x27d   :  { %v1953_v7 = vpop.xlane.xlu0 %1952  ;;  %3047 = vadd.xlane.f32.xlu1 %v3046_v29  ;;  %1506 = vmatmul.mubr.f32.gmra.mrb[180].mxu1 %v499_v60  ;;  %13747 = vst [vmem:[#allocation169_spill] sm:$0xff] %v8765_v33  ;;  %v8767_v29 = vpop.f32.mrb[154].mxu0 }
 0x27e   :  { %13743 = vst [vmem:[#allocation62_spill] sm:$0xff] %v8753_v44  ;;  %v2251_v51 = vmul.f32 0.020408163, %v1953_v7  ;;  %v1668_v28 = vpop.xlane.xlu1 %1667  ;;  %13746 = vst [vmem:[#allocation22_spill] sm:$0xff] %v8761_v41  ;;  %v2234_v7 = vmul.f32 0.020408163, %v8378_v40  ;;  %v2617_v40 = vmul.f32 %v8761_v41, %v8761_v41 }
 0x27f   :  { %v2156_v24 = vmul.f32 0.020408163, %v1668_v28  ;;  %13748 = vst [vmem:[#allocation170_spill] sm:$0xff] %v8767_v29  ;;  %13750 = vst [vmem:[#allocation23_spill] sm:$0xff] %v8770_v10  ;;  %v964_v45 = vpop.f32.mrb[155].mxu0  ;;  %v1439_v23 = vpop.f32.mrb[153].mxu1 }
 0x280   :  { %v8774_v44 = vsub.f32 %v13751_v22, %v2251_v51  ;;  %2006 = vadd.xlane.f32.xlu0 %v2005_v3  ;;  %v13753_v28 = vld [vmem:[#allocation65_spill] sm:$0xff]  ;;  %v8786_v22 = vpop.f32.mrb[154].mxu1  ;;  %v13756_v3 = vld [vmem:[#allocation24_spill] sm:$0xff]  ;;  %v13758_v23 = vld [vmem:[#allocation66_spill] sm:$0xff] }
 0x281   :  { %v8777_v13 = vsub.f32 %v13753_v28, %v2156_v24  ;;  %v8779_v27 = vpop.xlane.xlu0 %2708  ;;  %1721 = vadd.xlane.f32.xlu1 %v1720_v5  ;;  %13755 = vst [vmem:[#allocation171_spill] sm:$0xff] %v8786_v22  ;;  %v8789_v51 = vsub.f32 %v13756_v3, %v2234_v7  ;;  %v2522_v24 = vmul.f32 %v8770_v10, %v8770_v10  ;;  %v1444_v5 = vpop.f32.mrb[155].mxu1  ;;  %v310_v45 = vld [vmem:[#allocation2 + $0x5b8] sm:$0xff]  ;;  %v2139_v7 = vmul.f32 0.020408163, %v8380_v35 }
 0x282   :  { %13752 = vst [vmem:[#allocation63_spill] sm:$0xff] %v8774_v44  ;;  %v1956_v60 = vpop.xlane.xlu1 %1955  ;;  %1030 = vmatprep.mubr.f32.mxu0 %v310_v45  ;;  %v311_v45 = vld [vmem:[#allocation2 + $0x5c0] sm:$0xff] }
 0x283   :  { %13754 = vst [vmem:[#allocation65_spill] sm:$0xff] %v8777_v13  ;;  %v2252_v14 = vmul.f32 0.020408163, %v1956_v60  ;;  %13757 = vst [vmem:[#allocation24_spill] sm:$0xff] %v8789_v51  ;;  %1031 = vmatmul.mubr.f32.gmra.mrb[182].mxu0 %v309_v11  ;;  %v2764_v3 = vsel %vm1536_vm0, %v2522_v24, 0.0  ;;  %v2618_v5 = vmul.f32 %v8789_v51, %v8789_v51  ;;  %v501_v11 = vld [vmem:[#allocation2 + $0xbb0] sm:$0xff] }
 0x284   :  { %2762 = vadd.xlane.f32.xlu0 %v2761_v58  ;;  %v3049_v58 = vsel %vm1536_vm0, %v2617_v40, 0.0  ;;  %v13763_v40 = vld [vmem:[#allocation25_spill] sm:$0xff]  ;;  %v2140_v51 = vmul.f32 0.020408163, %v8398_v19  ;;  %v13768_v19 = vld [vmem:[#allocation26_spill] sm:$0xff] }
 0x285   :  { %v8794_v28 = vsub.f32 %v13758_v23, %v2252_v14  ;;  %v8796_v60 = vpop.xlane.xlu0 %2996  ;;  %2009 = vadd.xlane.f32.xlu1 %v2008_v36  ;;  %v312_v14 = vld [vmem:[#allocation2 + $0x5c8] sm:$0xff]  ;;  %v502_v23 = vld [vmem:[#allocation2 + $0xbb8] sm:$0xff]  ;;  %v1723_v36 = vsel %vm1536_vm0, %v8384_v32, 0.0  ;;  %v8810_v24 = vsub.f32 %v13763_v40, %v2139_v7  ;;  %v503_v7 = vld [vmem:[#allocation2 + $0xbc0] sm:$0xff] }
 0x286   :  { %13760 = vst [vmem:[#allocation172_spill] sm:$0xff] %v8796_v60  ;;  %v8798_v41 = vpop.xlane.xlu1 %2711  ;;  %1035 = vmatprep.mubr.f32.mxu0 %v312_v14  ;;  %1510 = vmatprep.mubr.f32.mxu1 %v502_v23  ;;  %v3052_v14 = vsel %vm1536_vm0, %v2618_v5, 0.0  ;;  %v504_v32 = vld [vmem:[#allocation2 + $0xbc8] sm:$0xff]  ;;  %v2011_v23 = vsel %vm1536_vm0, %v8386_v17, 0.0 }
 0x287   :  { %13759 = vst [vmem:[#allocation66_spill] sm:$0xff] %v8794_v28  ;;  %13761 = vst [vmem:[#allocation173_spill] sm:$0xff] %v8798_v41  ;;  %1036 = vmatmul.mubr.f32.gmra.mrb[184].mxu0 %v311_v45  ;;  %1511 = vmatmul.mubr.f32.gmra.mrb[182].mxu1 %v501_v11  ;;  %v2523_v5 = vmul.f32 %v8810_v24, %v8810_v24 }
 0x288   :  { %3050 = vadd.xlane.f32.xlu0 %v3049_v58  ;;  %13764 = vst [vmem:[#allocation25_spill] sm:$0xff] %v8810_v24  ;;  %v2235_v58 = vmul.f32 0.020408163, %v8396_v49  ;;  %1515 = vmatprep.mubr.f32.mxu1 %v504_v32  ;;  %v13767_v49 = vld [vmem:[#allocation127_spill] sm:$0xff]  ;;  %v13772_v32 = vld [vmem:[#allocation68_spill] sm:$0xff]  ;;  %v7420_v24 = vmov 0  }
 0x289   :  { %v1671_v10 = vpop.xlane.xlu0 %1670  ;;  %2765 = vadd.xlane.f32.xlu1 %v2764_v3  ;;  %v13765_v3 = vld [vmem:[#allocation67_spill] sm:$0xff]  ;;  %v1726_v11 = vsel %vm1536_vm0, %v13767_v49, 0.0  ;;  %6812 = vset.pattern.permute.xlu0 %v7420_v24 }
 0x28a   :  { %v2157_v60 = vmul.f32 0.020408163, %v1671_v10  ;;  %v8807_v35 = vpop.xlane.xlu1 %2999  ;;  %6813 = vset.pattern.permute.xlu1 %v7420_v24  ;;  %v315_v24 = vld [vmem:[#allocation2 + $0x5e0] sm:$0xff] }
 0x28b   :  { %13762 = vst [vmem:[#allocation174_spill] sm:$0xff] %v8807_v35  ;;  %v8823_v35 = vsub.f32 %v13768_v19, %v2235_v58  ;;  %1516 = vmatmul.mubr.f32.gmra.mrb[184].mxu1 %v503_v7 }
 0x28c   :  { %v8815_v1 = vsub.f32 %v13765_v3, %v2157_v60  ;;  %1724 = vadd.xlane.f32.xlu0 %v1723_v36  ;;  %v13770_v36 = vld [vmem:[#allocation27_spill] sm:$0xff] }
 0x28d   :  { %v1959_v10 = vpop.xlane.xlu0 %1958  ;;  %3053 = vadd.xlane.f32.xlu1 %v3052_v14  ;;  %13769 = vst [vmem:[#allocation26_spill] sm:$0xff] %v8823_v35  ;;  %v8828_v3 = vsub.f32 %v13770_v36, %v2140_v51  ;;  %v2236_v14 = vmul.f32 0.020408163, %v8409_v55  ;;  %v2767_v51 = vsel %vm1536_vm0, %v2523_v5, 0.0  ;;  %v2619_v55 = vmul.f32 %v8823_v35, %v8823_v35  ;;  %v13778_v36 = vld [vmem:[#allocation28_spill] sm:$0xff] }
 0x28e   :  { %13766 = vst [vmem:[#allocation67_spill] sm:$0xff] %v8815_v1  ;;  %v2253_v45 = vmul.f32 0.020408163, %v1959_v10  ;;  %v1674_v40 = vpop.xlane.xlu1 %1673  ;;  %v13774_v10 = vld [vmem:[#allocation70_spill] sm:$0xff] }
 0x28f   :  { %v2158_v60 = vmul.f32 0.020408163, %v1674_v40  ;;  %13771 = vst [vmem:[#allocation27_spill] sm:$0xff] %v8828_v3  ;;  %v13777_v40 = vld [vmem:[#allocation128_spill] sm:$0xff] }
 0x290   :  { %v8832_v17 = vsub.f32 %v13772_v32, %v2253_v45  ;;  %2012 = vadd.xlane.f32.xlu0 %v2011_v23  ;;  %v2014_v19 = vsel %vm1536_vm0, %v13777_v40, 0.0  ;;  %v8845_v45 = vsub.f32 %v13778_v36, %v2236_v14  ;;  %v2524_v23 = vmul.f32 %v8828_v3, %v8828_v3  ;;  %v13780_v32 = vld [vmem:[#allocation71_spill] sm:$0xff]  ;;  %v13783_v14 = vld [vmem:[#allocation129_spill] sm:$0xff] }
 0x291   :  { %v8835_v41 = vsub.f32 %v13774_v10, %v2158_v60  ;;  %v8837_v49 = vpop.xlane.xlu0 %2714  ;;  %1727 = vadd.xlane.f32.xlu1 %v1726_v11  ;;  %v314_v60 = vld [vmem:[#allocation2 + $0x5d8] sm:$0xff]  ;;  %v2141_v36 = vmul.f32 0.020408163, %v13783_v14  ;;  %v1729_v3 = vsel %vm1536_vm0, %v8415_v4, 0.0 }
 0x292   :  { %13773 = vst [vmem:[#allocation68_spill] sm:$0xff] %v8832_v17  ;;  %13776 = vst [vmem:[#allocation175_spill] sm:$0xff] %v8837_v49  ;;  %v1962_v58 = vpop.xlane.xlu1 %1961  ;;  %1040 = vmatprep.mubr.f32.mxu0 %v314_v60  ;;  %v2770_v35 = vsel %vm1536_vm0, %v2524_v23, 0.0  ;;  %v2237_v23 = vmul.f32 0.020408163, %v8425_v34  ;;  %v508_v49 = vld [vmem:[#allocation2 + $0xbe8] sm:$0xff] }
 0x293   :  { %13775 = vst [vmem:[#allocation70_spill] sm:$0xff] %v8835_v41  ;;  %v2254_v7 = vmul.f32 0.020408163, %v1962_v58  ;;  %13779 = vst [vmem:[#allocation28_spill] sm:$0xff] %v8845_v45  ;;  %v313_v58 = vld [vmem:[#allocation2 + $0x5d0] sm:$0xff] }
 0x294   :  { %2768 = vadd.xlane.f32.xlu0 %v2767_v51  ;;  %v3055_v51 = vsel %vm1536_vm0, %v2619_v55, 0.0  ;;  %1041 = vmatmul.mubr.f32.gmra.mrb[186].mxu0 %v313_v58  ;;  %v13785_v55 = vld [vmem:[#allocation29_spill] sm:$0xff] }
 0x295   :  { %v8850_v11 = vsub.f32 %v13780_v32, %v2254_v7  ;;  %v8852_v10 = vpop.xlane.xlu0 %3002  ;;  %2015 = vadd.xlane.f32.xlu1 %v2014_v19  ;;  %v2620_v7 = vmul.f32 %v8845_v45, %v8845_v45  ;;  %v316_v32 = vld [vmem:[#allocation2 + $0x5e8] sm:$0xff]  ;;  %v506_v19 = vld [vmem:[#allocation2 + $0xbd8] sm:$0xff]  ;;  %v8866_v58 = vsub.f32 %v13785_v55, %v2141_v36  ;;  %v507_v36 = vld [vmem:[#allocation2 + $0xbe0] sm:$0xff] }
 0x296   :  { %13782 = vst [vmem:[#allocation176_spill] sm:$0xff] %v8852_v10  ;;  %v8854_v5 = vpop.xlane.xlu1 %2717  ;;  %1045 = vmatprep.mubr.f32.mxu0 %v316_v32  ;;  %v505_v10 = vld [vmem:[#allocation2 + $0xbd0] sm:$0xff]  ;;  %1520 = vmatprep.mubr.f32.mxu1 %v506_v19 }
 0x297   :  { %13781 = vst [vmem:[#allocation71_spill] sm:$0xff] %v8850_v11  ;;  %13786 = vst [vmem:[#allocation29_spill] sm:$0xff] %v8866_v58  ;;  %1521 = vmatmul.mubr.f32.gmra.mrb[186].mxu1 %v505_v10  ;;  %v3058_v32 = vsel %vm1536_vm0, %v2620_v7, 0.0  ;;  %v1732_v10 = vsel %vm1536_vm0, %v8433_v61, 0.0  ;;  %v13792_v7 = vld [vmem:[#allocation31_spill] sm:$0xff] }
 0x298   :  { %3056 = vadd.xlane.f32.xlu0 %v3055_v51  ;;  %1046 = vmatmul.mubr.f32.gmra.mrb[188].mxu0 %v315_v24  ;;  %v2142_v51 = vmul.f32 0.020408163, %v8427_v37  ;;  %v13790_v37 = vld [vmem:[#allocation30_spill] sm:$0xff] }
 0x299   :  { %v1677_v60 = vpop.xlane.xlu0 %1676  ;;  %2771 = vadd.xlane.f32.xlu1 %v2770_v35  ;;  %v13787_v35 = vld [vmem:[#allocation74_spill] sm:$0xff]  ;;  %1525 = vmatprep.mubr.f32.mxu1 %v508_v49  ;;  %v8879_v24 = vsub.f32 %v13790_v37, %v2237_v23  ;;  %v13794_v49 = vld [vmem:[#allocation75_spill] sm:$0xff]  ;;  %v13799_v37 = vld [vmem:[#allocation32_spill] sm:$0xff] }
 0x29a   :  { %v2159_v14 = vmul.f32 0.020408163, %v1677_v60  ;;  %v8863_v40 = vpop.xlane.xlu1 %3005 }
 0x29b   :  { %13784 = vst [vmem:[#allocation129_spill] sm:$0xff] %v8863_v40  ;;  %v13789_v40 = vld [vmem:[#allocation131_spill] sm:$0xff]  ;;  %13791 = vst [vmem:[#allocation30_spill] sm:$0xff] %v8879_v24  ;;  %1526 = vmatmul.mubr.f32.gmra.mrb[188].mxu1 %v507_v36 }
 0x29c   :  { %v8871_v45 = vsub.f32 %v13787_v35, %v2159_v14  ;;  %1730 = vadd.xlane.f32.xlu0 %v1729_v3  ;;  %v2017_v19 = vsel %vm1536_vm0, %v13789_v40, 0.0  ;;  %v2525_v3 = vmul.f32 %v8866_v58, %v8866_v58  ;;  %v8884_v35 = vsub.f32 %v13792_v7, %v2142_v51  ;;  %v13808_v58 = vld [vmem:[#allocation80_spill] sm:$0xff] }
 0x29d   :  { %v1965_v60 = vpop.xlane.xlu0 %1964  ;;  %3059 = vadd.xlane.f32.xlu1 %v3058_v32  ;;  %v2238_v32 = vmul.f32 0.020408163, %v8446_v46  ;;  %v2621_v46 = vmul.f32 %v8879_v24, %v8879_v24 }
 0x29e   :  { %13788 = vst [vmem:[#allocation74_spill] sm:$0xff] %v8871_v45  ;;  %v2255_v55 = vmul.f32 0.020408163, %v1965_v60  ;;  %v1680_v34 = vpop.xlane.xlu1 %1679  ;;  %13793 = vst [vmem:[#allocation31_spill] sm:$0xff] %v8884_v35  ;;  %v13796_v60 = vld [vmem:[#allocation77_spill] sm:$0xff]  ;;  %v2773_v51 = vsel %vm1536_vm0, %v2525_v3, 0.0 }
 0x29f   :  { %v2160_v14 = vmul.f32 0.020408163, %v1680_v34  ;;  %v2020_v34 = vsel %vm1536_vm0, %v8435_v47, 0.0  ;;  %v3061_v3 = vsel %vm1536_vm0, %v2621_v46, 0.0  ;;  %v13824_v47 = vld [vmem:[#allocation144_spill] sm:$0xff] }
 0x2a0   :  { %v8888_v40 = vsub.f32 %v13794_v49, %v2255_v55  ;;  %2018 = vadd.xlane.f32.xlu0 %v2017_v19  ;;  %v8901_v55 = vsub.f32 %v13799_v37, %v2238_v32  ;;  %v2526_v19 = vmul.f32 %v8884_v35, %v8884_v35 }
 0x2a1   :  { %v8891_v4 = vsub.f32 %v13796_v60, %v2160_v14  ;;  %v8893_v61 = vpop.xlane.xlu0 %2720  ;;  %1733 = vadd.xlane.f32.xlu1 %v1732_v10  ;;  %v13801_v14 = vld [vmem:[#allocation78_spill] sm:$0xff] }
 0x2a2   :  { %13795 = vst [vmem:[#allocation75_spill] sm:$0xff] %v8888_v40  ;;  %13798 = vst [vmem:[#allocation177_spill] sm:$0xff] %v8893_v61  ;;  %v1968_v23 = vpop.xlane.xlu1 %1967  ;;  %v2776_v60 = vsel %vm1536_vm0, %v2526_v19, 0.0  ;;  %v2622_v32 = vmul.f32 %v8901_v55, %v8901_v55  ;;  %v2023_v19 = vsel %vm1536_vm0, %v8452_v8, 0.0 }
 0x2a3   :  { %13797 = vst [vmem:[#allocation77_spill] sm:$0xff] %v8891_v4  ;;  %v2256_v36 = vmul.f32 0.020408163, %v1968_v23  ;;  %13800 = vst [vmem:[#allocation32_spill] sm:$0xff] %v8901_v55 }
 0x2a4   :  { %2774 = vadd.xlane.f32.xlu0 %v2773_v51  ;;  %v1735_v51 = vsel %vm1536_vm0, %v8450_v56, 0.0  ;;  %v3064_v46 = vsel %vm1536_vm0, %v2622_v32, 0.0 }
 0x2a5   :  { %v8906_v7 = vsub.f32 %v13801_v14, %v2256_v36  ;;  %v8908_v10 = vpop.xlane.xlu0 %3008  ;;  %2021 = vadd.xlane.f32.xlu1 %v2020_v34  ;;  %v13806_v14 = vld [vmem:[#allocation79_spill] sm:$0xff] }
 0x2a6   :  { %13803 = vst [vmem:[#allocation178_spill] sm:$0xff] %v8908_v10  ;;  %v8910_v49 = vpop.xlane.xlu1 %2723 }
 0x2a7   :  { %13802 = vst [vmem:[#allocation78_spill] sm:$0xff] %v8906_v7  ;;  %13804 = vst [vmem:[#allocation179_spill] sm:$0xff] %v8910_v49 }
 0x2a8   :  { %3062 = vadd.xlane.f32.xlu0 %v3061_v3 }
 0x2a9   :  { %v1683_v23 = vpop.xlane.xlu0 %1682  ;;  %2777 = vadd.xlane.f32.xlu1 %v2776_v60  ;;  %v1738_v60 = vsel %vm1536_vm0, %v8465_v16, 0.0 }
 0x2aa   :  { %v2161_v36 = vmul.f32 0.020408163, %v1683_v23  ;;  %v8918_v37 = vpop.xlane.xlu1 %3011  ;;  %v2527_v23 = vmul.f32 %v8461_v0, %v8461_v0  ;;  %v2623_v0 = vmul.f32 %v8472_v25, %v8472_v25  ;;  %v13818_v25 = vld [vmem:[#allocation142_spill] sm:$0xff] }
 0x2ab   :  { %13805 = vst [vmem:[#allocation180_spill] sm:$0xff] %v8918_v37 }
 0x2ac   :  { %v8921_v34 = vsub.f32 %v13806_v14, %v2161_v36  ;;  %1736 = vadd.xlane.f32.xlu0 %v1735_v51  ;;  %v13810_v51 = vld [vmem:[#allocation82_spill] sm:$0xff]  ;;  %v3067_v37 = vsel %vm1536_vm0, %v2623_v0, 0.0 }
 0x2ad   :  { %v1971_v3 = vpop.xlane.xlu0 %1970  ;;  %3065 = vadd.xlane.f32.xlu1 %v3064_v46 }
 0x2ae   :  { %13807 = vst [vmem:[#allocation79_spill] sm:$0xff] %v8921_v34  ;;  %v2257_v55 = vmul.f32 0.020408163, %v1971_v3  ;;  %v1686_v24 = vpop.xlane.xlu1 %1685  ;;  %v2026_v3 = vsel %vm1536_vm0, %v8467_v39, 0.0 }
 0x2af   :  { %v2162_v35 = vmul.f32 0.020408163, %v1686_v24  ;;  %v2779_v24 = vsel %vm1536_vm0, %v2527_v23, 0.0 }
 0x2b0   :  { %v8931_v36 = vsub.f32 %v13808_v58, %v2257_v55  ;;  %2024 = vadd.xlane.f32.xlu0 %v2023_v19  ;;  %v13813_v58 = vld [vmem:[#allocation33_spill] sm:$0xff]  ;;  %v13814_v19 = vld [vmem:[#allocation83_spill] sm:$0xff] }
 0x2b1   :  { %v8934_v32 = vsub.f32 %v13810_v51, %v2162_v35  ;;  %v8936_v14 = vpop.xlane.xlu0 %2726  ;;  %1739 = vadd.xlane.f32.xlu1 %v1738_v60  ;;  %v2528_v55 = vmul.f32 %v13813_v58, %v13813_v58  ;;  %v1741_v58 = vsel %vm1536_vm0, %v13818_v25, 0.0 }
 0x2b2   :  { %13809 = vst [vmem:[#allocation80_spill] sm:$0xff] %v8931_v36  ;;  %13812 = vst [vmem:[#allocation181_spill] sm:$0xff] %v8936_v14  ;;  %v1974_v46 = vpop.xlane.xlu1 %1973  ;;  %v13823_v14 = vld [vmem:[#allocation143_spill] sm:$0xff] }
 0x2b3   :  { %13811 = vst [vmem:[#allocation82_spill] sm:$0xff] %v8934_v32  ;;  %v2258_v10 = vmul.f32 0.020408163, %v1974_v46  ;;  %v2782_v23 = vsel %vm1536_vm0, %v2528_v55, 0.0  ;;  %v2624_v46 = vmul.f32 %v8490_v52, %v8490_v52  ;;  %v2029_v52 = vsel %vm1536_vm0, %v13823_v14, 0.0 }
 0x2b4   :  { %2780 = vadd.xlane.f32.xlu0 %v2779_v24 }
 0x2b5   :  { %v8946_v35 = vsub.f32 %v13814_v19, %v2258_v10  ;;  %v8948_v51 = vpop.xlane.xlu0 %3014  ;;  %2027 = vadd.xlane.f32.xlu1 %v2026_v3  ;;  %v3070_v0 = vsel %vm1536_vm0, %v2624_v46, 0.0  ;;  %v13828_v46 = vld [vmem:[#allocation89_spill] sm:$0xff] }
 0x2b6   :  { %13816 = vst [vmem:[#allocation182_spill] sm:$0xff] %v8948_v51  ;;  %v8950_v60 = vpop.xlane.xlu1 %2729  ;;  %v13820_v51 = vld [vmem:[#allocation86_spill] sm:$0xff] }
 0x2b7   :  { %13815 = vst [vmem:[#allocation83_spill] sm:$0xff] %v8946_v35  ;;  %13817 = vst [vmem:[#allocation183_spill] sm:$0xff] %v8950_v60  ;;  %v13825_v60 = vld [vmem:[#allocation35_spill] sm:$0xff] }
 0x2b8   :  { %3068 = vadd.xlane.f32.xlu0 %v3067_v37  ;;  %v8964_v37 = vpop.f32.mrb[156].mxu0 }
 0x2b9   :  { %v1689_v24 = vpop.xlane.xlu0 %1688  ;;  %2783 = vadd.xlane.f32.xlu1 %v2782_v23  ;;  %13822 = vst [vmem:[#allocation185_spill] sm:$0xff] %v8964_v37  ;;  %v969_v23 = vpop.f32.mrb[157].mxu0 }
 0x2ba   :  { %v2163_v10 = vmul.f32 0.020408163, %v1689_v24  ;;  %v8958_v19 = vpop.xlane.xlu1 %3017  ;;  %v1744_v24 = vsel %vm1536_vm0, %v13824_v47, 0.0  ;;  %v2032_v47 = vsel %vm1536_vm0, %v8521_v30, 0.0 }
 0x2bb   :  { %13819 = vst [vmem:[#allocation184_spill] sm:$0xff] %v8958_v19 }
 0x2bc   :  { %v8961_v3 = vsub.f32 %v13820_v51, %v2163_v10  ;;  %1742 = vadd.xlane.f32.xlu0 %v1741_v58  ;;  %v2529_v51 = vmul.f32 %v13825_v60, %v13825_v60  ;;  %v13826_v58 = vld [vmem:[#allocation87_spill] sm:$0xff]  ;;  %v8980_v23 = vpop.f32.mrb[158].mxu0 }
 0x2bd   :  { %v1977_v55 = vpop.xlane.xlu0 %1976  ;;  %3071 = vadd.xlane.f32.xlu1 %v3070_v0  ;;  %13831 = vst [vmem:[#allocation187_spill] sm:$0xff] %v8980_v23 }
 0x2be   :  { %13821 = vst [vmem:[#allocation86_spill] sm:$0xff] %v8961_v3  ;;  %v2259_v39 = vmul.f32 0.020408163, %v1977_v55  ;;  %v1692_v16 = vpop.xlane.xlu1 %1691  ;;  %v2785_v60 = vsel %vm1536_vm0, %v2529_v51, 0.0 }
 0x2bf   :  { %v2164_v19 = vmul.f32 0.020408163, %v1692_v16  ;;  %v8984_v16 = vpop.f32.mrb[156].mxu1 }
 0x2c0   :  { %v8973_v10 = vsub.f32 %v13826_v58, %v2259_v39  ;;  %2030 = vadd.xlane.f32.xlu0 %v2029_v52  ;;  %13832 = vst [vmem:[#allocation188_spill] sm:$0xff] %v8984_v16  ;;  %v2625_v39 = vmul.f32 %v8514_v57, %v8514_v57  ;;  %v974_v52 = vpop.f32.mrb[159].mxu0  ;;  %v13833_v58 = vld [vmem:[#allocation90_spill] sm:$0xff]  ;;  %v13839_v57 = vld [vmem:[#allocation91_spill] sm:$0xff] }
 0x2c1   :  { %v8976_v49 = vsub.f32 %v13828_v46, %v2164_v19  ;;  %v8978_v0 = vpop.xlane.xlu0 %2732  ;;  %1745 = vadd.xlane.f32.xlu1 %v1744_v24  ;;  %v1449_v19 = vpop.f32.mrb[157].mxu1  ;;  %v2530_v24 = vmul.f32 %v8517_v63, %v8517_v63 }
 0x2c2   :  { %13827 = vst [vmem:[#allocation87_spill] sm:$0xff] %v8973_v10  ;;  %13830 = vst [vmem:[#allocation186_spill] sm:$0xff] %v8978_v0  ;;  %v1980_v55 = vpop.xlane.xlu1 %1979  ;;  %v8996_v30 = vpop.f32.mrb[158].mxu1 }
 0x2c3   :  { %13829 = vst [vmem:[#allocation89_spill] sm:$0xff] %v8976_v49  ;;  %v2260_v61 = vmul.f32 0.020408163, %v1980_v55  ;;  %13836 = vst [vmem:[#allocation190_spill] sm:$0xff] %v8996_v30  ;;  %v1454_v51 = vpop.f32.mrb[159].mxu1  ;;  %v3073_v49 = vsel %vm1536_vm0, %v2625_v39, 0.0 }
 0x2c4   :  { %2786 = vadd.xlane.f32.xlu0 %v2785_v60  ;;  %v2788_v52 = vsel %vm1536_vm0, %v2530_v24, 0.0  ;;  %v2626_v60 = vmul.f32 %v8530_v12, %v8530_v12  ;;  %v2035_v51 = vsel %vm1536_vm0, %v8573_v50, 0.0 }
 0x2c5   :  { %v8992_v46 = vsub.f32 %v13833_v58, %v2260_v61  ;;  %v8994_v0 = vpop.xlane.xlu0 %3020  ;;  %2033 = vadd.xlane.f32.xlu1 %v2032_v47  ;;  %v1747_v61 = vsel %vm1536_vm0, %v8554_v43, 0.0 }
 0x2c6   :  { %13835 = vst [vmem:[#allocation189_spill] sm:$0xff] %v8994_v0  ;;  %v8998_v55 = vpop.xlane.xlu1 %2735  ;;  %v3076_v39 = vsel %vm1536_vm0, %v2626_v60, 0.0  ;;  %v13841_v0 = vld [vmem:[#allocation148_spill] sm:$0xff]  ;;  %v13843_v60 = vld [vmem:[#allocation94_spill] sm:$0xff] }
 0x2c7   :  { %13834 = vst [vmem:[#allocation90_spill] sm:$0xff] %v8992_v46  ;;  %13837 = vst [vmem:[#allocation191_spill] sm:$0xff] %v8998_v55  ;;  %v13842_v55 = vld [vmem:[#allocation39_spill] sm:$0xff] }
 0x2c8   :  { %3074 = vadd.xlane.f32.xlu0 %v3073_v49  ;;  %v9012_v49 = vpop.f32.mrb[160].mxu0 }
 0x2c9   :  { %v1695_v19 = vpop.xlane.xlu0 %1694  ;;  %2789 = vadd.xlane.f32.xlu1 %v2788_v52  ;;  %v979_v52 = vpop.f32.mrb[161].mxu0 }
 0x2ca   :  { %v2165_v58 = vmul.f32 0.020408163, %v1695_v19  ;;  %v9006_v47 = vpop.xlane.xlu1 %3023  ;;  %v1750_v19 = vsel %vm1536_vm0, %v13841_v0, 0.0  ;;  %v2038_v52 = vsel %vm1536_vm0, %v8594_v42, 0.0  ;;  %v13846_v0 = vld [vmem:[#allocation40_spill] sm:$0xff]  ;;  %v2044_v42 = vsel %vm1536_vm0, %v8658_v6, 0.0 }
 0x2cb   :  { %13838 = vst [vmem:[#allocation192_spill] sm:$0xff] %v9006_v47  ;;  %v2050_v6 = vsel %vm1536_vm0, %v8722_v20, 0.0  ;;  %v13864_v20 = vld [vmem:[#allocation152_spill] sm:$0xff] }
 0x2cc   :  { %v9009_v63 = vsub.f32 %v13839_v57, %v2165_v58  ;;  %1748 = vadd.xlane.f32.xlu0 %v1747_v61  ;;  %v2531_v57 = vmul.f32 %v13842_v55, %v13842_v55  ;;  %v9022_v61 = vpop.f32.mrb[160].mxu1  ;;  %v13847_v55 = vld [vmem:[#allocation41_spill] sm:$0xff] }
 0x2cd   :  { %v9014_v24 = vpop.xlane.xlu0 %1982  ;;  %3077 = vadd.xlane.f32.xlu1 %v3076_v39  ;;  %v1459_v39 = vpop.f32.mrb[161].mxu1 }
 0x2ce   :  { %13840 = vst [vmem:[#allocation91_spill] sm:$0xff] %v9009_v63  ;;  %v1698_v12 = vpop.xlane.xlu1 %1697  ;;  %v2791_v35 = vsel %vm1536_vm0, %v2531_v57, 0.0 }
 0x2cf   :  { %v2166_v47 = vmul.f32 0.020408163, %v1698_v12  ;;  %v2627_v12 = vmul.f32 %v13846_v0, %v13846_v0 }
 0x2d0   :  { %2036 = vadd.xlane.f32.xlu0 %v2035_v51  ;;  %v2532_v51 = vmul.f32 %v13847_v55, %v13847_v55 }
 0x2d1   :  { %v9025_v58 = vsub.f32 %v13843_v60, %v2166_v47  ;;  %v9027_v46 = vpop.xlane.xlu0 %2738  ;;  %1751 = vadd.xlane.f32.xlu1 %v1750_v19  ;;  %v3079_v47 = vsel %vm1536_vm0, %v2627_v12, 0.0  ;;  %v13849_v60 = vld [vmem:[#allocation42_spill] sm:$0xff]  ;;  %v2041_v12 = vsel %vm1536_vm0, %v8637_v48, 0.0 }
 0x2d2   :  { %13845 = vst [vmem:[#allocation193_spill] sm:$0xff] %v9027_v46  ;;  %v2794_v19 = vsel %vm1536_vm0, %v2532_v51, 0.0  ;;  %v2628_v39 = vmul.f32 %v13849_v60, %v13849_v60  ;;  %v13852_v60 = vld [vmem:[#allocation43_spill] sm:$0xff] }
 0x2d3   :  { %13844 = vst [vmem:[#allocation94_spill] sm:$0xff] %v9025_v58 }
 0x2d4   :  { %2792 = vadd.xlane.f32.xlu0 %v2791_v35  ;;  %v1753_v35 = vsel %vm1536_vm0, %v8621_v9, 0.0  ;;  %v2056_v9 = vsel %vm1536_vm0, %v8786_v22, 0.0 }
 0x2d5   :  { %v9036_v32 = vpop.xlane.xlu0 %3026  ;;  %2039 = vadd.xlane.f32.xlu1 %v2038_v52  ;;  %v9046_v57 = vpop.f32.mrb[162].mxu0  ;;  %v3082_v52 = vsel %vm1536_vm0, %v2628_v39, 0.0 }
 0x2d6   :  { %13848 = vst [vmem:[#allocation194_spill] sm:$0xff] %v9036_v32  ;;  %13850 = vst [vmem:[#allocation195_spill] sm:$0xff] %v9046_v57  ;;  %v984_v0 = vpop.f32.mrb[163].mxu0  ;;  %v2533_v32 = vmul.f32 %v13852_v60, %v13852_v60  ;;  %v13855_v60 = vld [vmem:[#allocation47_spill] sm:$0xff] }
 0x2d8   :  { %3080 = vadd.xlane.f32.xlu0 %v3079_v47  ;;  %v1756_v47 = vsel %vm1536_vm0, %v8639_v53, 0.0  ;;  %v2797_v48 = vsel %vm1536_vm0, %v2533_v32, 0.0  ;;  %v2629_v53 = vmul.f32 %v8582_v59, %v8582_v59 }
 0x2d9   :  { %v9042_v46 = vpop.xlane.xlu0 %1700  ;;  %2795 = vadd.xlane.f32.xlu1 %v2794_v19  ;;  %v9053_v51 = vpop.f32.mrb[164].mxu0 }
 0x2da   :  { %v9057_v19 = vpop.f32.mrb[162].mxu1 }
 0x2db   :  { %13851 = vst [vmem:[#allocation196_spill] sm:$0xff] %v9057_v19  ;;  %v1464_v0 = vpop.f32.mrb[163].mxu1 }
 0x2dc   :  { %1754 = vadd.xlane.f32.xlu0 %v1753_v35  ;;  %v989_v35 = vpop.f32.mrb[165].mxu0  ;;  %v2534_v0 = vmul.f32 %v8585_v62, %v8585_v62 }
 0x2dd   :  { %v9049_v55 = vpop.xlane.xlu0 %1988  ;;  %3083 = vadd.xlane.f32.xlu1 %v3082_v52 }
 0x2de   :  { %v9063_v52 = vpop.f32.mrb[164].mxu1 }
 0x2df   :  { %v1469_v58 = vpop.f32.mrb[165].mxu1 }
 0x2e0   :  { %2042 = vadd.xlane.f32.xlu0 %v2041_v12  ;;  %v3085_v12 = vsel %vm1536_vm0, %v2629_v53, 0.0  ;;  %v2630_v58 = vmul.f32 %v13855_v60, %v13855_v60  ;;  %v2047_v53 = vsel %vm1536_vm0, %v8701_v2, 0.0  ;;  %v13858_v60 = vld [vmem:[#allocation49_spill] sm:$0xff] }
 0x2e1   :  { %v9061_v39 = vpop.xlane.xlu0 %2744  ;;  %1757 = vadd.xlane.f32.xlu1 %v1756_v47  ;;  %v2800_v47 = vsel %vm1536_vm0, %v2534_v0, 0.0 }
 0x2e2   :  { %13853 = vst [vmem:[#allocation197_spill] sm:$0xff] %v9061_v39 }
 0x2e4   :  { %2798 = vadd.xlane.f32.xlu0 %v2797_v48  ;;  %v1759_v48 = vsel %vm1536_vm0, %v8685_v26, 0.0 }
 0x2e5   :  { %v9072_v35 = vpop.xlane.xlu0 %3032  ;;  %2045 = vadd.xlane.f32.xlu1 %v2044_v42  ;;  %v9082_v32 = vpop.f32.mrb[166].mxu0  ;;  %v3088_v42 = vsel %vm1536_vm0, %v2630_v58, 0.0 }
 0x2e6   :  { %13854 = vst [vmem:[#allocation198_spill] sm:$0xff] %v9072_v35  ;;  %13856 = vst [vmem:[#allocation199_spill] sm:$0xff] %v9082_v32  ;;  %v994_v59 = vpop.f32.mrb[167].mxu0  ;;  %v2535_v35 = vmul.f32 %v13858_v60, %v13858_v60  ;;  %v13862_v60 = vld [vmem:[#allocation54_spill] sm:$0xff] }
 0x2e8   :  { %3086 = vadd.xlane.f32.xlu0 %v3085_v12  ;;  %v1762_v12 = vsel %vm1536_vm0, %v8703_v54, 0.0  ;;  %v2803_v26 = vsel %vm1536_vm0, %v2535_v35, 0.0  ;;  %v2631_v54 = vmul.f32 %v8646_v38, %v8646_v38 }
 0x2e9   :  { %v9078_v39 = vpop.xlane.xlu0 %1706  ;;  %2801 = vadd.xlane.f32.xlu1 %v2800_v47  ;;  %v9089_v0 = vpop.f32.mrb[168].mxu0 }
 0x2ea   :  { %v9093_v47 = vpop.f32.mrb[166].mxu1 }
 0x2eb   :  { %13857 = vst [vmem:[#allocation200_spill] sm:$0xff] %v9093_v47  ;;  %v1474_v59 = vpop.f32.mrb[167].mxu1 }
 0x2ec   :  { %1760 = vadd.xlane.f32.xlu0 %v1759_v48  ;;  %v999_v48 = vpop.f32.mrb[169].mxu0  ;;  %v2536_v59 = vmul.f32 %v8649_v15, %v8649_v15 }
 0x2ed   :  { %v9085_v62 = vpop.xlane.xlu0 %1994  ;;  %3089 = vadd.xlane.f32.xlu1 %v3088_v42 }
 0x2ee   :  { %v9099_v42 = vpop.f32.mrb[168].mxu1 }
 0x2ef   :  { %13860 = vst [vmem:[#allocation202_spill] sm:$0xff] %v9099_v42  ;;  %v1479_v2 = vpop.f32.mrb[169].mxu1 }
 0x2f0   :  { %2048 = vadd.xlane.f32.xlu0 %v2047_v53  ;;  %v3091_v53 = vsel %vm1536_vm0, %v2631_v54, 0.0  ;;  %v2632_v2 = vmul.f32 %v13862_v60, %v13862_v60  ;;  %v2053_v54 = vsel %vm1536_vm0, %v8765_v33, 0.0 }
 0x2f1   :  { %v9097_v58 = vpop.xlane.xlu0 %2750  ;;  %1763 = vadd.xlane.f32.xlu1 %v1762_v12  ;;  %v2806_v12 = vsel %vm1536_vm0, %v2536_v59, 0.0 }
 0x2f2   :  { %13859 = vst [vmem:[#allocation201_spill] sm:$0xff] %v9097_v58 }
 0x2f4   :  { %2804 = vadd.xlane.f32.xlu0 %v2803_v26  ;;  %v1765_v26 = vsel %vm1536_vm0, %v8749_v18, 0.0 }
 0x2f5   :  { %v9108_v48 = vpop.xlane.xlu0 %3038  ;;  %2051 = vadd.xlane.f32.xlu1 %v2050_v6  ;;  %v9118_v35 = vpop.f32.mrb[170].mxu0  ;;  %v3094_v6 = vsel %vm1536_vm0, %v2632_v2, 0.0 }
 0x2f6   :  { %13861 = vst [vmem:[#allocation203_spill] sm:$0xff] %v9108_v48  ;;  %v1004_v38 = vpop.f32.mrb[171].mxu0  ;;  %v9130_v48 = vpop.f32.mrb[170].mxu1 }
 0x2f7   :  { %v3266_v38 = vmul.f32 0.020408163, %v13864_v20 }
 0x2f8   :  { %3092 = vadd.xlane.f32.xlu0 %v3091_v53  ;;  %v13863_v53 = vld [vmem:[#allocation149_spill] sm:$0xff] }
 0x2f9   :  { %v9114_v58 = vpop.xlane.xlu0 %1712  ;;  %2807 = vadd.xlane.f32.xlu1 %v2806_v12  ;;  %v9125_v59 = vpop.f32.mrb[172].mxu0  ;;  %v3265_v60 = vmul.f32 0.020408163, %v13863_v53  ;;  %v1768_v12 = vsel %vm1536_vm0, %v8767_v29, 0.0  ;;  %v3458_v50 = vadd.f32 0.001, %v3266_v38 }
 0x2fa   :  { %v1009_v18 = vpop.f32.mrb[173].mxu0  ;;  %v3842_v38 = vld [vmem:[%s13158_s3 + $0x8] sm:$0xff] }
 0x2fb   :  { %v3457_v33 = vadd.f32 0.001, %v3265_v60  ;;  %v3841_v60 = vld [vmem:[%s13158_s3] sm:$0xff] }
 0x2fc   :  { %1766 = vadd.xlane.f32.xlu0 %v1765_v26  ;;  %v1484_v26 = vpop.f32.mrb[171].mxu1 }
 0x2fd   :  { %v9121_v15 = vpop.xlane.xlu0 %2000  ;;  %3095 = vadd.xlane.f32.xlu1 %v3094_v6  ;;  %6816 = vrsqrt.f32 %v3457_v33 }
 0x2fe   :  { %v9135_v6 = vpop.f32.mrb[172].mxu1  ;;  %6818 = vrsqrt.f32 %v3458_v50  ;;  %v9155_v50 = vpop.xlane.xlu1 %1985 }
 0x2ff   :  { %v1489_v53 = vpop.f32.mrb[173].mxu1  ;;  %13869 = vst [vmem:[#allocation206_spill] sm:$0xff] %v9155_v50 }
 0x300   :  { %2054 = vadd.xlane.f32.xlu0 %v2053_v54 }
 0x301   :  { %v9133_v2 = vpop.xlane.xlu0 %2756  ;;  %1769 = vadd.xlane.f32.xlu1 %v1768_v12 }
 0x302   :  { %13865 = vst [vmem:[#allocation149_spill] sm:$0xff] %v9133_v2  ;;  %v9167_v14 = vpop.xlane.xlu1 %2741 }
 0x303   :  { %13872 = vst [vmem:[#allocation209_spill] sm:$0xff] %v9167_v14  ;;  %v13876_v14 = vld [vmem:[#allocation59_spill] sm:$0xff] }
 0x304   :  { %v2634_v50 = vmul.f32 %v13876_v14, %v13876_v14  ;;  %v1774_v14 = vsel %vm1536_vm0, %v8980_v23, 0.0 }
 0x305   :  { %v9139_v43 = vpop.xlane.xlu0 %3044  ;;  %2057 = vadd.xlane.f32.xlu1 %v2056_v9 }
 0x306   :  { %13866 = vst [vmem:[#allocation152_spill] sm:$0xff] %v9139_v43 }
 0x307   :  { %v6817_v54 = vpop.eup %6816 }
 0x308   :  { %v6819_v26 = vpop.eup %6818  ;;  %v4033_v53 = vmul.f32 %v6817_v54, %v3841_v60  ;;  %v13873_v54 = vld [vmem:[#allocation55_spill] sm:$0xff] }
 0x309   :  { %v9141_v20 = vpop.xlane.xlu0 %1718  ;;  %v4034_v9 = vmul.f32 %v6819_v26, %v3842_v38  ;;  %v2537_v26 = vmul.f32 %v13873_v54, %v13873_v54 }
 0x30b   :  { %v2809_v38 = vsel %vm1536_vm0, %v2537_v26, 0.0  ;;  %v1771_v26 = vsel %vm1536_vm0, %v8964_v37, 0.0  ;;  %v13882_v37 = vld [vmem:[#allocation62_spill] sm:$0xff] }
 0x30d   :  { %v9143_v18 = vpop.xlane.xlu0 %2006 }
 0x311   :  { %v9145_v12 = vpop.xlane.xlu0 %2762 }
 0x312   :  { %13867 = vst [vmem:[#allocation204_spill] sm:$0xff] %v9145_v12 }
 0x315   :  { %v9153_v33 = vpop.xlane.xlu0 %3050 }
 0x316   :  { %13868 = vst [vmem:[#allocation205_spill] sm:$0xff] %v9153_v33  ;;  %4227 = vperm.xlu0 %6812, %v4033_v53   ;;  %4232 = vperm.xlu1 %6813, %v4034_v9   ;;  %v2633_v53 = vmul.f32 %v8710_v21, %v8710_v21  ;;  %v2538_v9 = vmul.f32 %v8713_v31, %v8713_v31  ;;  %v9178_v33 = vpop.xlane.xlu1 %3029 }
 0x317   :  { %13874 = vst [vmem:[#allocation210_spill] sm:$0xff] %v9178_v33 }
 0x318   :  { %v2812_v54 = vsel %vm1536_vm0, %v2538_v9, 0.0  ;;  %v2059_v9 = vsel %vm1536_vm0, %v8984_v16, 0.0 }
 0x319   :  { %v9157_v43 = vpop.xlane.xlu0 %1724 }
 0x31a   :  { %v9190_v31 = vpop.xlane.xlu1 %1703 }
 0x31b   :  { %13878 = vst [vmem:[#allocation213_spill] sm:$0xff] %v9190_v31 }
 0x31d   :  { %v9159_v2 = vpop.xlane.xlu0 %2012 }
 0x321   :  { %v9161_v12 = vpop.xlane.xlu0 %2768 }
 0x322   :  { %13870 = vst [vmem:[#allocation207_spill] sm:$0xff] %v9161_v12  ;;  %v3097_v12 = vsel %vm1536_vm0, %v2633_v53, 0.0  ;;  %v3100_v53 = vsel %vm1536_vm0, %v2634_v50, 0.0  ;;  %v9206_v50 = vpop.xlane.xlu1 %1991 }
 0x325   :  { %v9163_v22 = vpop.xlane.xlu0 %3056 }
 0x326   :  { %13871 = vst [vmem:[#allocation208_spill] sm:$0xff] %v9163_v22 }
 0x329   :  { %v9165_v29 = vpop.xlane.xlu0 %1730 }
 0x32d   :  { %v9171_v60 = vpop.xlane.xlu0 %2018 }
 0x331   :  { %v9180_v22 = vpop.xlane.xlu0 %2774 }
 0x332   :  { %13875 = vst [vmem:[#allocation211_spill] sm:$0xff] %v9180_v22 }
 0x335   :  { %2810 = vadd.xlane.f32.xlu0 %v2809_v38  ;;  %v9188_v38 = vpop.f32.mrb[174].mxu0  ;;  %v9192_v33 = vpop.xlane.xlu0 %3062 }
 0x336   :  { %13877 = vst [vmem:[#allocation212_spill] sm:$0xff] %v9188_v38  ;;  %v1014_v21 = vpop.f32.mrb[175].mxu0  ;;  %13879 = vst [vmem:[#allocation214_spill] sm:$0xff] %v9192_v33  ;;  %v13881_v38 = vld [vmem:[#allocation156_spill] sm:$0xff] }
 0x337   :  { %v3267_v31 = vmul.f32 0.020408163, %v13881_v38  ;;  %13883 = vst [vmem:[#allocation156_spill] sm:$0xff] %v9206_v50 }
 0x339   :  { %3098 = vadd.xlane.f32.xlu0 %v3097_v12  ;;  %v9210_v33 = vpop.xlane.xlu0 %1736  ;;  %v3459_v23 = vadd.f32 0.001, %v3267_v31  ;;  %v1777_v31 = vsel %vm1536_vm0, %v9012_v49, 0.0 }
 0x33a   :  { %2813 = vadd.xlane.f32.xlu1 %v2812_v54  ;;  %v9195_v12 = vpop.f32.mrb[176].mxu0  ;;  %v9199_v54 = vpop.f32.mrb[174].mxu1 }
 0x33b   :  { %13880 = vst [vmem:[#allocation215_spill] sm:$0xff] %v9199_v54  ;;  %v1494_v22 = vpop.f32.mrb[175].mxu1  ;;  %v1019_v21 = vpop.f32.mrb[177].mxu0  ;;  %v2062_v54 = vsel %vm1536_vm0, %v8996_v30, 0.0  ;;  %6820 = vrsqrt.f32 %v3459_v23  ;;  %v2065_v23 = vsel %vm1536_vm0, %v9022_v61, 0.0 }
 0x33c   :  { %v13884_v22 = vld [vmem:[#allocation159_spill] sm:$0xff] }
 0x33d   :  { %1772 = vadd.xlane.f32.xlu0 %v1771_v26  ;;  %v2539_v26 = vmul.f32 %v13882_v37, %v13882_v37  ;;  %v3268_v21 = vmul.f32 0.020408163, %v13884_v22  ;;  %v2635_v37 = vmul.f32 %v8774_v44, %v8774_v44  ;;  %v9221_v25 = vpop.xlane.xlu0 %2024 }
 0x33e   :  { %3101 = vadd.xlane.f32.xlu1 %v3100_v53 }
 0x33f   :  { %v2815_v38 = vsel %vm1536_vm0, %v2539_v26, 0.0  ;;  %v3103_v50 = vsel %vm1536_vm0, %v2635_v37, 0.0 }
 0x340   :  { %v9208_v53 = vpop.f32.mrb[176].mxu1 }
 0x341   :  { %2060 = vadd.xlane.f32.xlu0 %v2059_v9  ;;  %v1499_v16 = vpop.f32.mrb[177].mxu1  ;;  %v9218_v9 = vpop.xlane.xlu1 %2747 }
 0x342   :  { %1775 = vadd.xlane.f32.xlu1 %v1774_v14  ;;  %v3460_v14 = vadd.f32 0.001, %v3268_v21  ;;  %13885 = vst [vmem:[#allocation159_spill] sm:$0xff] %v9218_v9  ;;  %v9233_v37 = vpop.xlane.xlu0 %2780 }
 0x343   :  { %13888 = vst [vmem:[#allocation218_spill] sm:$0xff] %v9233_v37  ;;  %v2637_v37 = vmul.f32 %v8832_v17, %v8832_v17 }
 0x344   :  { %6822 = vrsqrt.f32 %v3460_v14 }
 0x345   :  { %2816 = vadd.xlane.f32.xlu0 %v2815_v38  ;;  %v6821_v14 = vpop.eup %6820 }
 0x346   :  { %2063 = vadd.xlane.f32.xlu1 %v2062_v54  ;;  %v9225_v16 = vpop.f32.mrb[178].mxu0  ;;  %v9229_v54 = vpop.xlane.xlu1 %3035 }
 0x347   :  { %13886 = vst [vmem:[#allocation216_spill] sm:$0xff] %v9225_v16  ;;  %v1024_v26 = vpop.f32.mrb[179].mxu0  ;;  %13887 = vst [vmem:[#allocation217_spill] sm:$0xff] %v9229_v54  ;;  %v9249_v9 = vpop.xlane.xlu0 %3068 }
 0x348   :  { %13891 = vst [vmem:[#allocation221_spill] sm:$0xff] %v9249_v9  ;;  %v2543_v9 = vmul.f32 %v8871_v45, %v8871_v45  ;;  %v1789_v45 = vsel %vm1536_vm0, %v9089_v0, 0.0 }
 0x349   :  { %3104 = vadd.xlane.f32.xlu0 %v3103_v50  ;;  %v2541_v50 = vmul.f32 %v8815_v1, %v8815_v1  ;;  %v3844_v1 = vld [vmem:[%s13158_s3 + $0x18] sm:$0xff] }
 0x34a   :  { %v9227_v22 = vpop.f32.mrb[180].mxu0  ;;  %v9235_v38 = vpop.f32.mrb[178].mxu1 }
 0x34b   :  { %v1029_v21 = vpop.f32.mrb[181].mxu0  ;;  %13889 = vst [vmem:[#allocation219_spill] sm:$0xff] %v9235_v38  ;;  %v1504_v44 = vpop.f32.mrb[179].mxu1  ;;  %v3109_v38 = vsel %vm1536_vm0, %v2637_v37, 0.0 }
 0x34c   :  { %v9244_v30 = vpop.xlane.xlu1 %1709  ;;  %v2821_v21 = vsel %vm1536_vm0, %v2541_v50, 0.0  ;;  %v1783_v50 = vsel %vm1536_vm0, %v9053_v51, 0.0  ;;  %v9259_v17 = vpop.xlane.xlu0 %1742 }
 0x34d   :  { %1778 = vadd.xlane.f32.xlu0 %v1777_v31  ;;  %v3843_v31 = vld [vmem:[%s13158_s3 + $0x10] sm:$0xff]  ;;  %13890 = vst [vmem:[#allocation220_spill] sm:$0xff] %v9244_v30 }
 0x34e   :  { %v4035_v44 = vmul.f32 %v6821_v14, %v3843_v31 }
 0x350   :  { %v9242_v26 = vpop.f32.mrb[180].mxu1  ;;  %v9255_v30 = vpop.xlane.xlu1 %1997 }
 0x351   :  { %2066 = vadd.xlane.f32.xlu0 %v2065_v23  ;;  %v1509_v54 = vpop.f32.mrb[181].mxu1  ;;  %v6823_v23 = vpop.eup %6822  ;;  %13892 = vst [vmem:[#allocation222_spill] sm:$0xff] %v9255_v30 }
 0x352   :  { %v4036_v54 = vmul.f32 %v6823_v23, %v3844_v1  ;;  %v9273_v30 = vpop.xlane.xlu0 %2030 }
 0x354   :  { %v9269_v23 = vpop.xlane.xlu1 %2753 }
 0x355   :  { %2822 = vadd.xlane.f32.xlu0 %v2821_v21  ;;  %13895 = vst [vmem:[#allocation225_spill] sm:$0xff] %v9269_v23 }
 0x356   :  { %v9261_v21 = vpop.f32.mrb[182].mxu0 }
 0x357   :  { %4237 = vperm.xlu1 %6813, %v4035_v44   ;;  %13893 = vst [vmem:[#allocation223_spill] sm:$0xff] %v9261_v21  ;;  %v1034_v14 = vpop.f32.mrb[183].mxu0  ;;  %v2071_v44 = vsel %vm1536_vm0, %v9063_v52, 0.0  ;;  %v2639_v21 = vmul.f32 %v8888_v40, %v8888_v40  ;;  %v2077_v40 = vsel %vm1536_vm0, %v9099_v42, 0.0 }
 0x358   :  { %v2827_v14 = vsel %vm1536_vm0, %v2543_v9, 0.0  ;;  %v318_v9 = vld [vmem:[#allocation2 + $0x5f8] sm:$0xff] }
 0x359   :  { %3110 = vadd.xlane.f32.xlu0 %v3109_v38  ;;  %1050 = vmatprep.mubr.f32.mxu0 %v318_v9 }
 0x35a   :  { %v9263_v31 = vpop.f32.mrb[184].mxu0  ;;  %v9267_v37 = vpop.f32.mrb[182].mxu1 }
 0x35b   :  { %4242 = vperm.xlu1 %6813, %v4036_v54   ;;  %13894 = vst [vmem:[#allocation224_spill] sm:$0xff] %v9267_v37  ;;  %v1514_v1 = vpop.f32.mrb[183].mxu1  ;;  %v1039_v38 = vpop.f32.mrb[185].mxu0 }
 0x35c   :  { %v9280_v37 = vpop.xlane.xlu1 %3041  ;;  %v9282_v1 = vpop.xlane.xlu0 %2786  ;;  %v3115_v38 = vsel %vm1536_vm0, %v2639_v21, 0.0 }
 0x35d   :  { %1784 = vadd.xlane.f32.xlu0 %v1783_v50  ;;  %13896 = vst [vmem:[#allocation226_spill] sm:$0xff] %v9280_v37  ;;  %13897 = vst [vmem:[#allocation227_spill] sm:$0xff] %v9282_v1  ;;  %v2545_v1 = vmul.f32 %v8921_v34, %v8921_v34 }
 0x35e   :  { %v9275_v54 = vpop.f32.mrb[184].mxu1 }
 0x35f   :  { %v1519_v50 = vpop.f32.mrb[185].mxu1 }
 0x360   :  { %v9289_v23 = vpop.xlane.xlu1 %1715  ;;  %v9291_v16 = vpop.xlane.xlu0 %3074 }
 0x361   :  { %2072 = vadd.xlane.f32.xlu0 %v2071_v44  ;;  %13899 = vst [vmem:[#allocation229_spill] sm:$0xff] %v9289_v23  ;;  %13900 = vst [vmem:[#allocation230_spill] sm:$0xff] %v9291_v16  ;;  %v509_v16 = vld [vmem:[#allocation2 + $0xbf0] sm:$0xff] }
 0x365   :  { %2828 = vadd.xlane.f32.xlu0 %v2827_v14  ;;  %v317_v14 = vld [vmem:[#allocation2 + $0x5f0] sm:$0xff] }
 0x366   :  { %1051 = vmatmul.mubr.f32.gmra.mrb[190].mxu0 %v317_v14  ;;  %v2833_v14 = vsel %vm1536_vm0, %v2545_v1, 0.0  ;;  %v2083_v1 = vsel %vm1536_vm0, %v9135_v6, 0.0 }
 0x367   :  { %v9287_v44 = vpop.f32.mrb[186].mxu0 }
 0x368   :  { %13898 = vst [vmem:[#allocation228_spill] sm:$0xff] %v9287_v44  ;;  %v1044_v50 = vpop.f32.mrb[187].mxu0  ;;  %v9305_v44 = vpop.xlane.xlu0 %1748 }
 0x369   :  { %3116 = vadd.xlane.f32.xlu0 %v3115_v38  ;;  %v510_v50 = vld [vmem:[#allocation2 + $0xbf8] sm:$0xff] }
 0x36a   :  { %v9297_v21 = vpop.f32.mrb[186].mxu1  ;;  %1530 = vmatprep.mubr.f32.mxu1 %v510_v50  ;;  %v1795_v50 = vsel %vm1536_vm0, %v9125_v59, 0.0 }
 0x36b   :  { %v9295_v37 = vpop.f32.mrb[188].mxu0  ;;  %13901 = vst [vmem:[#allocation231_spill] sm:$0xff] %v9297_v21  ;;  %v1524_v23 = vpop.f32.mrb[187].mxu1  ;;  %1531 = vmatmul.mubr.f32.gmra.mrb[190].mxu1 %v509_v16  ;;  %v2540_v16 = vmul.f32 %v8777_v13, %v8777_v13  ;;  %v13906_v13 = vld [vmem:[#allocation164_spill] sm:$0xff] }
 0x36c   :  { %v1049_v38 = vpop.f32.mrb[189].mxu0  ;;  %v3269_v21 = vmul.f32 0.020408163, %v13906_v13 }
 0x36d   :  { %1790 = vadd.xlane.f32.xlu0 %v1789_v45  ;;  %v9301_v45 = vpop.xlane.xlu1 %2003  ;;  %v2641_v38 = vmul.f32 %v8931_v36, %v8931_v36 }
 0x36e   :  { %13902 = vst [vmem:[#allocation232_spill] sm:$0xff] %v9301_v45  ;;  %v9303_v9 = vpop.f32.mrb[188].mxu1 }
 0x36f   :  { %v1529_v42 = vpop.f32.mrb[189].mxu1  ;;  %v3121_v23 = vsel %vm1536_vm0, %v2641_v38, 0.0 }
 0x370   :  { %v2818_v42 = vsel %vm1536_vm0, %v2540_v16, 0.0  ;;  %v1780_v16 = vsel %vm1536_vm0, %v9046_v57, 0.0 }
 0x371   :  { %2078 = vadd.xlane.f32.xlu0 %v2077_v40  ;;  %v9311_v34 = vpop.xlane.xlu1 %2759  ;;  %v9313_v40 = vpop.xlane.xlu0 %2036 }
 0x372   :  { %13903 = vst [vmem:[#allocation233_spill] sm:$0xff] %v9311_v34 }
 0x375   :  { %2834 = vadd.xlane.f32.xlu0 %v2833_v14  ;;  %v2636_v14 = vmul.f32 %v8794_v28, %v8794_v28  ;;  %v9324_v38 = vpop.xlane.xlu1 %3047  ;;  %v9326_v36 = vpop.xlane.xlu0 %2792 }
 0x376   :  { %13904 = vst [vmem:[#allocation234_spill] sm:$0xff] %v9324_v38  ;;  %13905 = vst [vmem:[#allocation235_spill] sm:$0xff] %v9326_v36 }
 0x377   :  { %v3106_v45 = vsel %vm1536_vm0, %v2636_v14, 0.0 }
 0x379   :  { %3122 = vadd.xlane.f32.xlu0 %v3121_v23  ;;  %v3274_v23 = vmul.f32 0.020408163, %v8854_v5  ;;  %v9333_v34 = vpop.xlane.xlu1 %1721  ;;  %v9335_v28 = vpop.xlane.xlu0 %3080  ;;  %v3461_v5 = vadd.f32 0.001, %v3269_v21 }
 0x37a   :  { %13907 = vst [vmem:[#allocation164_spill] sm:$0xff] %v9333_v34  ;;  %13908 = vst [vmem:[#allocation236_spill] sm:$0xff] %v9335_v28 }
 0x37d   :  { %1796 = vadd.xlane.f32.xlu0 %v1795_v50  ;;  %v3466_v50 = vadd.f32 0.001, %v3274_v23  ;;  %v9340_v14 = vpop.xlane.xlu1 %2009 }
 0x37f   :  { %2819 = vadd.xlane.f32.xlu1 %v2818_v42  ;;  %6824 = vrsqrt.f32 %v3466_v50  ;;  %v2068_v42 = vsel %vm1536_vm0, %v9057_v19, 0.0  ;;  %v3850_v50 = vld [vmem:[%s13158_s3 + $0x48] sm:$0xff] }
 0x380   :  { %6826 = vrsqrt.f32 %v3461_v5 }
 0x381   :  { %2084 = vadd.xlane.f32.xlu0 %v2083_v1  ;;  %v13909_v1 = vld [vmem:[#allocation167_spill] sm:$0xff]  ;;  %v9344_v13 = vpop.xlane.xlu1 %2765 }
 0x382   :  { %v3270_v38 = vmul.f32 0.020408163, %v13909_v1  ;;  %13910 = vst [vmem:[#allocation167_spill] sm:$0xff] %v9340_v14 }
 0x383   :  { %3107 = vadd.xlane.f32.xlu1 %v3106_v45  ;;  %v9342_v45 = vpop.xlane.xlu0 %1754 }
 0x384   :  { %v3462_v23 = vadd.f32 0.001, %v3270_v38  ;;  %v3845_v38 = vld [vmem:[%s13158_s3 + $0x20] sm:$0xff] }
 0x385   :  { %v9351_v1 = vpop.xlane.xlu1 %3053 }
 0x386   :  { %6828 = vrsqrt.f32 %v3462_v23  ;;  %13911 = vst [vmem:[#allocation237_spill] sm:$0xff] %v9351_v1  ;;  %v3846_v23 = vld [vmem:[%s13158_s3 + $0x28] sm:$0xff] }
 0x387   :  { %1781 = vadd.xlane.f32.xlu1 %v1780_v16  ;;  %v9346_v36 = vpop.xlane.xlu0 %2042 }
 0x389   :  { %v6825_v16 = vpop.eup %6824  ;;  %v9361_v57 = vpop.xlane.xlu1 %1727 }
 0x38a   :  { %v4042_v21 = vmul.f32 %v6825_v16, %v3850_v50  ;;  %v6827_v28 = vpop.eup %6826  ;;  %13913 = vst [vmem:[#allocation239_spill] sm:$0xff] %v9361_v57 }
 0x38b   :  { %2069 = vadd.xlane.f32.xlu1 %v2068_v42  ;;  %v9353_v19 = vpop.xlane.xlu0 %2798  ;;  %v4037_v42 = vmul.f32 %v6827_v28, %v3845_v38 }
 0x38c   :  { %13912 = vst [vmem:[#allocation238_spill] sm:$0xff] %v9353_v19 }
 0x38d   :  { %v9365_v1 = vpop.xlane.xlu1 %2015 }
 0x38e   :  { %13915 = vst [vmem:[#allocation241_spill] sm:$0xff] %v9365_v1 }
 0x38f   :  { %v9363_v16 = vpop.xlane.xlu0 %3086 }
 0x390   :  { %v6829_v5 = vpop.eup %6828  ;;  %13914 = vst [vmem:[#allocation240_spill] sm:$0xff] %v9363_v16 }
 0x391   :  { %v4038_v50 = vmul.f32 %v6829_v5, %v3846_v23  ;;  %v9369_v19 = vpop.xlane.xlu1 %2771  ;;  %v2643_v23 = vmul.f32 %v8973_v10, %v8973_v10  ;;  %v2542_v10 = vmul.f32 %v8835_v41, %v8835_v41 }
 0x395   :  { %v9373_v28 = vpop.xlane.xlu1 %3059 }
 0x396   :  { %13916 = vst [vmem:[#allocation242_spill] sm:$0xff] %v9373_v28 }
 0x397   :  { %4272 = vperm.xlu0 %6812, %v4042_v21   ;;  %v9367_v21 = vpop.xlane.xlu0 %1760 }
 0x399   :  { %v9379_v57 = vpop.xlane.xlu1 %1733 }
 0x39a   :  { %13918 = vst [vmem:[#allocation244_spill] sm:$0xff] %v9379_v57 }
 0x39b   :  { %v9371_v14 = vpop.xlane.xlu0 %2048 }
 0x39c   :  { %4247 = vperm.xlu1 %6813, %v4037_v42   ;;  %v2547_v42 = vmul.f32 %v8961_v3, %v8961_v3  ;;  %v1801_v3 = vsel %vm1536_vm0, %v9195_v12, 0.0 }
 0x39d   :  { %v9387_v1 = vpop.xlane.xlu1 %2021 }
 0x39e   :  { %v2839_v5 = vsel %vm1536_vm0, %v2547_v42, 0.0  ;;  %13920 = vst [vmem:[#allocation246_spill] sm:$0xff] %v9387_v1  ;;  %v2089_v42 = vsel %vm1536_vm0, %v9208_v53, 0.0  ;;  %v2549_v1 = vmul.f32 %v9009_v63, %v9009_v63 }
 0x39f   :  { %v9375_v38 = vpop.xlane.xlu0 %2804 }
 0x3a0   :  { %4252 = vperm.xlu1 %6813, %v4038_v50   ;;  %13917 = vst [vmem:[#allocation243_spill] sm:$0xff] %v9375_v38  ;;  %v3127_v50 = vsel %vm1536_vm0, %v2643_v23, 0.0  ;;  %v2261_v38 = vmul.f32 0.020408163, %v9014_v24  ;;  %v2824_v24 = vsel %vm1536_vm0, %v2542_v10, 0.0  ;;  %v2845_v41 = vsel %vm1536_vm0, %v2549_v1, 0.0 }
 0x3a1   :  { %v9401_v23 = vpop.xlane.xlu1 %2777  ;;  %v3271_v1 = vmul.f32 0.020408163, %v8779_v27 }
 0x3a3   :  { %v9381_v16 = vpop.xlane.xlu0 %3092 }
 0x3a4   :  { %13919 = vst [vmem:[#allocation245_spill] sm:$0xff] %v9381_v16 }
 0x3a7   :  { %v9389_v28 = vpop.xlane.xlu0 %1766 }
 0x3b6   :  { %2840 = vadd.xlane.f32.xlu0 %v2839_v5  ;;  %v13921_v5 = vld [vmem:[#allocation92_spill] sm:$0xff] }
 0x3b7   :  { %v9399_v16 = vsub.f32 %v13921_v5, %v2261_v38  ;;  %v9415_v5 = vpop.xlane.xlu1 %3065 }
 0x3b8   :  { %13924 = vst [vmem:[#allocation248_spill] sm:$0xff] %v9415_v5 }
 0x3b9   :  { %13922 = vst [vmem:[#allocation92_spill] sm:$0xff] %v9399_v16  ;;  %v2645_v38 = vmul.f32 %v9399_v16, %v9399_v16  ;;  %v13926_v16 = vld [vmem:[#allocation98_spill] sm:$0xff] }
 0x3ba   :  { %3128 = vadd.xlane.f32.xlu0 %v3127_v50  ;;  %v9403_v50 = vpop.xlane.xlu0 %2054 }
 0x3be   :  { %1802 = vadd.xlane.f32.xlu0 %v1801_v3  ;;  %v2638_v3 = vmul.f32 %v8850_v11, %v8850_v11  ;;  %v9410_v57 = vpop.permute.xlu0 %4227  ;;  %v3133_v11 = vsel %vm1536_vm0, %v2645_v38, 0.0  ;;  %v3463_v38 = vadd.f32 0.001, %v3271_v1 }
 0x3bf   :  { %13923 = vst [vmem:[#allocation247_spill] sm:$0xff] %v9410_v57  ;;  %v13928_v57 = vld [vmem:[#allocation173_spill] sm:$0xff] }
 0x3c0   :  { %v3112_v34 = vsel %vm1536_vm0, %v2638_v3, 0.0  ;;  %v2074_v3 = vsel %vm1536_vm0, %v9093_v47, 0.0  ;;  %v3272_v5 = vmul.f32 0.020408163, %v13928_v57  ;;  %6830 = vrsqrt.f32 %v3463_v38  ;;  %v13936_v47 = vld [vmem:[#allocation105_spill] sm:$0xff] }
 0x3c1   :  { %v1813_v38 = vsel %vm1536_vm0, %v9263_v31, 0.0 }
 0x3c2   :  { %2090 = vadd.xlane.f32.xlu0 %v2089_v42  ;;  %v2167_v42 = vmul.f32 0.020408163, %v9042_v46  ;;  %v9419_v10 = vpop.xlane.xlu0 %2810  ;;  %v9431_v46 = vpop.xlane.xlu1 %1739 }
 0x3c3   :  { %13925 = vst [vmem:[#allocation249_spill] sm:$0xff] %v9419_v10 }
 0x3c4   :  { %2825 = vadd.xlane.f32.xlu1 %v2824_v24  ;;  %v1786_v24 = vsel %vm1536_vm0, %v9082_v32, 0.0  ;;  %v9428_v63 = vsub.f32 %v13926_v16, %v2167_v42  ;;  %v3464_v42 = vadd.f32 0.001, %v3272_v5 }
 0x3c6   :  { %2846 = vadd.xlane.f32.xlu0 %v2845_v41  ;;  %v1807_v41 = vsel %vm1536_vm0, %v9227_v22, 0.0  ;;  %13927 = vst [vmem:[#allocation98_spill] sm:$0xff] %v9428_v63  ;;  %v9436_v27 = vpop.xlane.xlu0 %3098  ;;  %v9445_v10 = vpop.xlane.xlu1 %2027  ;;  %6832 = vrsqrt.f32 %v3464_v42 }
 0x3c7   :  { %13929 = vst [vmem:[#allocation173_spill] sm:$0xff] %v9436_v27  ;;  %13932 = vst [vmem:[#allocation250_spill] sm:$0xff] %v9445_v10  ;;  %v3848_v27 = vld [vmem:[%s13158_s3 + $0x38] sm:$0xff] }
 0x3c8   :  { %3113 = vadd.xlane.f32.xlu1 %v3112_v34  ;;  %v2263_v34 = vmul.f32 0.020408163, %v9049_v55  ;;  %v2551_v55 = vmul.f32 %v9428_v63, %v9428_v63 }
 0x3ca   :  { %3134 = vadd.xlane.f32.xlu0 %v3133_v11  ;;  %v2095_v11 = vsel %vm1536_vm0, %v9242_v26, 0.0  ;;  %v9447_v1 = vpop.xlane.xlu0 %1772  ;;  %v2851_v57 = vsel %vm1536_vm0, %v2551_v55, 0.0  ;;  %v3847_v55 = vld [vmem:[%s13158_s3 + $0x30] sm:$0xff] }
 0x3cc   :  { %1787 = vadd.xlane.f32.xlu1 %v1786_v24  ;;  %v13930_v24 = vld [vmem:[#allocation99_spill] sm:$0xff] }
 0x3cd   :  { %v9441_v16 = vsub.f32 %v13930_v24, %v2263_v34  ;;  %v2169_v34 = vmul.f32 0.020408163, %v9078_v39  ;;  %v2265_v39 = vmul.f32 0.020408163, %v9085_v62 }
 0x3ce   :  { %1808 = vadd.xlane.f32.xlu0 %v1807_v41  ;;  %v9456_v5 = vpop.xlane.xlu0 %2060 }
 0x3cf   :  { %13931 = vst [vmem:[#allocation99_spill] sm:$0xff] %v9441_v16  ;;  %v2647_v41 = vmul.f32 %v9441_v16, %v9441_v16  ;;  %v13933_v16 = vld [vmem:[#allocation104_spill] sm:$0xff]  ;;  %v9475_v32 = vsub.f32 %v13936_v47, %v2265_v39  ;;  %v2171_v47 = vmul.f32 0.020408163, %v9114_v58 }
 0x3d0   :  { %2075 = vadd.xlane.f32.xlu1 %v2074_v3  ;;  %v9453_v3 = vpop.xlane.xlu1 %2783  ;;  %v9464_v42 = vsub.f32 %v13933_v16, %v2169_v34  ;;  %v13941_v58 = vld [vmem:[#allocation112_spill] sm:$0xff] }
 0x3d1   :  { %v3139_v24 = vsel %vm1536_vm0, %v2647_v41, 0.0  ;;  %13937 = vst [vmem:[#allocation105_spill] sm:$0xff] %v9475_v32 }
 0x3d2   :  { %2096 = vadd.xlane.f32.xlu0 %v2095_v11  ;;  %v6831_v11 = vpop.eup %6830  ;;  %13934 = vst [vmem:[#allocation104_spill] sm:$0xff] %v9464_v42  ;;  %v9477_v10 = vpop.xlane.xlu0 %2816  ;;  %v2553_v62 = vmul.f32 %v9464_v42, %v9464_v42 }
 0x3d3   :  { %v4039_v41 = vmul.f32 %v6831_v11, %v3847_v55  ;;  %v6833_v63 = vpop.eup %6832  ;;  %v2649_v11 = vmul.f32 %v9475_v32, %v9475_v32 }
 0x3d4   :  { %v4040_v16 = vmul.f32 %v6833_v63, %v3848_v27  ;;  %v1819_v63 = vsel %vm1536_vm0, %v9295_v37, 0.0  ;;  %v13939_v27 = vld [vmem:[#allocation111_spill] sm:$0xff] }
 0x3d5   :  { %v3145_v39 = vsel %vm1536_vm0, %v2649_v11, 0.0  ;;  %v2173_v11 = vmul.f32 0.020408163, %v9141_v20 }
 0x3d6   :  { %2852 = vadd.xlane.f32.xlu0 %v2851_v57  ;;  %v9467_v57 = vpop.xlane.xlu1 %3071  ;;  %v9486_v55 = vpop.xlane.xlu0 %3104 }
 0x3d7   :  { %13935 = vst [vmem:[#allocation251_spill] sm:$0xff] %v9467_v57  ;;  %13938 = vst [vmem:[#allocation252_spill] sm:$0xff] %v9486_v55 }
 0x3da   :  { %3140 = vadd.xlane.f32.xlu0 %v3139_v24  ;;  %v2101_v24 = vsel %vm1536_vm0, %v9275_v54, 0.0  ;;  %v9481_v34 = vpop.xlane.xlu1 %1745 }
 0x3de   :  { %1814 = vadd.xlane.f32.xlu0 %v1813_v38  ;;  %v2857_v38 = vsel %vm1536_vm0, %v2553_v62, 0.0  ;;  %v2267_v62 = vmul.f32 0.020408163, %v9121_v15  ;;  %v13943_v15 = vld [vmem:[#allocation117_spill] sm:$0xff] }
 0x3e0   :  { %v9503_v32 = vsub.f32 %v13941_v58, %v2267_v62  ;;  %v13946_v58 = vld [vmem:[#allocation118_spill] sm:$0xff] }
 0x3e1   :  { %4257 = vperm.xlu1 %6813, %v4039_v41   ;;  %v9490_v41 = vpop.xlane.xlu1 %2033 }
 0x3e2   :  { %2102 = vadd.xlane.f32.xlu0 %v2101_v24  ;;  %v9495_v24 = vsub.f32 %v13939_v27, %v2171_v47  ;;  %13942 = vst [vmem:[#allocation112_spill] sm:$0xff] %v9503_v32  ;;  %v9513_v27 = vsub.f32 %v13943_v15, %v2173_v11  ;;  %v2651_v62 = vmul.f32 %v9503_v32, %v9503_v32 }
 0x3e4   :  { %13940 = vst [vmem:[#allocation111_spill] sm:$0xff] %v9495_v24  ;;  %v2555_v42 = vmul.f32 %v9495_v24, %v9495_v24  ;;  %13944 = vst [vmem:[#allocation117_spill] sm:$0xff] %v9513_v27  ;;  %v3151_v11 = vsel %vm1536_vm0, %v2651_v62, 0.0  ;;  %v13951_v62 = vld [vmem:[#allocation125_spill] sm:$0xff] }
 0x3e5   :  { %4262 = vperm.xlu1 %6813, %v4040_v16   ;;  %v9498_v16 = vpop.xlane.xlu0 %1778 }
 0x3e6   :  { %2858 = vadd.xlane.f32.xlu0 %v2857_v38  ;;  %v2107_v38 = vsel %vm1536_vm0, %v9303_v9, 0.0  ;;  %v2863_v55 = vsel %vm1536_vm0, %v2555_v42, 0.0  ;;  %v13948_v42 = vld [vmem:[#allocation124_spill] sm:$0xff] }
 0x3e9   :  { %v9510_v47 = vpop.xlane.xlu0 %2066 }
 0x3ea   :  { %3146 = vadd.xlane.f32.xlu0 %v3145_v39  ;;  %v9506_v39 = vpop.xlane.xlu1 %2789 }
 0x3ed   :  { %v9525_v24 = vpop.xlane.xlu0 %2822 }
 0x3ee   :  { %1820 = vadd.xlane.f32.xlu0 %v1819_v63  ;;  %v2269_v63 = vmul.f32 0.020408163, %v9143_v18  ;;  %v9519_v20 = vpop.xlane.xlu1 %3077  ;;  %v2557_v18 = vmul.f32 %v9513_v27, %v9513_v27  ;;  %v2273_v27 = vmul.f32 0.020408163, %v9171_v60 }
 0x3ef   :  { %13945 = vst [vmem:[#allocation253_spill] sm:$0xff] %v9519_v20 }
 0x3f0   :  { %v9522_v57 = vsub.f32 %v13946_v58, %v2269_v63  ;;  %v2869_v63 = vsel %vm1536_vm0, %v2557_v18, 0.0  ;;  %v2544_v18 = vmul.f32 %v8891_v4, %v8891_v4 }
 0x3f1   :  { %v9539_v58 = vpop.xlane.xlu0 %3110 }
 0x3f2   :  { %2108 = vadd.xlane.f32.xlu0 %v2107_v38  ;;  %13947 = vst [vmem:[#allocation118_spill] sm:$0xff] %v9522_v57  ;;  %v2175_v38 = vmul.f32 0.020408163, %v9157_v43  ;;  %v9534_v32 = vpop.xlane.xlu1 %1751  ;;  %v2653_v43 = vmul.f32 %v9522_v57, %v9522_v57  ;;  %13950 = vst [vmem:[#allocation254_spill] sm:$0xff] %v9539_v58  ;;  %v13953_v57 = vld [vmem:[#allocation130_spill] sm:$0xff]  ;;  %v13991_v58 = vld [vmem:[#allocation83_spill] sm:$0xff] }
 0x3f4   :  { %v9531_v15 = vsub.f32 %v13948_v42, %v2175_v38  ;;  %v3157_v38 = vsel %vm1536_vm0, %v2653_v43, 0.0 }
 0x3f6   :  { %2864 = vadd.xlane.f32.xlu0 %v2863_v55  ;;  %13949 = vst [vmem:[#allocation124_spill] sm:$0xff] %v9531_v15  ;;  %v2271_v55 = vmul.f32 0.020408163, %v9159_v2  ;;  %v2559_v2 = vmul.f32 %v9531_v15, %v9531_v15  ;;  %v9548_v42 = vpop.xlane.xlu1 %2039  ;;  %v13955_v15 = vld [vmem:[#allocation131_spill] sm:$0xff] }
 0x3f7   :  { %v9565_v4 = vsub.f32 %v13955_v15, %v2273_v27  ;;  %v2275_v27 = vmul.f32 0.020408163, %v9221_v25 }
 0x3f8   :  { %v9542_v20 = vsub.f32 %v13951_v62, %v2271_v55  ;;  %v9556_v55 = vpop.xlane.xlu0 %1784  ;;  %v2830_v62 = vsel %vm1536_vm0, %v2544_v18, 0.0 }
 0x3f9   :  { %13956 = vst [vmem:[#allocation131_spill] sm:$0xff] %v9565_v4  ;;  %v2657_v15 = vmul.f32 %v9565_v4, %v9565_v4 }
 0x3fa   :  { %3152 = vadd.xlane.f32.xlu0 %v3151_v11  ;;  %13952 = vst [vmem:[#allocation125_spill] sm:$0xff] %v9542_v20  ;;  %v2177_v11 = vmul.f32 0.020408163, %v9165_v29  ;;  %v2875_v29 = vsel %vm1536_vm0, %v2559_v2, 0.0  ;;  %v2655_v43 = vmul.f32 %v9542_v20, %v9542_v20 }
 0x3fc   :  { %v3163_v60 = vsel %vm1536_vm0, %v2655_v43, 0.0  ;;  %v1792_v43 = vsel %vm1536_vm0, %v9118_v35, 0.0 }
 0x3fe   :  { %2870 = vadd.xlane.f32.xlu0 %v2869_v63  ;;  %v9553_v63 = vsub.f32 %v13953_v57, %v2177_v11  ;;  %v2179_v57 = vmul.f32 0.020408163, %v9210_v33  ;;  %v9568_v11 = vpop.xlane.xlu1 %2795 }
 0x400   :  { %13954 = vst [vmem:[#allocation130_spill] sm:$0xff] %v9553_v63  ;;  %v2561_v2 = vmul.f32 %v9553_v63, %v9553_v63  ;;  %v9577_v20 = vsub.f32 %v8450_v56, %v2179_v57  ;;  %v2181_v56 = vmul.f32 0.020408163, %v9259_v17  ;;  %v3169_v57 = vsel %vm1536_vm0, %v2657_v15, 0.0 }
 0x402   :  { %3158 = vadd.xlane.f32.xlu0 %v3157_v38  ;;  %v2640_v38 = vmul.f32 %v8906_v7, %v8906_v7  ;;  %13957 = vst [vmem:[#allocation255_spill] sm:$0xff] %v9577_v20  ;;  %v2881_v33 = vsel %vm1536_vm0, %v2561_v2, 0.0  ;;  %v9586_v7 = vpop.xlane.xlu1 %3083  ;;  %v2563_v2 = vmul.f32 %v9577_v20, %v9577_v20 }
 0x404   :  { %v3118_v18 = vsel %vm1536_vm0, %v2640_v38, 0.0  ;;  %v9589_v38 = vsub.f32 %v8452_v8, %v2275_v27  ;;  %v2277_v8 = vmul.f32 0.020408163, %v9273_v30  ;;  %v2887_v17 = vsel %vm1536_vm0, %v2563_v2, 0.0  ;;  %v13965_v2 = vld [vmem:[#allocation146_spill] sm:$0xff] }
 0x406   :  { %2876 = vadd.xlane.f32.xlu0 %v2875_v29  ;;  %v9573_v29 = vpop.xlane.xlu0 %2072  ;;  %v9603_v27 = vpop.xlane.xlu1 %1757  ;;  %v2659_v15 = vmul.f32 %v9589_v38, %v9589_v38 }
 0x409   :  { %2831 = vadd.xlane.f32.xlu1 %v2830_v62  ;;  %v13958_v62 = vld [vmem:[#allocation175_spill] sm:$0xff] }
 0x40a   :  { %3164 = vadd.xlane.f32.xlu0 %v3163_v60  ;;  %v3273_v60 = vmul.f32 0.020408163, %v13958_v62  ;;  %13959 = vst [vmem:[#allocation175_spill] sm:$0xff] %v9589_v38  ;;  %v9592_v25 = vpop.xlane.xlu0 %2828  ;;  %v13960_v62 = vld [vmem:[#allocation142_spill] sm:$0xff] }
 0x40b   :  { %v9600_v4 = vsub.f32 %v13960_v62, %v2181_v56  ;;  %v3175_v56 = vsel %vm1536_vm0, %v2659_v15, 0.0 }
 0x40d   :  { %3119 = vadd.xlane.f32.xlu1 %v3118_v18  ;;  %v2080_v18 = vsel %vm1536_vm0, %v9130_v48, 0.0  ;;  %13961 = vst [vmem:[#allocation142_spill] sm:$0xff] %v9600_v4  ;;  %v2565_v30 = vmul.f32 %v9600_v4, %v9600_v4 }
 0x40e   :  { %2882 = vadd.xlane.f32.xlu0 %v2881_v33  ;;  %v3465_v33 = vadd.f32 0.001, %v3273_v60  ;;  %v2183_v60 = vmul.f32 0.020408163, %v9305_v44 }
 0x410   :  { %6834 = vrsqrt.f32 %v3465_v33  ;;  %v9620_v62 = vsub.f32 %v13965_v2, %v2183_v60  ;;  %v2279_v33 = vmul.f32 0.020408163, %v9313_v40  ;;  %v3849_v40 = vld [vmem:[%s13158_s3 + $0x40] sm:$0xff] }
 0x411   :  { %1793 = vadd.xlane.f32.xlu1 %v1792_v43  ;;  %v9608_v43 = vpop.xlane.xlu0 %3116 }
 0x412   :  { %3170 = vadd.xlane.f32.xlu0 %v3169_v57  ;;  %13962 = vst [vmem:[#allocation256_spill] sm:$0xff] %v9608_v43  ;;  %v13963_v57 = vld [vmem:[#allocation143_spill] sm:$0xff]  ;;  %13966 = vst [vmem:[#allocation146_spill] sm:$0xff] %v9620_v62  ;;  %v13971_v43 = vld [vmem:[#allocation154_spill] sm:$0xff] }
 0x413   :  { %v9611_v20 = vsub.f32 %v13963_v57, %v2277_v8  ;;  %v2893_v8 = vsel %vm1536_vm0, %v2565_v30, 0.0  ;;  %v13967_v57 = vld [vmem:[#allocation147_spill] sm:$0xff]  ;;  %v2567_v30 = vmul.f32 %v9620_v62, %v9620_v62 }
 0x414   :  { %v9629_v38 = vsub.f32 %v13967_v57, %v2279_v33 }
 0x415   :  { %2081 = vadd.xlane.f32.xlu1 %v2080_v18  ;;  %13964 = vst [vmem:[#allocation143_spill] sm:$0xff] %v9611_v20  ;;  %v9617_v18 = vpop.xlane.xlu1 %2045  ;;  %v2661_v44 = vmul.f32 %v9611_v20, %v9611_v20  ;;  %v13969_v20 = vld [vmem:[#allocation153_spill] sm:$0xff]  ;;  %v2899_v57 = vsel %vm1536_vm0, %v2567_v30, 0.0  ;;  %v2283_v30 = vmul.f32 0.020408163, %v9371_v14 }
 0x416   :  { %2888 = vadd.xlane.f32.xlu0 %v2887_v17  ;;  %v9623_v17 = vpop.xlane.xlu0 %1790  ;;  %13968 = vst [vmem:[#allocation147_spill] sm:$0xff] %v9629_v38 }
 0x417   :  { %v3181_v60 = vsel %vm1536_vm0, %v2661_v44, 0.0  ;;  %v2663_v44 = vmul.f32 %v9629_v38, %v9629_v38  ;;  %v13978_v38 = vld [vmem:[#allocation168_spill] sm:$0xff] }
 0x419   :  { %v9632_v4 = vpop.xlane.xlu1 %2801 }
 0x41a   :  { %3176 = vadd.xlane.f32.xlu0 %v3175_v56  ;;  %v6835_v15 = vpop.eup %6834  ;;  %v2185_v56 = vmul.f32 0.020408163, %v9342_v45  ;;  %v9640_v2 = vpop.xlane.xlu0 %2078  ;;  %v2281_v45 = vmul.f32 0.020408163, %v9346_v36 }
 0x41c   :  { %v9643_v33 = vsub.f32 %v13969_v20, %v2185_v56  ;;  %v9652_v62 = vsub.f32 %v13971_v43, %v2281_v45  ;;  %v3187_v20 = vsel %vm1536_vm0, %v2663_v44, 0.0  ;;  %v13973_v56 = vld [vmem:[#allocation161_spill] sm:$0xff] }
 0x41d   :  { %v9649_v63 = vpop.xlane.xlu1 %3089 }
 0x41e   :  { %2894 = vadd.xlane.f32.xlu0 %v2893_v8  ;;  %v4041_v8 = vmul.f32 %v6835_v15, %v3849_v40  ;;  %13970 = vst [vmem:[#allocation153_spill] sm:$0xff] %v9643_v33  ;;  %13972 = vst [vmem:[#allocation154_spill] sm:$0xff] %v9652_v62  ;;  %v9655_v15 = vpop.xlane.xlu0 %2834  ;;  %v2569_v36 = vmul.f32 %v9643_v33, %v9643_v33 }
 0x420   :  { %v2905_v43 = vsel %vm1536_vm0, %v2569_v36, 0.0 }
 0x422   :  { %3182 = vadd.xlane.f32.xlu0 %v3181_v60  ;;  %v2187_v60 = vmul.f32 0.020408163, %v9367_v21  ;;  %v2665_v21 = vmul.f32 %v9652_v62, %v9652_v62  ;;  %v9669_v45 = vpop.xlane.xlu0 %3122 }
 0x423   :  { %13975 = vst [vmem:[#allocation257_spill] sm:$0xff] %v9669_v45 }
 0x424   :  { %v9661_v40 = vsub.f32 %v13973_v56, %v2187_v60  ;;  %v3193_v60 = vsel %vm1536_vm0, %v2665_v21, 0.0 }
 0x426   :  { %4267 = vperm.xlu1 %6813, %v4041_v8   ;;  %2900 = vadd.xlane.f32.xlu0 %v2899_v57  ;;  %13974 = vst [vmem:[#allocation161_spill] sm:$0xff] %v9661_v40  ;;  %v9664_v8 = vpop.xlane.xlu1 %1763  ;;  %v13976_v57 = vld [vmem:[#allocation162_spill] sm:$0xff]  ;;  %v2571_v14 = vmul.f32 %v9661_v40, %v9661_v40  ;;  %v9680_v36 = vpop.xlane.xlu0 %1796 }
 0x427   :  { %v9672_v44 = vsub.f32 %v13976_v57, %v2283_v30  ;;  %v13980_v57 = vld [vmem:[#allocation169_spill] sm:$0xff] }
 0x428   :  { %v2911_v30 = vsel %vm1536_vm0, %v2571_v14, 0.0 }
 0x429   :  { %13977 = vst [vmem:[#allocation162_spill] sm:$0xff] %v9672_v44 }
 0x42a   :  { %3188 = vadd.xlane.f32.xlu0 %v3187_v20  ;;  %v2189_v20 = vmul.f32 0.020408163, %v9389_v28  ;;  %v9678_v56 = vpop.xlane.xlu1 %2051  ;;  %v2667_v28 = vmul.f32 %v9672_v44, %v9672_v44  ;;  %v9695_v33 = vpop.xlane.xlu0 %2084 }
 0x42c   :  { %v9683_v62 = vsub.f32 %v13978_v38, %v2189_v20  ;;  %v3199_v38 = vsel %vm1536_vm0, %v2667_v28, 0.0  ;;  %v13982_v20 = vld [vmem:[#allocation185_spill] sm:$0xff]  ;;  %v13986_v28 = vld [vmem:[#allocation188_spill] sm:$0xff] }
 0x42e   :  { %2906 = vadd.xlane.f32.xlu0 %v2905_v43  ;;  %13979 = vst [vmem:[#allocation168_spill] sm:$0xff] %v9683_v62  ;;  %v2285_v43 = vmul.f32 0.020408163, %v9403_v50  ;;  %v9689_v21 = vpop.xlane.xlu1 %2807  ;;  %v2573_v50 = vmul.f32 %v9683_v62, %v9683_v62 }
 0x430   :  { %v9692_v40 = vsub.f32 %v13980_v57, %v2285_v43  ;;  %v2917_v44 = vsel %vm1536_vm0, %v2573_v50, 0.0  ;;  %v9709_v57 = vpop.permute.xlu0 %4272 }
 0x431   :  { %13985 = vst [vmem:[#allocation259_spill] sm:$0xff] %v9709_v57 }
 0x432   :  { %3194 = vadd.xlane.f32.xlu0 %v3193_v60  ;;  %13981 = vst [vmem:[#allocation169_spill] sm:$0xff] %v9692_v40  ;;  %v2191_v60 = vmul.f32 0.020408163, %v9447_v1  ;;  %v2669_v43 = vmul.f32 %v9692_v40, %v9692_v40  ;;  %v9707_v1 = vpop.xlane.xlu1 %3095 }
 0x433   :  { %13984 = vst [vmem:[#allocation258_spill] sm:$0xff] %v9707_v1  ;;  %v2642_v1 = vmul.f32 %v13991_v58, %v13991_v58  ;;  %v13995_v58 = vld [vmem:[#allocation177_spill] sm:$0xff] }
 0x434   :  { %v9701_v14 = vsub.f32 %v13982_v20, %v2191_v60  ;;  %v3205_v60 = vsel %vm1536_vm0, %v2669_v43, 0.0 }
 0x436   :  { %2912 = vadd.xlane.f32.xlu0 %v2911_v30  ;;  %13983 = vst [vmem:[#allocation185_spill] sm:$0xff] %v9701_v14  ;;  %v2287_v30 = vmul.f32 0.020408163, %v9456_v5  ;;  %v2575_v5 = vmul.f32 %v9701_v14, %v9701_v14  ;;  %v9724_v57 = vpop.xlane.xlu1 %1769 }
 0x438   :  { %v9712_v45 = vsub.f32 %v13986_v28, %v2287_v30  ;;  %v2923_v43 = vsel %vm1536_vm0, %v2575_v5, 0.0 }
 0x439   :  { %v9718_v20 = vpop.f32.mrb[190].mxu0 }
 0x43a   :  { %3200 = vadd.xlane.f32.xlu0 %v3199_v38  ;;  %13987 = vst [vmem:[#allocation188_spill] sm:$0xff] %v9712_v45  ;;  %v2193_v38 = vmul.f32 0.020408163, %v9498_v16  ;;  %v1054_v50 = vpop.f32.mrb[191].mxu0  ;;  %v2289_v16 = vmul.f32 0.020408163, %v9510_v47  ;;  %v2671_v28 = vmul.f32 %v9712_v45, %v9712_v45 }
 0x43b   :  { %v2195_v47 = vmul.f32 0.020408163, %v9556_v55 }
 0x43c   :  { %v9727_v30 = vsub.f32 %v9012_v49, %v2193_v38  ;;  %v9741_v49 = vsub.f32 %v9022_v61, %v2289_v16  ;;  %v3211_v38 = vsel %vm1536_vm0, %v2671_v28, 0.0  ;;  %v2291_v61 = vmul.f32 0.020408163, %v9573_v29 }
 0x43d   :  { %v9751_v45 = vsub.f32 %v9053_v51, %v2195_v47  ;;  %v2197_v29 = vmul.f32 0.020408163, %v9623_v17  ;;  %v2293_v17 = vmul.f32 0.020408163, %v9640_v2 }
 0x43e   :  { %2918 = vadd.xlane.f32.xlu0 %v2917_v44  ;;  %v13988_v44 = vld [vmem:[#allocation82_spill] sm:$0xff]  ;;  %13989 = vst [vmem:[#allocation260_spill] sm:$0xff] %v9727_v30  ;;  %v9733_v14 = vpop.f32.mrb[190].mxu1  ;;  %13992 = vst [vmem:[#allocation262_spill] sm:$0xff] %v9741_v49  ;;  %v2577_v5 = vmul.f32 %v9727_v30, %v9727_v30  ;;  %v2673_v55 = vmul.f32 %v9741_v49, %v9741_v49  ;;  %v3275_v30 = vmul.f32 0.020408163, %v13995_v58 }
 0x43f   :  { %v2546_v62 = vmul.f32 %v13988_v44, %v13988_v44  ;;  %13993 = vst [vmem:[#allocation263_spill] sm:$0xff] %v9751_v45  ;;  %v9763_v51 = vsub.f32 %v9063_v52, %v2291_v61  ;;  %v2579_v47 = vmul.f32 %v9751_v45, %v9751_v45  ;;  %v9776_v52 = vsub.f32 %v9089_v0, %v2197_v29 }
 0x440   :  { %v2929_v16 = vsel %vm1536_vm0, %v2577_v5, 0.0  ;;  %v3467_v58 = vadd.f32 0.001, %v3275_v30  ;;  %v2199_v30 = vmul.f32 0.020408163, %v9680_v36 }
 0x441   :  { %v2836_v44 = vsel %vm1536_vm0, %v2546_v62, 0.0  ;;  %v3124_v62 = vsel %vm1536_vm0, %v2642_v1, 0.0  ;;  %13997 = vst [vmem:[#allocation177_spill] sm:$0xff] %v9763_v51  ;;  %v3217_v1 = vsel %vm1536_vm0, %v2673_v55, 0.0  ;;  %v2935_v61 = vsel %vm1536_vm0, %v2579_v47, 0.0 }
 0x442   :  { %3206 = vadd.xlane.f32.xlu0 %v3205_v60  ;;  %v1534_v60 = vpop.f32.mrb[191].mxu1  ;;  %v2675_v55 = vmul.f32 %v9763_v51, %v9763_v51  ;;  %6836 = vrsqrt.f32 %v3467_v58  ;;  %v2581_v2 = vmul.f32 %v9776_v52, %v9776_v52 }
 0x443   :  { %v9720_v40 = vpop.xlane.xlu0 %2840 }
 0x444   :  { %v3223_v0 = vsel %vm1536_vm0, %v2675_v55, 0.0  ;;  %v2941_v58 = vsel %vm1536_vm0, %v2581_v2, 0.0 }
 0x446   :  { %2924 = vadd.xlane.f32.xlu0 %v2923_v43  ;;  %v9747_v43 = vpop.xlane.xlu1 %2057 }
 0x447   :  { %v9735_v50 = vpop.xlane.xlu0 %3128 }
 0x448   :  { %13990 = vst [vmem:[#allocation261_spill] sm:$0xff] %v9735_v50 }
 0x44a   :  { %2837 = vadd.xlane.f32.xlu1 %v2836_v44  ;;  %3212 = vadd.xlane.f32.xlu0 %v3211_v38  ;;  %v13994_v44 = vld [vmem:[#allocation212_spill] sm:$0xff]  ;;  %v9760_v50 = vpop.permute.xlu1 %4232 }
 0x44b   :  { %v1803_v60 = vpop.xlane.xlu0 %1802  ;;  %v1798_v38 = vsel %vm1536_vm0, %v13994_v44, 0.0  ;;  %13996 = vst [vmem:[#allocation212_spill] sm:$0xff] %v9760_v50  ;;  %v14032_v50 = vld [vmem:[#allocation94_spill] sm:$0xff] }
 0x44c   :  { %v2201_v36 = vmul.f32 0.020408163, %v1803_v60 }
 0x44e   :  { %3125 = vadd.xlane.f32.xlu1 %v3124_v62  ;;  %2930 = vadd.xlane.f32.xlu0 %v2929_v16  ;;  %v13998_v62 = vld [vmem:[#allocation215_spill] sm:$0xff]  ;;  %v9773_v49 = vpop.xlane.xlu1 %2813  ;;  %v9812_v2 = vsub.f32 %v9195_v12, %v2201_v36 }
 0x44f   :  { %v2091_v28 = vpop.xlane.xlu0 %2090  ;;  %v2086_v16 = vsel %vm1536_vm0, %v13998_v62, 0.0  ;;  %13999 = vst [vmem:[#allocation215_spill] sm:$0xff] %v9776_v52 }
 0x450   :  { %14006 = vst [vmem:[#allocation268_spill] sm:$0xff] %v9812_v2  ;;  %v2297_v60 = vmul.f32 0.020408163, %v2091_v28  ;;  %v2585_v12 = vmul.f32 %v9812_v2, %v9812_v2 }
 0x452   :  { %1799 = vadd.xlane.f32.xlu1 %v1798_v38  ;;  %3218 = vadd.xlane.f32.xlu0 %v3217_v1  ;;  %v14001_v1 = vld [vmem:[#allocation202_spill] sm:$0xff]  ;;  %v9791_v29 = vpop.xlane.xlu1 %3101 }
 0x453   :  { %v9769_v5 = vpop.xlane.xlu0 %2846  ;;  %v9785_v45 = vsub.f32 %v14001_v1, %v2293_v17  ;;  %14003 = vst [vmem:[#allocation265_spill] sm:$0xff] %v9791_v29 }
 0x455   :  { %14002 = vst [vmem:[#allocation202_spill] sm:$0xff] %v9785_v45  ;;  %v2677_v17 = vmul.f32 %v9785_v45, %v9785_v45 }
 0x456   :  { %2087 = vadd.xlane.f32.xlu1 %v2086_v16  ;;  %2936 = vadd.xlane.f32.xlu0 %v2935_v61  ;;  %v9794_v16 = vsub.f32 %v9125_v59, %v2199_v30  ;;  %v2295_v61 = vmul.f32 0.020408163, %v9695_v33  ;;  %v9800_v1 = vpop.xlane.xlu1 %1775  ;;  %v6837_v30 = vpop.eup %6836  ;;  %v3851_v33 = vld [vmem:[%s13158_s3 + $0x50] sm:$0xff] }
 0x457   :  { %v9782_v38 = vpop.xlane.xlu0 %3134  ;;  %v3229_v51 = vsel %vm1536_vm0, %v2677_v17, 0.0 }
 0x458   :  { %14000 = vst [vmem:[#allocation264_spill] sm:$0xff] %v9782_v38  ;;  %14004 = vst [vmem:[#allocation266_spill] sm:$0xff] %v9794_v16  ;;  %v2583_v59 = vmul.f32 %v9794_v16, %v9794_v16 }
 0x45a   :  { %3224 = vadd.xlane.f32.xlu0 %v3223_v0  ;;  %v9803_v0 = vsub.f32 %v9135_v6, %v2295_v61  ;;  %v2947_v6 = vsel %vm1536_vm0, %v2583_v59, 0.0  ;;  %v4043_v61 = vmul.f32 %v6837_v30, %v3851_v33  ;;  %v9819_v45 = vpop.xlane.xlu1 %2063  ;;  %v2953_v33 = vsel %vm1536_vm0, %v2585_v12, 0.0 }
 0x45b   :  { %v1809_v47 = vpop.xlane.xlu0 %1808 }
 0x45c   :  { %14005 = vst [vmem:[#allocation267_spill] sm:$0xff] %v9803_v0  ;;  %v2679_v17 = vmul.f32 %v9803_v0, %v9803_v0  ;;  %v2203_v16 = vmul.f32 0.020408163, %v1809_v47 }
 0x45e   :  { %2942 = vadd.xlane.f32.xlu0 %v2941_v58  ;;  %v3235_v28 = vsel %vm1536_vm0, %v2679_v17, 0.0  ;;  %v9830_v36 = vsub.f32 %v9227_v22, %v2203_v16  ;;  %v9835_v47 = vpop.permute.xlu1 %4237 }
 0x45f   :  { %v2097_v55 = vpop.xlane.xlu0 %2096  ;;  %14010 = vst [vmem:[#allocation272_spill] sm:$0xff] %v9835_v47 }
 0x460   :  { %14009 = vst [vmem:[#allocation271_spill] sm:$0xff] %v9830_v36  ;;  %v2299_v59 = vmul.f32 0.020408163, %v2097_v55  ;;  %v2587_v22 = vmul.f32 %v9830_v36, %v9830_v36 }
 0x462   :  { %3230 = vadd.xlane.f32.xlu0 %v3229_v51  ;;  %v9822_v51 = vsub.f32 %v9208_v53, %v2297_v60  ;;  %v9838_v60 = vsub.f32 %v9242_v26, %v2299_v59  ;;  %v9843_v16 = vpop.permute.xlu1 %4242 }
 0x463   :  { %v9814_v58 = vpop.xlane.xlu0 %2852  ;;  %14012 = vst [vmem:[#allocation274_spill] sm:$0xff] %v9843_v16 }
 0x464   :  { %14007 = vst [vmem:[#allocation269_spill] sm:$0xff] %v9822_v51  ;;  %v2681_v53 = vmul.f32 %v9822_v51, %v9822_v51  ;;  %14011 = vst [vmem:[#allocation273_spill] sm:$0xff] %v9838_v60  ;;  %v2683_v26 = vmul.f32 %v9838_v60, %v9838_v60 }
 0x466   :  { %2948 = vadd.xlane.f32.xlu0 %v2947_v6  ;;  %v3241_v17 = vsel %vm1536_vm0, %v2681_v53, 0.0  ;;  %v9853_v59 = vpop.xlane.xlu1 %2819 }
 0x467   :  { %4277 = vperm.xlu1 %6813, %v4043_v61   ;;  %v9824_v52 = vpop.xlane.xlu0 %3140 }
 0x468   :  { %14008 = vst [vmem:[#allocation270_spill] sm:$0xff] %v9824_v52 }
 0x46a   :  { %3236 = vadd.xlane.f32.xlu0 %v3235_v28  ;;  %v9866_v60 = vpop.xlane.xlu1 %3107 }
 0x46b   :  { %v1815_v30 = vpop.xlane.xlu0 %1814  ;;  %14016 = vst [vmem:[#allocation278_spill] sm:$0xff] %v9866_v60 }
 0x46c   :  { %v2205_v6 = vmul.f32 0.020408163, %v1815_v30 }
 0x46e   :  { %2954 = vadd.xlane.f32.xlu0 %v2953_v33  ;;  %v9846_v55 = vsub.f32 %v9263_v31, %v2205_v6  ;;  %v2959_v33 = vsel %vm1536_vm0, %v2587_v22, 0.0 }
 0x46f   :  { %v2103_v61 = vpop.xlane.xlu0 %2102 }
 0x470   :  { %14013 = vst [vmem:[#allocation275_spill] sm:$0xff] %v9846_v55  ;;  %v2301_v12 = vmul.f32 0.020408163, %v2103_v61  ;;  %v2589_v31 = vmul.f32 %v9846_v55, %v9846_v55  ;;  %v14022_v55 = vld [vmem:[#allocation183_spill] sm:$0xff] }
 0x472   :  { %3242 = vadd.xlane.f32.xlu0 %v3241_v17  ;;  %v9856_v30 = vsub.f32 %v9275_v54, %v2301_v12  ;;  %v3247_v17 = vsel %vm1536_vm0, %v2683_v26, 0.0  ;;  %v2965_v61 = vsel %vm1536_vm0, %v2589_v31, 0.0  ;;  %v9877_v31 = vpop.xlane.xlu1 %1781 }
 0x473   :  { %v9848_v28 = vpop.xlane.xlu0 %2858 }
 0x474   :  { %14014 = vst [vmem:[#allocation276_spill] sm:$0xff] %v9856_v30  ;;  %v2685_v22 = vmul.f32 %v9856_v30, %v9856_v30 }
 0x476   :  { %2960 = vadd.xlane.f32.xlu0 %v2959_v33  ;;  %v3253_v26 = vsel %vm1536_vm0, %v2685_v22, 0.0 }
 0x477   :  { %v9858_v53 = vpop.xlane.xlu0 %3146 }
 0x478   :  { %14015 = vst [vmem:[#allocation277_spill] sm:$0xff] %v9858_v53 }
 0x47a   :  { %3248 = vadd.xlane.f32.xlu0 %v3247_v17 }
 0x47b   :  { %v1821_v6 = vpop.xlane.xlu0 %1820 }
 0x47c   :  { %v2207_v33 = vmul.f32 0.020408163, %v1821_v6 }
 0x47e   :  { %v9869_v54 = vsub.f32 %v9295_v37, %v2207_v33  ;;  %2966 = vadd.xlane.f32.xlu0 %v2965_v61  ;;  %v14019_v61 = vld [vmem:[#allocation89_spill] sm:$0xff] }
 0x47f   :  { %v2109_v12 = vpop.xlane.xlu0 %2108  ;;  %v2548_v33 = vmul.f32 %v14019_v61, %v14019_v61 }
 0x480   :  { %14017 = vst [vmem:[#allocation279_spill] sm:$0xff] %v9869_v54  ;;  %v2303_v51 = vmul.f32 0.020408163, %v2109_v12  ;;  %v2591_v17 = vmul.f32 %v9869_v54, %v9869_v54  ;;  %v14020_v12 = vld [vmem:[#allocation179_spill] sm:$0xff]  ;;  %v9886_v54 = vpop.xlane.xlu1 %2069 }
 0x481   :  { %v3276_v30 = vmul.f32 0.020408163, %v14020_v12 }
 0x482   :  { %v9875_v0 = vsub.f32 %v9303_v9, %v2303_v51  ;;  %3254 = vadd.xlane.f32.xlu0 %v3253_v26  ;;  %v2971_v6 = vsel %vm1536_vm0, %v2591_v17, 0.0  ;;  %v2842_v9 = vsel %vm1536_vm0, %v2548_v33, 0.0  ;;  %v14021_v51 = vld [vmem:[#allocation90_spill] sm:$0xff] }
 0x483   :  { %v2644_v26 = vmul.f32 %v14021_v51, %v14021_v51  ;;  %v3468_v17 = vadd.f32 0.001, %v3276_v30  ;;  %v14026_v33 = vld [vmem:[#allocation206_spill] sm:$0xff]  ;;  %v14027_v51 = vld [vmem:[#allocation219_spill] sm:$0xff] }
 0x484   :  { %14018 = vst [vmem:[#allocation280_spill] sm:$0xff] %v9875_v0  ;;  %v2687_v37 = vmul.f32 %v9875_v0, %v9875_v0  ;;  %v3278_v0 = vmul.f32 0.020408163, %v14022_v55  ;;  %v9893_v36 = vpop.permute.xlu1 %4247  ;;  %v2262_v16 = vmul.f32 0.020408163, %v14026_v33  ;;  %v2092_v30 = vsel %vm1536_vm0, %v14027_v51, 0.0 }
 0x485   :  { %14023 = vst [vmem:[#allocation179_spill] sm:$0xff] %v9893_v36  ;;  %6838 = vrsqrt.f32 %v3468_v17 }
 0x486   :  { %2972 = vadd.xlane.f32.xlu0 %v2971_v6  ;;  %v3259_v22 = vsel %vm1536_vm0, %v2687_v37, 0.0  ;;  %v3130_v6 = vsel %vm1536_vm0, %v2644_v26, 0.0  ;;  %v14024_v37 = vld [vmem:[#allocation216_spill] sm:$0xff]  ;;  %v3470_v2 = vadd.f32 0.001, %v3278_v0  ;;  %v2550_v0 = vmul.f32 %v14032_v50, %v14032_v50 }
 0x487   :  { %v1804_v12 = vsel %vm1536_vm0, %v14024_v37, 0.0 }
 0x488   :  { %6840 = vrsqrt.f32 %v3470_v2  ;;  %v9902_v47 = vpop.permute.xlu1 %4252  ;;  %v2848_v2 = vsel %vm1536_vm0, %v2550_v0, 0.0 }
 0x489   :  { %14029 = vst [vmem:[#allocation183_spill] sm:$0xff] %v9902_v47 }
 0x48a   :  { %3260 = vadd.xlane.f32.xlu0 %v3259_v22  ;;  %v14025_v22 = vld [vmem:[#allocation191_spill] sm:$0xff] }
 0x48b   :  { %2843 = vadd.xlane.f32.xlu1 %v2842_v9  ;;  %v3280_v61 = vmul.f32 0.020408163, %v14025_v22  ;;  %v14028_v9 = vld [vmem:[#allocation209_spill] sm:$0xff]  ;;  %v14033_v22 = vld [vmem:[#allocation159_spill] sm:$0xff] }
 0x48c   :  { %v3282_v26 = vmul.f32 0.020408163, %v14028_v9  ;;  %v9910_v33 = vpop.xlane.xlu1 %2825 }
 0x48d   :  { %v3472_v55 = vadd.f32 0.001, %v3280_v61 }
 0x48e   :  { %v3474_v17 = vadd.f32 0.001, %v3282_v26  ;;  %v14035_v26 = vld [vmem:[#allocation213_spill] sm:$0xff] }
 0x48f   :  { %3131 = vadd.xlane.f32.xlu1 %v3130_v6  ;;  %v14030_v6 = vld [vmem:[#allocation95_spill] sm:$0xff]  ;;  %6842 = vrsqrt.f32 %v3472_v55  ;;  %v6839_v9 = vpop.eup %6838  ;;  %v2168_v50 = vmul.f32 0.020408163, %v14035_v26  ;;  %v14039_v26 = vld [vmem:[#allocation101_spill] sm:$0xff] }
 0x490   :  { %v9905_v36 = vsub.f32 %v14030_v6, %v2262_v16  ;;  %v3852_v16 = vld [vmem:[%s13158_s3 + $0x58] sm:$0xff]  ;;  %6844 = vrsqrt.f32 %v3474_v17  ;;  %v9921_v0 = vpop.xlane.xlu1 %3113 }
 0x491   :  { %v4044_v47 = vmul.f32 %v6839_v9, %v3852_v16  ;;  %14036 = vst [vmem:[#allocation191_spill] sm:$0xff] %v9921_v0  ;;  %v9930_v38 = vsub.f32 %v14039_v26, %v2168_v50  ;;  %v14043_v50 = vld [vmem:[#allocation102_spill] sm:$0xff] }
 0x492   :  { %14031 = vst [vmem:[#allocation216_spill] sm:$0xff] %v9905_v36  ;;  %v2646_v61 = vmul.f32 %v9905_v36, %v9905_v36  ;;  %v6841_v53 = vpop.eup %6840  ;;  %v14037_v36 = vld [vmem:[#allocation223_spill] sm:$0xff] }
 0x493   :  { %1805 = vadd.xlane.f32.xlu1 %v1804_v12  ;;  %v3284_v12 = vmul.f32 0.020408163, %v14033_v22  ;;  %v1810_v17 = vsel %vm1536_vm0, %v14037_v36, 0.0  ;;  %14040 = vst [vmem:[#allocation206_spill] sm:$0xff] %v9930_v38 }
 0x494   :  { %v3136_v22 = vsel %vm1536_vm0, %v2646_v61, 0.0  ;;  %v14041_v61 = vld [vmem:[#allocation156_spill] sm:$0xff] }
 0x495   :  { %v3476_v6 = vadd.f32 0.001, %v3284_v12  ;;  %v2264_v9 = vmul.f32 0.020408163, %v14041_v61  ;;  %v3858_v61 = vld [vmem:[%s13158_s3 + $0x88] sm:$0xff] }
 0x497   :  { %2093 = vadd.xlane.f32.xlu1 %v2092_v30  ;;  %v14034_v30 = vld [vmem:[#allocation225_spill] sm:$0xff]  ;;  %6846 = vrsqrt.f32 %v3476_v6  ;;  %v9942_v26 = vsub.f32 %v14043_v50, %v2264_v9 }
 0x498   :  { %v3286_v55 = vmul.f32 0.020408163, %v14034_v30  ;;  %v14038_v30 = vld [vmem:[#allocation233_spill] sm:$0xff] }
 0x499   :  { %v3288_v52 = vmul.f32 0.020408163, %v14038_v30  ;;  %v6843_v0 = vpop.eup %6842  ;;  %v9939_v30 = vpop.xlane.xlu1 %1787  ;;  %14044 = vst [vmem:[#allocation219_spill] sm:$0xff] %v9942_v26 }
 0x49a   :  { %v3478_v12 = vadd.f32 0.001, %v3286_v55  ;;  %v3290_v55 = vmul.f32 0.020408163, %v9344_v13  ;;  %v3292_v13 = vmul.f32 0.020408163, %v9369_v19 }
 0x49b   :  { %2849 = vadd.xlane.f32.xlu1 %v2848_v2  ;;  %v3854_v2 = vld [vmem:[%s13158_s3 + $0x68] sm:$0xff]  ;;  %v3480_v6 = vadd.f32 0.001, %v3288_v52  ;;  %v14045_v19 = vld [vmem:[#allocation220_spill] sm:$0xff] }
 0x49c   :  { %v4046_v16 = vmul.f32 %v6841_v53, %v3854_v2  ;;  %6848 = vrsqrt.f32 %v3478_v12  ;;  %v2552_v2 = vmul.f32 %v9930_v38, %v9930_v38  ;;  %v3482_v52 = vadd.f32 0.001, %v3290_v55  ;;  %v14051_v38 = vld [vmem:[#allocation231_spill] sm:$0xff] }
 0x49d   :  { %6850 = vrsqrt.f32 %v3480_v6  ;;  %v3484_v6 = vadd.f32 0.001, %v3292_v13  ;;  %v3294_v55 = vmul.f32 0.020408163, %v9401_v23  ;;  %v2170_v50 = vmul.f32 0.020408163, %v14045_v19 }
 0x49e   :  { %v2854_v12 = vsel %vm1536_vm0, %v2552_v2, 0.0  ;;  %6852 = vrsqrt.f32 %v3482_v52  ;;  %v3296_v13 = vmul.f32 0.020408163, %v9453_v3 }
 0x49f   :  { %3137 = vadd.xlane.f32.xlu1 %v3136_v22  ;;  %v3856_v22 = vld [vmem:[%s13158_s3 + $0x78] sm:$0xff]  ;;  %6854 = vrsqrt.f32 %v3484_v6  ;;  %v3486_v52 = vadd.f32 0.001, %v3294_v55  ;;  %v2104_v6 = vsel %vm1536_vm0, %v14051_v38, 0.0  ;;  %v3298_v55 = vmul.f32 0.020408163, %v9506_v39 }
 0x4a0   :  { %4282 = vperm.xlu0 %6812, %v4044_v47   ;;  %v14042_v47 = vld [vmem:[#allocation224_spill] sm:$0xff]  ;;  %v4048_v53 = vmul.f32 %v6843_v0, %v3856_v22  ;;  %v2648_v0 = vmul.f32 %v9942_v26, %v9942_v26  ;;  %v9953_v22 = vpop.xlane.xlu1 %2075  ;;  %v3488_v3 = vadd.f32 0.001, %v3296_v13  ;;  %v3300_v39 = vmul.f32 0.020408163, %v9568_v11 }
 0x4a1   :  { %v2098_v60 = vsel %vm1536_vm0, %v14042_v47, 0.0  ;;  %6856 = vrsqrt.f32 %v3486_v52  ;;  %v3490_v52 = vadd.f32 0.001, %v3298_v55 }
 0x4a2   :  { %6858 = vrsqrt.f32 %v3488_v3  ;;  %v14055_v3 = vld [vmem:[#allocation229_spill] sm:$0xff]  ;;  %v3492_v11 = vadd.f32 0.001, %v3300_v39 }
 0x4a3   :  { %1811 = vadd.xlane.f32.xlu1 %v1810_v17  ;;  %v6845_v17 = vpop.eup %6844  ;;  %v2172_v55 = vmul.f32 0.020408163, %v14055_v3  ;;  %6860 = vrsqrt.f32 %v3490_v52 }
 0x4a4   :  { %4292 = vperm.xlu0 %6812, %v4046_v16   ;;  %v4050_v16 = vmul.f32 %v6845_v17, %v3858_v61  ;;  %v6847_v9 = vpop.eup %6846  ;;  %v3862_v61 = vld [vmem:[%s13158_s3 + $0xa8] sm:$0xff]  ;;  %v9967_v23 = vpop.permute.xlu1 %4257  ;;  %6862 = vrsqrt.f32 %v3492_v11 }
 0x4a5   :  { %14047 = vst [vmem:[#allocation209_spill] sm:$0xff] %v9967_v23  ;;  %v14052_v23 = vld [vmem:[#allocation108_spill] sm:$0xff] }
 0x4a6   :  { %v6849_v17 = vpop.eup %6848 }
 0x4a7   :  { %2099 = vadd.xlane.f32.xlu1 %v2098_v60  ;;  %v3860_v60 = vld [vmem:[%s13158_s3 + $0x98] sm:$0xff] }
 0x4a8   :  { %4302 = vperm.xlu0 %6812, %v4048_v53   ;;  %v3142_v53 = vsel %vm1536_vm0, %v2648_v0, 0.0  ;;  %v4052_v2 = vmul.f32 %v6847_v9, %v3860_v60  ;;  %v14050_v0 = vld [vmem:[#allocation222_spill] sm:$0xff]  ;;  %v4054_v60 = vmul.f32 %v6849_v17, %v3862_v61  ;;  %v9984_v61 = vpop.permute.xlu1 %4262 }
 0x4a9   :  { %v2266_v9 = vmul.f32 0.020408163, %v14050_v0  ;;  %14054 = vst [vmem:[#allocation225_spill] sm:$0xff] %v9984_v61  ;;  %v3866_v0 = vld [vmem:[%s13158_s3 + $0xc8] sm:$0xff] }
 0x4ab   :  { %2855 = vadd.xlane.f32.xlu1 %v2854_v12  ;;  %v14046_v12 = vld [vmem:[#allocation228_spill] sm:$0xff] }
 0x4ac   :  { %4312 = vperm.xlu0 %6812, %v4050_v16   ;;  %v1816_v26 = vsel %vm1536_vm0, %v14046_v12, 0.0  ;;  %v14048_v16 = vld [vmem:[#allocation107_spill] sm:$0xff] }
 0x4ad   :  { %v9970_v19 = vsub.f32 %v14048_v16, %v2170_v50  ;;  %v9980_v50 = vsub.f32 %v14052_v23, %v2266_v9 }
 0x4af   :  { %3143 = vadd.xlane.f32.xlu1 %v3142_v53  ;;  %14049 = vst [vmem:[#allocation95_spill] sm:$0xff] %v9970_v19  ;;  %v6851_v53 = vpop.eup %6850  ;;  %14053 = vst [vmem:[#allocation159_spill] sm:$0xff] %v9980_v50  ;;  %v2554_v17 = vmul.f32 %v9970_v19, %v9970_v19  ;;  %v2650_v9 = vmul.f32 %v9980_v50, %v9980_v50  ;;  %v1822_v50 = vsel %vm1536_vm0, %v9718_v20, 0.0 }
 0x4b0   :  { %4322 = vperm.xlu0 %6812, %v4052_v2   ;;  %v3864_v2 = vld [vmem:[%s13158_s3 + $0xb8] sm:$0xff] }
 0x4b1   :  { %v4056_v16 = vmul.f32 %v6851_v53, %v3864_v2  ;;  %v2860_v13 = vsel %vm1536_vm0, %v2554_v17, 0.0  ;;  %v9993_v53 = vpop.xlane.xlu1 %2831  ;;  %v3868_v2 = vld [vmem:[%s13158_s3 + $0xd8] sm:$0xff]  ;;  %v3148_v17 = vsel %vm1536_vm0, %v2650_v9, 0.0 }
 0x4b2   :  { %v14059_v9 = vld [vmem:[#allocation232_spill] sm:$0xff] }
 0x4b3   :  { %1817 = vadd.xlane.f32.xlu1 %v1816_v26  ;;  %v6853_v26 = vpop.eup %6852 }
 0x4b4   :  { %4332 = vperm.xlu0 %6812, %v4054_v60   ;;  %v4058_v23 = vmul.f32 %v6853_v26, %v3866_v0  ;;  %v6855_v60 = vpop.eup %6854 }
 0x4b5   :  { %v4060_v26 = vmul.f32 %v6855_v60, %v3868_v2  ;;  %v6857_v0 = vpop.eup %6856  ;;  %v10012_v39 = vpop.xlane.xlu1 %3119  ;;  %v2268_v60 = vmul.f32 0.020408163, %v14059_v9 }
 0x4b6   :  { %14058 = vst [vmem:[#allocation223_spill] sm:$0xff] %v10012_v39 }
 0x4b7   :  { %2105 = vadd.xlane.f32.xlu1 %v2104_v6  ;;  %v9998_v6 = vpop.xlane.xlu0 %2864 }
 0x4b8   :  { %4342 = vperm.xlu0 %6812, %v4056_v16   ;;  %v3302_v16 = vmul.f32 0.020408163, %v9632_v4  ;;  %v3304_v4 = vmul.f32 0.020408163, %v9689_v21  ;;  %v3306_v21 = vmul.f32 0.020408163, %v9773_v49 }
 0x4ba   :  { %v3494_v52 = vadd.f32 0.001, %v3302_v16  ;;  %v3496_v11 = vadd.f32 0.001, %v3304_v4  ;;  %v3498_v49 = vadd.f32 0.001, %v3306_v21 }
 0x4bb   :  { %2861 = vadd.xlane.f32.xlu1 %v2860_v13  ;;  %v3870_v13 = vld [vmem:[%s13158_s3 + $0xe8] sm:$0xff]  ;;  %v10015_v2 = vpop.xlane.xlu0 %3152  ;;  %v14067_v21 = vld [vmem:[#allocation239_spill] sm:$0xff] }
 0x4bc   :  { %4352 = vperm.xlu0 %6812, %v4058_v23   ;;  %v14056_v23 = vld [vmem:[#allocation114_spill] sm:$0xff]  ;;  %14060 = vst [vmem:[#allocation233_spill] sm:$0xff] %v10015_v2  ;;  %v4062_v3 = vmul.f32 %v6857_v0, %v3870_v13  ;;  %6864 = vrsqrt.f32 %v3494_v52  ;;  %v14063_v0 = vld [vmem:[#allocation164_spill] sm:$0xff]  ;;  %v10029_v2 = vpop.xlane.xlu1 %1793 }
 0x4bd   :  { %v10009_v19 = vsub.f32 %v14056_v23, %v2172_v55  ;;  %v2110_v55 = vsel %vm1536_vm0, %v9733_v14, 0.0  ;;  %v14061_v23 = vld [vmem:[#allocation115_spill] sm:$0xff]  ;;  %v3874_v52 = vld [vmem:[%s13158_s3 + $0x108] sm:$0xff]  ;;  %6866 = vrsqrt.f32 %v3496_v11  ;;  %v3876_v11 = vld [vmem:[%s13158_s3 + $0x118] sm:$0xff] }
 0x4be   :  { %v10026_v9 = vsub.f32 %v14061_v23, %v2268_v60  ;;  %v14064_v23 = vld [vmem:[#allocation120_spill] sm:$0xff]  ;;  %6868 = vrsqrt.f32 %v3498_v49 }
 0x4bf   :  { %3149 = vadd.xlane.f32.xlu1 %v3148_v17  ;;  %14057 = vst [vmem:[#allocation213_spill] sm:$0xff] %v10009_v19  ;;  %v6859_v17 = vpop.eup %6858  ;;  %v2556_v16 = vmul.f32 %v10009_v19, %v10009_v19  ;;  %v10034_v4 = vpop.xlane.xlu0 %2870 }
 0x4c0   :  { %4362 = vperm.xlu0 %6812, %v4060_v26   ;;  %v3872_v26 = vld [vmem:[%s13158_s3 + $0xf8] sm:$0xff]  ;;  %14062 = vst [vmem:[#allocation101_spill] sm:$0xff] %v10026_v9  ;;  %v6861_v61 = vpop.eup %6860 }
 0x4c1   :  { %v4064_v13 = vmul.f32 %v6859_v17, %v3872_v26  ;;  %v2866_v60 = vsel %vm1536_vm0, %v2556_v16, 0.0  ;;  %v14066_v17 = vld [vmem:[#allocation167_spill] sm:$0xff]  ;;  %v4066_v19 = vmul.f32 %v6861_v61, %v3874_v52  ;;  %v6863_v39 = vpop.eup %6862  ;;  %v3310_v16 = vmul.f32 0.020408163, %v9910_v33 }
 0x4c2   :  { %v2270_v26 = vmul.f32 0.020408163, %v14066_v17  ;;  %v4068_v17 = vmul.f32 %v6863_v39, %v3876_v11  ;;  %v14070_v33 = vld [vmem:[#allocation127_spill] sm:$0xff] }
 0x4c3   :  { %1823 = vadd.xlane.f32.xlu1 %v1822_v50  ;;  %v2174_v50 = vmul.f32 0.020408163, %v14063_v0  ;;  %v10054_v52 = vpop.xlane.xlu0 %3158 }
 0x4c4   :  { %4372 = vperm.xlu0 %6812, %v4062_v3   ;;  %v3308_v3 = vmul.f32 0.020408163, %v9853_v59 }
 0x4c5   :  { %v10039_v0 = vsub.f32 %v14064_v23, %v2174_v50  ;;  %v10049_v50 = vpop.xlane.xlu1 %2081  ;;  %v14068_v23 = vld [vmem:[#allocation121_spill] sm:$0xff] }
 0x4c6   :  { %v3500_v59 = vadd.f32 0.001, %v3308_v3  ;;  %v10052_v61 = vsub.f32 %v14068_v23, %v2270_v26  ;;  %v6865_v29 = vpop.eup %6864  ;;  %v14072_v3 = vld [vmem:[#allocation241_spill] sm:$0xff] }
 0x4c7   :  { %2111 = vadd.xlane.f32.xlu1 %v2110_v55  ;;  %14065 = vst [vmem:[#allocation156_spill] sm:$0xff] %v10039_v0  ;;  %v2652_v55 = vmul.f32 %v10026_v9, %v10026_v9  ;;  %v2558_v9 = vmul.f32 %v10039_v0, %v10039_v0  ;;  %v2272_v26 = vmul.f32 0.020408163, %v14072_v3 }
 0x4c8   :  { %4382 = vperm.xlu0 %6812, %v4064_v13   ;;  %v2176_v13 = vmul.f32 0.020408163, %v14067_v21  ;;  %14069 = vst [vmem:[#allocation224_spill] sm:$0xff] %v10052_v61  ;;  %6870 = vrsqrt.f32 %v3500_v59  ;;  %v3502_v21 = vadd.f32 0.001, %v3310_v16  ;;  %v2654_v23 = vmul.f32 %v10052_v61, %v10052_v61  ;;  %v14074_v59 = vld [vmem:[#allocation128_spill] sm:$0xff] }
 0x4c9   :  { %v2872_v39 = vsel %vm1536_vm0, %v2558_v9, 0.0  ;;  %v10070_v0 = vpop.permute.xlu1 %4267  ;;  %v10078_v16 = vsub.f32 %v14074_v59, %v2272_v26  ;;  %v14076_v9 = vld [vmem:[#allocation244_spill] sm:$0xff] }
 0x4ca   :  { %v10063_v49 = vsub.f32 %v14070_v33, %v2176_v13  ;;  %14073 = vst [vmem:[#allocation220_spill] sm:$0xff] %v10070_v0  ;;  %v3880_v13 = vld [vmem:[%s13158_s3 + $0x138] sm:$0xff]  ;;  %6872 = vrsqrt.f32 %v3502_v21  ;;  %v3160_v33 = vsel %vm1536_vm0, %v2654_v23, 0.0  ;;  %v14079_v23 = vld [vmem:[#allocation246_spill] sm:$0xff] }
 0x4cb   :  { %2867 = vadd.xlane.f32.xlu1 %v2866_v60  ;;  %v3154_v60 = vsel %vm1536_vm0, %v2652_v55, 0.0  ;;  %v3312_v55 = vmul.f32 0.020408163, %v9993_v53  ;;  %14075 = vst [vmem:[#allocation228_spill] sm:$0xff] %v10078_v16  ;;  %v2656_v21 = vmul.f32 %v10078_v16, %v10078_v16 }
 0x4cc   :  { %4392 = vperm.xlu0 %6812, %v4066_v19   ;;  %v3878_v19 = vld [vmem:[%s13158_s3 + $0x128] sm:$0xff]  ;;  %14071 = vst [vmem:[#allocation102_spill] sm:$0xff] %v10063_v49 }
 0x4cd   :  { %v4070_v11 = vmul.f32 %v6865_v29, %v3878_v19  ;;  %v3504_v53 = vadd.f32 0.001, %v3312_v55  ;;  %v2560_v29 = vmul.f32 %v10063_v49, %v10063_v49  ;;  %v2178_v19 = vmul.f32 0.020408163, %v14076_v9  ;;  %v14077_v55 = vld [vmem:[#allocation133_spill] sm:$0xff] }
 0x4cf   :  { %3155 = vadd.xlane.f32.xlu1 %v3154_v60  ;;  %v6867_v60 = vpop.eup %6866  ;;  %6874 = vrsqrt.f32 %v3504_v53  ;;  %v2878_v26 = vsel %vm1536_vm0, %v2560_v29, 0.0  ;;  %v10091_v59 = vsub.f32 %v14077_v55, %v2178_v19  ;;  %v2180_v53 = vmul.f32 0.020408163, %v9431_v46  ;;  %v14080_v29 = vld [vmem:[#allocation134_spill] sm:$0xff]  ;;  %v14082_v46 = vld [vmem:[#allocation139_spill] sm:$0xff] }
 0x4d0   :  { %4402 = vperm.xlu0 %6812, %v4068_v17   ;;  %v10075_v17 = vpop.xlane.xlu0 %2876  ;;  %v4072_v3 = vmul.f32 %v6867_v60, %v3880_v13  ;;  %v2274_v60 = vmul.f32 0.020408163, %v14079_v23  ;;  %v3166_v19 = vsel %vm1536_vm0, %v2656_v21, 0.0 }
 0x4d1   :  { %14078 = vst [vmem:[#allocation107_spill] sm:$0xff] %v10091_v59  ;;  %v10112_v23 = vsub.f32 %v14082_v46, %v2180_v53  ;;  %v14085_v53 = vld [vmem:[#allocation140_spill] sm:$0xff]  ;;  %v2182_v46 = vmul.f32 0.020408163, %v9481_v34 }
 0x4d3   :  { %2873 = vadd.xlane.f32.xlu1 %v2872_v39  ;;  %v6869_v39 = vpop.eup %6868  ;;  %14083 = vst [vmem:[#allocation231_spill] sm:$0xff] %v10112_v23 }
 0x4d4   :  { %4412 = vperm.xlu0 %6812, %v4070_v11   ;;  %v3882_v11 = vld [vmem:[%s13158_s3 + $0x148] sm:$0xff]  ;;  %v10094_v13 = vpop.xlane.xlu0 %3164  ;;  %v6871_v49 = vpop.eup %6870 }
 0x4d7   :  { %v2838_v61 = vpop.xlane.xlu1 %2837  ;;  %3161 = vadd.xlane.f32.xlu1 %v3160_v33  ;;  %v4074_v33 = vmul.f32 %v6869_v39, %v3882_v11  ;;  %v6873_v39 = vpop.eup %6872  ;;  %v3886_v11 = vld [vmem:[%s13158_s3 + $0x168] sm:$0xff] }
 0x4d8   :  { %v3314_v0 = vmul.f32 0.020408163, %v2838_v61  ;;  %4422 = vperm.xlu0 %6812, %v4072_v3   ;;  %v3884_v61 = vld [vmem:[%s13158_s3 + $0x158] sm:$0xff]  ;;  %v10101_v3 = vsub.f32 %v14080_v29, %v2274_v60  ;;  %v14084_v60 = vld [vmem:[#allocation250_spill] sm:$0xff] }
 0x4d9   :  { %v4076_v55 = vmul.f32 %v6871_v49, %v3884_v61  ;;  %v4078_v49 = vmul.f32 %v6873_v39, %v3886_v11  ;;  %v6875_v61 = vpop.eup %6874  ;;  %v3888_v29 = vld [vmem:[%s13158_s3 + $0x178] sm:$0xff] }
 0x4da   :  { %v3506_v9 = vadd.f32 0.001, %v3314_v0  ;;  %14081 = vst [vmem:[#allocation222_spill] sm:$0xff] %v10101_v3  ;;  %v2562_v0 = vmul.f32 %v10091_v59, %v10091_v59  ;;  %v4080_v11 = vmul.f32 %v6875_v61, %v3888_v29  ;;  %v14089_v61 = vld [vmem:[#allocation145_spill] sm:$0xff] }
 0x4db   :  { %2879 = vadd.xlane.f32.xlu1 %v2878_v26  ;;  %v10109_v26 = vpop.xlane.xlu0 %2882 }
 0x4dc   :  { %4432 = vperm.xlu0 %6812, %v4074_v33   ;;  %6876 = vrsqrt.f32 %v3506_v9  ;;  %v2276_v9 = vmul.f32 0.020408163, %v14084_v60  ;;  %v2884_v21 = vsel %vm1536_vm0, %v2562_v0, 0.0  ;;  %v2658_v33 = vmul.f32 %v10101_v3, %v10101_v3  ;;  %v14087_v3 = vld [vmem:[#allocation144_spill] sm:$0xff] }
 0x4dd   :  { %v10135_v16 = vsub.f32 %v14087_v3, %v2182_v46 }
 0x4de   :  { %v3172_v39 = vsel %vm1536_vm0, %v2658_v33, 0.0 }
 0x4df   :  { %3167 = vadd.xlane.f32.xlu1 %v3166_v19  ;;  %v2564_v19 = vmul.f32 %v10112_v23, %v10112_v23  ;;  %v10127_v0 = vpop.xlane.xlu0 %3170  ;;  %14088 = vst [vmem:[#allocation229_spill] sm:$0xff] %v10135_v16  ;;  %v2566_v3 = vmul.f32 %v10135_v16, %v10135_v16  ;;  %v14143_v16 = vld [vmem:[#allocation197_spill] sm:$0xff] }
 0x4e0   :  { %4442 = vperm.xlu0 %6812, %v4076_v55   ;;  %v10124_v55 = vsub.f32 %v14085_v53, %v2276_v9  ;;  %v2278_v9 = vmul.f32 0.020408163, %v9490_v41  ;;  %v14091_v41 = vld [vmem:[#allocation148_spill] sm:$0xff] }
 0x4e2   :  { %14086 = vst [vmem:[#allocation108_spill] sm:$0xff] %v10124_v55  ;;  %v2660_v53 = vmul.f32 %v10124_v55, %v10124_v55  ;;  %v10143_v29 = vsub.f32 %v14089_v61, %v2278_v9  ;;  %v14095_v61 = vld [vmem:[#allocation155_spill] sm:$0xff] }
 0x4e3   :  { %2885 = vadd.xlane.f32.xlu1 %v2884_v21  ;;  %v3890_v21 = vld [vmem:[%s13158_s3 + $0x188] sm:$0xff]  ;;  %v10140_v33 = vpop.xlane.xlu0 %2888 }
 0x4e4   :  { %4452 = vperm.xlu0 %6812, %v4078_v49   ;;  %v2890_v49 = vsel %vm1536_vm0, %v2564_v19, 0.0  ;;  %14090 = vst [vmem:[#allocation114_spill] sm:$0xff] %v10143_v29  ;;  %v3178_v19 = vsel %vm1536_vm0, %v2660_v53, 0.0 }
 0x4e6   :  { %v6877_v60 = vpop.eup %6876 }
 0x4e7   :  { %3173 = vadd.xlane.f32.xlu1 %v3172_v39  ;;  %v4082_v34 = vmul.f32 %v6877_v60, %v3890_v21  ;;  %v2184_v39 = vmul.f32 0.020408163, %v9534_v32  ;;  %v2896_v60 = vsel %vm1536_vm0, %v2566_v3, 0.0  ;;  %v2662_v21 = vmul.f32 %v10143_v29, %v10143_v29  ;;  %v10264_v55 = vpop.xlane.xlu0 %3176 }
 0x4e8   :  { %4462 = vperm.xlu0 %6812, %v4080_v11   ;;  %v2280_v11 = vmul.f32 0.020408163, %v9548_v42  ;;  %v2186_v32 = vmul.f32 0.020408163, %v9603_v27  ;;  %v2282_v42 = vmul.f32 0.020408163, %v9617_v18 }
 0x4e9   :  { %v10150_v46 = vsub.f32 %v14091_v41, %v2184_v39  ;;  %v14097_v41 = vld [vmem:[#allocation157_spill] sm:$0xff]  ;;  %v2188_v27 = vmul.f32 0.020408163, %v9664_v8  ;;  %v2284_v18 = vmul.f32 0.020408163, %v9678_v56 }
 0x4ea   :  { %v10164_v39 = vsub.f32 %v14095_v61, %v2186_v32  ;;  %v14101_v8 = vld [vmem:[#allocation165_spill] sm:$0xff]  ;;  %v2294_v29 = vmul.f32 0.020408163, %v10049_v50 }
 0x4eb   :  { %2891 = vadd.xlane.f32.xlu1 %v2890_v49  ;;  %14092 = vst [vmem:[#allocation232_spill] sm:$0xff] %v10150_v46  ;;  %v14093_v49 = vld [vmem:[#allocation150_spill] sm:$0xff]  ;;  %v2568_v53 = vmul.f32 %v10150_v46, %v10150_v46 }
 0x4ec   :  { %4472 = vperm.xlu0 %6812, %v4082_v34   ;;  %v10157_v9 = vsub.f32 %v14093_v49, %v2280_v11  ;;  %v3184_v34 = vsel %vm1536_vm0, %v2662_v21, 0.0  ;;  %14096 = vst [vmem:[#allocation164_spill] sm:$0xff] %v10164_v39  ;;  %v10171_v11 = vsub.f32 %v14097_v41, %v2282_v42  ;;  %v2570_v21 = vmul.f32 %v10164_v39, %v10164_v39  ;;  %v14099_v49 = vld [vmem:[#allocation163_spill] sm:$0xff] }
 0x4ed   :  { %v10178_v32 = vsub.f32 %v14099_v49, %v2188_v27  ;;  %v10187_v42 = vsub.f32 %v14101_v8, %v2284_v18  ;;  %v14103_v27 = vld [vmem:[#allocation170_spill] sm:$0xff] }
 0x4ee   :  { %14094 = vst [vmem:[#allocation115_spill] sm:$0xff] %v10157_v9  ;;  %v2664_v3 = vmul.f32 %v10157_v9, %v10157_v9  ;;  %14098 = vst [vmem:[#allocation120_spill] sm:$0xff] %v10171_v11  ;;  %v2666_v61 = vmul.f32 %v10171_v11, %v10171_v11 }
 0x4ef   :  { %3179 = vadd.xlane.f32.xlu1 %v3178_v19  ;;  %v2902_v19 = vsel %vm1536_vm0, %v2568_v53, 0.0  ;;  %14100 = vst [vmem:[#allocation167_spill] sm:$0xff] %v10178_v32  ;;  %v2908_v53 = vsel %vm1536_vm0, %v2570_v21, 0.0  ;;  %14102 = vst [vmem:[#allocation239_spill] sm:$0xff] %v10187_v42  ;;  %v2572_v41 = vmul.f32 %v10178_v32, %v10178_v32  ;;  %v2286_v21 = vmul.f32 0.020408163, %v9747_v43 }
 0x4f0   :  { %v2668_v18 = vmul.f32 %v10187_v42, %v10187_v42  ;;  %v14107_v43 = vld [vmem:[#allocation187_spill] sm:$0xff] }
 0x4f1   :  { %v2914_v49 = vsel %vm1536_vm0, %v2572_v41, 0.0  ;;  %v2288_v41 = vmul.f32 0.020408163, %v9819_v45 }
 0x4f3   :  { %2897 = vadd.xlane.f32.xlu1 %v2896_v60  ;;  %v3190_v60 = vsel %vm1536_vm0, %v2664_v3, 0.0  ;;  %v3196_v3 = vsel %vm1536_vm0, %v2666_v61, 0.0  ;;  %v2192_v61 = vmul.f32 0.020408163, %v9800_v1 }
 0x4f7   :  { %3185 = vadd.xlane.f32.xlu1 %v3184_v34  ;;  %v10181_v34 = vpop.xlane.xlu1 %3125 }
 0x4fb   :  { %2903 = vadd.xlane.f32.xlu1 %v2902_v19  ;;  %v2190_v19 = vmul.f32 0.020408163, %v9724_v57  ;;  %v10193_v56 = vpop.xlane.xlu1 %1799  ;;  %v14105_v57 = vld [vmem:[#allocation171_spill] sm:$0xff] }
 0x4ff   :  { %3191 = vadd.xlane.f32.xlu1 %v3190_v60  ;;  %v10196_v60 = vsub.f32 %v14103_v27, %v2190_v19  ;;  %v10206_v8 = vpop.xlane.xlu1 %2087  ;;  %v10212_v27 = vsub.f32 %v14107_v43, %v2192_v61 }
 0x501   :  { %14104 = vst [vmem:[#allocation121_spill] sm:$0xff] %v10196_v60  ;;  %v2574_v19 = vmul.f32 %v10196_v60, %v10196_v60  ;;  %14108 = vst [vmem:[#allocation241_spill] sm:$0xff] %v10212_v27  ;;  %v2576_v61 = vmul.f32 %v10212_v27, %v10212_v27 }
 0x503   :  { %2909 = vadd.xlane.f32.xlu1 %v2908_v53  ;;  %v10203_v53 = vsub.f32 %v14105_v57, %v2286_v21  ;;  %v10218_v1 = vpop.permute.xlu1 %4277  ;;  %v14110_v57 = vld [vmem:[#allocation190_spill] sm:$0xff] }
 0x504   :  { %14109 = vst [vmem:[#allocation128_spill] sm:$0xff] %v10218_v1  ;;  %v10221_v42 = vsub.f32 %v14110_v57, %v2288_v41 }
 0x505   :  { %14106 = vst [vmem:[#allocation127_spill] sm:$0xff] %v10203_v53  ;;  %v2670_v21 = vmul.f32 %v10203_v53, %v10203_v53  ;;  %v2926_v53 = vsel %vm1536_vm0, %v2576_v61, 0.0 }
 0x506   :  { %14111 = vst [vmem:[#allocation244_spill] sm:$0xff] %v10221_v42  ;;  %v2672_v41 = vmul.f32 %v10221_v42, %v10221_v42 }
 0x507   :  { %3197 = vadd.xlane.f32.xlu1 %v3196_v3  ;;  %v3202_v3 = vsel %vm1536_vm0, %v2668_v18, 0.0  ;;  %v2194_v18 = vmul.f32 0.020408163, %v9877_v31 }
 0x50b   :  { %2915 = vadd.xlane.f32.xlu1 %v2914_v49  ;;  %v2920_v49 = vsel %vm1536_vm0, %v2574_v19, 0.0  ;;  %v14112_v19 = vld [vmem:[#allocation195_spill] sm:$0xff] }
 0x50c   :  { %v10228_v11 = vsub.f32 %v14112_v19, %v2194_v18  ;;  %v3214_v18 = vsel %vm1536_vm0, %v2672_v41, 0.0  ;;  %v14118_v41 = vld [vmem:[#allocation200_spill] sm:$0xff] }
 0x50e   :  { %14113 = vst [vmem:[#allocation133_spill] sm:$0xff] %v10228_v11 }
 0x50f   :  { %3203 = vadd.xlane.f32.xlu1 %v3202_v3  ;;  %v3208_v3 = vsel %vm1536_vm0, %v2670_v21, 0.0  ;;  %v14114_v21 = vld [vmem:[#allocation196_spill] sm:$0xff] }
 0x513   :  { %2921 = vadd.xlane.f32.xlu1 %v2920_v49  ;;  %v2290_v49 = vmul.f32 0.020408163, %v9886_v54  ;;  %v2578_v54 = vmul.f32 %v10228_v11, %v10228_v11 }
 0x515   :  { %v10237_v9 = vsub.f32 %v14114_v21, %v2290_v49 }
 0x517   :  { %3209 = vadd.xlane.f32.xlu1 %v3208_v3  ;;  %14115 = vst [vmem:[#allocation246_spill] sm:$0xff] %v10237_v9  ;;  %v2196_v3 = vmul.f32 0.020408163, %v9939_v30  ;;  %v2674_v49 = vmul.f32 %v10237_v9, %v10237_v9  ;;  %v3892_v30 = vld [vmem:[%s13158_s3 + $0x198] sm:$0xff] }
 0x518   :  { %v2844_v45 = vpop.xlane.xlu1 %2843 }
 0x519   :  { %v3316_v43 = vmul.f32 0.020408163, %v2844_v45  ;;  %v14116_v45 = vld [vmem:[#allocation199_spill] sm:$0xff] }
 0x51a   :  { %v10244_v19 = vsub.f32 %v14116_v45, %v2196_v3  ;;  %v3220_v3 = vsel %vm1536_vm0, %v2674_v49, 0.0 }
 0x51b   :  { %v3508_v57 = vadd.f32 0.001, %v3316_v43  ;;  %2927 = vadd.xlane.f32.xlu1 %v2926_v53  ;;  %v2292_v53 = vmul.f32 0.020408163, %v9953_v22  ;;  %v2932_v43 = vsel %vm1536_vm0, %v2578_v54, 0.0 }
 0x51c   :  { %v10234_v31 = vpop.xlane.xlu1 %3131  ;;  %14117 = vst [vmem:[#allocation134_spill] sm:$0xff] %v10244_v19  ;;  %v2580_v22 = vmul.f32 %v10244_v19, %v10244_v19 }
 0x51d   :  { %6878 = vrsqrt.f32 %v3508_v57  ;;  %v10254_v21 = vsub.f32 %v14118_v41, %v2292_v53 }
 0x51f   :  { %3215 = vadd.xlane.f32.xlu1 %v3214_v18  ;;  %14119 = vst [vmem:[#allocation139_spill] sm:$0xff] %v10254_v21  ;;  %v2198_v18 = vmul.f32 0.020408163, %v10029_v2  ;;  %v2938_v2 = vsel %vm1536_vm0, %v2580_v22, 0.0  ;;  %v2676_v53 = vmul.f32 %v10254_v21, %v10254_v21  ;;  %v2296_v22 = vmul.f32 0.020408163, %v10206_v8 }
 0x520   :  { %v1806_v61 = vpop.xlane.xlu1 %1805 }
 0x521   :  { %v10261_v42 = vsub.f32 %v9118_v35, %v2198_v18  ;;  %v2200_v35 = vmul.f32 0.020408163, %v10193_v56  ;;  %v3226_v50 = vsel %vm1536_vm0, %v2676_v53, 0.0  ;;  %v3894_v56 = vld [vmem:[%s13158_s3 + $0x1a8] sm:$0xff] }
 0x523   :  { %2933 = vadd.xlane.f32.xlu1 %v2932_v43  ;;  %14120 = vst [vmem:[#allocation250_spill] sm:$0xff] %v10261_v42 }
 0x524   :  { %v2094_v57 = vpop.xlane.xlu1 %2093 }
 0x527   :  { %v6879_v54 = vpop.eup %6878  ;;  %3221 = vadd.xlane.f32.xlu1 %v3220_v3  ;;  %v10279_v3 = vsub.f32 %v13994_v44, %v2200_v35  ;;  %v2202_v44 = vmul.f32 0.020408163, %v1806_v61 }
 0x528   :  { %v2850_v45 = vpop.xlane.xlu1 %2849  ;;  %v4084_v9 = vmul.f32 %v6879_v54, %v3892_v30  ;;  %v10272_v30 = vsub.f32 %v9130_v48, %v2294_v29 }
 0x529   :  { %v3318_v43 = vmul.f32 0.020408163, %v2850_v45  ;;  %14122 = vst [vmem:[#allocation144_spill] sm:$0xff] %v10279_v3  ;;  %v10288_v45 = vpop.xlane.xlu0 %2894  ;;  %v2584_v8 = vmul.f32 %v10279_v3, %v10279_v3 }
 0x52a   :  { %4482 = vperm.xlu0 %6812, %v4084_v9   ;;  %14121 = vst [vmem:[#allocation140_spill] sm:$0xff] %v10272_v30  ;;  %v2582_v9 = vmul.f32 %v10261_v42, %v10261_v42  ;;  %v2678_v48 = vmul.f32 %v10272_v30, %v10272_v30 }
 0x52b   :  { %v3510_v49 = vadd.f32 0.001, %v3318_v43  ;;  %2939 = vadd.xlane.f32.xlu1 %v2938_v2  ;;  %v10291_v43 = vsub.f32 %v13998_v62, %v2296_v22  ;;  %v2950_v30 = vsel %vm1536_vm0, %v2584_v8, 0.0 }
 0x52c   :  { %v10269_v41 = vpop.xlane.xlu1 %3137  ;;  %v2944_v54 = vsel %vm1536_vm0, %v2582_v9, 0.0  ;;  %v3232_v2 = vsel %vm1536_vm0, %v2678_v48, 0.0  ;;  %v10297_v9 = vsub.f32 %v14024_v37, %v2202_v44 }
 0x52d   :  { %6880 = vrsqrt.f32 %v3510_v49  ;;  %14123 = vst [vmem:[#allocation145_spill] sm:$0xff] %v10291_v43  ;;  %v2680_v62 = vmul.f32 %v10291_v43, %v10291_v43  ;;  %v10302_v22 = vpop.xlane.xlu0 %3182 }
 0x52e   :  { %14124 = vst [vmem:[#allocation148_spill] sm:$0xff] %v10297_v9  ;;  %14125 = vst [vmem:[#allocation150_spill] sm:$0xff] %v10302_v22 }
 0x52f   :  { %3227 = vadd.xlane.f32.xlu1 %v3226_v50  ;;  %v3238_v37 = vsel %vm1536_vm0, %v2680_v62, 0.0 }
 0x530   :  { %v1812_v18 = vpop.xlane.xlu1 %1811 }
 0x531   :  { %v10312_v8 = vpop.xlane.xlu0 %2900 }
 0x533   :  { %2945 = vadd.xlane.f32.xlu1 %v2944_v54  ;;  %v2298_v54 = vmul.f32 0.020408163, %v2094_v57  ;;  %v2586_v57 = vmul.f32 %v10297_v9, %v10297_v9 }
 0x534   :  { %v2100_v29 = vpop.xlane.xlu1 %2099 }
 0x537   :  { %v6881_v53 = vpop.eup %6880  ;;  %3233 = vadd.xlane.f32.xlu1 %v3232_v2  ;;  %v2204_v2 = vmul.f32 0.020408163, %v1812_v18 }
 0x538   :  { %v2856_v49 = vpop.xlane.xlu1 %2855  ;;  %v4086_v35 = vmul.f32 %v6881_v53, %v3894_v56  ;;  %v10307_v56 = vsub.f32 %v14027_v51, %v2298_v54  ;;  %v2300_v53 = vmul.f32 0.020408163, %v2100_v29 }
 0x539   :  { %v3320_v50 = vmul.f32 0.020408163, %v2856_v49  ;;  %v2956_v49 = vsel %vm1536_vm0, %v2586_v57, 0.0 }
 0x53a   :  { %4492 = vperm.xlu0 %6812, %v4086_v35   ;;  %14126 = vst [vmem:[#allocation155_spill] sm:$0xff] %v10307_v56  ;;  %v2682_v51 = vmul.f32 %v10307_v56, %v10307_v56  ;;  %v3896_v35 = vld [vmem:[%s13158_s3 + $0x1b8] sm:$0xff] }
 0x53b   :  { %v3512_v61 = vadd.f32 0.001, %v3320_v50  ;;  %2951 = vadd.xlane.f32.xlu1 %v2950_v30  ;;  %v10315_v30 = vsub.f32 %v14037_v36, %v2204_v2  ;;  %v10324_v50 = vsub.f32 %v14042_v47, %v2300_v53 }
 0x53c   :  { %v10304_v48 = vpop.xlane.xlu1 %3143  ;;  %v3244_v62 = vsel %vm1536_vm0, %v2682_v51, 0.0 }
 0x53d   :  { %6882 = vrsqrt.f32 %v3512_v61  ;;  %14127 = vst [vmem:[#allocation157_spill] sm:$0xff] %v10315_v30  ;;  %14128 = vst [vmem:[#allocation163_spill] sm:$0xff] %v10324_v50  ;;  %v2588_v36 = vmul.f32 %v10315_v30, %v10315_v30  ;;  %v10329_v61 = vpop.xlane.xlu0 %3188 }
 0x53e   :  { %14129 = vst [vmem:[#allocation165_spill] sm:$0xff] %v10329_v61 }
 0x53f   :  { %3239 = vadd.xlane.f32.xlu1 %v3238_v37  ;;  %v2962_v47 = vsel %vm1536_vm0, %v2588_v36, 0.0  ;;  %v14132_v36 = vld [vmem:[#allocation181_spill] sm:$0xff] }
 0x540   :  { %v1818_v44 = vpop.xlane.xlu1 %1817 }
 0x541   :  { %v2206_v54 = vmul.f32 0.020408163, %v1818_v44  ;;  %v2684_v44 = vmul.f32 %v10324_v50, %v10324_v50 }
 0x543   :  { %2957 = vadd.xlane.f32.xlu1 %v2956_v49  ;;  %v10332_v49 = vsub.f32 %v14046_v12, %v2206_v54  ;;  %v3250_v12 = vsel %vm1536_vm0, %v2684_v44, 0.0 }
 0x544   :  { %v2106_v18 = vpop.xlane.xlu1 %2105 }
 0x545   :  { %14130 = vst [vmem:[#allocation170_spill] sm:$0xff] %v10332_v49  ;;  %v2302_v56 = vmul.f32 0.020408163, %v2106_v18  ;;  %v2590_v18 = vmul.f32 %v10332_v49, %v10332_v49 }
 0x547   :  { %v6883_v29 = vpop.eup %6882  ;;  %3245 = vadd.xlane.f32.xlu1 %v3244_v62  ;;  %v10339_v62 = vpop.xlane.xlu0 %2906 }
 0x548   :  { %v2862_v2 = vpop.xlane.xlu1 %2861  ;;  %v4088_v37 = vmul.f32 %v6883_v29, %v3896_v35  ;;  %v10342_v35 = vsub.f32 %v14051_v38, %v2302_v56  ;;  %v3277_v29 = vmul.f32 0.020408163, %v14132_v36 }
 0x549   :  { %v3322_v57 = vmul.f32 0.020408163, %v2862_v2  ;;  %v2968_v2 = vsel %vm1536_vm0, %v2590_v18, 0.0 }
 0x54a   :  { %4502 = vperm.xlu0 %6812, %v4088_v37   ;;  %14131 = vst [vmem:[#allocation171_spill] sm:$0xff] %v10342_v35  ;;  %v2686_v37 = vmul.f32 %v10342_v35, %v10342_v35  ;;  %v3469_v56 = vadd.f32 0.001, %v3277_v29 }
 0x54b   :  { %v3514_v53 = vadd.f32 0.001, %v3322_v57  ;;  %2963 = vadd.xlane.f32.xlu1 %v2962_v47  ;;  %v10353_v57 = vpop.xlane.xlu0 %3194  ;;  %v3898_v47 = vld [vmem:[%s13158_s3 + $0x1c8] sm:$0xff] }
 0x54c   :  { %v10337_v51 = vpop.xlane.xlu1 %3149  ;;  %14133 = vst [vmem:[#allocation187_spill] sm:$0xff] %v10353_v57  ;;  %v3256_v44 = vsel %vm1536_vm0, %v2686_v37, 0.0  ;;  %v3853_v37 = vld [vmem:[%s13158_s3 + $0x60] sm:$0xff]  ;;  %v14151_v57 = vld [vmem:[#allocation218_spill] sm:$0xff] }
 0x54d   :  { %6884 = vrsqrt.f32 %v3514_v53 }
 0x54e   :  { %6886 = vrsqrt.f32 %v3469_v56  ;;  %v3900_v56 = vld [vmem:[%s13158_s3 + $0x1d8] sm:$0xff] }
 0x54f   :  { %3251 = vadd.xlane.f32.xlu1 %v3250_v12  ;;  %v10361_v50 = vpop.xlane.xlu0 %2912 }
 0x550   :  { %v10347_v54 = vpop.xlane.xlu1 %1823 }
 0x553   :  { %2969 = vadd.xlane.f32.xlu1 %v2968_v2  ;;  %v10365_v29 = vpop.xlane.xlu0 %3200 }
 0x554   :  { %v10355_v38 = vpop.xlane.xlu1 %2111  ;;  %14134 = vst [vmem:[#allocation190_spill] sm:$0xff] %v10365_v29 }
 0x557   :  { %v6885_v53 = vpop.eup %6884  ;;  %3257 = vadd.xlane.f32.xlu1 %v3256_v44  ;;  %v10375_v44 = vpop.xlane.xlu0 %2918 }
 0x558   :  { %v2868_v12 = vpop.xlane.xlu1 %2867  ;;  %v4090_v36 = vmul.f32 %v6885_v53, %v3898_v47  ;;  %v6887_v49 = vpop.eup %6886 }
 0x559   :  { %v3324_v18 = vmul.f32 0.020408163, %v2868_v12  ;;  %v4045_v53 = vmul.f32 %v6887_v49, %v3853_v37 }
 0x55a   :  { %4512 = vperm.xlu0 %6812, %v4090_v36  }
 0x55b   :  { %v3516_v2 = vadd.f32 0.001, %v3324_v18 }
 0x55c   :  { %v10363_v35 = vpop.xlane.xlu1 %3155 }
 0x55d   :  { %6888 = vrsqrt.f32 %v3516_v2  ;;  %v10377_v2 = vpop.xlane.xlu0 %3206 }
 0x55e   :  { %14135 = vst [vmem:[#allocation195_spill] sm:$0xff] %v10377_v2 }
 0x560   :  { %v2874_v43 = vpop.xlane.xlu1 %2873 }
 0x561   :  { %v3326_v21 = vmul.f32 0.020408163, %v2874_v43  ;;  %v10384_v37 = vpop.xlane.xlu0 %2924 }
 0x563   :  { %v3518_v30 = vadd.f32 0.001, %v3326_v21 }
 0x564   :  { %v10370_v47 = vpop.xlane.xlu1 %3161 }
 0x565   :  { %6890 = vrsqrt.f32 %v3518_v30  ;;  %v3902_v30 = vld [vmem:[%s13158_s3 + $0x1e8] sm:$0xff] }
 0x567   :  { %v6889_v12 = vpop.eup %6888 }
 0x568   :  { %4287 = vperm.xlu1 %6813, %v4045_v53   ;;  %v2880_v36 = vpop.xlane.xlu1 %2879  ;;  %v4092_v43 = vmul.f32 %v6889_v12, %v3900_v56  ;;  %v3904_v12 = vld [vmem:[%s13158_s3 + $0x1f8] sm:$0xff] }
 0x569   :  { %v3328_v18 = vmul.f32 0.020408163, %v2880_v36 }
 0x56a   :  { %4522 = vperm.xlu0 %6812, %v4092_v43   ;;  %v10391_v43 = vpop.xlane.xlu0 %3212 }
 0x56b   :  { %v3520_v21 = vadd.f32 0.001, %v3328_v18  ;;  %14136 = vst [vmem:[#allocation196_spill] sm:$0xff] %v10391_v43  ;;  %v14148_v43 = vld [vmem:[#allocation207_spill] sm:$0xff] }
 0x56c   :  { %v10379_v9 = vpop.xlane.xlu1 %3167  ;;  %v3291_v2 = vmul.f32 0.020408163, %v14148_v43 }
 0x56d   :  { %6892 = vrsqrt.f32 %v3520_v21 }
 0x56e   :  { %v3483_v43 = vadd.f32 0.001, %v3291_v2 }
 0x56f   :  { %v6891_v3 = vpop.eup %6890 }
 0x570   :  { %v2886_v42 = vpop.xlane.xlu1 %2885  ;;  %v4094_v19 = vmul.f32 %v6891_v3, %v3902_v30  ;;  %v10398_v30 = vpop.xlane.xlu0 %2930 }
 0x571   :  { %v3330_v49 = vmul.f32 0.020408163, %v2886_v42 }
 0x572   :  { %4532 = vperm.xlu0 %6812, %v4094_v19   ;;  %v3906_v19 = vld [vmem:[%s13158_s3 + $0x208] sm:$0xff] }
 0x573   :  { %v3522_v56 = vadd.f32 0.001, %v3330_v49 }
 0x574   :  { %v10386_v53 = vpop.xlane.xlu1 %3173 }
 0x575   :  { %6894 = vrsqrt.f32 %v3522_v56  ;;  %v2208_v56 = vmul.f32 0.020408163, %v10347_v54 }
 0x577   :  { %v6893_v36 = vpop.eup %6892 }
 0x578   :  { %v2892_v18 = vpop.xlane.xlu1 %2891  ;;  %v4096_v21 = vmul.f32 %v6893_v36, %v3904_v12  ;;  %v10402_v12 = vsub.f32 %v9718_v20, %v2208_v56 }
 0x579   :  { %v3332_v11 = vmul.f32 0.020408163, %v2892_v18  ;;  %v10405_v18 = vpop.xlane.xlu0 %3218 }
 0x57a   :  { %4542 = vperm.xlu0 %6812, %v4096_v21   ;;  %14137 = vst [vmem:[#allocation199_spill] sm:$0xff] %v10402_v12  ;;  %14138 = vst [vmem:[#allocation200_spill] sm:$0xff] %v10405_v18  ;;  %v2592_v20 = vmul.f32 %v10402_v12, %v10402_v12 }
 0x57b   :  { %v3524_v3 = vadd.f32 0.001, %v3332_v11  ;;  %v2304_v11 = vmul.f32 0.020408163, %v10355_v38 }
 0x57c   :  { %v10393_v42 = vpop.xlane.xlu1 %3179  ;;  %v2974_v39 = vsel %vm1536_vm0, %v2592_v20, 0.0 }
 0x57d   :  { %6896 = vrsqrt.f32 %v3524_v3  ;;  %v3908_v3 = vld [vmem:[%s13158_s3 + $0x218] sm:$0xff]  ;;  %v10418_v56 = vpop.xlane.xlu0 %2936 }
 0x57f   :  { %v6895_v49 = vpop.eup %6894 }
 0x580   :  { %v2898_v27 = vpop.xlane.xlu1 %2897  ;;  %v4098_v60 = vmul.f32 %v6895_v49, %v3906_v19  ;;  %v10413_v19 = vsub.f32 %v9733_v14, %v2304_v11  ;;  %v3910_v11 = vld [vmem:[%s13158_s3 + $0x228] sm:$0xff] }
 0x581   :  { %v3334_v32 = vmul.f32 0.020408163, %v2898_v27 }
 0x582   :  { %4552 = vperm.xlu0 %6812, %v4098_v60   ;;  %14139 = vst [vmem:[#allocation181_spill] sm:$0xff] %v10413_v19  ;;  %v2688_v46 = vmul.f32 %v10413_v19, %v10413_v19 }
 0x583   :  { %v3526_v36 = vadd.f32 0.001, %v3334_v32  ;;  %v14140_v32 = vld [vmem:[#allocation186_spill] sm:$0xff] }
 0x584   :  { %v10407_v21 = vpop.xlane.xlu1 %3185  ;;  %v3279_v49 = vmul.f32 0.020408163, %v14140_v32 }
 0x585   :  { %6898 = vrsqrt.f32 %v3526_v36 }
 0x587   :  { %v6897_v54 = vpop.eup %6896 }
 0x588   :  { %v2904_v60 = vpop.xlane.xlu1 %2903  ;;  %v4100_v27 = vmul.f32 %v6897_v54, %v3908_v3  ;;  %v3471_v3 = vadd.f32 0.001, %v3279_v49  ;;  %v14141_v54 = vld [vmem:[#allocation193_spill] sm:$0xff]  ;;  %v3912_v49 = vld [vmem:[%s13158_s3 + $0x238] sm:$0xff] }
 0x589   :  { %v3336_v38 = vmul.f32 0.020408163, %v2904_v60  ;;  %v3281_v60 = vmul.f32 0.020408163, %v14141_v54  ;;  %v14144_v54 = vld [vmem:[#allocation201_spill] sm:$0xff] }
 0x58a   :  { %4562 = vperm.xlu0 %6812, %v4100_v27   ;;  %v3262_v27 = vsel %vm1536_vm0, %v2688_v46, 0.0 }
 0x58b   :  { %v3528_v36 = vadd.f32 0.001, %v3336_v38  ;;  %v10430_v38 = vpop.xlane.xlu0 %3224 }
 0x58c   :  { %2975 = vadd.xlane.f32.xlu1 %v2974_v39  ;;  %v10423_v14 = vpop.xlane.xlu1 %3191  ;;  %14142 = vst [vmem:[#allocation186_spill] sm:$0xff] %v10430_v38  ;;  %v3473_v39 = vadd.f32 0.001, %v3281_v60 }
 0x58d   :  { %6900 = vrsqrt.f32 %v3528_v36  ;;  %v3283_v36 = vmul.f32 0.020408163, %v14143_v16 }
 0x58e   :  { %6902 = vrsqrt.f32 %v3471_v3 }
 0x58f   :  { %v6899_v32 = vpop.eup %6898  ;;  %v3475_v46 = vadd.f32 0.001, %v3283_v36  ;;  %v10439_v1 = vpop.xlane.xlu0 %2942  ;;  %v3914_v36 = vld [vmem:[%s13158_s3 + $0x248] sm:$0xff] }
 0x590   :  { %3263 = vadd.xlane.f32.xlu1 %v3262_v27  ;;  %v2910_v20 = vpop.xlane.xlu1 %2909  ;;  %v4102_v12 = vmul.f32 %v6899_v32, %v3910_v11  ;;  %v3285_v27 = vmul.f32 0.020408163, %v14144_v54 }
 0x591   :  { %v3338_v19 = vmul.f32 0.020408163, %v2910_v20 }
 0x592   :  { %4572 = vperm.xlu0 %6812, %v4102_v12   ;;  %v3477_v16 = vadd.f32 0.001, %v3285_v27  ;;  %v14145_v12 = vld [vmem:[#allocation149_spill] sm:$0xff] }
 0x593   :  { %v3530_v23 = vadd.f32 0.001, %v3338_v19  ;;  %v3287_v19 = vmul.f32 0.020408163, %v14145_v12  ;;  %v10442_v38 = vpop.xlane.xlu0 %3230  ;;  %v3857_v12 = vld [vmem:[%s13158_s3 + $0x80] sm:$0xff] }
 0x594   :  { %v10433_v59 = vpop.xlane.xlu1 %3197  ;;  %14146 = vst [vmem:[#allocation193_spill] sm:$0xff] %v10442_v38 }
 0x595   :  { %6904 = vrsqrt.f32 %v3530_v23 }
 0x596   :  { %6906 = vrsqrt.f32 %v3473_v39  ;;  %v3855_v39 = vld [vmem:[%s13158_s3 + $0x70] sm:$0xff] }
 0x597   :  { %v6901_v11 = vpop.eup %6900  ;;  %6908 = vrsqrt.f32 %v3475_v46  ;;  %v14147_v46 = vld [vmem:[#allocation204_spill] sm:$0xff]  ;;  %v10457_v29 = vpop.xlane.xlu0 %2948 }
 0x598   :  { %v2916_v3 = vpop.xlane.xlu1 %2915  ;;  %v4104_v60 = vmul.f32 %v6901_v11, %v3912_v49  ;;  %v6903_v20 = vpop.eup %6902  ;;  %v3479_v49 = vadd.f32 0.001, %v3287_v19  ;;  %v3289_v54 = vmul.f32 0.020408163, %v14147_v46 }
 0x599   :  { %v3340_v32 = vmul.f32 0.020408163, %v2916_v3  ;;  %v4047_v11 = vmul.f32 %v6903_v20, %v3855_v39  ;;  %v3859_v39 = vld [vmem:[%s13158_s3 + $0x90] sm:$0xff] }
 0x59a   :  { %4582 = vperm.xlu0 %6812, %v4104_v60  }
 0x59b   :  { %v3532_v23 = vadd.f32 0.001, %v3340_v32 }
 0x59c   :  { %v10444_v18 = vpop.xlane.xlu1 %3203 }
 0x59d   :  { %6910 = vrsqrt.f32 %v3532_v23  ;;  %v3481_v23 = vadd.f32 0.001, %v3289_v54 }
 0x59e   :  { %6912 = vrsqrt.f32 %v3477_v16 }
 0x59f   :  { %v6905_v27 = vpop.eup %6904  ;;  %6914 = vrsqrt.f32 %v3479_v49  ;;  %v14149_v49 = vld [vmem:[#allocation211_spill] sm:$0xff] }
 0x5a0   :  { %v6907_v3 = vpop.eup %6906  ;;  %v2922_v60 = vpop.xlane.xlu1 %2921  ;;  %v4106_v32 = vmul.f32 %v6905_v27, %v3914_v36  ;;  %v3916_v36 = vld [vmem:[%s13158_s3 + $0x258] sm:$0xff]  ;;  %v3293_v54 = vmul.f32 0.020408163, %v14149_v49 }
 0x5a1   :  { %v3342_v38 = vmul.f32 0.020408163, %v2922_v60  ;;  %4297 = vperm.xlu1 %6813, %v4047_v11   ;;  %v4049_v19 = vmul.f32 %v6907_v3, %v3857_v12  ;;  %v6909_v46 = vpop.eup %6908  ;;  %v10468_v3 = vpop.xlane.xlu0 %3236  ;;  %v3861_v12 = vld [vmem:[%s13158_s3 + $0xa0] sm:$0xff] }
 0x5a2   :  { %4592 = vperm.xlu0 %6812, %v4106_v32   ;;  %14150 = vst [vmem:[#allocation197_spill] sm:$0xff] %v10468_v3 }
 0x5a3   :  { %v3534_v16 = vadd.f32 0.001, %v3342_v38  ;;  %v4051_v38 = vmul.f32 %v6909_v46, %v3859_v39 }
 0x5a4   :  { %v10459_v20 = vpop.xlane.xlu1 %3209 }
 0x5a5   :  { %6916 = vrsqrt.f32 %v3534_v16  ;;  %4307 = vperm.xlu1 %6813, %v4049_v19   ;;  %v3485_v19 = vadd.f32 0.001, %v3293_v54  ;;  %v10474_v46 = vpop.xlane.xlu0 %2954  ;;  %v14153_v54 = vld [vmem:[#allocation227_spill] sm:$0xff] }
 0x5a6   :  { %6918 = vrsqrt.f32 %v3481_v23  ;;  %v3295_v23 = vmul.f32 0.020408163, %v14151_v57 }
 0x5a7   :  { %v6911_v27 = vpop.eup %6910  ;;  %6920 = vrsqrt.f32 %v3483_v43  ;;  %v3918_v43 = vld [vmem:[%s13158_s3 + $0x268] sm:$0xff] }
 0x5a8   :  { %v6913_v11 = vpop.eup %6912  ;;  %v2928_v60 = vpop.xlane.xlu1 %2927  ;;  %v4108_v32 = vmul.f32 %v6911_v27, %v3916_v36  ;;  %v3863_v36 = vld [vmem:[%s13158_s3 + $0xb0] sm:$0xff]  ;;  %v3487_v57 = vadd.f32 0.001, %v3295_v23  ;;  %v3297_v27 = vmul.f32 0.020408163, %v14153_v54 }
 0x5a9   :  { %v3344_v16 = vmul.f32 0.020408163, %v2928_v60  ;;  %4317 = vperm.xlu1 %6813, %v4051_v38   ;;  %v4053_v49 = vmul.f32 %v6913_v11, %v3861_v12  ;;  %v6915_v61 = vpop.eup %6914 }
 0x5aa   :  { %4602 = vperm.xlu0 %6812, %v4108_v32   ;;  %v4055_v11 = vmul.f32 %v6915_v61, %v3863_v36  ;;  %v3867_v36 = vld [vmem:[%s13158_s3 + $0xd0] sm:$0xff] }
 0x5ab   :  { %v3536_v2 = vadd.f32 0.001, %v3344_v16  ;;  %v3865_v16 = vld [vmem:[%s13158_s3 + $0xc0] sm:$0xff] }
 0x5ac   :  { %v10476_v39 = vpop.xlane.xlu1 %3215 }
 0x5ad   :  { %14152 = vst [vmem:[#allocation201_spill] sm:$0xff] %v10476_v39  ;;  %6922 = vrsqrt.f32 %v3536_v2  ;;  %4327 = vperm.xlu1 %6813, %v4053_v49   ;;  %v3489_v2 = vadd.f32 0.001, %v3297_v27  ;;  %v14154_v49 = vld [vmem:[#allocation235_spill] sm:$0xff]  ;;  %v10489_v39 = vpop.xlane.xlu0 %3242  ;;  %v14157_v27 = vld [vmem:[#allocation238_spill] sm:$0xff] }
 0x5ae   :  { %6924 = vrsqrt.f32 %v3485_v19  ;;  %v3299_v22 = vmul.f32 0.020408163, %v14154_v49  ;;  %14155 = vst [vmem:[#allocation149_spill] sm:$0xff] %v10489_v39  ;;  %v3869_v49 = vld [vmem:[%s13158_s3 + $0xe0] sm:$0xff]  ;;  %v14158_v39 = vld [vmem:[#allocation243_spill] sm:$0xff] }
 0x5af   :  { %v6917_v38 = vpop.eup %6916  ;;  %6926 = vrsqrt.f32 %v3487_v57 }
 0x5b0   :  { %v6919_v60 = vpop.eup %6918  ;;  %v2934_v32 = vpop.xlane.xlu1 %2933  ;;  %v4110_v12 = vmul.f32 %v6917_v38, %v3918_v43  ;;  %v3920_v43 = vld [vmem:[%s13158_s3 + $0x278] sm:$0xff]  ;;  %v3491_v57 = vadd.f32 0.001, %v3299_v22  ;;  %v3301_v38 = vmul.f32 0.020408163, %v14157_v27 }
 0x5b1   :  { %v3346_v3 = vmul.f32 0.020408163, %v2934_v32  ;;  %4337 = vperm.xlu1 %6813, %v4055_v11   ;;  %v4057_v23 = vmul.f32 %v6919_v60, %v3865_v16  ;;  %v6921_v54 = vpop.eup %6920  ;;  %v10500_v32 = vpop.xlane.xlu0 %2960 }
 0x5b2   :  { %4612 = vperm.xlu0 %6812, %v4110_v12  }
 0x5b3   :  { %v3538_v19 = vadd.f32 0.001, %v3346_v3  ;;  %v4059_v3 = vmul.f32 %v6921_v54, %v3867_v36  ;;  %v3871_v36 = vld [vmem:[%s13158_s3 + $0xf0] sm:$0xff] }
 0x5b4   :  { %v10491_v61 = vpop.xlane.xlu1 %3221 }
 0x5b5   :  { %14156 = vst [vmem:[#allocation204_spill] sm:$0xff] %v10491_v61  ;;  %6928 = vrsqrt.f32 %v3538_v19  ;;  %4347 = vperm.xlu1 %6813, %v4057_v23   ;;  %v3493_v23 = vadd.f32 0.001, %v3301_v38  ;;  %v14160_v38 = vld [vmem:[#allocation249_spill] sm:$0xff] }
 0x5b6   :  { %6930 = vrsqrt.f32 %v3489_v2  ;;  %v3303_v2 = vmul.f32 0.020408163, %v14158_v39  ;;  %v3305_v39 = vmul.f32 0.020408163, %v14160_v38 }
 0x5b7   :  { %v6923_v11 = vpop.eup %6922  ;;  %6932 = vrsqrt.f32 %v3491_v57 }
 0x5b8   :  { %v6925_v60 = vpop.eup %6924  ;;  %v2940_v12 = vpop.xlane.xlu1 %2939  ;;  %v4112_v16 = vmul.f32 %v6923_v11, %v3920_v43  ;;  %v3922_v43 = vld [vmem:[%s13158_s3 + $0x288] sm:$0xff]  ;;  %v3495_v57 = vadd.f32 0.001, %v3303_v2 }
 0x5b9   :  { %v3348_v19 = vmul.f32 0.020408163, %v2940_v12  ;;  %4357 = vperm.xlu1 %6813, %v4059_v3   ;;  %v4061_v27 = vmul.f32 %v6925_v60, %v3869_v49  ;;  %v6927_v61 = vpop.eup %6926  ;;  %v10515_v11 = vpop.xlane.xlu0 %3248 }
 0x5ba   :  { %4622 = vperm.xlu0 %6812, %v4112_v16   ;;  %14161 = vst [vmem:[#allocation211_spill] sm:$0xff] %v10515_v11  ;;  %v4063_v60 = vmul.f32 %v6927_v61, %v3871_v36  ;;  %v3875_v36 = vld [vmem:[%s13158_s3 + $0x110] sm:$0xff] }
 0x5bb   :  { %v3540_v22 = vadd.f32 0.001, %v3348_v19  ;;  %v3873_v19 = vld [vmem:[%s13158_s3 + $0x100] sm:$0xff] }
 0x5bc   :  { %v10506_v54 = vpop.xlane.xlu1 %3227 }
 0x5bd   :  { %14159 = vst [vmem:[#allocation207_spill] sm:$0xff] %v10506_v54  ;;  %6934 = vrsqrt.f32 %v3540_v22  ;;  %4367 = vperm.xlu1 %6813, %v4061_v27   ;;  %v3497_v27 = vadd.f32 0.001, %v3305_v39  ;;  %v10521_v11 = vpop.xlane.xlu0 %2966 }
 0x5be   :  { %6936 = vrsqrt.f32 %v3493_v23  ;;  %v3307_v23 = vmul.f32 0.020408163, %v9477_v10 }
 0x5bf   :  { %v6929_v3 = vpop.eup %6928  ;;  %6938 = vrsqrt.f32 %v3495_v57  ;;  %v3309_v57 = vmul.f32 0.020408163, %v9525_v24 }
 0x5c0   :  { %v6931_v12 = vpop.eup %6930  ;;  %v2946_v16 = vpop.xlane.xlu1 %2945  ;;  %v4114_v49 = vmul.f32 %v6929_v3, %v3922_v43  ;;  %v3924_v43 = vld [vmem:[%s13158_s3 + $0x298] sm:$0xff]  ;;  %v3499_v10 = vadd.f32 0.001, %v3307_v23 }
 0x5c1   :  { %v3350_v22 = vmul.f32 0.020408163, %v2946_v16  ;;  %4377 = vperm.xlu1 %6813, %v4063_v60   ;;  %v4065_v38 = vmul.f32 %v6931_v12, %v3873_v19  ;;  %v6933_v54 = vpop.eup %6932 }
 0x5c2   :  { %4632 = vperm.xlu0 %6812, %v4114_v49   ;;  %v4067_v3 = vmul.f32 %v6933_v54, %v3875_v36  ;;  %v3877_v49 = vld [vmem:[%s13158_s3 + $0x120] sm:$0xff]  ;;  %v3879_v36 = vld [vmem:[%s13158_s3 + $0x130] sm:$0xff] }
 0x5c3   :  { %v3542_v2 = vadd.f32 0.001, %v3350_v22  ;;  %v3501_v22 = vadd.f32 0.001, %v3309_v57 }
 0x5c4   :  { %v10523_v61 = vpop.xlane.xlu1 %3233 }
 0x5c5   :  { %6940 = vrsqrt.f32 %v3542_v2  ;;  %4387 = vperm.xlu1 %6813, %v4065_v38   ;;  %v3311_v2 = vmul.f32 0.020408163, %v9592_v25  ;;  %v10536_v38 = vpop.xlane.xlu0 %3254 }
 0x5c6   :  { %6942 = vrsqrt.f32 %v3497_v27 }
 0x5c7   :  { %v6935_v39 = vpop.eup %6934  ;;  %6944 = vrsqrt.f32 %v3499_v10  ;;  %v3503_v25 = vadd.f32 0.001, %v3311_v2  ;;  %v3313_v10 = vmul.f32 0.020408163, %v9655_v15 }
 0x5c8   :  { %v6937_v60 = vpop.eup %6936  ;;  %v2952_v12 = vpop.xlane.xlu1 %2951  ;;  %v4116_v16 = vmul.f32 %v6935_v39, %v3924_v43  ;;  %v3926_v43 = vld [vmem:[%s13158_s3 + $0x2a8] sm:$0xff] }
 0x5c9   :  { %v3352_v19 = vmul.f32 0.020408163, %v2952_v12  ;;  %4397 = vperm.xlu1 %6813, %v4067_v3   ;;  %v4069_v24 = vmul.f32 %v6937_v60, %v3877_v49  ;;  %v6939_v23 = vpop.eup %6938  ;;  %v10547_v60 = vpop.xlane.xlu0 %2972  ;;  %v3881_v49 = vld [vmem:[%s13158_s3 + $0x140] sm:$0xff] }
 0x5ca   :  { %4642 = vperm.xlu0 %6812, %v4116_v16   ;;  %v4071_v39 = vmul.f32 %v6939_v23, %v3879_v36  ;;  %v3883_v36 = vld [vmem:[%s13158_s3 + $0x150] sm:$0xff] }
 0x5cb   :  { %v3544_v27 = vadd.f32 0.001, %v3352_v19 }
 0x5cc   :  { %v10538_v54 = vpop.xlane.xlu1 %3239 }
 0x5cd   :  { %6946 = vrsqrt.f32 %v3544_v27  ;;  %4407 = vperm.xlu1 %6813, %v4069_v24   ;;  %v3505_v27 = vadd.f32 0.001, %v3313_v10  ;;  %v10562_v10 = vpop.xlane.xlu0 %3260 }
 0x5ce   :  { %6948 = vrsqrt.f32 %v3501_v22  ;;  %v3315_v22 = vmul.f32 0.020408163, %v9720_v40  ;;  %v3317_v40 = vmul.f32 0.020408163, %v9769_v5  ;;  %14162 = vst [vmem:[#allocation218_spill] sm:$0xff] %v10562_v10 }
 0x5cf   :  { %v6941_v57 = vpop.eup %6940  ;;  %6950 = vrsqrt.f32 %v3503_v25 }
 0x5d0   :  { %v6943_v3 = vpop.eup %6942  ;;  %v2958_v12 = vpop.xlane.xlu1 %2957  ;;  %v4118_v16 = vmul.f32 %v6941_v57, %v3926_v43  ;;  %v3928_v43 = vld [vmem:[%s13158_s3 + $0x2b8] sm:$0xff]  ;;  %v3507_v25 = vadd.f32 0.001, %v3315_v22 }
 0x5d1   :  { %v3354_v19 = vmul.f32 0.020408163, %v2958_v12  ;;  %4417 = vperm.xlu1 %6813, %v4071_v39   ;;  %v4073_v15 = vmul.f32 %v6943_v3, %v3881_v49  ;;  %v6945_v24 = vpop.eup %6944  ;;  %v3885_v49 = vld [vmem:[%s13158_s3 + $0x160] sm:$0xff]  ;;  %v10568_v10 = vpop.permute.xlu0 %4282 }
 0x5d2   :  { %4652 = vperm.xlu0 %6812, %v4118_v16   ;;  %v4075_v39 = vmul.f32 %v6945_v24, %v3883_v36  ;;  %v3887_v36 = vld [vmem:[%s13158_s3 + $0x170] sm:$0xff] }
 0x5d3   :  { %v3546_v2 = vadd.f32 0.001, %v3354_v19 }
 0x5d4   :  { %v10553_v23 = vpop.xlane.xlu1 %3245 }
 0x5d5   :  { %6952 = vrsqrt.f32 %v3546_v2  ;;  %4427 = vperm.xlu1 %6813, %v4073_v15   ;;  %v3509_v2 = vadd.f32 0.001, %v3317_v40 }
 0x5d6   :  { %6954 = vrsqrt.f32 %v3505_v27  ;;  %v3319_v27 = vmul.f32 0.020408163, %v9814_v58 }
 0x5d7   :  { %v6947_v57 = vpop.eup %6946  ;;  %6956 = vrsqrt.f32 %v3507_v25  ;;  %v3321_v25 = vmul.f32 0.020408163, %v9848_v28 }
 0x5d8   :  { %v6949_v3 = vpop.eup %6948  ;;  %v2964_v12 = vpop.xlane.xlu1 %2963  ;;  %v4120_v16 = vmul.f32 %v6947_v57, %v3928_v43  ;;  %v3930_v43 = vld [vmem:[%s13158_s3 + $0x2c8] sm:$0xff]  ;;  %v3511_v58 = vadd.f32 0.001, %v3319_v27 }
 0x5d9   :  { %v3356_v19 = vmul.f32 0.020408163, %v2964_v12  ;;  %4437 = vperm.xlu1 %6813, %v4075_v39   ;;  %v4077_v5 = vmul.f32 %v6949_v3, %v3885_v49  ;;  %v6951_v15 = vpop.eup %6950 }
 0x5da   :  { %4662 = vperm.xlu0 %6812, %v4120_v16   ;;  %v4079_v57 = vmul.f32 %v6951_v15, %v3887_v36  ;;  %v3889_v16 = vld [vmem:[%s13158_s3 + $0x180] sm:$0xff]  ;;  %v3891_v15 = vld [vmem:[%s13158_s3 + $0x190] sm:$0xff]  ;;  %v3932_v36 = vld [vmem:[%s13158_s3 + $0x2d8] sm:$0xff] }
 0x5db   :  { %v3548_v22 = vadd.f32 0.001, %v3356_v19  ;;  %v3513_v19 = vadd.f32 0.001, %v3321_v25 }
 0x5dc   :  { %v10570_v24 = vpop.xlane.xlu1 %3251 }
 0x5dd   :  { %6958 = vrsqrt.f32 %v3548_v22  ;;  %4447 = vperm.xlu1 %6813, %v4077_v5   ;;  %v3323_v22 = vmul.f32 0.020408163, %v9998_v6  ;;  %v10583_v5 = vpop.permute.xlu0 %4292  ;;  %v3325_v6 = vmul.f32 0.020408163, %v10034_v4  ;;  %v3895_v4 = vld [vmem:[%s13158_s3 + $0x1b0] sm:$0xff] }
 0x5de   :  { %6960 = vrsqrt.f32 %v3509_v2 }
 0x5df   :  { %v6953_v40 = vpop.eup %6952  ;;  %6962 = vrsqrt.f32 %v3511_v58 }
 0x5e0   :  { %v6955_v39 = vpop.eup %6954  ;;  %v2970_v3 = vpop.xlane.xlu1 %2969  ;;  %v4122_v12 = vmul.f32 %v6953_v40, %v3930_v43  ;;  %v3515_v43 = vadd.f32 0.001, %v3323_v22  ;;  %v3934_v22 = vld [vmem:[%s13158_s3 + $0x2e8] sm:$0xff] }
 0x5e1   :  { %v3358_v49 = vmul.f32 0.020408163, %v2970_v3  ;;  %4457 = vperm.xlu1 %6813, %v4079_v57   ;;  %v4081_v28 = vmul.f32 %v6955_v39, %v3889_v16  ;;  %v6957_v27 = vpop.eup %6956  ;;  %v10592_v57 = vpop.permute.xlu0 %4302  ;;  %v3893_v3 = vld [vmem:[%s13158_s3 + $0x1a0] sm:$0xff]  ;;  %v3327_v16 = vmul.f32 0.020408163, %v10075_v17 }
 0x5e2   :  { %4672 = vperm.xlu0 %6812, %v4122_v12   ;;  %v4083_v25 = vmul.f32 %v6957_v27, %v3891_v15  ;;  %v3517_v12 = vadd.f32 0.001, %v3325_v6  ;;  %v3897_v6 = vld [vmem:[%s13158_s3 + $0x1c0] sm:$0xff] }
 0x5e3   :  { %v3550_v2 = vadd.f32 0.001, %v3358_v49 }
 0x5e5   :  { %6964 = vrsqrt.f32 %v3550_v2  ;;  %4467 = vperm.xlu1 %6813, %v4081_v28   ;;  %v3519_v2 = vadd.f32 0.001, %v3327_v16  ;;  %v3329_v28 = vmul.f32 0.020408163, %v10109_v26  ;;  %v10605_v27 = vpop.permute.xlu0 %4312  ;;  %v3899_v26 = vld [vmem:[%s13158_s3 + $0x1d0] sm:$0xff] }
 0x5e6   :  { %6966 = vrsqrt.f32 %v3513_v19  ;;  %v3333_v16 = vmul.f32 0.020408163, %v10288_v45 }
 0x5e7   :  { %v6959_v58 = vpop.eup %6958  ;;  %6968 = vrsqrt.f32 %v3515_v43 }
 0x5e8   :  { %v6961_v40 = vpop.eup %6960  ;;  %v4124_v39 = vmul.f32 %v6959_v58, %v3932_v36  ;;  %6970 = vrsqrt.f32 %v3517_v12  ;;  %v3521_v58 = vadd.f32 0.001, %v3329_v28 }
 0x5e9   :  { %4477 = vperm.xlu1 %6813, %v4083_v25   ;;  %v4085_v49 = vmul.f32 %v6961_v40, %v3893_v3  ;;  %v6963_v19 = vpop.eup %6962  ;;  %6972 = vrsqrt.f32 %v3519_v2  ;;  %v3331_v25 = vmul.f32 0.020408163, %v10140_v33  ;;  %v10611_v3 = vpop.permute.xlu0 %4322  ;;  %v3901_v33 = vld [vmem:[%s13158_s3 + $0x1e0] sm:$0xff] }
 0x5ea   :  { %4682 = vperm.xlu0 %6812, %v4124_v39   ;;  %v4087_v17 = vmul.f32 %v6963_v19, %v3895_v4  ;;  %14163 = vst [vmem:[#allocation227_spill] sm:$0xff] %v10611_v3  ;;  %6974 = vrsqrt.f32 %v3521_v58  ;;  %v3525_v4 = vadd.f32 0.001, %v3333_v16  ;;  %v3341_v16 = vmul.f32 0.020408163, %v10375_v44  ;;  %v3911_v44 = vld [vmem:[%s13158_s3 + $0x230] sm:$0xff] }
 0x5eb   :  { %v3523_v12 = vadd.f32 0.001, %v3331_v25 }
 0x5ed   :  { %4487 = vperm.xlu1 %6813, %v4085_v49   ;;  %6976 = vrsqrt.f32 %v3523_v12  ;;  %v10621_v2 = vpop.permute.xlu0 %4332  ;;  %v3907_v12 = vld [vmem:[%s13158_s3 + $0x210] sm:$0xff] }
 0x5ee   :  { %14164 = vst [vmem:[#allocation235_spill] sm:$0xff] %v10621_v2  ;;  %6978 = vrsqrt.f32 %v3525_v4  ;;  %v3909_v4 = vld [vmem:[%s13158_s3 + $0x220] sm:$0xff] }
 0x5ef   :  { %v6965_v15 = vpop.eup %6964 }
 0x5f0   :  { %v6967_v36 = vpop.eup %6966  ;;  %v4126_v43 = vmul.f32 %v6965_v15, %v3934_v22  ;;  %v3335_v22 = vmul.f32 0.020408163, %v10312_v8  ;;  %v3905_v8 = vld [vmem:[%s13158_s3 + $0x200] sm:$0xff] }
 0x5f1   :  { %4497 = vperm.xlu1 %6813, %v4087_v17   ;;  %v4089_v40 = vmul.f32 %v6967_v36, %v3897_v6  ;;  %v6969_v39 = vpop.eup %6968  ;;  %v3903_v17 = vld [vmem:[%s13158_s3 + $0x1f0] sm:$0xff]  ;;  %v3337_v36 = vmul.f32 0.020408163, %v10339_v62  ;;  %v10627_v58 = vpop.permute.xlu0 %4342 }
 0x5f2   :  { %4692 = vperm.xlu0 %6812, %v4126_v43   ;;  %v4091_v49 = vmul.f32 %v6969_v39, %v3899_v26  ;;  %v6971_v19 = vpop.eup %6970  ;;  %v3527_v45 = vadd.f32 0.001, %v3335_v22  ;;  %14165 = vst [vmem:[#allocation238_spill] sm:$0xff] %v10627_v58  ;;  %v3343_v22 = vmul.f32 0.020408163, %v10384_v37  ;;  %v3913_v37 = vld [vmem:[%s13158_s3 + $0x240] sm:$0xff] }
 0x5f3   :  { %v4093_v28 = vmul.f32 %v6971_v19, %v3901_v33  ;;  %v6973_v15 = vpop.eup %6972  ;;  %v3529_v25 = vadd.f32 0.001, %v3337_v36  ;;  %v3345_v36 = vmul.f32 0.020408163, %v10398_v30  ;;  %v3915_v30 = vld [vmem:[%s13158_s3 + $0x250] sm:$0xff] }
 0x5f4   :  { %v4095_v43 = vmul.f32 %v6973_v15, %v3903_v17  ;;  %v6975_v6 = vpop.eup %6974  ;;  %6980 = vrsqrt.f32 %v3527_v45  ;;  %v3535_v45 = vadd.f32 0.001, %v3343_v22 }
 0x5f5   :  { %4507 = vperm.xlu1 %6813, %v4089_v40   ;;  %v3339_v40 = vmul.f32 0.020408163, %v10361_v50  ;;  %v4097_v39 = vmul.f32 %v6975_v6, %v3905_v8  ;;  %6982 = vrsqrt.f32 %v3529_v25  ;;  %v3533_v50 = vadd.f32 0.001, %v3341_v16 }
 0x5f6   :  { %v3537_v25 = vadd.f32 0.001, %v3345_v36 }
 0x5f7   :  { %v6977_v26 = vpop.eup %6976  ;;  %v3531_v62 = vadd.f32 0.001, %v3339_v40  ;;  %v3347_v40 = vmul.f32 0.020408163, %v10418_v56 }
 0x5f8   :  { %v4099_v19 = vmul.f32 %v6977_v26, %v3907_v12  ;;  %v6979_v33 = vpop.eup %6978 }
 0x5f9   :  { %4517 = vperm.xlu1 %6813, %v4091_v49   ;;  %v10637_v49 = vpop.permute.xlu0 %4352  ;;  %6984 = vrsqrt.f32 %v3531_v62  ;;  %v3349_v62 = vmul.f32 0.020408163, %v10439_v1  ;;  %v3351_v1 = vmul.f32 0.020408163, %v10457_v29 }
 0x5fa   :  { %14166 = vst [vmem:[#allocation243_spill] sm:$0xff] %v10637_v49  ;;  %6986 = vrsqrt.f32 %v3533_v50 }
 0x5fb   :  { %6988 = vrsqrt.f32 %v3535_v45 }
 0x5fc   :  { %6990 = vrsqrt.f32 %v3537_v25 }
 0x5fd   :  { %4527 = vperm.xlu1 %6813, %v4093_v28   ;;  %v4101_v28 = vmul.f32 %v6979_v33, %v3909_v4  ;;  %v10643_v17 = vpop.permute.xlu0 %4362  ;;  %v14169_v33 = vld [vmem:[#allocation103_spill] sm:$0xff] }
 0x5fe   :  { %v6981_v15 = vpop.eup %6980  ;;  %14167 = vst [vmem:[#allocation249_spill] sm:$0xff] %v10643_v17  ;;  %v3362_v4 = vmul.f32 0.020408163, %v14169_v33 }
 0x5ff   :  { %v4103_v6 = vmul.f32 %v6981_v15, %v3911_v44  ;;  %v6983_v8 = vpop.eup %6982  ;;  %v3541_v15 = vadd.f32 0.001, %v3349_v62  ;;  %v3353_v62 = vmul.f32 0.020408163, %v10474_v46  ;;  %v3355_v46 = vmul.f32 0.020408163, %v10500_v32 }
 0x600   :  { %v4105_v26 = vmul.f32 %v6983_v8, %v3913_v37  ;;  %v3554_v36 = vadd.f32 0.001, %v3362_v4  ;;  %v14171_v37 = vld [vmem:[#allocation160_spill] sm:$0xff] }
 0x601   :  { %4537 = vperm.xlu1 %6813, %v4095_v43   ;;  %v10649_v43 = vpop.xlane.xlu1 %3257  ;;  %v3364_v25 = vmul.f32 0.020408163, %v14171_v37  ;;  %v3936_v32 = vld [vmem:[%s13158_s3 + $0x2f8] sm:$0xff] }
 0x603   :  { %v6985_v12 = vpop.eup %6984  ;;  %v3556_v4 = vadd.f32 0.001, %v3364_v25  ;;  %v3923_v25 = vld [vmem:[%s13158_s3 + $0x290] sm:$0xff] }
 0x604   :  { %v4107_v50 = vmul.f32 %v6985_v12, %v3915_v30  ;;  %v6987_v22 = vpop.eup %6986  ;;  %v3543_v30 = vadd.f32 0.001, %v3351_v1 }
 0x605   :  { %4547 = vperm.xlu1 %6813, %v4097_v39   ;;  %v10655_v39 = vpop.permute.xlu0 %4372  ;;  %v10661_v16 = vpop.permute.xlu1 %4287 }
 0x606   :  { %14168 = vst [vmem:[#allocation281_spill] sm:$0xff] %v10655_v39  ;;  %v6989_v8 = vpop.eup %6988 }
 0x607   :  { %v6991_v33 = vpop.eup %6990 }
 0x609   :  { %4557 = vperm.xlu1 %6813, %v4099_v19   ;;  %v3539_v19 = vadd.f32 0.001, %v3347_v40  ;;  %v10664_v56 = vpop.permute.xlu0 %4382 }
 0x60a   :  { %14170 = vst [vmem:[#allocation103_spill] sm:$0xff] %v10664_v56  ;;  %v14182_v56 = vld [vmem:[#allocation158_spill] sm:$0xff] }
 0x60b   :  { %6992 = vrsqrt.f32 %v3539_v19 }
 0x60c   :  { %6994 = vrsqrt.f32 %v3541_v15 }
 0x60d   :  { %4567 = vperm.xlu1 %6813, %v4101_v28   ;;  %v3917_v28 = vld [vmem:[%s13158_s3 + $0x260] sm:$0xff]  ;;  %v10677_v19 = vpop.permute.xlu0 %4392 }
 0x60e   :  { %14172 = vst [vmem:[#allocation160_spill] sm:$0xff] %v10677_v19 }
 0x611   :  { %4577 = vperm.xlu1 %6813, %v4103_v6   ;;  %v4109_v6 = vmul.f32 %v6987_v22, %v3917_v28  ;;  %v3921_v28 = vld [vmem:[%s13158_s3 + $0x280] sm:$0xff]  ;;  %v10687_v37 = vpop.permute.xlu0 %4402 }
 0x612   :  { %v4113_v1 = vmul.f32 %v6991_v33, %v3921_v28  ;;  %v3925_v28 = vld [vmem:[%s13158_s3 + $0x2a0] sm:$0xff] }
 0x615   :  { %4587 = vperm.xlu1 %6813, %v4105_v26   ;;  %v3919_v26 = vld [vmem:[%s13158_s3 + $0x270] sm:$0xff] }
 0x616   :  { %v4111_v29 = vmul.f32 %v6989_v8, %v3919_v26  ;;  %v14174_v8 = vld [vmem:[#allocation174_spill] sm:$0xff]  ;;  %v3547_v26 = vadd.f32 0.001, %v3355_v46 }
 0x619   :  { %4597 = vperm.xlu1 %6813, %v4107_v50   ;;  %v2976_v44 = vpop.xlane.xlu1 %2975  ;;  %v14173_v50 = vld [vmem:[#allocation116_spill] sm:$0xff] }
 0x61a   :  { %v3360_v45 = vmul.f32 0.020408163, %v2976_v44  ;;  %v3366_v22 = vmul.f32 0.020408163, %v14173_v50  ;;  %v3545_v44 = vadd.f32 0.001, %v3353_v62 }
 0x61b   :  { %14175 = vst [vmem:[#allocation116_spill] sm:$0xff] %v10687_v37  ;;  %v14176_v50 = vld [vmem:[#allocation129_spill] sm:$0xff]  ;;  %v10705_v37 = vpop.permute.xlu0 %4412 }
 0x61c   :  { %v3552_v40 = vadd.f32 0.001, %v3360_v45  ;;  %v6993_v45 = vpop.eup %6992  ;;  %14177 = vst [vmem:[#allocation174_spill] sm:$0xff] %v10705_v37 }
 0x61d   :  { %4607 = vperm.xlu1 %6813, %v4109_v6   ;;  %v10674_v12 = vpop.xlane.xlu1 %3263  ;;  %v3558_v6 = vadd.f32 0.001, %v3366_v22  ;;  %v6995_v62 = vpop.eup %6994  ;;  %v3370_v22 = vmul.f32 0.020408163, %v14176_v50 }
 0x61e   :  { %6996 = vrsqrt.f32 %v3552_v40 }
 0x61f   :  { %6998 = vrsqrt.f32 %v3554_v36  ;;  %v3368_v36 = vmul.f32 0.020408163, %v14174_v8  ;;  %v3359_v8 = vmul.f32 0.020408163, %v10547_v60 }
 0x620   :  { %7000 = vrsqrt.f32 %v3543_v30  ;;  %v3357_v30 = vmul.f32 0.020408163, %v10521_v11 }
 0x621   :  { %4617 = vperm.xlu1 %6813, %v4111_v29   ;;  %v10683_v15 = vpop.permute.xlu1 %4297  ;;  %7002 = vrsqrt.f32 %v3556_v4  ;;  %v4115_v29 = vmul.f32 %v6993_v45, %v3923_v25  ;;  %v3560_v4 = vadd.f32 0.001, %v3368_v36  ;;  %v3938_v45 = vld [vmem:[%s13158_s3 + $0x308] sm:$0xff]  ;;  %v3562_v25 = vadd.f32 0.001, %v3370_v22 }
 0x622   :  { %7004 = vrsqrt.f32 %v3545_v44  ;;  %v3551_v19 = vadd.f32 0.001, %v3359_v8 }
 0x623   :  { %7006 = vrsqrt.f32 %v3558_v6  ;;  %v4117_v6 = vmul.f32 %v6995_v62, %v3925_v28  ;;  %v3940_v62 = vld [vmem:[%s13158_s3 + $0x318] sm:$0xff] }
 0x624   :  { %7008 = vrsqrt.f32 %v3547_v26  ;;  %v3927_v26 = vld [vmem:[%s13158_s3 + $0x2b0] sm:$0xff] }
 0x625   :  { %4627 = vperm.xlu1 %6813, %v4113_v1   ;;  %v10692_v40 = vpop.permute.xlu1 %4307  ;;  %v3549_v1 = vadd.f32 0.001, %v3357_v30  ;;  %7010 = vrsqrt.f32 %v3560_v4 }
 0x627   :  { %7012 = vrsqrt.f32 %v3549_v1 }
 0x628   :  { %v6997_v33 = vpop.eup %6996  ;;  %7014 = vrsqrt.f32 %v3562_v25 }
 0x629   :  { %4637 = vperm.xlu1 %6813, %v4115_v29   ;;  %v10702_v44 = vpop.permute.xlu1 %4317  ;;  %v4128_v46 = vmul.f32 %v6997_v33, %v3936_v32  ;;  %v6999_v11 = vpop.eup %6998  ;;  %v14178_v29 = vld [vmem:[#allocation180_spill] sm:$0xff]  ;;  %v14179_v33 = vld [vmem:[#allocation151_spill] sm:$0xff]  ;;  %7016 = vrsqrt.f32 %v3551_v19 }
 0x62a   :  { %v7001_v36 = vpop.eup %7000  ;;  %v3372_v50 = vmul.f32 0.020408163, %v14178_v29  ;;  %v4130_v60 = vmul.f32 %v6999_v11, %v3938_v45  ;;  %v3361_v37 = vmul.f32 0.020408163, %v14179_v33  ;;  %v3929_v11 = vld [vmem:[%s13158_s3 + $0x2c0] sm:$0xff] }
 0x62b   :  { %4702 = vperm.xlu0 %6812, %v4128_v46   ;;  %v7003_v32 = vpop.eup %7002  ;;  %v4119_v4 = vmul.f32 %v7001_v36, %v3927_v26  ;;  %v14180_v46 = vld [vmem:[#allocation184_spill] sm:$0xff]  ;;  %v3942_v36 = vld [vmem:[%s13158_s3 + $0x328] sm:$0xff] }
 0x62c   :  { %v7005_v22 = vpop.eup %7004  ;;  %v3564_v28 = vadd.f32 0.001, %v3372_v50  ;;  %v3374_v29 = vmul.f32 0.020408163, %v14180_v46  ;;  %v4132_v8 = vmul.f32 %v7003_v32, %v3940_v62  ;;  %v3553_v33 = vadd.f32 0.001, %v3361_v37 }
 0x62d   :  { %4647 = vperm.xlu1 %6813, %v4117_v6   ;;  %v10714_v30 = vpop.permute.xlu1 %4327  ;;  %v10721_v6 = vpop.permute.xlu0 %4422  ;;  %v4121_v25 = vmul.f32 %v7005_v22, %v3929_v11  ;;  %v14183_v46 = vld [vmem:[#allocation192_spill] sm:$0xff]  ;;  %v3931_v32 = vld [vmem:[%s13158_s3 + $0x2d0] sm:$0xff] }
 0x62e   :  { %14181 = vst [vmem:[#allocation129_spill] sm:$0xff] %v10721_v6  ;;  %v7007_v45 = vpop.eup %7006  ;;  %7018 = vrsqrt.f32 %v3564_v28  ;;  %v3566_v26 = vadd.f32 0.001, %v3374_v29  ;;  %v3376_v6 = vmul.f32 0.020408163, %v14183_v46  ;;  %v3944_v22 = vld [vmem:[%s13158_s3 + $0x338] sm:$0xff] }
 0x62f   :  { %4712 = vperm.xlu0 %6812, %v4130_v60   ;;  %v3363_v60 = vmul.f32 0.020408163, %v14182_v56  ;;  %v7009_v50 = vpop.eup %7008  ;;  %v4134_v56 = vmul.f32 %v7007_v45, %v3942_v36  ;;  %7020 = vrsqrt.f32 %v3553_v33  ;;  %v3933_v45 = vld [vmem:[%s13158_s3 + $0x2e0] sm:$0xff] }
 0x630   :  { %v7011_v19 = vpop.eup %7010  ;;  %v4123_v28 = vmul.f32 %v7009_v50, %v3931_v32  ;;  %7022 = vrsqrt.f32 %v3566_v26  ;;  %v3568_v11 = vadd.f32 0.001, %v3376_v6  ;;  %v3946_v50 = vld [vmem:[%s13158_s3 + $0x348] sm:$0xff] }
 0x631   :  { %4657 = vperm.xlu1 %6813, %v4119_v4   ;;  %v10726_v1 = vpop.permute.xlu1 %4337  ;;  %v3555_v62 = vadd.f32 0.001, %v3363_v60  ;;  %v14184_v4 = vld [vmem:[#allocation166_spill] sm:$0xff]  ;;  %v7013_v29 = vpop.eup %7012  ;;  %v4136_v60 = vmul.f32 %v7011_v19, %v3944_v22  ;;  %v3935_v19 = vld [vmem:[%s13158_s3 + $0x2f0] sm:$0xff] }
 0x632   :  { %v3365_v39 = vmul.f32 0.020408163, %v14184_v4  ;;  %v7015_v36 = vpop.eup %7014  ;;  %v4125_v6 = vmul.f32 %v7013_v29, %v3933_v45 }
 0x633   :  { %4722 = vperm.xlu0 %6812, %v4132_v8   ;;  %v10739_v8 = vpop.permute.xlu0 %4432  ;;  %7024 = vrsqrt.f32 %v3555_v62  ;;  %v7017_v26 = vpop.eup %7016  ;;  %v4138_v62 = vmul.f32 %v7015_v36, %v3946_v50  ;;  %v3937_v36 = vld [vmem:[%s13158_s3 + $0x300] sm:$0xff] }
 0x634   :  { %14185 = vst [vmem:[#allocation180_spill] sm:$0xff] %v10739_v8  ;;  %v3557_v4 = vadd.f32 0.001, %v3365_v39  ;;  %v14187_v8 = vld [vmem:[#allocation172_spill] sm:$0xff]  ;;  %7026 = vrsqrt.f32 %v3568_v11 }
 0x635   :  { %4667 = vperm.xlu1 %6813, %v4121_v25   ;;  %v10736_v37 = vpop.permute.xlu1 %4347  ;;  %v14186_v25 = vld [vmem:[#allocation210_spill] sm:$0xff]  ;;  %v3367_v17 = vmul.f32 0.020408163, %v14187_v8  ;;  %v3948_v11 = vld [vmem:[%s13158_s3 + $0x358] sm:$0xff] }
 0x636   :  { %v3378_v46 = vmul.f32 0.020408163, %v14186_v25  ;;  %7028 = vrsqrt.f32 %v3557_v4 }
 0x637   :  { %4732 = vperm.xlu0 %6812, %v4134_v56   ;;  %v14188_v56 = vld [vmem:[#allocation217_spill] sm:$0xff]  ;;  %v3559_v22 = vadd.f32 0.001, %v3367_v17 }
 0x638   :  { %v3570_v32 = vadd.f32 0.001, %v3378_v46  ;;  %v3380_v25 = vmul.f32 0.020408163, %v14188_v56  ;;  %v7019_v8 = vpop.eup %7018  ;;  %v4127_v46 = vmul.f32 %v7017_v26, %v3935_v19  ;;  %v3950_v26 = vld [vmem:[%s13158_s3 + $0x368] sm:$0xff] }
 0x639   :  { %4677 = vperm.xlu1 %6813, %v4123_v28   ;;  %v10748_v33 = vpop.permute.xlu1 %4357  ;;  %v10755_v28 = vpop.permute.xlu0 %4442  ;;  %v4140_v17 = vmul.f32 %v7019_v8, %v3948_v11  ;;  %v14194_v19 = vld [vmem:[#allocation234_spill] sm:$0xff]  ;;  %v3939_v8 = vld [vmem:[%s13158_s3 + $0x310] sm:$0xff] }
 0x63a   :  { %14189 = vst [vmem:[#allocation151_spill] sm:$0xff] %v10755_v28  ;;  %v7021_v45 = vpop.eup %7020  ;;  %7030 = vrsqrt.f32 %v3570_v32  ;;  %v3572_v56 = vadd.f32 0.001, %v3380_v25  ;;  %v14191_v28 = vld [vmem:[#allocation226_spill] sm:$0xff] }
 0x63b   :  { %4742 = vperm.xlu0 %6812, %v4136_v60   ;;  %v14190_v60 = vld [vmem:[#allocation176_spill] sm:$0xff]  ;;  %v3382_v49 = vmul.f32 0.020408163, %v14191_v28  ;;  %v7023_v50 = vpop.eup %7022  ;;  %7032 = vrsqrt.f32 %v3559_v22  ;;  %v4129_v32 = vmul.f32 %v7021_v45, %v3937_v36 }
 0x63c   :  { %v3369_v29 = vmul.f32 0.020408163, %v14190_v60  ;;  %v14192_v60 = vld [vmem:[#allocation178_spill] sm:$0xff]  ;;  %7034 = vrsqrt.f32 %v3572_v56  ;;  %v3952_v45 = vld [vmem:[%s13158_s3 + $0x378] sm:$0xff] }
 0x63d   :  { %4687 = vperm.xlu1 %6813, %v4125_v6   ;;  %v10760_v39 = vpop.permute.xlu1 %4367  ;;  %v3371_v58 = vmul.f32 0.020408163, %v14192_v60  ;;  %v7025_v25 = vpop.eup %7024  ;;  %v3574_v28 = vadd.f32 0.001, %v3382_v49 }
 0x63e   :  { %v3561_v6 = vadd.f32 0.001, %v3369_v29  ;;  %v4142_v29 = vmul.f32 %v7023_v50, %v3950_v26  ;;  %v7027_v11 = vpop.eup %7026  ;;  %v4131_v49 = vmul.f32 %v7025_v25, %v3939_v8  ;;  %v3941_v50 = vld [vmem:[%s13158_s3 + $0x320] sm:$0xff] }
 0x63f   :  { %4752 = vperm.xlu0 %6812, %v4138_v62   ;;  %v10773_v62 = vpop.permute.xlu0 %4452  ;;  %v3563_v60 = vadd.f32 0.001, %v3371_v58 }
 0x640   :  { %14193 = vst [vmem:[#allocation184_spill] sm:$0xff] %v10773_v62  ;;  %7036 = vrsqrt.f32 %v3561_v6  ;;  %v14195_v62 = vld [vmem:[#allocation182_spill] sm:$0xff]  ;;  %v7029_v56 = vpop.eup %7028  ;;  %v4144_v6 = vmul.f32 %v7027_v11, %v3952_v45  ;;  %v3943_v11 = vld [vmem:[%s13158_s3 + $0x330] sm:$0xff] }
 0x641   :  { %4697 = vperm.xlu1 %6813, %v4127_v46   ;;  %v10770_v4 = vpop.permute.xlu1 %4377  ;;  %v3384_v46 = vmul.f32 0.020408163, %v14194_v19  ;;  %v3373_v2 = vmul.f32 0.020408163, %v14195_v62  ;;  %7038 = vrsqrt.f32 %v3574_v28  ;;  %v3954_v28 = vld [vmem:[%s13158_s3 + $0x388] sm:$0xff] }
 0x642   :  { %7040 = vrsqrt.f32 %v3563_v60 }
 0x643   :  { %4762 = vperm.xlu0 %6812, %v4140_v17   ;;  %v3576_v36 = vadd.f32 0.001, %v3384_v46  ;;  %v14196_v17 = vld [vmem:[#allocation237_spill] sm:$0xff]  ;;  %v3565_v26 = vadd.f32 0.001, %v3373_v2  ;;  %v4133_v46 = vmul.f32 %v7029_v56, %v3941_v50  ;;  %v3956_v56 = vld [vmem:[%s13158_s3 + $0x398] sm:$0xff] }
 0x644   :  { %v3386_v19 = vmul.f32 0.020408163, %v14196_v17  ;;  %v7031_v62 = vpop.eup %7030  ;;  %v14204_v50 = vld [vmem:[#allocation248_spill] sm:$0xff] }
 0x645   :  { %4707 = vperm.xlu1 %6813, %v4129_v32   ;;  %v10782_v22 = vpop.permute.xlu1 %4387  ;;  %v10789_v32 = vpop.permute.xlu0 %4462  ;;  %7042 = vrsqrt.f32 %v3576_v36  ;;  %v4146_v2 = vmul.f32 %v7031_v62, %v3954_v28  ;;  %v3945_v62 = vld [vmem:[%s13158_s3 + $0x340] sm:$0xff] }
 0x646   :  { %14197 = vst [vmem:[#allocation158_spill] sm:$0xff] %v10789_v32  ;;  %v7033_v8 = vpop.eup %7032  ;;  %v3578_v17 = vadd.f32 0.001, %v3386_v19  ;;  %v14200_v32 = vld [vmem:[#allocation242_spill] sm:$0xff]  ;;  %7044 = vrsqrt.f32 %v3565_v26 }
 0x647   :  { %4772 = vperm.xlu0 %6812, %v4142_v29   ;;  %v14199_v29 = vld [vmem:[#allocation189_spill] sm:$0xff]  ;;  %v3388_v3 = vmul.f32 0.020408163, %v14200_v32  ;;  %v7035_v45 = vpop.eup %7034  ;;  %v4135_v36 = vmul.f32 %v7033_v8, %v3943_v11 }
 0x648   :  { %v3375_v25 = vmul.f32 0.020408163, %v14199_v29  ;;  %v14202_v29 = vld [vmem:[#allocation194_spill] sm:$0xff]  ;;  %7046 = vrsqrt.f32 %v3578_v17 }
 0x649   :  { %4717 = vperm.xlu1 %6813, %v4131_v49   ;;  %v10794_v58 = vpop.permute.xlu1 %4397  ;;  %v3580_v32 = vadd.f32 0.001, %v3388_v3  ;;  %v3958_v3 = vld [vmem:[%s13158_s3 + $0x3a8] sm:$0xff] }
 0x64a   :  { %14198 = vst [vmem:[#allocation192_spill] sm:$0xff] %v10794_v58  ;;  %v3567_v49 = vadd.f32 0.001, %v3375_v25  ;;  %v3377_v58 = vmul.f32 0.020408163, %v14202_v29  ;;  %v7037_v19 = vpop.eup %7036  ;;  %v4148_v25 = vmul.f32 %v7035_v45, %v3956_v56  ;;  %v3947_v45 = vld [vmem:[%s13158_s3 + $0x350] sm:$0xff] }
 0x64b   :  { %4782 = vperm.xlu0 %6812, %v4144_v6   ;;  %v10807_v6 = vpop.permute.xlu0 %4472  ;;  %v7039_v28 = vpop.eup %7038  ;;  %v4137_v8 = vmul.f32 %v7037_v19, %v3945_v62  ;;  %v3960_v19 = vld [vmem:[%s13158_s3 + $0x3b8] sm:$0xff] }
 0x64c   :  { %14203 = vst [vmem:[#allocation210_spill] sm:$0xff] %v10807_v6  ;;  %7048 = vrsqrt.f32 %v3567_v49  ;;  %v3569_v29 = vadd.f32 0.001, %v3377_v58  ;;  %v14206_v6 = vld [vmem:[#allocation198_spill] sm:$0xff]  ;;  %v7041_v17 = vpop.eup %7040  ;;  %v4150_v49 = vmul.f32 %v7039_v28, %v3958_v3  ;;  %v3949_v28 = vld [vmem:[%s13158_s3 + $0x360] sm:$0xff] }
 0x64d   :  { %4727 = vperm.xlu1 %6813, %v4133_v46   ;;  %v10804_v60 = vpop.permute.xlu1 %4407  ;;  %v3390_v46 = vmul.f32 0.020408163, %v14204_v50  ;;  %7050 = vrsqrt.f32 %v3580_v32  ;;  %v4139_v32 = vmul.f32 %v7041_v17, %v3947_v45  ;;  %v3962_v17 = vld [vmem:[%s13158_s3 + $0x3c8] sm:$0xff] }
 0x64e   :  { %14201 = vst [vmem:[#allocation166_spill] sm:$0xff] %v10804_v60  ;;  %v3379_v60 = vmul.f32 0.020408163, %v14206_v6  ;;  %7052 = vrsqrt.f32 %v3569_v29 }
 0x64f   :  { %4792 = vperm.xlu0 %6812, %v4146_v2   ;;  %v10819_v2 = vpop.permute.xlu0 %4482  ;;  %v3582_v11 = vadd.f32 0.001, %v3390_v46  ;;  %v7043_v6 = vpop.eup %7042 }
 0x650   :  { %14207 = vst [vmem:[#allocation217_spill] sm:$0xff] %v10819_v2  ;;  %v3571_v56 = vadd.f32 0.001, %v3379_v60  ;;  %v14210_v2 = vld [vmem:[#allocation203_spill] sm:$0xff]  ;;  %v7045_v46 = vpop.eup %7044  ;;  %v4152_v29 = vmul.f32 %v7043_v6, %v3960_v19 }
 0x651   :  { %4737 = vperm.xlu1 %6813, %v4135_v36   ;;  %v10816_v26 = vpop.permute.xlu1 %4417  ;;  %v14208_v36 = vld [vmem:[#allocation251_spill] sm:$0xff]  ;;  %7054 = vrsqrt.f32 %v3582_v11  ;;  %v4141_v11 = vmul.f32 %v7045_v46, %v3949_v28  ;;  %v3964_v46 = vld [vmem:[%s13158_s3 + $0x3d8] sm:$0xff]  ;;  %v3398_v28 = vmul.f32 0.020408163, %v9649_v63 }
 0x652   :  { %14205 = vst [vmem:[#allocation172_spill] sm:$0xff] %v10816_v26  ;;  %v3392_v50 = vmul.f32 0.020408163, %v14208_v36  ;;  %v3381_v26 = vmul.f32 0.020408163, %v14210_v2  ;;  %v7047_v2 = vpop.eup %7046  ;;  %7056 = vrsqrt.f32 %v3571_v56  ;;  %v3951_v6 = vld [vmem:[%s13158_s3 + $0x370] sm:$0xff] }
 0x653   :  { %4802 = vperm.xlu0 %6812, %v4148_v25   ;;  %v10831_v25 = vpop.permute.xlu0 %4492  ;;  %v4154_v56 = vmul.f32 %v7047_v2, %v3962_v17  ;;  %v3953_v2 = vld [vmem:[%s13158_s3 + $0x380] sm:$0xff] }
 0x654   :  { %14211 = vst [vmem:[#allocation226_spill] sm:$0xff] %v10831_v25  ;;  %v3584_v62 = vadd.f32 0.001, %v3392_v50  ;;  %v3573_v3 = vadd.f32 0.001, %v3381_v26  ;;  %v14213_v25 = vld [vmem:[#allocation152_spill] sm:$0xff] }
 0x655   :  { %4747 = vperm.xlu1 %6813, %v4137_v8   ;;  %v10828_v58 = vpop.permute.xlu1 %4427  ;;  %v14212_v8 = vld [vmem:[#allocation253_spill] sm:$0xff] }
 0x656   :  { %14209 = vst [vmem:[#allocation176_spill] sm:$0xff] %v10828_v58  ;;  %v3394_v36 = vmul.f32 0.020408163, %v14212_v8  ;;  %v3383_v58 = vmul.f32 0.020408163, %v14213_v25  ;;  %v7049_v50 = vpop.eup %7048  ;;  %7058 = vrsqrt.f32 %v3584_v62  ;;  %v14215_v8 = vld [vmem:[#allocation205_spill] sm:$0xff] }
 0x657   :  { %4812 = vperm.xlu0 %6812, %v4150_v49   ;;  %v10843_v49 = vpop.permute.xlu0 %4502  ;;  %v7051_v25 = vpop.eup %7050  ;;  %7060 = vrsqrt.f32 %v3573_v3 }
 0x658   :  { %14214 = vst [vmem:[#allocation178_spill] sm:$0xff] %v10843_v49  ;;  %v3586_v45 = vadd.f32 0.001, %v3394_v36  ;;  %v3575_v19 = vadd.f32 0.001, %v3383_v58  ;;  %v7053_v62 = vpop.eup %7052  ;;  %v4156_v3 = vmul.f32 %v7051_v25, %v3964_v46  ;;  %v3955_v25 = vld [vmem:[%s13158_s3 + $0x390] sm:$0xff] }
 0x659   :  { %4757 = vperm.xlu1 %6813, %v4139_v32   ;;  %v10840_v60 = vpop.permute.xlu1 %4437  ;;  %v3396_v32 = vmul.f32 0.020408163, %v9586_v7  ;;  %v3385_v49 = vmul.f32 0.020408163, %v14215_v8  ;;  %v4143_v7 = vmul.f32 %v7049_v50, %v3951_v6  ;;  %v14218_v8 = vld [vmem:[#allocation208_spill] sm:$0xff]  ;;  %v3966_v50 = vld [vmem:[%s13158_s3 + $0x3e8] sm:$0xff]  ;;  %v4145_v63 = vmul.f32 %v7053_v62, %v3953_v2 }
 0x65a   :  { %7062 = vrsqrt.f32 %v3586_v45  ;;  %v14220_v6 = vld [vmem:[#allocation258_spill] sm:$0xff]  ;;  %v3968_v62 = vld [vmem:[%s13158_s3 + $0x3f8] sm:$0xff] }
 0x65b   :  { %4822 = vperm.xlu0 %6812, %v4152_v29   ;;  %v10855_v29 = vpop.permute.xlu0 %4512  ;;  %v3588_v36 = vadd.f32 0.001, %v3396_v32  ;;  %v7055_v17 = vpop.eup %7054  ;;  %7064 = vrsqrt.f32 %v3575_v19  ;;  %v3590_v32 = vadd.f32 0.001, %v3398_v28 }
 0x65c   :  { %14216 = vst [vmem:[#allocation234_spill] sm:$0xff] %v10855_v29  ;;  %v3387_v29 = vmul.f32 0.020408163, %v14218_v8  ;;  %v7057_v45 = vpop.eup %7056  ;;  %v4158_v19 = vmul.f32 %v7055_v17, %v3966_v50  ;;  %v3957_v17 = vld [vmem:[%s13158_s3 + $0x3a0] sm:$0xff] }
 0x65d   :  { %4767 = vperm.xlu1 %6813, %v4141_v11   ;;  %v10852_v26 = vpop.permute.xlu1 %4447  ;;  %v3577_v11 = vadd.f32 0.001, %v3385_v49  ;;  %7066 = vrsqrt.f32 %v3588_v36  ;;  %v4147_v36 = vmul.f32 %v7057_v45, %v3955_v25  ;;  %v3970_v45 = vld [vmem:[%s13158_s3 + $0x408] sm:$0xff] }
 0x65e   :  { %v3579_v8 = vadd.f32 0.001, %v3387_v29 }
 0x65f   :  { %4832 = vperm.xlu0 %6812, %v4154_v56   ;;  %v10867_v56 = vpop.permute.xlu0 %4522  ;;  %7068 = vrsqrt.f32 %v3577_v11 }
 0x660   :  { %14219 = vst [vmem:[#allocation237_spill] sm:$0xff] %v10867_v56  ;;  %v7059_v46 = vpop.eup %7058  ;;  %v14222_v56 = vld [vmem:[#allocation214_spill] sm:$0xff]  ;;  %7070 = vrsqrt.f32 %v3590_v32 }
 0x661   :  { %4777 = vperm.xlu1 %6813, %v4143_v7   ;;  %v10864_v58 = vpop.permute.xlu1 %4457  ;;  %v3400_v7 = vmul.f32 0.020408163, %v14220_v6  ;;  %v7061_v28 = vpop.eup %7060  ;;  %v4160_v11 = vmul.f32 %v7059_v46, %v3968_v62  ;;  %7072 = vrsqrt.f32 %v3579_v8  ;;  %v3959_v46 = vld [vmem:[%s13158_s3 + $0x3b0] sm:$0xff] }
 0x662   :  { %14217 = vst [vmem:[#allocation182_spill] sm:$0xff] %v10864_v58  ;;  %v3389_v58 = vmul.f32 0.020408163, %v14222_v56  ;;  %v4149_v32 = vmul.f32 %v7061_v28, %v3957_v17  ;;  %v3972_v28 = vld [vmem:[%s13158_s3 + $0x418] sm:$0xff] }
 0x663   :  { %4842 = vperm.xlu0 %6812, %v4156_v3   ;;  %v10879_v3 = vpop.permute.xlu0 %4532  ;;  %v3592_v2 = vadd.f32 0.001, %v3400_v7 }
 0x664   :  { %14223 = vst [vmem:[#allocation242_spill] sm:$0xff] %v10879_v3  ;;  %v7063_v56 = vpop.eup %7062  ;;  %v3581_v50 = vadd.f32 0.001, %v3389_v58  ;;  %v14226_v3 = vld [vmem:[#allocation221_spill] sm:$0xff] }
 0x665   :  { %4787 = vperm.xlu1 %6813, %v4145_v63   ;;  %v10876_v49 = vpop.permute.xlu1 %4467  ;;  %v14224_v63 = vld [vmem:[#allocation265_spill] sm:$0xff]  ;;  %v7065_v7 = vpop.eup %7064  ;;  %7074 = vrsqrt.f32 %v3592_v2  ;;  %v4162_v8 = vmul.f32 %v7063_v56, %v3970_v45 }
 0x666   :  { %14221 = vst [vmem:[#allocation189_spill] sm:$0xff] %v10876_v49  ;;  %v3402_v6 = vmul.f32 0.020408163, %v14224_v63  ;;  %v3391_v49 = vmul.f32 0.020408163, %v14226_v3  ;;  %7076 = vrsqrt.f32 %v3581_v50  ;;  %v4151_v2 = vmul.f32 %v7065_v7, %v3959_v46  ;;  %v3961_v56 = vld [vmem:[%s13158_s3 + $0x3c0] sm:$0xff] }
 0x667   :  { %4852 = vperm.xlu0 %6812, %v4158_v19   ;;  %v10891_v19 = vpop.permute.xlu0 %4542  ;;  %v7067_v3 = vpop.eup %7066  ;;  %v3974_v7 = vld [vmem:[%s13158_s3 + $0x428] sm:$0xff] }
 0x668   :  { %14227 = vst [vmem:[#allocation248_spill] sm:$0xff] %v10891_v19  ;;  %v3594_v25 = vadd.f32 0.001, %v3402_v6  ;;  %v3583_v62 = vadd.f32 0.001, %v3391_v49  ;;  %v14230_v19 = vld [vmem:[#allocation230_spill] sm:$0xff]  ;;  %v4164_v50 = vmul.f32 %v7067_v3, %v3972_v28 }
 0x669   :  { %4797 = vperm.xlu1 %6813, %v4147_v36   ;;  %v10888_v29 = vpop.permute.xlu1 %4477  ;;  %v14228_v36 = vld [vmem:[#allocation278_spill] sm:$0xff]  ;;  %v7069_v6 = vpop.eup %7068  ;;  %v3963_v3 = vld [vmem:[%s13158_s3 + $0x3d0] sm:$0xff] }
 0x66a   :  { %14225 = vst [vmem:[#allocation194_spill] sm:$0xff] %v10888_v29  ;;  %v3404_v63 = vmul.f32 0.020408163, %v14228_v36  ;;  %v3393_v29 = vmul.f32 0.020408163, %v14230_v19  ;;  %7078 = vrsqrt.f32 %v3594_v25  ;;  %v7071_v19 = vpop.eup %7070  ;;  %v4153_v25 = vmul.f32 %v7069_v6, %v3961_v56  ;;  %v3976_v6 = vld [vmem:[%s13158_s3 + $0x438] sm:$0xff] }
 0x66b   :  { %4862 = vperm.xlu0 %6812, %v4160_v11   ;;  %v10903_v11 = vpop.permute.xlu0 %4552  ;;  %7080 = vrsqrt.f32 %v3583_v62  ;;  %v4166_v62 = vmul.f32 %v7071_v19, %v3974_v7  ;;  %v3965_v19 = vld [vmem:[%s13158_s3 + $0x3e0] sm:$0xff] }
 0x66c   :  { %14231 = vst [vmem:[#allocation251_spill] sm:$0xff] %v10903_v11  ;;  %v3596_v17 = vadd.f32 0.001, %v3404_v63  ;;  %v3585_v45 = vadd.f32 0.001, %v3393_v29  ;;  %v14234_v11 = vld [vmem:[#allocation236_spill] sm:$0xff]  ;;  %v7073_v63 = vpop.eup %7072 }
 0x66d   :  { %4807 = vperm.xlu1 %6813, %v4149_v32   ;;  %v10900_v58 = vpop.permute.xlu1 %4487  ;;  %v14232_v32 = vld [vmem:[#allocation191_spill] sm:$0xff] }
 0x66e   :  { %14229 = vst [vmem:[#allocation198_spill] sm:$0xff] %v10900_v58  ;;  %v3406_v36 = vmul.f32 0.020408163, %v14232_v32  ;;  %v3395_v58 = vmul.f32 0.020408163, %v14234_v11  ;;  %7082 = vrsqrt.f32 %v3596_v17  ;;  %v4155_v17 = vmul.f32 %v7073_v63, %v3963_v3  ;;  %v3978_v63 = vld [vmem:[%s13158_s3 + $0x448] sm:$0xff] }
 0x66f   :  { %4872 = vperm.xlu0 %6812, %v4162_v8   ;;  %v10915_v8 = vpop.permute.xlu0 %4562  ;;  %v7075_v11 = vpop.eup %7074  ;;  %7084 = vrsqrt.f32 %v3585_v45  ;;  %v3412_v3 = vmul.f32 0.020408163, %v10234_v31 }
 0x670   :  { %14235 = vst [vmem:[#allocation253_spill] sm:$0xff] %v10915_v8  ;;  %v3598_v46 = vadd.f32 0.001, %v3406_v36  ;;  %v3587_v28 = vadd.f32 0.001, %v3395_v58  ;;  %v14237_v8 = vld [vmem:[#allocation240_spill] sm:$0xff]  ;;  %v7077_v36 = vpop.eup %7076  ;;  %v4168_v45 = vmul.f32 %v7075_v11, %v3976_v6 }
 0x671   :  { %4817 = vperm.xlu1 %6813, %v4151_v2   ;;  %v10912_v49 = vpop.permute.xlu1 %4497  ;;  %v14236_v2 = vld [vmem:[#allocation223_spill] sm:$0xff] }
 0x672   :  { %14233 = vst [vmem:[#allocation203_spill] sm:$0xff] %v10912_v49  ;;  %v3408_v32 = vmul.f32 0.020408163, %v14236_v2  ;;  %v3397_v49 = vmul.f32 0.020408163, %v14237_v8  ;;  %7086 = vrsqrt.f32 %v3598_v46  ;;  %v14239_v2 = vld [vmem:[#allocation245_spill] sm:$0xff] }
 0x673   :  { %4882 = vperm.xlu0 %6812, %v4164_v50   ;;  %v10927_v50 = vpop.permute.xlu0 %4572  ;;  %7088 = vrsqrt.f32 %v3587_v28  ;;  %v3967_v11 = vld [vmem:[%s13158_s3 + $0x3f0] sm:$0xff] }
 0x674   :  { %14238 = vst [vmem:[#allocation152_spill] sm:$0xff] %v10927_v50  ;;  %v3600_v56 = vadd.f32 0.001, %v3408_v32  ;;  %v7079_v8 = vpop.eup %7078  ;;  %v3589_v7 = vadd.f32 0.001, %v3397_v49 }
 0x675   :  { %4827 = vperm.xlu1 %6813, %v4153_v25   ;;  %v10924_v29 = vpop.permute.xlu1 %4507  ;;  %v3410_v25 = vmul.f32 0.020408163, %v10181_v34  ;;  %v3399_v50 = vmul.f32 0.020408163, %v14239_v2  ;;  %v4157_v34 = vmul.f32 %v7077_v36, %v3965_v19  ;;  %v7081_v46 = vpop.eup %7080  ;;  %v4170_v28 = vmul.f32 %v7079_v8, %v3978_v63  ;;  %v14241_v2 = vld [vmem:[#allocation173_spill] sm:$0xff]  ;;  %v3980_v36 = vld [vmem:[%s13158_s3 + $0x458] sm:$0xff] }
 0x676   :  { %7090 = vrsqrt.f32 %v3600_v56  ;;  %v4159_v31 = vmul.f32 %v7081_v46, %v3967_v11  ;;  %v3414_v19 = vmul.f32 0.020408163, %v10269_v41  ;;  %v3969_v8 = vld [vmem:[%s13158_s3 + $0x400] sm:$0xff]  ;;  %v3982_v46 = vld [vmem:[%s13158_s3 + $0x468] sm:$0xff]  ;;  %v3416_v11 = vmul.f32 0.020408163, %v10304_v48 }
 0x677   :  { %4892 = vperm.xlu0 %6812, %v4166_v62   ;;  %v10939_v62 = vpop.permute.xlu0 %4582  ;;  %v3602_v32 = vadd.f32 0.001, %v3410_v25  ;;  %7092 = vrsqrt.f32 %v3589_v7  ;;  %v3604_v25 = vadd.f32 0.001, %v3412_v3 }
 0x678   :  { %14240 = vst [vmem:[#allocation205_spill] sm:$0xff] %v10939_v62  ;;  %v7083_v6 = vpop.eup %7082  ;;  %v3401_v62 = vmul.f32 0.020408163, %v14241_v2  ;;  %v14243_v2 = vld [vmem:[#allocation252_spill] sm:$0xff]  ;;  %v3606_v3 = vadd.f32 0.001, %v3414_v19 }
 0x679   :  { %4837 = vperm.xlu1 %6813, %v4155_v17   ;;  %v10936_v58 = vpop.permute.xlu1 %4517  ;;  %v3591_v17 = vadd.f32 0.001, %v3399_v50  ;;  %v7085_v56 = vpop.eup %7084  ;;  %7094 = vrsqrt.f32 %v3602_v32  ;;  %v4172_v7 = vmul.f32 %v7083_v6, %v3980_v36  ;;  %v3971_v6 = vld [vmem:[%s13158_s3 + $0x410] sm:$0xff]  ;;  %v3608_v19 = vadd.f32 0.001, %v3416_v11 }
 0x67a   :  { %v4161_v41 = vmul.f32 %v7085_v56, %v3969_v8  ;;  %v3984_v56 = vld [vmem:[%s13158_s3 + $0x478] sm:$0xff]  ;;  %v3418_v8 = vmul.f32 0.020408163, %v10337_v51 }
 0x67b   :  { %4902 = vperm.xlu0 %6812, %v4168_v45   ;;  %v10951_v45 = vpop.permute.xlu0 %4592  ;;  %7096 = vrsqrt.f32 %v3591_v17 }
 0x67c   :  { %14242 = vst [vmem:[#allocation208_spill] sm:$0xff] %v10951_v45  ;;  %v7087_v63 = vpop.eup %7086  ;;  %v3403_v45 = vmul.f32 0.020408163, %v14243_v2  ;;  %7098 = vrsqrt.f32 %v3604_v25  ;;  %v14245_v2 = vld [vmem:[#allocation254_spill] sm:$0xff]  ;;  %v3610_v11 = vadd.f32 0.001, %v3418_v8 }
 0x67d   :  { %4847 = vperm.xlu1 %6813, %v4157_v34   ;;  %v10948_v49 = vpop.permute.xlu1 %4527  ;;  %v3593_v34 = vadd.f32 0.001, %v3401_v62  ;;  %v7089_v32 = vpop.eup %7088  ;;  %v4174_v17 = vmul.f32 %v7087_v63, %v3982_v46  ;;  %v3973_v63 = vld [vmem:[%s13158_s3 + $0x420] sm:$0xff] }
 0x67e   :  { %v4163_v48 = vmul.f32 %v7089_v32, %v3971_v6  ;;  %v3986_v32 = vld [vmem:[%s13158_s3 + $0x488] sm:$0xff]  ;;  %v3420_v6 = vmul.f32 0.020408163, %v10363_v35 }
 0x67f   :  { %4912 = vperm.xlu0 %6812, %v4170_v28   ;;  %v10963_v28 = vpop.permute.xlu0 %4602  ;;  %7100 = vrsqrt.f32 %v3593_v34 }
 0x680   :  { %14244 = vst [vmem:[#allocation258_spill] sm:$0xff] %v10963_v28  ;;  %v7091_v36 = vpop.eup %7090  ;;  %v3405_v28 = vmul.f32 0.020408163, %v14245_v2  ;;  %7102 = vrsqrt.f32 %v3606_v3  ;;  %v14247_v2 = vld [vmem:[#allocation256_spill] sm:$0xff]  ;;  %v3612_v8 = vadd.f32 0.001, %v3420_v6 }
 0x681   :  { %4857 = vperm.xlu1 %6813, %v4159_v31   ;;  %v10960_v50 = vpop.permute.xlu1 %4537  ;;  %v3595_v31 = vadd.f32 0.001, %v3403_v45  ;;  %v7093_v25 = vpop.eup %7092  ;;  %v4176_v34 = vmul.f32 %v7091_v36, %v3984_v56  ;;  %v3975_v36 = vld [vmem:[%s13158_s3 + $0x430] sm:$0xff] }
 0x682   :  { %v4165_v51 = vmul.f32 %v7093_v25, %v3973_v63  ;;  %v3988_v25 = vld [vmem:[%s13158_s3 + $0x498] sm:$0xff]  ;;  %v3422_v63 = vmul.f32 0.020408163, %v10370_v47 }
 0x683   :  { %4922 = vperm.xlu0 %6812, %v4172_v7   ;;  %v10975_v7 = vpop.permute.xlu0 %4612  ;;  %v7095_v46 = vpop.eup %7094  ;;  %7104 = vrsqrt.f32 %v3595_v31 }
 0x684   :  { %14246 = vst [vmem:[#allocation214_spill] sm:$0xff] %v10975_v7  ;;  %v3407_v7 = vmul.f32 0.020408163, %v14247_v2  ;;  %7106 = vrsqrt.f32 %v3608_v19  ;;  %v4178_v31 = vmul.f32 %v7095_v46, %v3986_v32  ;;  %v14249_v2 = vld [vmem:[#allocation257_spill] sm:$0xff]  ;;  %v3614_v6 = vadd.f32 0.001, %v3422_v63 }
 0x685   :  { %4867 = vperm.xlu1 %6813, %v4161_v41   ;;  %v10972_v62 = vpop.permute.xlu1 %4547  ;;  %v3597_v41 = vadd.f32 0.001, %v3405_v28  ;;  %v7097_v3 = vpop.eup %7096  ;;  %v3977_v46 = vld [vmem:[%s13158_s3 + $0x440] sm:$0xff] }
 0x686   :  { %v7099_v56 = vpop.eup %7098  ;;  %v4167_v35 = vmul.f32 %v7097_v3, %v3975_v36  ;;  %v3990_v3 = vld [vmem:[%s13158_s3 + $0x4a8] sm:$0xff]  ;;  %v3424_v36 = vmul.f32 0.020408163, %v10379_v9 }
 0x687   :  { %4932 = vperm.xlu0 %6812, %v4174_v17   ;;  %v10987_v17 = vpop.permute.xlu0 %4622  ;;  %7108 = vrsqrt.f32 %v3597_v41  ;;  %v4180_v41 = vmul.f32 %v7099_v56, %v3988_v25  ;;  %v3979_v56 = vld [vmem:[%s13158_s3 + $0x450] sm:$0xff] }
 0x688   :  { %14248 = vst [vmem:[#allocation265_spill] sm:$0xff] %v10987_v17  ;;  %v3409_v17 = vmul.f32 0.020408163, %v14249_v2  ;;  %7110 = vrsqrt.f32 %v3610_v11  ;;  %v14251_v2 = vld [vmem:[#allocation261_spill] sm:$0xff]  ;;  %v3616_v63 = vadd.f32 0.001, %v3424_v36 }
 0x689   :  { %4877 = vperm.xlu1 %6813, %v4163_v48   ;;  %v10984_v45 = vpop.permute.xlu1 %4557  ;;  %v3599_v48 = vadd.f32 0.001, %v3407_v7  ;;  %v7101_v19 = vpop.eup %7100 }
 0x68a   :  { %v7103_v32 = vpop.eup %7102  ;;  %v4169_v47 = vmul.f32 %v7101_v19, %v3977_v46  ;;  %v3992_v19 = vld [vmem:[%s13158_s3 + $0x4b8] sm:$0xff]  ;;  %v3426_v46 = vmul.f32 0.020408163, %v10386_v53 }
 0x68b   :  { %4942 = vperm.xlu0 %6812, %v4176_v34   ;;  %v10999_v34 = vpop.permute.xlu0 %4632  ;;  %7112 = vrsqrt.f32 %v3599_v48  ;;  %v4182_v48 = vmul.f32 %v7103_v32, %v3990_v3  ;;  %v3981_v32 = vld [vmem:[%s13158_s3 + $0x460] sm:$0xff] }
 0x68c   :  { %14250 = vst [vmem:[#allocation221_spill] sm:$0xff] %v10999_v34  ;;  %v3411_v34 = vmul.f32 0.020408163, %v14251_v2  ;;  %7114 = vrsqrt.f32 %v3612_v8  ;;  %v14253_v2 = vld [vmem:[#allocation264_spill] sm:$0xff]  ;;  %v3618_v36 = vadd.f32 0.001, %v3426_v46 }
 0x68d   :  { %4887 = vperm.xlu1 %6813, %v4165_v51   ;;  %v10996_v28 = vpop.permute.xlu1 %4567  ;;  %v3601_v51 = vadd.f32 0.001, %v3409_v17  ;;  %v7105_v11 = vpop.eup %7104 }
 0x68e   :  { %v7107_v25 = vpop.eup %7106  ;;  %v4171_v9 = vmul.f32 %v7105_v11, %v3979_v56  ;;  %v3994_v11 = vld [vmem:[%s13158_s3 + $0x4c8] sm:$0xff]  ;;  %v3428_v56 = vmul.f32 0.020408163, %v10393_v42 }
 0x68f   :  { %4952 = vperm.xlu0 %6812, %v4178_v31   ;;  %v11011_v31 = vpop.permute.xlu0 %4642  ;;  %7116 = vrsqrt.f32 %v3601_v51  ;;  %v4184_v51 = vmul.f32 %v7107_v25, %v3992_v19  ;;  %v3983_v25 = vld [vmem:[%s13158_s3 + $0x470] sm:$0xff] }
 0x690   :  { %14252 = vst [vmem:[#allocation278_spill] sm:$0xff] %v11011_v31  ;;  %v3413_v31 = vmul.f32 0.020408163, %v14253_v2  ;;  %7118 = vrsqrt.f32 %v3614_v6  ;;  %v14255_v2 = vld [vmem:[#allocation270_spill] sm:$0xff]  ;;  %v3620_v46 = vadd.f32 0.001, %v3428_v56 }
 0x691   :  { %4897 = vperm.xlu1 %6813, %v4167_v35   ;;  %v11008_v7 = vpop.permute.xlu1 %4577  ;;  %v3603_v35 = vadd.f32 0.001, %v3411_v34  ;;  %v7109_v8 = vpop.eup %7108 }
 0x692   :  { %v7111_v3 = vpop.eup %7110  ;;  %v4173_v53 = vmul.f32 %v7109_v8, %v3981_v32  ;;  %v3996_v8 = vld [vmem:[%s13158_s3 + $0x4d8] sm:$0xff]  ;;  %v3430_v32 = vmul.f32 0.020408163, %v10407_v21 }
 0x693   :  { %4962 = vperm.xlu0 %6812, %v4180_v41   ;;  %v11023_v41 = vpop.permute.xlu0 %4652  ;;  %7120 = vrsqrt.f32 %v3603_v35  ;;  %v4186_v35 = vmul.f32 %v7111_v3, %v3994_v11  ;;  %v3985_v3 = vld [vmem:[%s13158_s3 + $0x480] sm:$0xff] }
 0x694   :  { %14254 = vst [vmem:[#allocation230_spill] sm:$0xff] %v11023_v41  ;;  %v3415_v41 = vmul.f32 0.020408163, %v14255_v2  ;;  %7122 = vrsqrt.f32 %v3616_v63  ;;  %v14257_v2 = vld [vmem:[#allocation277_spill] sm:$0xff]  ;;  %v3622_v56 = vadd.f32 0.001, %v3430_v32 }
 0x695   :  { %4907 = vperm.xlu1 %6813, %v4169_v47   ;;  %v11020_v17 = vpop.permute.xlu1 %4587  ;;  %v3605_v47 = vadd.f32 0.001, %v3413_v31  ;;  %v7113_v6 = vpop.eup %7112 }
 0x696   :  { %v7115_v19 = vpop.eup %7114  ;;  %v4175_v42 = vmul.f32 %v7113_v6, %v3983_v25  ;;  %v3998_v6 = vld [vmem:[%s13158_s3 + $0x4e8] sm:$0xff]  ;;  %v3432_v25 = vmul.f32 0.020408163, %v10423_v14 }
 0x697   :  { %4972 = vperm.xlu0 %6812, %v4182_v48   ;;  %v11035_v48 = vpop.permute.xlu0 %4662  ;;  %7124 = vrsqrt.f32 %v3605_v47  ;;  %v4188_v47 = vmul.f32 %v7115_v19, %v3996_v8  ;;  %v3987_v19 = vld [vmem:[%s13158_s3 + $0x490] sm:$0xff] }
 0x698   :  { %14256 = vst [vmem:[#allocation191_spill] sm:$0xff] %v11035_v48  ;;  %v3417_v48 = vmul.f32 0.020408163, %v14257_v2  ;;  %7126 = vrsqrt.f32 %v3618_v36  ;;  %v14259_v2 = vld [vmem:[#allocation233_spill] sm:$0xff]  ;;  %v3624_v32 = vadd.f32 0.001, %v3432_v25 }
 0x699   :  { %4917 = vperm.xlu1 %6813, %v4171_v9   ;;  %v11032_v34 = vpop.permute.xlu1 %4597  ;;  %v3607_v9 = vadd.f32 0.001, %v3415_v41  ;;  %v7117_v63 = vpop.eup %7116 }
 0x69a   :  { %v7119_v11 = vpop.eup %7118  ;;  %v4177_v21 = vmul.f32 %v7117_v63, %v3985_v3  ;;  %v4000_v63 = vld [vmem:[%s13158_s3 + $0x4f8] sm:$0xff]  ;;  %v3434_v3 = vmul.f32 0.020408163, %v10433_v59 }
 0x69b   :  { %4982 = vperm.xlu0 %6812, %v4184_v51   ;;  %v11047_v51 = vpop.permute.xlu0 %4672  ;;  %7128 = vrsqrt.f32 %v3607_v9  ;;  %v4190_v9 = vmul.f32 %v7119_v11, %v3998_v6  ;;  %v3989_v11 = vld [vmem:[%s13158_s3 + $0x4a0] sm:$0xff] }
 0x69c   :  { %14258 = vst [vmem:[#allocation236_spill] sm:$0xff] %v11047_v51  ;;  %v3419_v51 = vmul.f32 0.020408163, %v14259_v2  ;;  %7130 = vrsqrt.f32 %v3620_v46  ;;  %v3421_v2 = vmul.f32 0.020408163, %v10054_v52 }
 0x69d   :  { %4927 = vperm.xlu1 %6813, %v4173_v53   ;;  %v11044_v31 = vpop.permute.xlu1 %4607  ;;  %v3609_v53 = vadd.f32 0.001, %v3417_v48  ;;  %v7121_v36 = vpop.eup %7120  ;;  %v3626_v25 = vadd.f32 0.001, %v3434_v3 }
 0x69e   :  { %v7123_v8 = vpop.eup %7122  ;;  %v4179_v14 = vmul.f32 %v7121_v36, %v3987_v19  ;;  %v3613_v6 = vadd.f32 0.001, %v3421_v2  ;;  %v4002_v36 = vld [vmem:[%s13158_s3 + $0x508] sm:$0xff]  ;;  %v3436_v19 = vmul.f32 0.020408163, %v10444_v18 }
 0x69f   :  { %4992 = vperm.xlu0 %6812, %v4186_v35   ;;  %v11059_v35 = vpop.permute.xlu0 %4682  ;;  %7132 = vrsqrt.f32 %v3609_v53  ;;  %v4192_v52 = vmul.f32 %v7123_v8, %v4000_v63  ;;  %v3991_v8 = vld [vmem:[%s13158_s3 + $0x4b0] sm:$0xff] }
 0x6a0   :  { %7134 = vrsqrt.f32 %v3622_v56  ;;  %v3628_v3 = vadd.f32 0.001, %v3436_v19 }
 0x6a1   :  { %4937 = vperm.xlu1 %6813, %v4175_v42   ;;  %v11056_v41 = vpop.permute.xlu1 %4617  ;;  %v3611_v42 = vadd.f32 0.001, %v3419_v51  ;;  %v7125_v46 = vpop.eup %7124 }
 0x6a2   :  { %v7127_v53 = vpop.eup %7126  ;;  %v4181_v59 = vmul.f32 %v7125_v46, %v3989_v11  ;;  %v4004_v46 = vld [vmem:[%s13158_s3 + $0x518] sm:$0xff]  ;;  %v3438_v11 = vmul.f32 0.020408163, %v10459_v20 }
 0x6a3   :  { %5002 = vperm.xlu0 %6812, %v4188_v47   ;;  %v11071_v47 = vpop.permute.xlu0 %4692  ;;  %7136 = vrsqrt.f32 %v3611_v42 }
 0x6a4   :  { %14260 = vst [vmem:[#allocation223_spill] sm:$0xff] %v11071_v47  ;;  %7138 = vrsqrt.f32 %v3624_v32  ;;  %v3630_v19 = vadd.f32 0.001, %v3438_v11 }
 0x6a5   :  { %4947 = vperm.xlu1 %6813, %v4177_v21   ;;  %v11068_v48 = vpop.permute.xlu1 %4627  ;;  %v3423_v21 = vmul.f32 0.020408163, %v10094_v13  ;;  %v7129_v56 = vpop.eup %7128  ;;  %v4194_v13 = vmul.f32 %v7127_v53, %v4002_v36  ;;  %7140 = vrsqrt.f32 %v3613_v6  ;;  %v3993_v53 = vld [vmem:[%s13158_s3 + $0x4c0] sm:$0xff] }
 0x6a6   :  { %v7131_v2 = vpop.eup %7130  ;;  %v4183_v18 = vmul.f32 %v7129_v56, %v3991_v8  ;;  %7142 = vrsqrt.f32 %v3626_v25  ;;  %v4006_v56 = vld [vmem:[%s13158_s3 + $0x528] sm:$0xff]  ;;  %v14264_v8 = vld [vmem:[#allocation201_spill] sm:$0xff] }
 0x6a7   :  { %5012 = vperm.xlu0 %6812, %v4190_v9   ;;  %v3615_v63 = vadd.f32 0.001, %v3423_v21 }
 0x6a9   :  { %4957 = vperm.xlu1 %6813, %v4179_v14   ;;  %v11080_v51 = vpop.permute.xlu1 %4637  ;;  %v3425_v14 = vmul.f32 0.020408163, %v10127_v0  ;;  %v7133_v32 = vpop.eup %7132  ;;  %v4196_v0 = vmul.f32 %v7131_v2, %v4004_v46  ;;  %7144 = vrsqrt.f32 %v3615_v63  ;;  %v3995_v2 = vld [vmem:[%s13158_s3 + $0x4d0] sm:$0xff] }
 0x6aa   :  { %v11083_v9 = vpop.permute.xlu0 %4702  ;;  %v7135_v21 = vpop.eup %7134  ;;  %v4185_v20 = vmul.f32 %v7133_v32, %v3993_v53  ;;  %7146 = vrsqrt.f32 %v3628_v3  ;;  %v4008_v32 = vld [vmem:[%s13158_s3 + $0x538] sm:$0xff] }
 0x6ab   :  { %14261 = vst [vmem:[#allocation240_spill] sm:$0xff] %v11083_v9  ;;  %5022 = vperm.xlu0 %6812, %v4192_v52   ;;  %v3617_v36 = vadd.f32 0.001, %v3425_v14 }
 0x6ad   :  { %4967 = vperm.xlu1 %6813, %v4181_v59   ;;  %v11092_v42 = vpop.permute.xlu1 %4647  ;;  %v3427_v59 = vmul.f32 0.020408163, %v10264_v55  ;;  %v7137_v25 = vpop.eup %7136  ;;  %v4198_v55 = vmul.f32 %v7135_v21, %v4006_v56  ;;  %7148 = vrsqrt.f32 %v3617_v36  ;;  %v3997_v21 = vld [vmem:[%s13158_s3 + $0x4e0] sm:$0xff] }
 0x6ae   :  { %v11095_v52 = vpop.permute.xlu0 %4712  ;;  %v7139_v14 = vpop.eup %7138  ;;  %v4187_v3 = vmul.f32 %v7137_v25, %v3995_v2  ;;  %7150 = vrsqrt.f32 %v3630_v19  ;;  %v4010_v25 = vld [vmem:[%s13158_s3 + $0x548] sm:$0xff] }
 0x6af   :  { %14262 = vst [vmem:[#allocation245_spill] sm:$0xff] %v11095_v52  ;;  %5032 = vperm.xlu0 %6812, %v4194_v13   ;;  %v3619_v46 = vadd.f32 0.001, %v3427_v59  ;;  %v7141_v11 = vpop.eup %7140  ;;  %v4200_v59 = vmul.f32 %v7139_v14, %v4008_v32  ;;  %v3999_v14 = vld [vmem:[%s13158_s3 + $0x4f0] sm:$0xff] }
 0x6b0   :  { %v4189_v19 = vmul.f32 %v7141_v11, %v3997_v21  ;;  %v4012_v11 = vld [vmem:[%s13158_s3 + $0x558] sm:$0xff] }
 0x6b1   :  { %4977 = vperm.xlu1 %6813, %v4183_v18   ;;  %v11104_v6 = vpop.permute.xlu1 %4657  ;;  %v3440_v18 = vmul.f32 0.020408163, %v14264_v8  ;;  %7152 = vrsqrt.f32 %v3619_v46 }
 0x6b2   :  { %v11107_v13 = vpop.permute.xlu0 %4722 }
 0x6b3   :  { %14263 = vst [vmem:[#allocation173_spill] sm:$0xff] %v11107_v13  ;;  %5042 = vperm.xlu0 %6812, %v4196_v0   ;;  %v14265_v13 = vld [vmem:[#allocation150_spill] sm:$0xff]  ;;  %v3632_v53 = vadd.f32 0.001, %v3440_v18 }
 0x6b4   :  { %v3429_v52 = vmul.f32 0.020408163, %v14265_v13  ;;  %v7143_v13 = vpop.eup %7142 }
 0x6b5   :  { %4987 = vperm.xlu1 %6813, %v4185_v20   ;;  %v11116_v63 = vpop.permute.xlu1 %4667  ;;  %v14267_v20 = vld [vmem:[#allocation204_spill] sm:$0xff]  ;;  %v7145_v18 = vpop.eup %7144  ;;  %7154 = vrsqrt.f32 %v3632_v53  ;;  %v4202_v46 = vmul.f32 %v7143_v13, %v4010_v25  ;;  %v4001_v13 = vld [vmem:[%s13158_s3 + $0x500] sm:$0xff] }
 0x6b6   :  { %v11119_v0 = vpop.permute.xlu0 %4732  ;;  %v3442_v8 = vmul.f32 0.020408163, %v14267_v20  ;;  %v3621_v56 = vadd.f32 0.001, %v3429_v52  ;;  %v4191_v53 = vmul.f32 %v7145_v18, %v3999_v14  ;;  %v4014_v18 = vld [vmem:[%s13158_s3 + $0x568] sm:$0xff] }
 0x6b7   :  { %14266 = vst [vmem:[#allocation252_spill] sm:$0xff] %v11119_v0  ;;  %5052 = vperm.xlu0 %6812, %v4198_v55   ;;  %v14268_v0 = vld [vmem:[#allocation165_spill] sm:$0xff]  ;;  %v3448_v14 = vmul.f32 0.020408163, %v10538_v54 }
 0x6b8   :  { %v3431_v9 = vmul.f32 0.020408163, %v14268_v0  ;;  %v3634_v2 = vadd.f32 0.001, %v3442_v8  ;;  %v7147_v0 = vpop.eup %7146  ;;  %7156 = vrsqrt.f32 %v3621_v56 }
 0x6b9   :  { %4997 = vperm.xlu1 %6813, %v4187_v3   ;;  %v11128_v36 = vpop.permute.xlu1 %4677  ;;  %v14270_v3 = vld [vmem:[#allocation207_spill] sm:$0xff]  ;;  %v7149_v8 = vpop.eup %7148  ;;  %v4204_v56 = vmul.f32 %v7147_v0, %v4012_v11 }
 0x6ba   :  { %v11131_v55 = vpop.permute.xlu0 %4742  ;;  %v3444_v20 = vmul.f32 0.020408163, %v14270_v3  ;;  %v3623_v32 = vadd.f32 0.001, %v3431_v9  ;;  %7158 = vrsqrt.f32 %v3634_v2  ;;  %v14273_v3 = vld [vmem:[#allocation190_spill] sm:$0xff]  ;;  %v4003_v0 = vld [vmem:[%s13158_s3 + $0x510] sm:$0xff] }
 0x6bb   :  { %14269 = vst [vmem:[#allocation254_spill] sm:$0xff] %v11131_v55  ;;  %5062 = vperm.xlu0 %6812, %v4200_v59   ;;  %v14271_v55 = vld [vmem:[#allocation187_spill] sm:$0xff] }
 0x6bc   :  { %v3433_v47 = vmul.f32 0.020408163, %v14271_v55  ;;  %v3636_v21 = vadd.f32 0.001, %v3444_v20  ;;  %v7151_v55 = vpop.eup %7150  ;;  %7160 = vrsqrt.f32 %v3623_v32 }
 0x6bd   :  { %5007 = vperm.xlu1 %6813, %v4189_v19   ;;  %v11140_v52 = vpop.permute.xlu1 %4687  ;;  %v3446_v19 = vmul.f32 0.020408163, %v10523_v61  ;;  %v4193_v61 = vmul.f32 %v7149_v8, %v4001_v13  ;;  %v7153_v2 = vpop.eup %7152  ;;  %v4206_v32 = vmul.f32 %v7151_v55, %v4014_v18  ;;  %v4016_v8 = vld [vmem:[%s13158_s3 + $0x578] sm:$0xff]  ;;  %v3450_v13 = vmul.f32 0.020408163, %v10553_v23  ;;  %v4005_v55 = vld [vmem:[%s13158_s3 + $0x520] sm:$0xff] }
 0x6be   :  { %v11143_v59 = vpop.permute.xlu0 %4752  ;;  %v3625_v25 = vadd.f32 0.001, %v3433_v47  ;;  %7162 = vrsqrt.f32 %v3636_v21  ;;  %v4195_v54 = vmul.f32 %v7153_v2, %v4003_v0  ;;  %v4018_v2 = vld [vmem:[%s13158_s3 + $0x588] sm:$0xff]  ;;  %v3452_v0 = vmul.f32 0.020408163, %v10570_v24 }
 0x6bf   :  { %14272 = vst [vmem:[#allocation256_spill] sm:$0xff] %v11143_v59  ;;  %5072 = vperm.xlu0 %6812, %v4202_v46   ;;  %v3435_v59 = vmul.f32 0.020408163, %v14273_v3  ;;  %v3638_v20 = vadd.f32 0.001, %v3446_v19  ;;  %v7155_v11 = vpop.eup %7154  ;;  %v14275_v3 = vld [vmem:[#allocation195_spill] sm:$0xff] }
 0x6c0   :  { %7164 = vrsqrt.f32 %v3625_v25  ;;  %v3640_v19 = vadd.f32 0.001, %v3448_v14  ;;  %v4208_v25 = vmul.f32 %v7155_v11, %v4016_v8  ;;  %v3642_v14 = vadd.f32 0.001, %v3450_v13  ;;  %v4007_v11 = vld [vmem:[%s13158_s3 + $0x530] sm:$0xff] }
 0x6c1   :  { %5017 = vperm.xlu1 %6813, %v4191_v53   ;;  %v11152_v9 = vpop.permute.xlu1 %4697  ;;  %v3627_v53 = vadd.f32 0.001, %v3435_v59  ;;  %7166 = vrsqrt.f32 %v3638_v20  ;;  %v3644_v13 = vadd.f32 0.001, %v3452_v0 }
 0x6c2   :  { %v11155_v46 = vpop.permute.xlu0 %4762  ;;  %v7157_v21 = vpop.eup %7156 }
 0x6c3   :  { %14274 = vst [vmem:[#allocation257_spill] sm:$0xff] %v11155_v46  ;;  %5082 = vperm.xlu0 %6812, %v4204_v56   ;;  %v3437_v46 = vmul.f32 0.020408163, %v14275_v3  ;;  %7168 = vrsqrt.f32 %v3627_v53  ;;  %v14277_v3 = vld [vmem:[#allocation196_spill] sm:$0xff]  ;;  %v4197_v23 = vmul.f32 %v7157_v21, %v4005_v55  ;;  %v3454_v55 = vmul.f32 0.020408163, %v10649_v43 }
 0x6c4   :  { %v7159_v18 = vpop.eup %7158  ;;  %7170 = vrsqrt.f32 %v3640_v19  ;;  %v4020_v21 = vld [vmem:[%s13158_s3 + $0x598] sm:$0xff] }
 0x6c5   :  { %5027 = vperm.xlu1 %6813, %v4193_v61   ;;  %v11164_v47 = vpop.permute.xlu1 %4707  ;;  %v3629_v61 = vadd.f32 0.001, %v3437_v46  ;;  %v4210_v53 = vmul.f32 %v7159_v18, %v4018_v2  ;;  %v4009_v18 = vld [vmem:[%s13158_s3 + $0x540] sm:$0xff]  ;;  %v3646_v0 = vadd.f32 0.001, %v3454_v55 }
 0x6c6   :  { %v11167_v56 = vpop.permute.xlu0 %4772  ;;  %v7161_v20 = vpop.eup %7160 }
 0x6c7   :  { %14276 = vst [vmem:[#allocation261_spill] sm:$0xff] %v11167_v56  ;;  %5092 = vperm.xlu0 %6812, %v4206_v32   ;;  %v3439_v56 = vmul.f32 0.020408163, %v14277_v3  ;;  %7172 = vrsqrt.f32 %v3629_v61  ;;  %v14279_v3 = vld [vmem:[#allocation200_spill] sm:$0xff]  ;;  %v4199_v24 = vmul.f32 %v7161_v20, %v4007_v11  ;;  %v4022_v20 = vld [vmem:[%s13158_s3 + $0x5a8] sm:$0xff] }
 0x6c8   :  { %v7163_v8 = vpop.eup %7162  ;;  %7174 = vrsqrt.f32 %v3642_v14  ;;  %v3456_v11 = vmul.f32 0.020408163, %v10674_v12 }
 0x6c9   :  { %5037 = vperm.xlu1 %6813, %v4195_v54   ;;  %v11176_v59 = vpop.permute.xlu1 %4717  ;;  %v3631_v54 = vadd.f32 0.001, %v3439_v56  ;;  %v4212_v61 = vmul.f32 %v7163_v8, %v4020_v21  ;;  %v4011_v8 = vld [vmem:[%s13158_s3 + $0x550] sm:$0xff] }
 0x6ca   :  { %v11179_v32 = vpop.permute.xlu0 %4782  ;;  %v7165_v19 = vpop.eup %7164  ;;  %v3648_v55 = vadd.f32 0.001, %v3456_v11 }
 0x6cb   :  { %14278 = vst [vmem:[#allocation264_spill] sm:$0xff] %v11179_v32  ;;  %5102 = vperm.xlu0 %6812, %v4208_v25   ;;  %v3441_v32 = vmul.f32 0.020408163, %v14279_v3  ;;  %v7167_v2 = vpop.eup %7166  ;;  %7176 = vrsqrt.f32 %v3631_v54  ;;  %v14281_v3 = vld [vmem:[#allocation186_spill] sm:$0xff]  ;;  %v4201_v43 = vmul.f32 %v7165_v19, %v4009_v18  ;;  %v4024_v19 = vld [vmem:[%s13158_s3 + $0x5b8] sm:$0xff]  ;;  %v4013_v18 = vld [vmem:[%s13158_s3 + $0x560] sm:$0xff] }
 0x6cc   :  { %7178 = vrsqrt.f32 %v3644_v13  ;;  %v4214_v54 = vmul.f32 %v7167_v2, %v4022_v20 }
 0x6cd   :  { %5047 = vperm.xlu1 %6813, %v4197_v23   ;;  %v11188_v46 = vpop.permute.xlu1 %4727  ;;  %v3633_v23 = vadd.f32 0.001, %v3441_v32  ;;  %v7169_v14 = vpop.eup %7168 }
 0x6ce   :  { %v11191_v25 = vpop.permute.xlu0 %4792  ;;  %v7171_v21 = vpop.eup %7170  ;;  %v4203_v12 = vmul.f32 %v7169_v14, %v4011_v8  ;;  %v4026_v14 = vld [vmem:[%s13158_s3 + $0x5c8] sm:$0xff]  ;;  %v4015_v8 = vld [vmem:[%s13158_s3 + $0x570] sm:$0xff] }
 0x6cf   :  { %14280 = vst [vmem:[#allocation270_spill] sm:$0xff] %v11191_v25  ;;  %5112 = vperm.xlu0 %6812, %v4210_v53   ;;  %v3443_v25 = vmul.f32 0.020408163, %v14281_v3  ;;  %7180 = vrsqrt.f32 %v3633_v23  ;;  %v14283_v3 = vld [vmem:[#allocation193_spill] sm:$0xff] }
 0x6d0   :  { %7182 = vrsqrt.f32 %v3646_v0 }
 0x6d1   :  { %5057 = vperm.xlu1 %6813, %v4199_v24   ;;  %v11200_v56 = vpop.permute.xlu1 %4737  ;;  %v3635_v24 = vadd.f32 0.001, %v3443_v25  ;;  %v7173_v13 = vpop.eup %7172  ;;  %v4216_v25 = vmul.f32 %v7171_v21, %v4024_v19  ;;  %v14287_v19 = vld [vmem:[#allocation149_spill] sm:$0xff] }
 0x6d2   :  { %v11203_v53 = vpop.permute.xlu0 %4802  ;;  %v7175_v23 = vpop.eup %7174  ;;  %v4205_v0 = vmul.f32 %v7173_v13, %v4013_v18  ;;  %v4028_v13 = vld [vmem:[%s13158_s3 + $0x5d8] sm:$0xff] }
 0x6d3   :  { %14282 = vst [vmem:[#allocation277_spill] sm:$0xff] %v11203_v53  ;;  %5122 = vperm.xlu0 %6812, %v4212_v61   ;;  %v3445_v53 = vmul.f32 0.020408163, %v14283_v3  ;;  %7184 = vrsqrt.f32 %v3635_v24 }
 0x6d4   :  { %7186 = vrsqrt.f32 %v3648_v55 }
 0x6d5   :  { %5067 = vperm.xlu1 %6813, %v4201_v43   ;;  %v11212_v32 = vpop.permute.xlu1 %4747  ;;  %v3637_v20 = vadd.f32 0.001, %v3445_v53  ;;  %v14285_v43 = vld [vmem:[#allocation197_spill] sm:$0xff]  ;;  %v7177_v11 = vpop.eup %7176  ;;  %v4218_v53 = vmul.f32 %v7175_v23, %v4026_v14 }
 0x6d6   :  { %v11215_v61 = vpop.permute.xlu0 %4812  ;;  %v3447_v3 = vmul.f32 0.020408163, %v14285_v43  ;;  %v7179_v21 = vpop.eup %7178  ;;  %v4207_v55 = vmul.f32 %v7177_v11, %v4015_v8  ;;  %v4030_v11 = vld [vmem:[%s13158_s3 + $0x5e8] sm:$0xff] }
 0x6d7   :  { %14284 = vst [vmem:[#allocation233_spill] sm:$0xff] %v11215_v61  ;;  %5132 = vperm.xlu0 %6812, %v4214_v54   ;;  %7188 = vrsqrt.f32 %v3637_v20  ;;  %v4220_v20 = vmul.f32 %v7179_v21, %v4028_v13 }
 0x6d8   :  { %v3639_v24 = vadd.f32 0.001, %v3447_v3 }
 0x6d9   :  { %5077 = vperm.xlu1 %6813, %v4203_v12   ;;  %v11223_v2 = vpop.permute.xlu1 %4757  ;;  %v3449_v12 = vmul.f32 0.020408163, %v14287_v19  ;;  %v7181_v18 = vpop.eup %7180 }
 0x6da   :  { %v11226_v61 = vpop.permute.xlu0 %4822  ;;  %v7183_v3 = vpop.eup %7182  ;;  %7190 = vrsqrt.f32 %v3639_v24 }
 0x6db   :  { %14286 = vst [vmem:[#allocation201_spill] sm:$0xff] %v11226_v61  ;;  %5142 = vperm.xlu0 %6812, %v4216_v25   ;;  %v4017_v25 = vld [vmem:[%s13158_s3 + $0x580] sm:$0xff]  ;;  %v3641_v14 = vadd.f32 0.001, %v3449_v12  ;;  %v4222_v24 = vmul.f32 %v7183_v3, %v4030_v11 }
 0x6dc   :  { %v4209_v8 = vmul.f32 %v7181_v18, %v4017_v25  ;;  %v4032_v18 = vld [vmem:[%s13158_s3 + $0x5f8] sm:$0xff] }
 0x6dd   :  { %5087 = vperm.xlu1 %6813, %v4205_v0   ;;  %v11234_v54 = vpop.permute.xlu1 %4767  ;;  %v14289_v0 = vld [vmem:[#allocation211_spill] sm:$0xff]  ;;  %7192 = vrsqrt.f32 %v3641_v14 }
 0x6de   :  { %v11237_v43 = vpop.permute.xlu0 %4832  ;;  %v3451_v19 = vmul.f32 0.020408163, %v14289_v0  ;;  %v3453_v0 = vmul.f32 0.020408163, %v10536_v38  ;;  %v14293_v38 = vld [vmem:[#allocation218_spill] sm:$0xff] }
 0x6df   :  { %14288 = vst [vmem:[#allocation150_spill] sm:$0xff] %v11237_v43  ;;  %5152 = vperm.xlu0 %6812, %v4218_v53   ;;  %v7185_v53 = vpop.eup %7184  ;;  %v3455_v11 = vmul.f32 0.020408163, %v14293_v38  ;;  %v4027_v38 = vld [vmem:[%s13158_s3 + $0x5d0] sm:$0xff] }
 0x6e0   :  { %v7187_v12 = vpop.eup %7186  ;;  %v3643_v13 = vadd.f32 0.001, %v3451_v19  ;;  %v3645_v19 = vadd.f32 0.001, %v3453_v0 }
 0x6e1   :  { %5097 = vperm.xlu1 %6813, %v4207_v55   ;;  %v11245_v23 = vpop.permute.xlu1 %4777  ;;  %v4019_v55 = vld [vmem:[%s13158_s3 + $0x590] sm:$0xff]  ;;  %v4224_v14 = vmul.f32 %v7187_v12, %v4032_v18  ;;  %v7421_v12 = vmov 1   ;;  %v7200_v18 = vld [vmem:[%s13158_s3 + $0x8] sm:$0xff] }
 0x6e2   :  { %v11248_v43 = vpop.permute.xlu0 %4842  ;;  %v4211_v25 = vmul.f32 %v7185_v53, %v4019_v55  ;;  %7194 = vrsqrt.f32 %v3643_v13  ;;  %v4023_v53 = vld [vmem:[%s13158_s3 + $0x5b0] sm:$0xff] }
 0x6e3   :  { %14290 = vst [vmem:[#allocation204_spill] sm:$0xff] %v11248_v43  ;;  %5162 = vperm.xlu0 %6812, %v4220_v20   ;;  %v7189_v20 = vpop.eup %7188  ;;  %7196 = vrsqrt.f32 %v3645_v19 }
 0x6e5   :  { %5107 = vperm.xlu1 %6813, %v4209_v8   ;;  %v11256_v21 = vpop.permute.xlu1 %4787  ;;  %v4021_v8 = vld [vmem:[%s13158_s3 + $0x5a0] sm:$0xff] }
 0x6e6   :  { %14291 = vst [vmem:[#allocation165_spill] sm:$0xff] %v11256_v21  ;;  %v11259_v43 = vpop.permute.xlu0 %4852  ;;  %v4213_v61 = vmul.f32 %v7189_v20, %v4021_v8  ;;  %v7191_v21 = vpop.eup %7190  ;;  %v4025_v20 = vld [vmem:[%s13158_s3 + $0x5c0] sm:$0xff] }
 0x6e7   :  { %14292 = vst [vmem:[#allocation207_spill] sm:$0xff] %v11259_v43  ;;  %5172 = vperm.xlu0 %6812, %v4222_v24   ;;  %v3647_v24 = vadd.f32 0.001, %v3455_v11  ;;  %v4215_v13 = vmul.f32 %v7191_v21, %v4023_v53  ;;  %v7193_v0 = vpop.eup %7192  ;;  %v7201_v21 = vld [vmem:[%s13158_s3 + $0x20] sm:$0xff] }
 0x6e9   :  { %5117 = vperm.xlu1 %6813, %v4211_v25   ;;  %v11267_v3 = vpop.permute.xlu1 %4797  ;;  %7198 = vrsqrt.f32 %v3647_v24 }
 0x6ea   :  { %v11270_v43 = vpop.permute.xlu0 %4862 }
 0x6eb   :  { %14294 = vst [vmem:[#allocation187_spill] sm:$0xff] %v11270_v43  ;;  %5182 = vperm.xlu0 %6812, %v4224_v14   ;;  %v4217_v14 = vmul.f32 %v7193_v0, %v4025_v20  ;;  %v7202_v0 = vld [vmem:[%s13158_s3 + $0x30] sm:$0xff] }
 0x6ec   :  { %v7195_v19 = vpop.eup %7194 }
 0x6ed   :  { %5127 = vperm.xlu1 %6813, %v4213_v61   ;;  %v11275_v55 = vpop.permute.xlu1 %4807  ;;  %v7197_v24 = vpop.eup %7196 }
 0x6ee   :  { %v11277_v25 = vpop.permute.xlu0 %4872 }
 0x6ef   :  { %14295 = vst [vmem:[#allocation190_spill] sm:$0xff] %v11277_v25  ;;  %6815 = vset.pattern.permute.xlu0 %v7421_v12 }
 0x6f0   :  { %5384 = vperm.xlu0 %6815, %v7200_v18   ;;  %v4029_v18 = vld [vmem:[%s13158_s3 + $0x5e0] sm:$0xff] }
 0x6f1   :  { %5137 = vperm.xlu1 %6813, %v4215_v13   ;;  %v11285_v61 = vpop.permute.xlu1 %4817  ;;  %v4219_v13 = vmul.f32 %v7195_v19, %v4027_v38  ;;  %v7203_v19 = vld [vmem:[%s13158_s3 + $0x40] sm:$0xff]  ;;  %v4031_v38 = vld [vmem:[%s13158_s3 + $0x5f0] sm:$0xff] }
 0x6f2   :  { %v11287_v8 = vpop.permute.xlu0 %4882 }
 0x6f3   :  { %14296 = vst [vmem:[#allocation195_spill] sm:$0xff] %v11287_v8  ;;  %v7199_v8 = vpop.eup %7198 }
 0x6f4   :  { %5399 = vperm.xlu0 %6815, %v7201_v21  }
 0x6f5   :  { %5147 = vperm.xlu1 %6813, %v4217_v14   ;;  %v11295_v11 = vpop.permute.xlu1 %4827  ;;  %v4221_v14 = vmul.f32 %v7197_v24, %v4029_v18  ;;  %v7204_v24 = vld [vmem:[%s13158_s3 + $0x50] sm:$0xff] }
 0x6f6   :  { %v11297_v53 = vpop.permute.xlu0 %4892 }
 0x6f7   :  { %14297 = vst [vmem:[#allocation196_spill] sm:$0xff] %v11297_v53 }
 0x6f8   :  { %5409 = vperm.xlu0 %6815, %v7202_v0  }
 0x6f9   :  { %5157 = vperm.xlu1 %6813, %v4219_v13   ;;  %v11305_v20 = vpop.permute.xlu1 %4837  ;;  %v4223_v13 = vmul.f32 %v7199_v8, %v4031_v38  ;;  %v7206_v8 = vld [vmem:[%s13158_s3] sm:$0xff]  ;;  %v7207_v38 = vld [vmem:[%s13158_s3 + $0x70] sm:$0xff] }
 0x6fa   :  { %v11307_v21 = vpop.permute.xlu0 %4902 }
 0x6fb   :  { %14298 = vst [vmem:[#allocation200_spill] sm:$0xff] %v11307_v21 }
 0x6fc   :  { %5419 = vperm.xlu0 %6815, %v7203_v19   ;;  %v7205_v19 = vld [vmem:[%s13158_s3 + $0x60] sm:$0xff] }
 0x6fd   :  { %5167 = vperm.xlu1 %6813, %v4221_v14   ;;  %v11315_v0 = vpop.permute.xlu1 %4847 }
 0x6fe   :  { %v11317_v53 = vpop.permute.xlu0 %4912 }
 0x6ff   :  { %14299 = vst [vmem:[#allocation186_spill] sm:$0xff] %v11317_v53 }
 0x700   :  { %5429 = vperm.xlu0 %6815, %v7204_v24  }
 0x701   :  { %5177 = vperm.xlu1 %6813, %v4223_v13   ;;  %v11322_v18 = vpop.permute.xlu1 %4857 }
 0x702   :  { %v11324_v21 = vpop.permute.xlu0 %4922 }
 0x703   :  { %14300 = vst [vmem:[#allocation193_spill] sm:$0xff] %v11324_v21 }
 0x704   :  { %5439 = vperm.xlu0 %6815, %v7205_v19   ;;  %v7209_v19 = vld [vmem:[%s13158_s3 + $0x80] sm:$0xff] }
 0x705   :  { %6814 = vset.pattern.permute.xlu1 %v7421_v12  ;;  %v11329_v14 = vpop.permute.xlu1 %4867  ;;  %v7208_v12 = vld [vmem:[%s13158_s3 + $0x10] sm:$0xff] }
 0x706   :  { %14301 = vst [vmem:[#allocation197_spill] sm:$0xff] %v11329_v14  ;;  %v11331_v53 = vpop.permute.xlu0 %4932  ;;  %5379 = vperm.xlu1 %6814, %v7206_v8   ;;  %v14358_v14 = vld [vmem:[#allocation179_spill] sm:$0xff] }
 0x707   :  { %14302 = vst [vmem:[#allocation149_spill] sm:$0xff] %v11331_v53 }
 0x708   :  { %5449 = vperm.xlu0 %6815, %v7207_v38   ;;  %v7210_v38 = vld [vmem:[%s13158_s3 + $0x18] sm:$0xff] }
 0x709   :  { %v11339_v13 = vpop.permute.xlu1 %4877 }
 0x70a   :  { %14303 = vst [vmem:[#allocation211_spill] sm:$0xff] %v11339_v13  ;;  %v11341_v24 = vpop.permute.xlu0 %4942  ;;  %5389 = vperm.xlu1 %6814, %v7208_v12  }
 0x70b   :  { %14304 = vst [vmem:[#allocation218_spill] sm:$0xff] %v11341_v24  ;;  %v7211_v24 = vld [vmem:[%s13158_s3 + $0x90] sm:$0xff] }
 0x70c   :  { %5459 = vperm.xlu0 %6815, %v7209_v19   ;;  %v7212_v19 = vld [vmem:[%s13158_s3 + $0x28] sm:$0xff] }
 0x70d   :  { %v11349_v8 = vpop.permute.xlu1 %4887 }
 0x70e   :  { %14305 = vst [vmem:[#allocation282_spill] sm:$0xff] %v11349_v8  ;;  %v11351_v53 = vpop.permute.xlu0 %4952  ;;  %5394 = vperm.xlu1 %6814, %v7210_v38  }
 0x70f   :  { %14306 = vst [vmem:[#allocation283_spill] sm:$0xff] %v11351_v53  ;;  %v7213_v53 = vld [vmem:[%s13158_s3 + $0xa0] sm:$0xff] }
 0x710   :  { %5469 = vperm.xlu0 %6815, %v7211_v24   ;;  %v7214_v24 = vld [vmem:[%s13158_s3 + $0x38] sm:$0xff] }
 0x711   :  { %v11359_v12 = vpop.permute.xlu1 %4897 }
 0x712   :  { %14307 = vst [vmem:[#allocation284_spill] sm:$0xff] %v11359_v12  ;;  %v11361_v21 = vpop.permute.xlu0 %4962  ;;  %5404 = vperm.xlu1 %6814, %v7212_v19   ;;  %v14355_v12 = vld [vmem:[#allocation212_spill] sm:$0xff] }
 0x713   :  { %14308 = vst [vmem:[#allocation285_spill] sm:$0xff] %v11361_v21  ;;  %v7215_v21 = vld [vmem:[%s13158_s3 + $0xb0] sm:$0xff] }
 0x714   :  { %5479 = vperm.xlu0 %6815, %v7213_v53   ;;  %v7216_v53 = vld [vmem:[%s13158_s3 + $0x48] sm:$0xff] }
 0x715   :  { %v11369_v38 = vpop.permute.xlu1 %4907 }
 0x716   :  { %14309 = vst [vmem:[#allocation286_spill] sm:$0xff] %v11369_v38  ;;  %v11371_v25 = vpop.permute.xlu0 %4972  ;;  %5414 = vperm.xlu1 %6814, %v7214_v24  }
 0x717   :  { %14310 = vst [vmem:[#allocation287_spill] sm:$0xff] %v11371_v25  ;;  %v7217_v25 = vld [vmem:[%s13158_s3 + $0xc0] sm:$0xff] }
 0x718   :  { %5489 = vperm.xlu0 %6815, %v7215_v21   ;;  %v7218_v21 = vld [vmem:[%s13158_s3 + $0x58] sm:$0xff] }
 0x719   :  { %v11379_v19 = vpop.permute.xlu1 %4917 }
 0x71a   :  { %14311 = vst [vmem:[#allocation288_spill] sm:$0xff] %v11379_v19  ;;  %v11381_v43 = vpop.permute.xlu0 %4982  ;;  %5424 = vperm.xlu1 %6814, %v7216_v53  }
 0x71b   :  { %14312 = vst [vmem:[#allocation289_spill] sm:$0xff] %v11381_v43  ;;  %v7219_v43 = vld [vmem:[%s13158_s3 + $0xd0] sm:$0xff] }
 0x71c   :  { %5499 = vperm.xlu0 %6815, %v7217_v25   ;;  %v7220_v25 = vld [vmem:[%s13158_s3 + $0x68] sm:$0xff] }
 0x71d   :  { %v11389_v24 = vpop.permute.xlu1 %4927 }
 0x71e   :  { %14313 = vst [vmem:[#allocation290_spill] sm:$0xff] %v11389_v24  ;;  %v11391_v38 = vpop.permute.xlu0 %4992  ;;  %5434 = vperm.xlu1 %6814, %v7218_v21  }
 0x71f   :  { %14314 = vst [vmem:[#allocation291_spill] sm:$0xff] %v11391_v38  ;;  %v7221_v38 = vld [vmem:[%s13158_s3 + $0xe0] sm:$0xff] }
 0x720   :  { %5509 = vperm.xlu0 %6815, %v7219_v43   ;;  %v7222_v43 = vld [vmem:[%s13158_s3 + $0x78] sm:$0xff] }
 0x721   :  { %v11399_v53 = vpop.permute.xlu1 %4937 }
 0x722   :  { %14315 = vst [vmem:[#allocation292_spill] sm:$0xff] %v11399_v53  ;;  %v11401_v19 = vpop.permute.xlu0 %5002  ;;  %5444 = vperm.xlu1 %6814, %v7220_v25  }
 0x723   :  { %14316 = vst [vmem:[#allocation293_spill] sm:$0xff] %v11401_v19  ;;  %v7223_v19 = vld [vmem:[%s13158_s3 + $0xf0] sm:$0xff] }
 0x724   :  { %5519 = vperm.xlu0 %6815, %v7221_v38   ;;  %v7224_v38 = vld [vmem:[%s13158_s3 + $0x88] sm:$0xff] }
 0x725   :  { %v11409_v21 = vpop.permute.xlu1 %4947 }
 0x726   :  { %14317 = vst [vmem:[#allocation294_spill] sm:$0xff] %v11409_v21  ;;  %v11411_v24 = vpop.permute.xlu0 %5012  ;;  %5454 = vperm.xlu1 %6814, %v7222_v43  }
 0x727   :  { %14318 = vst [vmem:[#allocation295_spill] sm:$0xff] %v11411_v24  ;;  %v7225_v24 = vld [vmem:[%s13158_s3 + $0x100] sm:$0xff] }
 0x728   :  { %5529 = vperm.xlu0 %6815, %v7223_v19   ;;  %v7226_v19 = vld [vmem:[%s13158_s3 + $0x98] sm:$0xff] }
 0x729   :  { %v11419_v25 = vpop.permute.xlu1 %4957 }
 0x72a   :  { %14319 = vst [vmem:[#allocation296_spill] sm:$0xff] %v11419_v25  ;;  %v11421_v53 = vpop.permute.xlu0 %5022  ;;  %5464 = vperm.xlu1 %6814, %v7224_v38  }
 0x72b   :  { %14320 = vst [vmem:[#allocation297_spill] sm:$0xff] %v11421_v53  ;;  %v7227_v53 = vld [vmem:[%s13158_s3 + $0x110] sm:$0xff] }
 0x72c   :  { %5539 = vperm.xlu0 %6815, %v7225_v24   ;;  %v7228_v24 = vld [vmem:[%s13158_s3 + $0xa8] sm:$0xff] }
 0x72d   :  { %v11429_v43 = vpop.permute.xlu1 %4967 }
 0x72e   :  { %14321 = vst [vmem:[#allocation298_spill] sm:$0xff] %v11429_v43  ;;  %v11431_v21 = vpop.permute.xlu0 %5032  ;;  %5474 = vperm.xlu1 %6814, %v7226_v19  }
 0x72f   :  { %14322 = vst [vmem:[#allocation299_spill] sm:$0xff] %v11431_v21  ;;  %v7229_v21 = vld [vmem:[%s13158_s3 + $0x120] sm:$0xff] }
 0x730   :  { %5549 = vperm.xlu0 %6815, %v7227_v53   ;;  %v7230_v53 = vld [vmem:[%s13158_s3 + $0xb8] sm:$0xff] }
 0x731   :  { %v11439_v38 = vpop.permute.xlu1 %4977 }
 0x732   :  { %14323 = vst [vmem:[#allocation300_spill] sm:$0xff] %v11439_v38  ;;  %v11441_v25 = vpop.permute.xlu0 %5042  ;;  %5484 = vperm.xlu1 %6814, %v7228_v24  }
 0x733   :  { %14324 = vst [vmem:[#allocation301_spill] sm:$0xff] %v11441_v25  ;;  %v7231_v25 = vld [vmem:[%s13158_s3 + $0x130] sm:$0xff] }
 0x734   :  { %5559 = vperm.xlu0 %6815, %v7229_v21   ;;  %v7232_v21 = vld [vmem:[%s13158_s3 + $0xc8] sm:$0xff] }
 0x735   :  { %v11449_v19 = vpop.permute.xlu1 %4987 }
 0x736   :  { %14325 = vst [vmem:[#allocation302_spill] sm:$0xff] %v11449_v19  ;;  %v11451_v43 = vpop.permute.xlu0 %5052  ;;  %5494 = vperm.xlu1 %6814, %v7230_v53  }
 0x737   :  { %14326 = vst [vmem:[#allocation303_spill] sm:$0xff] %v11451_v43  ;;  %v7233_v43 = vld [vmem:[%s13158_s3 + $0x140] sm:$0xff] }
 0x738   :  { %5569 = vperm.xlu0 %6815, %v7231_v25   ;;  %v7234_v25 = vld [vmem:[%s13158_s3 + $0xd8] sm:$0xff] }
 0x739   :  { %v11459_v24 = vpop.permute.xlu1 %4997 }
 0x73a   :  { %14327 = vst [vmem:[#allocation304_spill] sm:$0xff] %v11459_v24  ;;  %v11461_v38 = vpop.permute.xlu0 %5062  ;;  %5504 = vperm.xlu1 %6814, %v7232_v21  }
 0x73b   :  { %14328 = vst [vmem:[#allocation305_spill] sm:$0xff] %v11461_v38  ;;  %v7235_v38 = vld [vmem:[%s13158_s3 + $0x150] sm:$0xff] }
 0x73c   :  { %5579 = vperm.xlu0 %6815, %v7233_v43   ;;  %v7236_v43 = vld [vmem:[%s13158_s3 + $0xe8] sm:$0xff] }
 0x73d   :  { %v11469_v53 = vpop.permute.xlu1 %5007 }
 0x73e   :  { %14329 = vst [vmem:[#allocation306_spill] sm:$0xff] %v11469_v53  ;;  %v11471_v19 = vpop.permute.xlu0 %5072  ;;  %5514 = vperm.xlu1 %6814, %v7234_v25  }
 0x73f   :  { %14330 = vst [vmem:[#allocation307_spill] sm:$0xff] %v11471_v19  ;;  %v7237_v19 = vld [vmem:[%s13158_s3 + $0x160] sm:$0xff] }
 0x740   :  { %5589 = vperm.xlu0 %6815, %v7235_v38   ;;  %v7238_v38 = vld [vmem:[%s13158_s3 + $0xf8] sm:$0xff] }
 0x741   :  { %v11479_v21 = vpop.permute.xlu1 %5017 }
 0x742   :  { %14331 = vst [vmem:[#allocation308_spill] sm:$0xff] %v11479_v21  ;;  %v11481_v24 = vpop.permute.xlu0 %5082  ;;  %5524 = vperm.xlu1 %6814, %v7236_v43  }
 0x743   :  { %14332 = vst [vmem:[#allocation309_spill] sm:$0xff] %v11481_v24  ;;  %v7239_v24 = vld [vmem:[%s13158_s3 + $0x170] sm:$0xff] }
 0x744   :  { %5599 = vperm.xlu0 %6815, %v7237_v19   ;;  %v7240_v19 = vld [vmem:[%s13158_s3 + $0x108] sm:$0xff] }
 0x745   :  { %v11489_v25 = vpop.permute.xlu1 %5027 }
 0x746   :  { %14333 = vst [vmem:[#allocation310_spill] sm:$0xff] %v11489_v25  ;;  %v11491_v53 = vpop.permute.xlu0 %5092  ;;  %5534 = vperm.xlu1 %6814, %v7238_v38  }
 0x747   :  { %14334 = vst [vmem:[#allocation311_spill] sm:$0xff] %v11491_v53  ;;  %v7241_v53 = vld [vmem:[%s13158_s3 + $0x180] sm:$0xff] }
 0x748   :  { %5609 = vperm.xlu0 %6815, %v7239_v24   ;;  %v7242_v24 = vld [vmem:[%s13158_s3 + $0x118] sm:$0xff] }
 0x749   :  { %v11499_v43 = vpop.permute.xlu1 %5037 }
 0x74a   :  { %14335 = vst [vmem:[#allocation312_spill] sm:$0xff] %v11499_v43  ;;  %v11501_v21 = vpop.permute.xlu0 %5102  ;;  %5544 = vperm.xlu1 %6814, %v7240_v19  }
 0x74b   :  { %14336 = vst [vmem:[#allocation313_spill] sm:$0xff] %v11501_v21  ;;  %v7243_v21 = vld [vmem:[%s13158_s3 + $0x190] sm:$0xff] }
 0x74c   :  { %5619 = vperm.xlu0 %6815, %v7241_v53   ;;  %v7244_v53 = vld [vmem:[%s13158_s3 + $0x128] sm:$0xff] }
 0x74d   :  { %v11509_v38 = vpop.permute.xlu1 %5047 }
 0x74e   :  { %14337 = vst [vmem:[#allocation314_spill] sm:$0xff] %v11509_v38  ;;  %v11511_v25 = vpop.permute.xlu0 %5112  ;;  %5554 = vperm.xlu1 %6814, %v7242_v24  }
 0x74f   :  { %14338 = vst [vmem:[#allocation315_spill] sm:$0xff] %v11511_v25  ;;  %v7245_v25 = vld [vmem:[%s13158_s3 + $0x1a0] sm:$0xff] }
 0x750   :  { %5629 = vperm.xlu0 %6815, %v7243_v21   ;;  %v7246_v21 = vld [vmem:[%s13158_s3 + $0x138] sm:$0xff] }
 0x751   :  { %v11519_v19 = vpop.permute.xlu1 %5057 }
 0x752   :  { %14339 = vst [vmem:[#allocation316_spill] sm:$0xff] %v11519_v19  ;;  %v11521_v43 = vpop.permute.xlu0 %5122  ;;  %5564 = vperm.xlu1 %6814, %v7244_v53  }
 0x753   :  { %14340 = vst [vmem:[#allocation317_spill] sm:$0xff] %v11521_v43  ;;  %v7247_v43 = vld [vmem:[%s13158_s3 + $0x1b0] sm:$0xff] }
 0x754   :  { %5639 = vperm.xlu0 %6815, %v7245_v25   ;;  %v7248_v25 = vld [vmem:[%s13158_s3 + $0x148] sm:$0xff] }
 0x755   :  { %v11529_v24 = vpop.permute.xlu1 %5067 }
 0x756   :  { %14341 = vst [vmem:[#allocation318_spill] sm:$0xff] %v11529_v24  ;;  %v11531_v38 = vpop.permute.xlu0 %5132  ;;  %5574 = vperm.xlu1 %6814, %v7246_v21  }
 0x757   :  { %14342 = vst [vmem:[#allocation319_spill] sm:$0xff] %v11531_v38  ;;  %v7249_v38 = vld [vmem:[%s13158_s3 + $0x1c0] sm:$0xff] }
 0x758   :  { %5649 = vperm.xlu0 %6815, %v7247_v43   ;;  %v7250_v43 = vld [vmem:[%s13158_s3 + $0x158] sm:$0xff] }
 0x759   :  { %v11539_v53 = vpop.permute.xlu1 %5077 }
 0x75a   :  { %14343 = vst [vmem:[#allocation320_spill] sm:$0xff] %v11539_v53  ;;  %v11541_v19 = vpop.permute.xlu0 %5142  ;;  %5584 = vperm.xlu1 %6814, %v7248_v25  }
 0x75b   :  { %14344 = vst [vmem:[#allocation321_spill] sm:$0xff] %v11541_v19  ;;  %v7251_v19 = vld [vmem:[%s13158_s3 + $0x1d0] sm:$0xff] }
 0x75c   :  { %5659 = vperm.xlu0 %6815, %v7249_v38   ;;  %v7252_v38 = vld [vmem:[%s13158_s3 + $0x168] sm:$0xff] }
 0x75d   :  { %v11549_v21 = vpop.permute.xlu1 %5087 }
 0x75e   :  { %14345 = vst [vmem:[#allocation322_spill] sm:$0xff] %v11549_v21  ;;  %v11551_v24 = vpop.permute.xlu0 %5152  ;;  %5594 = vperm.xlu1 %6814, %v7250_v43  }
 0x75f   :  { %14346 = vst [vmem:[#allocation323_spill] sm:$0xff] %v11551_v24  ;;  %v7253_v24 = vld [vmem:[%s13158_s3 + $0x1e0] sm:$0xff] }
 0x760   :  { %5669 = vperm.xlu0 %6815, %v7251_v19   ;;  %v7254_v19 = vld [vmem:[%s13158_s3 + $0x178] sm:$0xff] }
 0x761   :  { %v11559_v25 = vpop.permute.xlu1 %5097 }
 0x762   :  { %14347 = vst [vmem:[#allocation324_spill] sm:$0xff] %v11559_v25  ;;  %v11561_v53 = vpop.permute.xlu0 %5162  ;;  %5604 = vperm.xlu1 %6814, %v7252_v38  }
 0x763   :  { %14348 = vst [vmem:[#allocation325_spill] sm:$0xff] %v11561_v53  ;;  %v7255_v53 = vld [vmem:[%s13158_s3 + $0x1f0] sm:$0xff] }
 0x764   :  { %5679 = vperm.xlu0 %6815, %v7253_v24   ;;  %v7256_v24 = vld [vmem:[%s13158_s3 + $0x188] sm:$0xff] }
 0x765   :  { %v11569_v43 = vpop.permute.xlu1 %5107 }
 0x766   :  { %14349 = vst [vmem:[#allocation326_spill] sm:$0xff] %v11569_v43  ;;  %v11571_v21 = vpop.permute.xlu0 %5172  ;;  %5614 = vperm.xlu1 %6814, %v7254_v19   ;;  %v14354_v43 = vld [vmem:[#allocation52_spill] sm:$0xff] }
 0x767   :  { %14350 = vst [vmem:[#allocation327_spill] sm:$0xff] %v11571_v21  ;;  %v7257_v21 = vld [vmem:[%s13158_s3 + $0x200] sm:$0xff]  ;;  %v5186_v8 = vmul.f32 %v14355_v12, %v14354_v43  ;;  %v7260_v12 = vld [vmem:[%s13158_s3 + $0x1a8] sm:$0xff] }
 0x768   :  { %5689 = vperm.xlu0 %6815, %v7255_v53   ;;  %v7258_v53 = vld [vmem:[%s13158_s3 + $0x198] sm:$0xff]  ;;  %v7261_v43 = vld [vmem:[%s13158_s3 + $0x220] sm:$0xff] }
 0x769   :  { %v11579_v38 = vpop.permute.xlu1 %5117 }
 0x76a   :  { %14351 = vst [vmem:[#allocation328_spill] sm:$0xff] %v11579_v38  ;;  %v11581_v25 = vpop.permute.xlu0 %5182  ;;  %5624 = vperm.xlu1 %6814, %v7256_v24   ;;  %v7259_v24 = vld [vmem:[%s13158_s3 + $0x210] sm:$0xff] }
 0x76b   :  { %14352 = vst [vmem:[#allocation329_spill] sm:$0xff] %v11581_v25 }
 0x76c   :  { %5699 = vperm.xlu0 %6815, %v7257_v21   ;;  %v14357_v21 = vld [vmem:[#allocation69_spill] sm:$0xff] }
 0x76d   :  { %v11589_v19 = vpop.permute.xlu1 %5127 }
 0x76e   :  { %14353 = vst [vmem:[#allocation330_spill] sm:$0xff] %v11589_v19  ;;  %5634 = vperm.xlu1 %6814, %v7258_v53   ;;  %v5189_v19 = vmul.f32 %v14358_v14, %v14357_v21  ;;  %v14360_v14 = vld [vmem:[#allocation81_spill] sm:$0xff] }
 0x76f   :  { %v5385_v25 = vpop.permute.xlu0 %5384 }
 0x770   :  { %v6338_v38 = vadd.f32 %v5385_v25, %v5186_v8  ;;  %5709 = vperm.xlu0 %6815, %v7259_v24   ;;  %v14361_v24 = vld [vmem:[#allocation209_spill] sm:$0xff] }
 0x771   :  { %v11599_v13 = vpop.permute.xlu1 %5137  ;;  %v5191_v21 = vmul.f32 %v14361_v24, %v14360_v14  ;;  %v14363_v14 = vld [vmem:[#allocation93_spill] sm:$0xff]  ;;  %v14364_v24 = vld [vmem:[#allocation220_spill] sm:$0xff] }
 0x772   :  { %14356 = vst [vmem:[#allocation52_spill] sm:$0xff] %v11599_v13  ;;  %6530 = vst.msk [vmem:[%s13159_s4 + $0x8] sm:$0xff] %vm1536_vm0, %v6338_v38  ;;  %5644 = vperm.xlu1 %6814, %v7260_v12   ;;  %v7262_v38 = vld [vmem:[%s13158_s3 + $0x1b8] sm:$0xff] }
 0x773   :  { %v5400_v8 = vpop.permute.xlu0 %5399 }
 0x774   :  { %v6341_v25 = vadd.f32 %v5400_v8, %v5189_v19  ;;  %5719 = vperm.xlu0 %6815, %v7261_v43   ;;  %v7263_v8 = vld [vmem:[%s13158_s3 + $0x230] sm:$0xff] }
 0x775   :  { %v11613_v53 = vpop.permute.xlu1 %5147 }
 0x776   :  { %14359 = vst [vmem:[#allocation212_spill] sm:$0xff] %v11613_v53  ;;  %6533 = vst.msk [vmem:[%s13159_s4 + $0x20] sm:$0xff] %vm1536_vm0, %v6341_v25  ;;  %5654 = vperm.xlu1 %6814, %v7262_v38   ;;  %v5193_v53 = vmul.f32 %v14364_v24, %v14363_v14  ;;  %v7264_v25 = vld [vmem:[%s13158_s3 + $0x1c8] sm:$0xff]  ;;  %v14367_v24 = vld [vmem:[#allocation128_spill] sm:$0xff] }
 0x777   :  { %v5410_v19 = vpop.permute.xlu0 %5409  ;;  %v14366_v14 = vld [vmem:[#allocation106_spill] sm:$0xff] }
 0x778   :  { %v6343_v12 = vadd.f32 %v5410_v19, %v5191_v21  ;;  %5729 = vperm.xlu0 %6815, %v7263_v8   ;;  %v7265_v19 = vld [vmem:[%s13158_s3 + $0x240] sm:$0xff] }
 0x779   :  { %v11627_v43 = vpop.permute.xlu1 %5157 }
 0x77a   :  { %14362 = vst [vmem:[#allocation69_spill] sm:$0xff] %v11627_v43  ;;  %6535 = vst.msk [vmem:[%s13159_s4 + $0x30] sm:$0xff] %vm1536_vm0, %v6343_v12  ;;  %5664 = vperm.xlu1 %6814, %v7264_v25   ;;  %v5195_v43 = vmul.f32 %v14367_v24, %v14366_v14  ;;  %v7266_v12 = vld [vmem:[%s13158_s3 + $0x1d8] sm:$0xff]  ;;  %v14369_v14 = vld [vmem:[#allocation119_spill] sm:$0xff] }
 0x77b   :  { %v5420_v21 = vpop.permute.xlu0 %5419  ;;  %v5197_v24 = vmul.f32 %v10661_v16, %v14369_v14  ;;  %v14372_v14 = vld [vmem:[#allocation132_spill] sm:$0xff] }
 0x77c   :  { %v6345_v38 = vadd.f32 %v5420_v21, %v5193_v53  ;;  %5739 = vperm.xlu0 %6815, %v7265_v19   ;;  %v7267_v21 = vld [vmem:[%s13158_s3 + $0x250] sm:$0xff]  ;;  %v5199_v13 = vmul.f32 %v10683_v15, %v14372_v14 }
 0x77d   :  { %v11641_v8 = vpop.permute.xlu1 %5167 }
 0x77e   :  { %14365 = vst [vmem:[#allocation179_spill] sm:$0xff] %v11641_v8  ;;  %6537 = vst.msk [vmem:[%s13159_s4 + $0x40] sm:$0xff] %vm1536_vm0, %v6345_v38  ;;  %5674 = vperm.xlu1 %6814, %v7266_v12   ;;  %v7268_v38 = vld [vmem:[%s13158_s3 + $0x1e8] sm:$0xff]  ;;  %v14370_v12 = vld [vmem:[#allocation45_spill] sm:$0xff] }
 0x77f   :  { %v5430_v53 = vpop.permute.xlu0 %5429 }
 0x780   :  { %v6347_v25 = vadd.f32 %v5430_v53, %v5195_v43  ;;  %5749 = vperm.xlu0 %6815, %v7267_v21   ;;  %v14371_v53 = vld [vmem:[#allocation247_spill] sm:$0xff] }
 0x781   :  { %v11655_v19 = vpop.permute.xlu1 %5177  ;;  %v5185_v8 = vmul.f32 %v14371_v53, %v14370_v12  ;;  %v14374_v12 = vld [vmem:[#allocation272_spill] sm:$0xff] }
 0x782   :  { %14368 = vst [vmem:[#allocation81_spill] sm:$0xff] %v11655_v19  ;;  %6539 = vst.msk [vmem:[%s13159_s4 + $0x50] sm:$0xff] %vm1536_vm0, %v6347_v25  ;;  %5684 = vperm.xlu1 %6814, %v7268_v38   ;;  %v7269_v19 = vld [vmem:[%s13158_s3 + $0x260] sm:$0xff]  ;;  %v7270_v38 = vld [vmem:[%s13158_s3 + $0x1f8] sm:$0xff] }
 0x783   :  { %v5440_v43 = vpop.permute.xlu0 %5439 }
 0x784   :  { %v6349_v21 = vadd.f32 %v5440_v43, %v5197_v24  ;;  %5759 = vperm.xlu0 %6815, %v7269_v19   ;;  %v14373_v43 = vld [vmem:[#allocation57_spill] sm:$0xff]  ;;  %v7271_v19 = vld [vmem:[%s13158_s3 + $0x270] sm:$0xff] }
 0x785   :  { %v5380_v16 = vpop.permute.xlu1 %5379  ;;  %v5187_v53 = vmul.f32 %v14374_v12, %v14373_v43  ;;  %v7273_v12 = vld [vmem:[%s13158_s3 + $0x280] sm:$0xff] }
 0x786   :  { %6541 = vst.msk [vmem:[%s13159_s4 + $0x60] sm:$0xff] %vm1536_vm0, %v6349_v21  ;;  %v6337_v25 = vadd.f32 %v5380_v16, %v5185_v8  ;;  %5694 = vperm.xlu1 %6814, %v7270_v38   ;;  %v14375_v21 = vld [vmem:[#allocation5_spill] sm:$0xff] }
 0x787   :  { %v5450_v24 = vpop.permute.xlu0 %5449  ;;  %v5201_v16 = vmul.f32 %v10692_v40, %v14375_v21  ;;  %v14376_v38 = vld [vmem:[#allocation61_spill] sm:$0xff]  ;;  %v7274_v21 = vld [vmem:[%s13158_s3 + $0x218] sm:$0xff] }
 0x788   :  { %6529 = vst.msk [vmem:[%s13159_s4] sm:$0xff] %vm1536_vm0, %v6337_v25  ;;  %v6351_v15 = vadd.f32 %v5450_v24, %v5199_v13  ;;  %5769 = vperm.xlu0 %6815, %v7271_v19   ;;  %v7272_v25 = vld [vmem:[%s13158_s3 + $0x208] sm:$0xff] }
 0x789   :  { %v5390_v8 = vpop.permute.xlu1 %5389  ;;  %v14377_v24 = vld [vmem:[#allocation274_spill] sm:$0xff] }
 0x78a   :  { %6543 = vst.msk [vmem:[%s13159_s4 + $0x70] sm:$0xff] %vm1536_vm0, %v6351_v15  ;;  %v6339_v14 = vadd.f32 %v5390_v8, %v5187_v53  ;;  %5704 = vperm.xlu1 %6814, %v7272_v25   ;;  %v5188_v43 = vmul.f32 %v14377_v24, %v14376_v38  ;;  %v14378_v15 = vld [vmem:[#allocation9_spill] sm:$0xff]  ;;  %v14380_v25 = vld [vmem:[#allocation183_spill] sm:$0xff] }
 0x78b   :  { %v5460_v13 = vpop.permute.xlu0 %5459  ;;  %v5203_v19 = vmul.f32 %v10702_v44, %v14378_v15  ;;  %v7275_v38 = vld [vmem:[%s13158_s3 + $0x290] sm:$0xff] }
 0x78c   :  { %6531 = vst.msk [vmem:[%s13159_s4 + $0x10] sm:$0xff] %vm1536_vm0, %v6339_v14  ;;  %v6353_v40 = vadd.f32 %v5460_v13, %v5201_v16  ;;  %5779 = vperm.xlu0 %6815, %v7273_v12   ;;  %v14379_v14 = vld [vmem:[#allocation73_spill] sm:$0xff] }
 0x78d   :  { %v5395_v53 = vpop.permute.xlu1 %5394  ;;  %v5190_v13 = vmul.f32 %v14380_v25, %v14379_v14  ;;  %v14384_v25 = vld [vmem:[#allocation17_spill] sm:$0xff] }
 0x78e   :  { %6545 = vst.msk [vmem:[%s13159_s4 + $0x80] sm:$0xff] %vm1536_vm0, %v6353_v40  ;;  %v6340_v8 = vadd.f32 %v5395_v53, %v5188_v43  ;;  %5714 = vperm.xlu1 %6814, %v7274_v21   ;;  %v14381_v43 = vld [vmem:[#allocation13_spill] sm:$0xff]  ;;  %v7276_v53 = vld [vmem:[%s13158_s3 + $0x228] sm:$0xff] }
 0x78f   :  { %v5470_v16 = vpop.permute.xlu0 %5469  ;;  %v5205_v40 = vmul.f32 %v10714_v30, %v14381_v43  ;;  %v14385_v43 = vld [vmem:[#allocation97_spill] sm:$0xff] }
 0x790   :  { %6532 = vst.msk [vmem:[%s13159_s4 + $0x18] sm:$0xff] %vm1536_vm0, %v6340_v8  ;;  %v6355_v44 = vadd.f32 %v5470_v16, %v5203_v19  ;;  %5789 = vperm.xlu0 %6815, %v7275_v38   ;;  %v14382_v19 = vld [vmem:[#allocation85_spill] sm:$0xff]  ;;  %v7278_v38 = vld [vmem:[%s13158_s3 + $0x238] sm:$0xff] }
 0x791   :  { %v5405_v24 = vpop.permute.xlu1 %5404  ;;  %v14383_v8 = vld [vmem:[#allocation225_spill] sm:$0xff] }
 0x792   :  { %6547 = vst.msk [vmem:[%s13159_s4 + $0x90] sm:$0xff] %vm1536_vm0, %v6355_v44  ;;  %v6342_v12 = vadd.f32 %v5405_v24, %v5190_v13  ;;  %5724 = vperm.xlu1 %6814, %v7276_v53   ;;  %v5192_v21 = vmul.f32 %v14383_v8, %v14382_v19  ;;  %v7277_v16 = vld [vmem:[%s13158_s3 + $0x2a0] sm:$0xff]  ;;  %v5207_v13 = vmul.f32 %v10726_v1, %v14384_v25  ;;  %v7279_v53 = vld [vmem:[%s13158_s3 + $0x2b0] sm:$0xff] }
 0x793   :  { %v5480_v15 = vpop.permute.xlu0 %5479  ;;  %v14387_v19 = vld [vmem:[#allocation21_spill] sm:$0xff] }
 0x794   :  { %6534 = vst.msk [vmem:[%s13159_s4 + $0x28] sm:$0xff] %vm1536_vm0, %v6342_v12  ;;  %v6357_v30 = vadd.f32 %v5480_v15, %v5205_v40  ;;  %5799 = vperm.xlu0 %6815, %v7277_v16   ;;  %v14386_v40 = vld [vmem:[#allocation259_spill] sm:$0xff]  ;;  %v5209_v8 = vmul.f32 %v10736_v37, %v14387_v19  ;;  %v14391_v19 = vld [vmem:[#allocation29_spill] sm:$0xff] }
 0x795   :  { %v5415_v14 = vpop.permute.xlu1 %5414  ;;  %v5194_v12 = vmul.f32 %v14386_v40, %v14385_v43  ;;  %v7282_v43 = vld [vmem:[%s13158_s3 + $0x258] sm:$0xff] }
 0x796   :  { %6549 = vst.msk [vmem:[%s13159_s4 + $0xa0] sm:$0xff] %vm1536_vm0, %v6357_v30  ;;  %v6344_v44 = vadd.f32 %v5415_v14, %v5192_v21  ;;  %5734 = vperm.xlu1 %6814, %v7278_v38   ;;  %v7280_v30 = vld [vmem:[%s13158_s3 + $0x248] sm:$0xff]  ;;  %v14389_v38 = vld [vmem:[#allocation25_spill] sm:$0xff] }
 0x797   :  { %v5490_v24 = vpop.permute.xlu0 %5489  ;;  %v14388_v14 = vld [vmem:[#allocation110_spill] sm:$0xff] }
 0x798   :  { %6536 = vst.msk [vmem:[%s13159_s4 + $0x38] sm:$0xff] %vm1536_vm0, %v6344_v44  ;;  %v6359_v1 = vadd.f32 %v5490_v24, %v5207_v13  ;;  %5809 = vperm.xlu0 %6815, %v7279_v53   ;;  %v5196_v25 = vmul.f32 %v10568_v10, %v14388_v14  ;;  %v7281_v13 = vld [vmem:[%s13158_s3 + $0x2c0] sm:$0xff]  ;;  %v5211_v24 = vmul.f32 %v10748_v33, %v14389_v38  ;;  %v7283_v53 = vld [vmem:[%s13158_s3 + $0x2d0] sm:$0xff]  ;;  %v7286_v38 = vld [vmem:[%s13158_s3 + $0x278] sm:$0xff] }
 0x799   :  { %v5425_v15 = vpop.permute.xlu1 %5424 }
 0x79a   :  { %6551 = vst.msk [vmem:[%s13159_s4 + $0xb0] sm:$0xff] %vm1536_vm0, %v6359_v1  ;;  %v6346_v21 = vadd.f32 %v5425_v15, %v5194_v12  ;;  %5744 = vperm.xlu1 %6814, %v7280_v30   ;;  %v14390_v12 = vld [vmem:[#allocation123_spill] sm:$0xff] }
 0x79b   :  { %v5500_v16 = vpop.permute.xlu0 %5499  ;;  %v5198_v1 = vmul.f32 %v10583_v5, %v14390_v12 }
 0x79c   :  { %6538 = vst.msk [vmem:[%s13159_s4 + $0x48] sm:$0xff] %vm1536_vm0, %v6346_v21  ;;  %v6361_v37 = vadd.f32 %v5500_v16, %v5209_v8  ;;  %5819 = vperm.xlu0 %6815, %v7281_v13   ;;  %v5213_v8 = vmul.f32 %v10760_v39, %v14391_v19  ;;  %v7284_v21 = vld [vmem:[%s13158_s3 + $0x268] sm:$0xff]  ;;  %v14392_v16 = vld [vmem:[#allocation136_spill] sm:$0xff]  ;;  %v14396_v19 = vld [vmem:[#allocation11_spill] sm:$0xff] }
 0x79d   :  { %v5435_v44 = vpop.permute.xlu1 %5434  ;;  %v5200_v14 = vmul.f32 %v10592_v57, %v14392_v16  ;;  %v14393_v13 = vld [vmem:[#allocation138_spill] sm:$0xff]  ;;  %v14398_v16 = vld [vmem:[#allocation39_spill] sm:$0xff] }
 0x79e   :  { %6553 = vst.msk [vmem:[%s13159_s4 + $0xc0] sm:$0xff] %vm1536_vm0, %v6361_v37  ;;  %v6348_v10 = vadd.f32 %v5435_v44, %v5196_v25  ;;  %5754 = vperm.xlu1 %6814, %v7282_v43   ;;  %v7285_v25 = vld [vmem:[%s13158_s3 + $0x2e0] sm:$0xff]  ;;  %v5215_v44 = vmul.f32 %v10770_v4, %v14393_v13 }
 0x79f   :  { %v5510_v40 = vpop.permute.xlu0 %5509 }
 0x7a0   :  { %6540 = vst.msk [vmem:[%s13159_s4 + $0x58] sm:$0xff] %vm1536_vm0, %v6348_v10  ;;  %v6363_v33 = vadd.f32 %v5510_v40, %v5211_v24  ;;  %5829 = vperm.xlu0 %6815, %v7283_v53   ;;  %v14394_v10 = vld [vmem:[#allocation7_spill] sm:$0xff]  ;;  %v7288_v53 = vld [vmem:[%s13158_s3 + $0x288] sm:$0xff] }
 0x7a1   :  { %v5445_v15 = vpop.permute.xlu1 %5444  ;;  %v5202_v43 = vmul.f32 %v10605_v27, %v14394_v10  ;;  %v7287_v40 = vld [vmem:[%s13158_s3 + $0x2f0] sm:$0xff] }
 0x7a2   :  { %6555 = vst.msk [vmem:[%s13159_s4 + $0xd0] sm:$0xff] %vm1536_vm0, %v6363_v33  ;;  %v6350_v5 = vadd.f32 %v5445_v15, %v5198_v1  ;;  %5764 = vperm.xlu1 %6814, %v7284_v21   ;;  %v14395_v1 = vld [vmem:[#allocation35_spill] sm:$0xff]  ;;  %v7289_v21 = vld [vmem:[%s13158_s3 + $0x300] sm:$0xff] }
 0x7a3   :  { %v5520_v30 = vpop.permute.xlu0 %5519  ;;  %v5217_v33 = vmul.f32 %v10782_v22, %v14395_v1  ;;  %v7291_v10 = vld [vmem:[%s13158_s3 + $0x310] sm:$0xff] }
 0x7a4   :  { %6542 = vst.msk [vmem:[%s13159_s4 + $0x68] sm:$0xff] %vm1536_vm0, %v6350_v5  ;;  %v6365_v39 = vadd.f32 %v5520_v30, %v5213_v8  ;;  %5839 = vperm.xlu0 %6815, %v7285_v25   ;;  %v14397_v8 = vld [vmem:[#allocation227_spill] sm:$0xff] }
 0x7a5   :  { %v5455_v37 = vpop.permute.xlu1 %5454  ;;  %v5204_v5 = vmul.f32 %v14397_v8, %v14396_v19 }
 0x7a6   :  { %6557 = vst.msk [vmem:[%s13159_s4 + $0xe0] sm:$0xff] %vm1536_vm0, %v6365_v39  ;;  %v6352_v57 = vadd.f32 %v5455_v37, %v5200_v14  ;;  %5774 = vperm.xlu1 %6814, %v7286_v38   ;;  %v14399_v14 = vld [vmem:[#allocation192_spill] sm:$0xff] }
 0x7a7   :  { %v5530_v24 = vpop.permute.xlu0 %5529  ;;  %v5219_v39 = vmul.f32 %v14399_v14, %v14398_v16  ;;  %v7290_v37 = vld [vmem:[%s13158_s3 + $0x298] sm:$0xff] }
 0x7a8   :  { %6544 = vst.msk [vmem:[%s13159_s4 + $0x78] sm:$0xff] %vm1536_vm0, %v6352_v57  ;;  %v6367_v4 = vadd.f32 %v5530_v24, %v5215_v44  ;;  %5849 = vperm.xlu0 %6815, %v7287_v40   ;;  %v14400_v44 = vld [vmem:[#allocation15_spill] sm:$0xff]  ;;  %v14403_v40 = vld [vmem:[#allocation166_spill] sm:$0xff] }
 0x7a9   :  { %v5465_v12 = vpop.permute.xlu1 %5464  ;;  %v14401_v57 = vld [vmem:[#allocation235_spill] sm:$0xff] }
 0x7aa   :  { %6559 = vst.msk [vmem:[%s13159_s4 + $0xf0] sm:$0xff] %vm1536_vm0, %v6367_v4  ;;  %v6354_v27 = vadd.f32 %v5465_v12, %v5202_v43  ;;  %5784 = vperm.xlu1 %6814, %v7288_v53   ;;  %v5206_v38 = vmul.f32 %v14401_v57, %v14400_v44  ;;  %v14402_v4 = vld [vmem:[#allocation43_spill] sm:$0xff] }
 0x7ab   :  { %v5540_v15 = vpop.permute.xlu0 %5539  ;;  %v5221_v12 = vmul.f32 %v14403_v40, %v14402_v4  ;;  %v14404_v53 = vld [vmem:[#allocation19_spill] sm:$0xff] }
 0x7ac   :  { %6546 = vst.msk [vmem:[%s13159_s4 + $0x88] sm:$0xff] %vm1536_vm0, %v6354_v27  ;;  %v6369_v22 = vadd.f32 %v5540_v15, %v5217_v33  ;;  %5859 = vperm.xlu0 %6815, %v7289_v21   ;;  %v7292_v33 = vld [vmem:[%s13158_s3 + $0x2a8] sm:$0xff]  ;;  %v14406_v21 = vld [vmem:[#allocation49_spill] sm:$0xff] }
 0x7ad   :  { %v5475_v30 = vpop.permute.xlu1 %5474  ;;  %v14405_v15 = vld [vmem:[#allocation238_spill] sm:$0xff] }
 0x7ae   :  { %6561 = vst.msk [vmem:[%s13159_s4 + $0x100] sm:$0xff] %vm1536_vm0, %v6369_v22  ;;  %v6356_v25 = vadd.f32 %v5475_v30, %v5204_v5  ;;  %5794 = vperm.xlu1 %6814, %v7290_v37   ;;  %v5208_v19 = vmul.f32 %v14405_v15, %v14404_v53  ;;  %v7293_v5 = vld [vmem:[%s13158_s3 + $0x320] sm:$0xff]  ;;  %v14407_v30 = vld [vmem:[#allocation172_spill] sm:$0xff]  ;;  %v14408_v37 = vld [vmem:[#allocation23_spill] sm:$0xff] }
 0x7af   :  { %v5550_v13 = vpop.permute.xlu0 %5549  ;;  %v5223_v16 = vmul.f32 %v14407_v30, %v14406_v21  ;;  %v7298_v30 = vld [vmem:[%s13158_s3 + $0x2d8] sm:$0xff] }
 0x7b0   :  { %6548 = vst.msk [vmem:[%s13159_s4 + $0x98] sm:$0xff] %vm1536_vm0, %v6356_v25  ;;  %v6371_v24 = vadd.f32 %v5550_v13, %v5219_v39  ;;  %5869 = vperm.xlu0 %6815, %v7291_v10   ;;  %v7294_v39 = vld [vmem:[%s13158_s3 + $0x2b8] sm:$0xff]  ;;  %v14409_v13 = vld [vmem:[#allocation243_spill] sm:$0xff] }
 0x7b1   :  { %v5485_v43 = vpop.permute.xlu1 %5484  ;;  %v5210_v44 = vmul.f32 %v14409_v13, %v14408_v37  ;;  %v14410_v10 = vld [vmem:[#allocation55_spill] sm:$0xff] }
 0x7b2   :  { %6563 = vst.msk [vmem:[%s13159_s4 + $0x110] sm:$0xff] %vm1536_vm0, %v6371_v24  ;;  %v6358_v1 = vadd.f32 %v5485_v43, %v5206_v38  ;;  %5804 = vperm.xlu1 %6814, %v7292_v33   ;;  %v7295_v38 = vld [vmem:[%s13158_s3 + $0x330] sm:$0xff]  ;;  %v14411_v43 = vld [vmem:[#allocation176_spill] sm:$0xff] }
 0x7b3   :  { %v5560_v27 = vpop.permute.xlu0 %5559  ;;  %v5225_v4 = vmul.f32 %v14411_v43, %v14410_v10  ;;  %v14412_v33 = vld [vmem:[#allocation27_spill] sm:$0xff]  ;;  %v14418_v43 = vld [vmem:[#allocation33_spill] sm:$0xff] }
 0x7b4   :  { %6550 = vst.msk [vmem:[%s13159_s4 + $0xa8] sm:$0xff] %vm1536_vm0, %v6358_v1  ;;  %v6373_v8 = vadd.f32 %v5560_v27, %v5221_v12  ;;  %5879 = vperm.xlu0 %6815, %v7293_v5   ;;  %v7296_v12 = vld [vmem:[%s13158_s3 + $0x2c8] sm:$0xff]  ;;  %v14413_v27 = vld [vmem:[#allocation249_spill] sm:$0xff]  ;;  %v7299_v37 = vld [vmem:[%s13158_s3 + $0x350] sm:$0xff] }
 0x7b5   :  { %v5495_v22 = vpop.permute.xlu1 %5494  ;;  %v5212_v53 = vmul.f32 %v14413_v27, %v14412_v33  ;;  %v14414_v5 = vld [vmem:[#allocation62_spill] sm:$0xff] }
 0x7b6   :  { %6565 = vst.msk [vmem:[%s13159_s4 + $0x120] sm:$0xff] %vm1536_vm0, %v6373_v8  ;;  %v6360_v14 = vadd.f32 %v5495_v22, %v5208_v19  ;;  %5814 = vperm.xlu1 %6814, %v7294_v39   ;;  %v7297_v19 = vld [vmem:[%s13158_s3 + $0x340] sm:$0xff]  ;;  %v5227_v22 = vmul.f32 %v10840_v60, %v14414_v5  ;;  %v14420_v33 = vld [vmem:[#allocation74_spill] sm:$0xff] }
 0x7b7   :  { %v5570_v25 = vpop.permute.xlu0 %5569  ;;  %v14416_v39 = vld [vmem:[#allocation281_spill] sm:$0xff]  ;;  %v14421_v27 = vld [vmem:[#allocation182_spill] sm:$0xff] }
 0x7b8   :  { %6552 = vst.msk [vmem:[%s13159_s4 + $0xb8] sm:$0xff] %vm1536_vm0, %v6360_v14  ;;  %v6375_v57 = vadd.f32 %v5570_v25, %v5223_v16  ;;  %5889 = vperm.xlu0 %6815, %v7295_v38   ;;  %v14415_v14 = vld [vmem:[#allocation31_spill] sm:$0xff]  ;;  %v14422_v5 = vld [vmem:[#allocation37_spill] sm:$0xff] }
 0x7b9   :  { %v5505_v24 = vpop.permute.xlu1 %5504  ;;  %v5214_v25 = vmul.f32 %v14416_v39, %v14415_v14  ;;  %v14424_v39 = vld [vmem:[#allocation79_spill] sm:$0xff] }
 0x7ba   :  { %6567 = vst.msk [vmem:[%s13159_s4 + $0x130] sm:$0xff] %vm1536_vm0, %v6375_v57  ;;  %v6362_v40 = vadd.f32 %v5505_v24, %v5210_v44  ;;  %5824 = vperm.xlu1 %6814, %v7296_v12   ;;  %v14417_v44 = vld [vmem:[#allocation67_spill] sm:$0xff]  ;;  %v7300_v24 = vld [vmem:[%s13158_s3 + $0x2e8] sm:$0xff]  ;;  %v7301_v12 = vld [vmem:[%s13158_s3 + $0x360] sm:$0xff] }
 0x7bb   :  { %v5580_v1 = vpop.permute.xlu0 %5579  ;;  %v5229_v57 = vmul.f32 %v10852_v26, %v14417_v44 }
 0x7bc   :  { %6554 = vst.msk [vmem:[%s13159_s4 + $0xc8] sm:$0xff] %vm1536_vm0, %v6362_v40  ;;  %v6377_v15 = vadd.f32 %v5580_v1, %v5225_v4  ;;  %5899 = vperm.xlu0 %6815, %v7297_v19   ;;  %v14419_v4 = vld [vmem:[#allocation103_spill] sm:$0xff]  ;;  %v7302_v19 = vld [vmem:[%s13158_s3 + $0x2f8] sm:$0xff] }
 0x7bd   :  { %v5515_v8 = vpop.permute.xlu1 %5514  ;;  %v5216_v40 = vmul.f32 %v14419_v4, %v14418_v43  ;;  %v7305_v43 = vld [vmem:[%s13158_s3 + $0x380] sm:$0xff] }
 0x7be   :  { %6569 = vst.msk [vmem:[%s13159_s4 + $0x140] sm:$0xff] %vm1536_vm0, %v6377_v15  ;;  %v6364_v21 = vadd.f32 %v5515_v8, %v5212_v53  ;;  %5834 = vperm.xlu1 %6814, %v7298_v30   ;;  %v5231_v53 = vmul.f32 %v14421_v27, %v14420_v33  ;;  %v7306_v33 = vld [vmem:[%s13158_s3 + $0x318] sm:$0xff] }
 0x7bf   :  { %v5590_v16 = vpop.permute.xlu0 %5589 }
 0x7c0   :  { %6556 = vst.msk [vmem:[%s13159_s4 + $0xd8] sm:$0xff] %vm1536_vm0, %v6364_v21  ;;  %v6379_v60 = vadd.f32 %v5590_v16, %v5227_v22  ;;  %5909 = vperm.xlu0 %6815, %v7299_v37   ;;  %v14423_v22 = vld [vmem:[#allocation160_spill] sm:$0xff]  ;;  %v7303_v16 = vld [vmem:[%s13158_s3 + $0x370] sm:$0xff] }
 0x7c1   :  { %v5525_v13 = vpop.permute.xlu1 %5524  ;;  %v5218_v21 = vmul.f32 %v14423_v22, %v14422_v5  ;;  %v7307_v5 = vld [vmem:[%s13158_s3 + $0x390] sm:$0xff] }
 0x7c2   :  { %6571 = vst.msk [vmem:[%s13159_s4 + $0x150] sm:$0xff] %vm1536_vm0, %v6379_v60  ;;  %v6366_v38 = vadd.f32 %v5525_v13, %v5214_v25  ;;  %5844 = vperm.xlu1 %6814, %v7300_v24   ;;  %v14425_v25 = vld [vmem:[#allocation189_spill] sm:$0xff]  ;;  %v7304_v13 = vld [vmem:[%s13158_s3 + $0x308] sm:$0xff] }
 0x7c3   :  { %v5600_v10 = vpop.permute.xlu0 %5599  ;;  %v5233_v60 = vmul.f32 %v14425_v25, %v14424_v39  ;;  %v7308_v39 = vld [vmem:[%s13158_s3 + $0x328] sm:$0xff] }
 0x7c4   :  { %6558 = vst.msk [vmem:[%s13159_s4 + $0xe8] sm:$0xff] %vm1536_vm0, %v6366_v38  ;;  %v6381_v26 = vadd.f32 %v5600_v10, %v5229_v57  ;;  %5919 = vperm.xlu0 %6815, %v7301_v12   ;;  %v14426_v57 = vld [vmem:[#allocation41_spill] sm:$0xff]  ;;  %v14427_v38 = vld [vmem:[#allocation116_spill] sm:$0xff] }
 0x7c5   :  { %v5535_v1 = vpop.permute.xlu1 %5534  ;;  %v5220_v24 = vmul.f32 %v14427_v38, %v14426_v57  ;;  %v7309_v57 = vld [vmem:[%s13158_s3 + $0x3a0] sm:$0xff] }
 0x7c6   :  { %6573 = vst.msk [vmem:[%s13159_s4 + $0x160] sm:$0xff] %vm1536_vm0, %v6381_v26  ;;  %v6368_v15 = vadd.f32 %v5535_v1, %v5216_v40  ;;  %5854 = vperm.xlu1 %6814, %v7302_v19   ;;  %v14428_v40 = vld [vmem:[#allocation86_spill] sm:$0xff] }
 0x7c7   :  { %v5610_v8 = vpop.permute.xlu0 %5609  ;;  %v14429_v26 = vld [vmem:[#allocation194_spill] sm:$0xff] }
 0x7c8   :  { %6560 = vst.msk [vmem:[%s13159_s4 + $0xf8] sm:$0xff] %vm1536_vm0, %v6368_v15  ;;  %v6383_v30 = vadd.f32 %v5610_v8, %v5231_v53  ;;  %5929 = vperm.xlu0 %6815, %v7303_v16   ;;  %v5235_v12 = vmul.f32 %v14429_v26, %v14428_v40  ;;  %v14430_v53 = vld [vmem:[#allocation46_spill] sm:$0xff]  ;;  %v7310_v40 = vld [vmem:[%s13158_s3 + $0x338] sm:$0xff] }
 0x7c9   :  { %v5545_v14 = vpop.permute.xlu1 %5544  ;;  %v14431_v15 = vld [vmem:[#allocation174_spill] sm:$0xff] }
 0x7ca   :  { %6575 = vst.msk [vmem:[%s13159_s4 + $0x170] sm:$0xff] %vm1536_vm0, %v6383_v30  ;;  %v6370_v37 = vadd.f32 %v5545_v14, %v5218_v21  ;;  %5864 = vperm.xlu1 %6814, %v7304_v13   ;;  %v5222_v19 = vmul.f32 %v14431_v15, %v14430_v53  ;;  %v14432_v21 = vld [vmem:[#allocation91_spill] sm:$0xff]  ;;  %v14433_v30 = vld [vmem:[#allocation198_spill] sm:$0xff] }
 0x7cb   :  { %v5620_v44 = vpop.permute.xlu0 %5619  ;;  %v5237_v16 = vmul.f32 %v14433_v30, %v14432_v21  ;;  %v7311_v53 = vld [vmem:[%s13158_s3 + $0x3b0] sm:$0xff]  ;;  %v14441_v30 = vld [vmem:[#allocation65_spill] sm:$0xff] }
 0x7cc   :  { %6562 = vst.msk [vmem:[%s13159_s4 + $0x108] sm:$0xff] %vm1536_vm0, %v6370_v37  ;;  %v6385_v10 = vadd.f32 %v5620_v44, %v5233_v60  ;;  %5939 = vperm.xlu0 %6815, %v7305_v43   ;;  %v14434_v60 = vld [vmem:[#allocation53_spill] sm:$0xff] }
 0x7cd   :  { %v5555_v4 = vpop.permute.xlu1 %5554  ;;  %v14435_v37 = vld [vmem:[#allocation129_spill] sm:$0xff] }
 0x7ce   :  { %6577 = vst.msk [vmem:[%s13159_s4 + $0x180] sm:$0xff] %vm1536_vm0, %v6385_v10  ;;  %v6372_v1 = vadd.f32 %v5555_v4, %v5220_v24  ;;  %5874 = vperm.xlu1 %6814, %v7306_v33   ;;  %v5224_v13 = vmul.f32 %v14435_v37, %v14434_v60  ;;  %v14436_v24 = vld [vmem:[#allocation98_spill] sm:$0xff]  ;;  %v14437_v10 = vld [vmem:[#allocation203_spill] sm:$0xff] }
 0x7cf   :  { %v5630_v27 = vpop.permute.xlu0 %5629  ;;  %v5239_v43 = vmul.f32 %v14437_v10, %v14436_v24  ;;  %v14443_v60 = vld [vmem:[#allocation111_spill] sm:$0xff]  ;;  %v14445_v24 = vld [vmem:[#allocation184_spill] sm:$0xff] }
 0x7d0   :  { %6564 = vst.msk [vmem:[%s13159_s4 + $0x118] sm:$0xff] %vm1536_vm0, %v6372_v1  ;;  %v6387_v8 = vadd.f32 %v5630_v27, %v5235_v12  ;;  %5949 = vperm.xlu0 %6815, %v7307_v5   ;;  %v14438_v12 = vld [vmem:[#allocation58_spill] sm:$0xff]  ;;  %v14439_v1 = vld [vmem:[#allocation180_spill] sm:$0xff]  ;;  %v5243_v37 = vmul.f32 %v10936_v58, %v14443_v60 }
 0x7d1   :  { %v5565_v22 = vpop.permute.xlu1 %5564  ;;  %v5226_v33 = vmul.f32 %v14439_v1, %v14438_v12  ;;  %v7316_v1 = vld [vmem:[%s13158_s3 + $0x368] sm:$0xff] }
 0x7d2   :  { %6579 = vst.msk [vmem:[%s13159_s4 + $0x190] sm:$0xff] %vm1536_vm0, %v6387_v8  ;;  %v6374_v14 = vadd.f32 %v5565_v22, %v5222_v19  ;;  %5884 = vperm.xlu1 %6814, %v7308_v39   ;;  %v14440_v19 = vld [vmem:[#allocation104_spill] sm:$0xff]  ;;  %v7312_v22 = vld [vmem:[%s13158_s3 + $0x348] sm:$0xff]  ;;  %v7313_v39 = vld [vmem:[%s13158_s3 + $0x3c0] sm:$0xff] }
 0x7d3   :  { %v5640_v25 = vpop.permute.xlu0 %5639  ;;  %v5241_v8 = vmul.f32 %v10924_v29, %v14440_v19  ;;  %v7317_v19 = vld [vmem:[%s13158_s3 + $0x3e0] sm:$0xff] }
 0x7d4   :  { %6566 = vst.msk [vmem:[%s13159_s4 + $0x128] sm:$0xff] %vm1536_vm0, %v6374_v14  ;;  %v6389_v44 = vadd.f32 %v5640_v25, %v5237_v16  ;;  %5959 = vperm.xlu0 %6815, %v7309_v57   ;;  %v14442_v16 = vld [vmem:[#allocation151_spill] sm:$0xff] }
 0x7d5   :  { %v5575_v38 = vpop.permute.xlu1 %5574  ;;  %v5228_v14 = vmul.f32 %v14442_v16, %v14441_v30  ;;  %v7318_v30 = vld [vmem:[%s13158_s3 + $0x378] sm:$0xff] }
 0x7d6   :  { %6581 = vst.msk [vmem:[%s13159_s4 + $0x1a0] sm:$0xff] %vm1536_vm0, %v6389_v44  ;;  %v6376_v4 = vadd.f32 %v5575_v38, %v5224_v13  ;;  %5894 = vperm.xlu1 %6814, %v7310_v40   ;;  %v7314_v44 = vld [vmem:[%s13158_s3 + $0x358] sm:$0xff]  ;;  %v14444_v38 = vld [vmem:[#allocation70_spill] sm:$0xff]  ;;  %v14446_v40 = vld [vmem:[#allocation117_spill] sm:$0xff] }
 0x7d7   :  { %v5650_v26 = vpop.permute.xlu0 %5649  ;;  %v5230_v10 = vmul.f32 %v14445_v24, %v14444_v38  ;;  %v14453_v24 = vld [vmem:[#allocation89_spill] sm:$0xff] }
 0x7d8   :  { %6568 = vst.msk [vmem:[%s13159_s4 + $0x138] sm:$0xff] %vm1536_vm0, %v6376_v4  ;;  %v6391_v27 = vadd.f32 %v5650_v26, %v5239_v43  ;;  %5969 = vperm.xlu0 %6815, %v7311_v53   ;;  %v7315_v43 = vld [vmem:[%s13158_s3 + $0x3d0] sm:$0xff]  ;;  %v5245_v26 = vmul.f32 %v10948_v49, %v14446_v40  ;;  %v14448_v53 = vld [vmem:[#allocation158_spill] sm:$0xff] }
 0x7d9   :  { %v5585_v15 = vpop.permute.xlu1 %5584  ;;  %v14455_v40 = vld [vmem:[#allocation255_spill] sm:$0xff] }
 0x7da   :  { %6583 = vst.msk [vmem:[%s13159_s4 + $0x1b0] sm:$0xff] %vm1536_vm0, %v6391_v27  ;;  %v6378_v5 = vadd.f32 %v5585_v15, %v5226_v33  ;;  %5904 = vperm.xlu1 %6814, %v7312_v22   ;;  %v14447_v27 = vld [vmem:[#allocation77_spill] sm:$0xff] }
 0x7db   :  { %v5660_v21 = vpop.permute.xlu0 %5659  ;;  %v5232_v15 = vmul.f32 %v14448_v53, %v14447_v27  ;;  %v14456_v27 = vld [vmem:[#allocation94_spill] sm:$0xff] }
 0x7dc   :  { %6570 = vst.msk [vmem:[%s13159_s4 + $0x148] sm:$0xff] %vm1536_vm0, %v6378_v5  ;;  %v6393_v29 = vadd.f32 %v5660_v21, %v5241_v8  ;;  %5979 = vperm.xlu0 %6815, %v7313_v39   ;;  %v14449_v5 = vld [vmem:[#allocation124_spill] sm:$0xff]  ;;  %v14457_v53 = vld [vmem:[#allocation226_spill] sm:$0xff] }
 0x7dd   :  { %v5595_v25 = vpop.permute.xlu1 %5594  ;;  %v5247_v22 = vmul.f32 %v10960_v50, %v14449_v5 }
 0x7de   :  { %6585 = vst.msk [vmem:[%s13159_s4 + $0x1c0] sm:$0xff] %vm1536_vm0, %v6393_v29  ;;  %v6380_v13 = vadd.f32 %v5595_v25, %v5228_v14  ;;  %5914 = vperm.xlu1 %6814, %v7314_v44   ;;  %v14450_v14 = vld [vmem:[#allocation82_spill] sm:$0xff]  ;;  %v7319_v25 = vld [vmem:[%s13158_s3 + $0x3f0] sm:$0xff] }
 0x7df   :  { %v5670_v57 = vpop.permute.xlu0 %5669  ;;  %v14451_v29 = vld [vmem:[#allocation210_spill] sm:$0xff] }
 0x7e0   :  { %6572 = vst.msk [vmem:[%s13159_s4 + $0x158] sm:$0xff] %vm1536_vm0, %v6380_v13  ;;  %v6395_v58 = vadd.f32 %v5670_v57, %v5243_v37  ;;  %5989 = vperm.xlu0 %6815, %v7315_v43   ;;  %v5234_v39 = vmul.f32 %v14451_v29, %v14450_v14  ;;  %v14452_v37 = vld [vmem:[#allocation130_spill] sm:$0xff]  ;;  %v7321_v43 = vld [vmem:[%s13158_s3 + $0x400] sm:$0xff] }
 0x7e1   :  { %v5605_v4 = vpop.permute.xlu1 %5604  ;;  %v5249_v13 = vmul.f32 %v10972_v62, %v14452_v37  ;;  %v7320_v57 = vld [vmem:[%s13158_s3 + $0x388] sm:$0xff] }
 0x7e2   :  { %6587 = vst.msk [vmem:[%s13159_s4 + $0x1d0] sm:$0xff] %vm1536_vm0, %v6395_v58  ;;  %v6382_v12 = vadd.f32 %v5605_v4, %v5230_v10  ;;  %5924 = vperm.xlu1 %6814, %v7316_v1   ;;  %v14454_v10 = vld [vmem:[#allocation217_spill] sm:$0xff]  ;;  %v7322_v1 = vld [vmem:[%s13158_s3 + $0x398] sm:$0xff]  ;;  %v14460_v14 = vld [vmem:[#allocation178_spill] sm:$0xff] }
 0x7e3   :  { %v5680_v33 = vpop.permute.xlu0 %5679  ;;  %v5236_v58 = vmul.f32 %v14454_v10, %v14453_v24  ;;  %v7327_v10 = vld [vmem:[%s13158_s3 + $0x430] sm:$0xff] }
 0x7e4   :  { %6574 = vst.msk [vmem:[%s13159_s4 + $0x168] sm:$0xff] %vm1536_vm0, %v6382_v12  ;;  %v6397_v49 = vadd.f32 %v5680_v33, %v5245_v26  ;;  %5999 = vperm.xlu0 %6815, %v7317_v19   ;;  %v5251_v26 = vmul.f32 %v10984_v45, %v14455_v40  ;;  %v7328_v40 = vld [vmem:[%s13158_s3 + $0x3c8] sm:$0xff] }
 0x7e5   :  { %v5615_v8 = vpop.permute.xlu1 %5614 }
 0x7e6   :  { %6589 = vst.msk [vmem:[%s13159_s4 + $0x1e0] sm:$0xff] %vm1536_vm0, %v6397_v49  ;;  %v6384_v21 = vadd.f32 %v5615_v8, %v5232_v15  ;;  %5934 = vperm.xlu1 %6814, %v7318_v30   ;;  %v5238_v15 = vmul.f32 %v14457_v53, %v14456_v27  ;;  %v7323_v49 = vld [vmem:[%s13158_s3 + $0x410] sm:$0xff]  ;;  %v14458_v8 = vld [vmem:[#allocation142_spill] sm:$0xff]  ;;  %v7329_v27 = vld [vmem:[%s13158_s3 + $0x440] sm:$0xff] }
 0x7e7   :  { %v5690_v16 = vpop.permute.xlu0 %5689  ;;  %v5253_v5 = vmul.f32 %v10996_v28, %v14458_v8 }
 0x7e8   :  { %6576 = vst.msk [vmem:[%s13159_s4 + $0x178] sm:$0xff] %vm1536_vm0, %v6384_v21  ;;  %v6399_v50 = vadd.f32 %v5690_v16, %v5247_v22  ;;  %6009 = vperm.xlu0 %6815, %v7319_v25   ;;  %v7324_v21 = vld [vmem:[%s13158_s3 + $0x3a8] sm:$0xff] }
 0x7e9   :  { %v5625_v60 = vpop.permute.xlu1 %5624  ;;  %v14459_v16 = vld [vmem:[#allocation206_spill] sm:$0xff] }
 0x7ea   :  { %6591 = vst.msk [vmem:[%s13159_s4 + $0x1f0] sm:$0xff] %vm1536_vm0, %v6399_v50  ;;  %v6386_v44 = vadd.f32 %v5625_v60, %v5234_v39  ;;  %5944 = vperm.xlu1 %6814, %v7320_v57   ;;  %v5240_v29 = vmul.f32 %v14460_v14, %v14459_v16  ;;  %v7325_v39 = vld [vmem:[%s13158_s3 + $0x420] sm:$0xff]  ;;  %v14461_v25 = vld [vmem:[#allocation146_spill] sm:$0xff]  ;;  %v14462_v57 = vld [vmem:[#allocation95_spill] sm:$0xff] }
 0x7eb   :  { %v5700_v38 = vpop.permute.xlu0 %5699  ;;  %v5255_v60 = vmul.f32 %v11008_v7, %v14461_v25  ;;  %v14470_v14 = vld [vmem:[#allocation168_spill] sm:$0xff]  ;;  %v14471_v25 = vld [vmem:[#allocation102_spill] sm:$0xff] }
 0x7ec   :  { %6578 = vst.msk [vmem:[%s13159_s4 + $0x188] sm:$0xff] %vm1536_vm0, %v6386_v44  ;;  %v6401_v62 = vadd.f32 %v5700_v38, %v5249_v13  ;;  %6019 = vperm.xlu0 %6815, %v7321_v43   ;;  %v7326_v13 = vld [vmem:[%s13158_s3 + $0x3b8] sm:$0xff]  ;;  %v14463_v38 = vld [vmem:[#allocation234_spill] sm:$0xff] }
 0x7ed   :  { %v5635_v4 = vpop.permute.xlu1 %5634  ;;  %v5242_v24 = vmul.f32 %v14463_v38, %v14462_v57  ;;  %v14473_v57 = vld [vmem:[#allocation185_spill] sm:$0xff] }
 0x7ee   :  { %6593 = vst.msk [vmem:[%s13159_s4 + $0x200] sm:$0xff] %vm1536_vm0, %v6401_v62  ;;  %v6388_v12 = vadd.f32 %v5635_v4, %v5236_v58  ;;  %5954 = vperm.xlu1 %6814, %v7322_v1   ;;  %v14464_v62 = vld [vmem:[#allocation153_spill] sm:$0xff]  ;;  %v5263_v38 = vmul.f32 %v11056_v41, %v14473_v57 }
 0x7ef   :  { %v5710_v33 = vpop.permute.xlu0 %5709  ;;  %v5257_v43 = vmul.f32 %v11020_v17, %v14464_v62  ;;  %v14466_v1 = vld [vmem:[#allocation237_spill] sm:$0xff]  ;;  %v14475_v62 = vld [vmem:[#allocation251_spill] sm:$0xff] }
 0x7f0   :  { %6580 = vst.msk [vmem:[%s13159_s4 + $0x198] sm:$0xff] %vm1536_vm0, %v6388_v12  ;;  %v6403_v45 = vadd.f32 %v5710_v33, %v5251_v26  ;;  %6029 = vperm.xlu0 %6815, %v7323_v49   ;;  %v14465_v12 = vld [vmem:[#allocation213_spill] sm:$0xff] }
 0x7f1   :  { %v5645_v19 = vpop.permute.xlu1 %5644  ;;  %v5244_v33 = vmul.f32 %v14466_v1, %v14465_v12 }
 0x7f2   :  { %6595 = vst.msk [vmem:[%s13159_s4 + $0x210] sm:$0xff] %vm1536_vm0, %v6403_v45  ;;  %v6390_v22 = vadd.f32 %v5645_v19, %v5238_v15  ;;  %5964 = vperm.xlu1 %6814, %v7324_v21   ;;  %v14467_v15 = vld [vmem:[#allocation161_spill] sm:$0xff]  ;;  %v7330_v19 = vld [vmem:[%s13158_s3 + $0x3d8] sm:$0xff] }
 0x7f3   :  { %v5720_v30 = vpop.permute.xlu0 %5719  ;;  %v5259_v45 = vmul.f32 %v11032_v34, %v14467_v15 }
 0x7f4   :  { %6582 = vst.msk [vmem:[%s13159_s4 + $0x1a8] sm:$0xff] %vm1536_vm0, %v6390_v22  ;;  %v6405_v28 = vadd.f32 %v5720_v30, %v5253_v5  ;;  %6039 = vperm.xlu0 %6815, %v7325_v39   ;;  %v14468_v5 = vld [vmem:[#allocation156_spill] sm:$0xff]  ;;  %v14469_v22 = vld [vmem:[#allocation242_spill] sm:$0xff]  ;;  %v7331_v30 = vld [vmem:[%s13158_s3 + $0x450] sm:$0xff] }
 0x7f5   :  { %v5655_v50 = vpop.permute.xlu1 %5654  ;;  %v5246_v21 = vmul.f32 %v14469_v22, %v14468_v5  ;;  %v7332_v39 = vld [vmem:[%s13158_s3 + $0x3e8] sm:$0xff]  ;;  %v7338_v22 = vld [vmem:[%s13158_s3 + $0x418] sm:$0xff] }
 0x7f6   :  { %6597 = vst.msk [vmem:[%s13159_s4 + $0x220] sm:$0xff] %vm1536_vm0, %v6405_v28  ;;  %v6392_v37 = vadd.f32 %v5655_v50, %v5240_v29  ;;  %5974 = vperm.xlu1 %6814, %v7326_v13   ;;  %v5261_v29 = vmul.f32 %v11044_v31, %v14470_v14  ;;  %v7333_v13 = vld [vmem:[%s13158_s3 + $0x460] sm:$0xff]  ;;  %v7339_v14 = vld [vmem:[%s13158_s3 + $0x490] sm:$0xff] }
 0x7f7   :  { %v5730_v44 = vpop.permute.xlu0 %5729 }
 0x7f8   :  { %6584 = vst.msk [vmem:[%s13159_s4 + $0x1b8] sm:$0xff] %vm1536_vm0, %v6392_v37  ;;  %v6407_v7 = vadd.f32 %v5730_v44, %v5255_v60  ;;  %6049 = vperm.xlu0 %6815, %v7327_v10   ;;  %v14472_v60 = vld [vmem:[#allocation248_spill] sm:$0xff] }
 0x7f9   :  { %v5665_v58 = vpop.permute.xlu1 %5664  ;;  %v5248_v37 = vmul.f32 %v14472_v60, %v14471_v25  ;;  %v7340_v25 = vld [vmem:[%s13158_s3 + $0x428] sm:$0xff] }
 0x7fa   :  { %6599 = vst.msk [vmem:[%s13159_s4 + $0x230] sm:$0xff] %vm1536_vm0, %v6407_v7  ;;  %v6394_v4 = vadd.f32 %v5665_v58, %v5242_v24  ;;  %5984 = vperm.xlu1 %6814, %v7328_v40   ;;  %v7334_v7 = vld [vmem:[%s13158_s3 + $0x3f8] sm:$0xff]  ;;  %v14474_v58 = vld [vmem:[#allocation107_spill] sm:$0xff] }
 0x7fb   :  { %v5740_v26 = vpop.permute.xlu0 %5739 }
 0x7fc   :  { %6586 = vst.msk [vmem:[%s13159_s4 + $0x1c8] sm:$0xff] %vm1536_vm0, %v6394_v4  ;;  %v6409_v17 = vadd.f32 %v5740_v26, %v5257_v43  ;;  %6059 = vperm.xlu0 %6815, %v7329_v27   ;;  %v5250_v43 = vmul.f32 %v14475_v62, %v14474_v58  ;;  %v7335_v4 = vld [vmem:[%s13158_s3 + $0x470] sm:$0xff]  ;;  %v14476_v26 = vld [vmem:[#allocation260_spill] sm:$0xff] }
 0x7fd   :  { %v5675_v53 = vpop.permute.xlu1 %5674  ;;  %v5265_v12 = vmul.f32 %v11068_v48, %v14476_v26  ;;  %v14477_v27 = vld [vmem:[#allocation231_spill] sm:$0xff]  ;;  %v14486_v62 = vld [vmem:[#allocation164_spill] sm:$0xff] }
 0x7fe   :  { %6601 = vst.msk [vmem:[%s13159_s4 + $0x240] sm:$0xff] %vm1536_vm0, %v6409_v17  ;;  %v6396_v49 = vadd.f32 %v5675_v53, %v5244_v33  ;;  %5994 = vperm.xlu1 %6814, %v7330_v19   ;;  %v7336_v33 = vld [vmem:[%s13158_s3 + $0x408] sm:$0xff]  ;;  %v14478_v53 = vld [vmem:[#allocation253_spill] sm:$0xff]  ;;  %v14479_v19 = vld [vmem:[#allocation263_spill] sm:$0xff] }
 0x7ff   :  { %v5750_v8 = vpop.permute.xlu0 %5749  ;;  %v5252_v15 = vmul.f32 %v14478_v53, %v14477_v27  ;;  %v14488_v26 = vld [vmem:[#allocation268_spill] sm:$0xff]  ;;  %v14489_v27 = vld [vmem:[#allocation167_spill] sm:$0xff]  ;;  %v14490_v53 = vld [vmem:[#allocation258_spill] sm:$0xff] }
 0x800   :  { %6588 = vst.msk [vmem:[%s13159_s4 + $0x1d8] sm:$0xff] %vm1536_vm0, %v6396_v49  ;;  %v6411_v34 = vadd.f32 %v5750_v8, %v5259_v45  ;;  %6069 = vperm.xlu0 %6815, %v7331_v30   ;;  %v7337_v45 = vld [vmem:[%s13158_s3 + $0x480] sm:$0xff]  ;;  %v5267_v8 = vmul.f32 %v11080_v51, %v14479_v19  ;;  %v14481_v30 = vld [vmem:[#allocation152_spill] sm:$0xff] }
 0x801   :  { %v5685_v16 = vpop.permute.xlu1 %5684 }
 0x802   :  { %6603 = vst.msk [vmem:[%s13159_s4 + $0x250] sm:$0xff] %vm1536_vm0, %v6411_v34  ;;  %v6398_v28 = vadd.f32 %v5685_v16, %v5246_v21  ;;  %6004 = vperm.xlu1 %6814, %v7332_v39   ;;  %v14480_v34 = vld [vmem:[#allocation229_spill] sm:$0xff] }
 0x803   :  { %v5760_v50 = vpop.permute.xlu0 %5759  ;;  %v5254_v16 = vmul.f32 %v14481_v30, %v14480_v34  ;;  %v14493_v34 = vld [vmem:[#allocation214_spill] sm:$0xff] }
 0x804   :  { %6590 = vst.msk [vmem:[%s13159_s4 + $0x1e8] sm:$0xff] %vm1536_vm0, %v6398_v28  ;;  %v6413_v31 = vadd.f32 %v5760_v50, %v5261_v29  ;;  %6079 = vperm.xlu0 %6815, %v7333_v13   ;;  %v14482_v28 = vld [vmem:[#allocation215_spill] sm:$0xff] }
 0x805   :  { %v5695_v44 = vpop.permute.xlu1 %5694  ;;  %v5269_v39 = vmul.f32 %v11092_v42, %v14482_v28 }
 0x806   :  { %6605 = vst.msk [vmem:[%s13159_s4 + $0x260] sm:$0xff] %vm1536_vm0, %v6413_v31  ;;  %v6400_v24 = vadd.f32 %v5695_v44, %v5248_v37  ;;  %6014 = vperm.xlu1 %6814, %v7334_v7   ;;  %v14483_v37 = vld [vmem:[#allocation232_spill] sm:$0xff]  ;;  %v14484_v31 = vld [vmem:[#allocation205_spill] sm:$0xff] }
 0x807   :  { %v5770_v10 = vpop.permute.xlu0 %5769  ;;  %v5256_v13 = vmul.f32 %v14484_v31, %v14483_v37  ;;  %v7341_v44 = vld [vmem:[%s13158_s3 + $0x4a0] sm:$0xff] }
 0x808   :  { %6592 = vst.msk [vmem:[%s13159_s4 + $0x1f8] sm:$0xff] %vm1536_vm0, %v6400_v24  ;;  %v6415_v41 = vadd.f32 %v5770_v10, %v5263_v38  ;;  %6089 = vperm.xlu0 %6815, %v7335_v4   ;;  %v14485_v38 = vld [vmem:[#allocation266_spill] sm:$0xff]  ;;  %v7342_v10 = vld [vmem:[%s13158_s3 + $0x438] sm:$0xff]  ;;  %v7343_v4 = vld [vmem:[%s13158_s3 + $0x4b0] sm:$0xff] }
 0x809   :  { %v5705_v40 = vpop.permute.xlu1 %5704  ;;  %v5271_v24 = vmul.f32 %v11104_v6, %v14485_v38  ;;  %v7349_v31 = vld [vmem:[%s13158_s3 + $0x4e0] sm:$0xff]  ;;  %v7350_v38 = vld [vmem:[%s13158_s3 + $0x478] sm:$0xff] }
 0x80a   :  { %6607 = vst.msk [vmem:[%s13159_s4 + $0x270] sm:$0xff] %vm1536_vm0, %v6415_v41  ;;  %v6402_v1 = vadd.f32 %v5705_v40, %v5250_v43  ;;  %6024 = vperm.xlu1 %6814, %v7336_v33   ;;  %v14487_v43 = vld [vmem:[#allocation208_spill] sm:$0xff]  ;;  %v7344_v33 = vld [vmem:[%s13158_s3 + $0x448] sm:$0xff] }
 0x80b   :  { %v5780_v17 = vpop.permute.xlu0 %5779  ;;  %v5258_v41 = vmul.f32 %v14487_v43, %v14486_v62  ;;  %v7351_v62 = vld [vmem:[%s13158_s3 + $0x4f0] sm:$0xff] }
 0x80c   :  { %6594 = vst.msk [vmem:[%s13159_s4 + $0x208] sm:$0xff] %vm1536_vm0, %v6402_v1  ;;  %v6417_v48 = vadd.f32 %v5780_v17, %v5265_v12  ;;  %6099 = vperm.xlu0 %6815, %v7337_v45   ;;  %v5273_v12 = vmul.f32 %v11116_v63, %v14488_v26 }
 0x80d   :  { %v5715_v49 = vpop.permute.xlu1 %5714 }
 0x80e   :  { %6609 = vst.msk [vmem:[%s13159_s4 + $0x280] sm:$0xff] %vm1536_vm0, %v6417_v48  ;;  %v6404_v5 = vadd.f32 %v5715_v49, %v5252_v15  ;;  %6034 = vperm.xlu1 %6814, %v7338_v22   ;;  %v5260_v15 = vmul.f32 %v14490_v53, %v14489_v27  ;;  %v7345_v48 = vld [vmem:[%s13158_s3 + $0x4c0] sm:$0xff]  ;;  %v14491_v49 = vld [vmem:[#allocation271_spill] sm:$0xff]  ;;  %v14503_v53 = vld [vmem:[#allocation60_spill] sm:$0xff] }
 0x80f   :  { %v5790_v21 = vpop.permute.xlu0 %5789  ;;  %v5275_v19 = vmul.f32 %v11128_v36, %v14491_v49  ;;  %v14504_v49 = vld [vmem:[#allocation250_spill] sm:$0xff] }
 0x810   :  { %6596 = vst.msk [vmem:[%s13159_s4 + $0x218] sm:$0xff] %vm1536_vm0, %v6404_v5  ;;  %v6419_v51 = vadd.f32 %v5790_v21, %v5267_v8  ;;  %6109 = vperm.xlu0 %6815, %v7339_v14   ;;  %v7346_v5 = vld [vmem:[%s13158_s3 + $0x458] sm:$0xff]  ;;  %v14492_v21 = vld [vmem:[#allocation121_spill] sm:$0xff]  ;;  %v14494_v14 = vld [vmem:[#allocation275_spill] sm:$0xff] }
 0x811   :  { %v5725_v29 = vpop.permute.xlu1 %5724  ;;  %v5262_v30 = vmul.f32 %v14493_v34, %v14492_v21  ;;  %v14506_v21 = vld [vmem:[#allocation72_spill] sm:$0xff] }
 0x812   :  { %6611 = vst.msk [vmem:[%s13159_s4 + $0x290] sm:$0xff] %vm1536_vm0, %v6419_v51  ;;  %v6406_v50 = vadd.f32 %v5725_v29, %v5254_v16  ;;  %6044 = vperm.xlu1 %6814, %v7340_v25   ;;  %v7347_v16 = vld [vmem:[%s13158_s3 + $0x4d0] sm:$0xff]  ;;  %v5277_v29 = vmul.f32 %v11140_v52, %v14494_v14  ;;  %v14495_v25 = vld [vmem:[#allocation241_spill] sm:$0xff]  ;;  %v5285_v34 = vmul.f32 %v11188_v46, %v14506_v21 }
 0x813   :  { %v5800_v60 = vpop.permute.xlu0 %5799  ;;  %v14508_v14 = vld [vmem:[#allocation191_spill] sm:$0xff] }
 0x814   :  { %6598 = vst.msk [vmem:[%s13159_s4 + $0x228] sm:$0xff] %vm1536_vm0, %v6406_v50  ;;  %v6421_v42 = vadd.f32 %v5800_v60, %v5269_v39  ;;  %6119 = vperm.xlu0 %6815, %v7341_v44   ;;  %v7348_v39 = vld [vmem:[%s13158_s3 + $0x468] sm:$0xff]  ;;  %v14496_v60 = vld [vmem:[#allocation265_spill] sm:$0xff] }
 0x815   :  { %v5735_v57 = vpop.permute.xlu1 %5734  ;;  %v5264_v37 = vmul.f32 %v14496_v60, %v14495_v25 }
 0x816   :  { %6613 = vst.msk [vmem:[%s13159_s4 + $0x2a0] sm:$0xff] %vm1536_vm0, %v6421_v42  ;;  %v6408_v7 = vadd.f32 %v5735_v57, %v5256_v13  ;;  %6054 = vperm.xlu1 %6814, %v7342_v10   ;;  %v14497_v42 = vld [vmem:[#allocation279_spill] sm:$0xff]  ;;  %v14499_v10 = vld [vmem:[#allocation221_spill] sm:$0xff] }
 0x817   :  { %v5810_v58 = vpop.permute.xlu0 %5809  ;;  %v5279_v44 = vmul.f32 %v11152_v9, %v14497_v42 }
 0x818   :  { %6600 = vst.msk [vmem:[%s13159_s4 + $0x238] sm:$0xff] %vm1536_vm0, %v6408_v7  ;;  %v6423_v6 = vadd.f32 %v5810_v58, %v5271_v24  ;;  %6129 = vperm.xlu0 %6815, %v7343_v4   ;;  %v14498_v7 = vld [vmem:[#allocation133_spill] sm:$0xff] }
 0x819   :  { %v5745_v40 = vpop.permute.xlu1 %5744  ;;  %v5266_v58 = vmul.f32 %v14499_v10, %v14498_v7  ;;  %v7360_v10 = vld [vmem:[%s13158_s3 + $0x4c8] sm:$0xff] }
 0x81a   :  { %6615 = vst.msk [vmem:[%s13159_s4 + $0x2b0] sm:$0xff] %vm1536_vm0, %v6423_v6  ;;  %v6410_v1 = vadd.f32 %v5745_v40, %v5258_v41  ;;  %6064 = vperm.xlu1 %6814, %v7344_v33   ;;  %v14500_v41 = vld [vmem:[#allocation48_spill] sm:$0xff]  ;;  %v7352_v40 = vld [vmem:[%s13158_s3 + $0x488] sm:$0xff] }
 0x81b   :  { %v5820_v17 = vpop.permute.xlu0 %5819  ;;  %v5281_v6 = vmul.f32 %v11164_v47, %v14500_v41 }
 0x81c   :  { %6602 = vst.msk [vmem:[%s13159_s4 + $0x248] sm:$0xff] %vm1536_vm0, %v6410_v1  ;;  %v6425_v63 = vadd.f32 %v5820_v17, %v5273_v12  ;;  %6139 = vperm.xlu0 %6815, %v7345_v48   ;;  %v14501_v12 = vld [vmem:[#allocation134_spill] sm:$0xff]  ;;  %v7353_v17 = vld [vmem:[%s13158_s3 + $0x500] sm:$0xff]  ;;  %v7354_v48 = vld [vmem:[%s13158_s3 + $0x498] sm:$0xff] }
 0x81d   :  { %v5755_v45 = vpop.permute.xlu1 %5754  ;;  %v14502_v1 = vld [vmem:[#allocation278_spill] sm:$0xff] }
 0x81e   :  { %6617 = vst.msk [vmem:[%s13159_s4 + $0x2c0] sm:$0xff] %vm1536_vm0, %v6425_v63  ;;  %v6412_v8 = vadd.f32 %v5755_v45, %v5260_v15  ;;  %6074 = vperm.xlu1 %6814, %v7346_v5   ;;  %v5268_v33 = vmul.f32 %v14502_v1, %v14501_v12  ;;  %v5283_v15 = vmul.f32 %v11176_v59, %v14503_v53  ;;  %v7355_v5 = vld [vmem:[%s13158_s3 + $0x510] sm:$0xff]  ;;  %v14515_v12 = vld [vmem:[#allocation170_spill] sm:$0xff] }
 0x81f   :  { %v5830_v22 = vpop.permute.xlu0 %5829  ;;  %v14516_v1 = vld [vmem:[#allocation223_spill] sm:$0xff] }
 0x820   :  { %6604 = vst.msk [vmem:[%s13159_s4 + $0x258] sm:$0xff] %vm1536_vm0, %v6412_v8  ;;  %v6427_v36 = vadd.f32 %v5830_v22, %v5275_v19  ;;  %6149 = vperm.xlu0 %6815, %v7347_v16   ;;  %v14505_v19 = vld [vmem:[#allocation230_spill] sm:$0xff] }
 0x821   :  { %v5765_v51 = vpop.permute.xlu1 %5764  ;;  %v5270_v8 = vmul.f32 %v14505_v19, %v14504_v49  ;;  %v14519_v49 = vld [vmem:[#allocation240_spill] sm:$0xff] }
 0x822   :  { %6619 = vst.msk [vmem:[%s13159_s4 + $0x2d0] sm:$0xff] %vm1536_vm0, %v6427_v36  ;;  %v6414_v28 = vadd.f32 %v5765_v51, %v5262_v30  ;;  %6084 = vperm.xlu1 %6814, %v7348_v39   ;;  %v7356_v36 = vld [vmem:[%s13158_s3 + $0x4a8] sm:$0xff]  ;;  %v14507_v51 = vld [vmem:[#allocation144_spill] sm:$0xff] }
 0x823   :  { %v5840_v50 = vpop.permute.xlu0 %5839 }
 0x824   :  { %6606 = vst.msk [vmem:[%s13159_s4 + $0x268] sm:$0xff] %vm1536_vm0, %v6414_v28  ;;  %v6429_v52 = vadd.f32 %v5840_v50, %v5277_v29  ;;  %6159 = vperm.xlu0 %6815, %v7349_v31   ;;  %v5272_v29 = vmul.f32 %v14508_v14, %v14507_v51  ;;  %v7357_v28 = vld [vmem:[%s13158_s3 + $0x520] sm:$0xff]  ;;  %v14509_v50 = vld [vmem:[#allocation84_spill] sm:$0xff]  ;;  %v7367_v14 = vld [vmem:[%s13158_s3 + $0x570] sm:$0xff] }
 0x825   :  { %v5775_v13 = vpop.permute.xlu1 %5774  ;;  %v5287_v25 = vmul.f32 %v11200_v56, %v14509_v50  ;;  %v14510_v31 = vld [vmem:[#allocation148_spill] sm:$0xff] }
 0x826   :  { %6621 = vst.msk [vmem:[%s13159_s4 + $0x2e0] sm:$0xff] %vm1536_vm0, %v6429_v52  ;;  %v6416_v57 = vadd.f32 %v5775_v13, %v5264_v37  ;;  %6094 = vperm.xlu1 %6814, %v7350_v38   ;;  %v7358_v37 = vld [vmem:[%s13158_s3 + $0x4b8] sm:$0xff] }
 0x827   :  { %v5850_v24 = vpop.permute.xlu0 %5849  ;;  %v14511_v13 = vld [vmem:[#allocation236_spill] sm:$0xff] }
 0x828   :  { %6608 = vst.msk [vmem:[%s13159_s4 + $0x278] sm:$0xff] %vm1536_vm0, %v6416_v57  ;;  %v6431_v9 = vadd.f32 %v5850_v24, %v5279_v44  ;;  %6169 = vperm.xlu0 %6815, %v7351_v62   ;;  %v5274_v42 = vmul.f32 %v14511_v13, %v14510_v31  ;;  %v7359_v44 = vld [vmem:[%s13158_s3 + $0x530] sm:$0xff]  ;;  %v14512_v38 = vld [vmem:[#allocation96_spill] sm:$0xff] }
 0x829   :  { %v5785_v43 = vpop.permute.xlu1 %5784  ;;  %v5289_v24 = vmul.f32 %v11212_v32, %v14512_v38 }
 0x82a   :  { %6623 = vst.msk [vmem:[%s13159_s4 + $0x2f0] sm:$0xff] %vm1536_vm0, %v6431_v9  ;;  %v6418_v4 = vadd.f32 %v5785_v43, %v5266_v58  ;;  %6104 = vperm.xlu1 %6814, %v7352_v40   ;;  %v14513_v9 = vld [vmem:[#allocation157_spill] sm:$0xff]  ;;  %v7362_v40 = vld [vmem:[%s13158_s3 + $0x4d8] sm:$0xff] }
 0x82b   :  { %v5860_v26 = vpop.permute.xlu0 %5859  ;;  %v5276_v62 = vmul.f32 %v11059_v35, %v14513_v9  ;;  %v7361_v43 = vld [vmem:[%s13158_s3 + $0x540] sm:$0xff] }
 0x82c   :  { %6610 = vst.msk [vmem:[%s13159_s4 + $0x288] sm:$0xff] %vm1536_vm0, %v6418_v4  ;;  %v6433_v47 = vadd.f32 %v5860_v26, %v5281_v6  ;;  %6179 = vperm.xlu0 %6815, %v7353_v17   ;;  %v14514_v6 = vld [vmem:[#allocation109_spill] sm:$0xff] }
 0x82d   :  { %v5795_v27 = vpop.permute.xlu1 %5794  ;;  %v5291_v4 = vmul.f32 %v11223_v2, %v14514_v6 }
 0x82e   :  { %6625 = vst.msk [vmem:[%s13159_s4 + $0x300] sm:$0xff] %vm1536_vm0, %v6433_v47  ;;  %v6420_v63 = vadd.f32 %v5795_v27, %v5268_v33  ;;  %6114 = vperm.xlu1 %6814, %v7354_v48   ;;  %v5278_v33 = vmul.f32 %v14516_v1, %v14515_v12  ;;  %v7363_v47 = vld [vmem:[%s13158_s3 + $0x550] sm:$0xff]  ;;  %v14517_v27 = vld [vmem:[#allocation122_spill] sm:$0xff]  ;;  %v7373_v1 = vld [vmem:[%s13158_s3 + $0x5a0] sm:$0xff] }
 0x82f   :  { %v5870_v45 = vpop.permute.xlu0 %5869  ;;  %v5293_v53 = vmul.f32 %v11234_v54, %v14517_v27  ;;  %v7374_v27 = vld [vmem:[%s13158_s3 + $0x538] sm:$0xff] }
 0x830   :  { %6612 = vst.msk [vmem:[%s13159_s4 + $0x298] sm:$0xff] %vm1536_vm0, %v6420_v63  ;;  %v6435_v59 = vadd.f32 %v5870_v45, %v5283_v15  ;;  %6189 = vperm.xlu0 %6815, %v7355_v5   ;;  %v7364_v63 = vld [vmem:[%s13158_s3 + $0x4e8] sm:$0xff]  ;;  %v14518_v45 = vld [vmem:[#allocation199_spill] sm:$0xff] }
 0x831   :  { %v5805_v22 = vpop.permute.xlu1 %5804  ;;  %v5280_v19 = vmul.f32 %v14519_v49, %v14518_v45  ;;  %v14520_v5 = vld [vmem:[#allocation135_spill] sm:$0xff] }
 0x832   :  { %6627 = vst.msk [vmem:[%s13159_s4 + $0x310] sm:$0xff] %vm1536_vm0, %v6435_v59  ;;  %v6422_v30 = vadd.f32 %v5805_v22, %v5270_v8  ;;  %6124 = vperm.xlu1 %6814, %v7356_v36   ;;  %v7365_v8 = vld [vmem:[%s13158_s3 + $0x560] sm:$0xff]  ;;  %v5295_v22 = vmul.f32 %v11245_v23, %v14520_v5  ;;  %v14521_v36 = vld [vmem:[#allocation51_spill] sm:$0xff] }
 0x833   :  { %v5880_v16 = vpop.permute.xlu0 %5879  ;;  %v7375_v45 = vld [vmem:[%s13158_s3 + $0x5b0] sm:$0xff] }
 0x834   :  { %6614 = vst.msk [vmem:[%s13159_s4 + $0x2a8] sm:$0xff] %vm1536_vm0, %v6422_v30  ;;  %v6437_v46 = vadd.f32 %v5880_v16, %v5285_v34  ;;  %6199 = vperm.xlu0 %6815, %v7357_v28   ;;  %v7366_v34 = vld [vmem:[%s13158_s3 + $0x4f8] sm:$0xff]  ;;  %v14522_v16 = vld [vmem:[#allocation245_spill] sm:$0xff] }
 0x835   :  { %v5815_v39 = vpop.permute.xlu1 %5814  ;;  %v5282_v51 = vmul.f32 %v14522_v16, %v14521_v36  ;;  %v14524_v28 = vld [vmem:[#allocation165_spill] sm:$0xff]  ;;  %v14539_v16 = vld [vmem:[#allocation26_spill] sm:$0xff] }
 0x836   :  { %6629 = vst.msk [vmem:[%s13159_s4 + $0x320] sm:$0xff] %vm1536_vm0, %v6437_v46  ;;  %v6424_v60 = vadd.f32 %v5815_v39, %v5272_v29  ;;  %6134 = vperm.xlu1 %6814, %v7358_v37   ;;  %v14523_v46 = vld [vmem:[#allocation6_spill] sm:$0xff]  ;;  %v14525_v37 = vld [vmem:[#allocation64_spill] sm:$0xff] }
 0x837   :  { %v5890_v52 = vpop.permute.xlu0 %5889  ;;  %v5297_v39 = vmul.f32 %v14524_v28, %v14523_v46  ;;  %v14540_v46 = vld [vmem:[#allocation126_spill] sm:$0xff]  ;;  %v14541_v28 = vld [vmem:[#allocation261_spill] sm:$0xff] }
 0x838   :  { %6616 = vst.msk [vmem:[%s13159_s4 + $0x2b8] sm:$0xff] %vm1536_vm0, %v6424_v60  ;;  %v6439_v56 = vadd.f32 %v5890_v52, %v5287_v25  ;;  %6209 = vperm.xlu0 %6815, %v7359_v44   ;;  %v7368_v25 = vld [vmem:[%s13158_s3 + $0x508] sm:$0xff]  ;;  %v14526_v52 = vld [vmem:[#allocation173_spill] sm:$0xff] }
 0x839   :  { %v5825_v57 = vpop.permute.xlu1 %5824  ;;  %v5284_v31 = vmul.f32 %v14526_v52, %v14525_v37  ;;  %v14527_v44 = vld [vmem:[#allocation10_spill] sm:$0xff] }
 0x83a   :  { %6631 = vst.msk [vmem:[%s13159_s4 + $0x330] sm:$0xff] %vm1536_vm0, %v6439_v56  ;;  %v6426_v7 = vadd.f32 %v5825_v57, %v5274_v42  ;;  %6144 = vperm.xlu1 %6814, %v7360_v10   ;;  %v7369_v42 = vld [vmem:[%s13158_s3 + $0x580] sm:$0xff]  ;;  %v5299_v57 = vmul.f32 %v11267_v3, %v14527_v44  ;;  %v14528_v10 = vld [vmem:[#allocation76_spill] sm:$0xff] }
 0x83b   :  { %v5900_v58 = vpop.permute.xlu0 %5899 }
 0x83c   :  { %6618 = vst.msk [vmem:[%s13159_s4 + $0x2c8] sm:$0xff] %vm1536_vm0, %v6426_v7  ;;  %v6441_v32 = vadd.f32 %v5900_v58, %v5289_v24  ;;  %6219 = vperm.xlu0 %6815, %v7361_v43   ;;  %v7370_v24 = vld [vmem:[%s13158_s3 + $0x518] sm:$0xff]  ;;  %v14530_v43 = vld [vmem:[#allocation14_spill] sm:$0xff] }
 0x83d   :  { %v5835_v41 = vpop.permute.xlu1 %5834  ;;  %v14529_v58 = vld [vmem:[#allocation252_spill] sm:$0xff] }
 0x83e   :  { %6633 = vst.msk [vmem:[%s13159_s4 + $0x340] sm:$0xff] %vm1536_vm0, %v6441_v32  ;;  %v6428_v35 = vadd.f32 %v5835_v41, %v5276_v62  ;;  %6154 = vperm.xlu1 %6814, %v7362_v40   ;;  %v5286_v9 = vmul.f32 %v14529_v58, %v14528_v10  ;;  %v7371_v62 = vld [vmem:[%s13158_s3 + $0x590] sm:$0xff]  ;;  %v5301_v41 = vmul.f32 %v11275_v55, %v14530_v43  ;;  %v14531_v40 = vld [vmem:[#allocation88_spill] sm:$0xff] }
 0x83f   :  { %v5910_v26 = vpop.permute.xlu0 %5909  ;;  %v7382_v58 = vld [vmem:[%s13158_s3 + $0x578] sm:$0xff]  ;;  %v7383_v43 = vld [vmem:[%s13158_s3 + $0x5f0] sm:$0xff] }
 0x840   :  { %6620 = vst.msk [vmem:[%s13159_s4 + $0x2d8] sm:$0xff] %vm1536_vm0, %v6428_v35  ;;  %v6443_v2 = vadd.f32 %v5910_v26, %v5291_v4  ;;  %6229 = vperm.xlu0 %6815, %v7363_v47   ;;  %v7372_v4 = vld [vmem:[%s13158_s3 + $0x528] sm:$0xff] }
 0x841   :  { %v5845_v17 = vpop.permute.xlu1 %5844  ;;  %v14532_v26 = vld [vmem:[#allocation254_spill] sm:$0xff] }
 0x842   :  { %6635 = vst.msk [vmem:[%s13159_s4 + $0x350] sm:$0xff] %vm1536_vm0, %v6443_v2  ;;  %v6430_v15 = vadd.f32 %v5845_v17, %v5278_v33  ;;  %6164 = vperm.xlu1 %6814, %v7364_v63   ;;  %v5288_v12 = vmul.f32 %v14532_v26, %v14531_v40  ;;  %v14533_v2 = vld [vmem:[#allocation18_spill] sm:$0xff]  ;;  %v14535_v63 = vld [vmem:[#allocation256_spill] sm:$0xff] }
 0x843   :  { %v5920_v48 = vpop.permute.xlu0 %5919  ;;  %v5303_v47 = vmul.f32 %v11285_v61, %v14533_v2  ;;  %v7384_v26 = vld [vmem:[%s13158_s3 + $0x588] sm:$0xff] }
 0x844   :  { %6622 = vst.msk [vmem:[%s13159_s4 + $0x2e8] sm:$0xff] %vm1536_vm0, %v6430_v15  ;;  %v6445_v54 = vadd.f32 %v5920_v48, %v5293_v53  ;;  %6239 = vperm.xlu0 %6815, %v7365_v8   ;;  %v14534_v15 = vld [vmem:[#allocation100_spill] sm:$0xff] }
 0x845   :  { %v5855_v59 = vpop.permute.xlu1 %5854  ;;  %v5290_v48 = vmul.f32 %v14535_v63, %v14534_v15  ;;  %v7385_v63 = vld [vmem:[%s13158_s3 + $0x598] sm:$0xff] }
 0x846   :  { %6637 = vst.msk [vmem:[%s13159_s4 + $0x360] sm:$0xff] %vm1536_vm0, %v6445_v54  ;;  %v6432_v21 = vadd.f32 %v5855_v59, %v5280_v19  ;;  %6174 = vperm.xlu1 %6814, %v7366_v34   ;;  %v14536_v19 = vld [vmem:[#allocation22_spill] sm:$0xff] }
 0x847   :  { %v5930_v30 = vpop.permute.xlu0 %5929  ;;  %v5305_v54 = vmul.f32 %v11295_v11, %v14536_v19  ;;  %v7376_v59 = vld [vmem:[%s13158_s3 + $0x548] sm:$0xff] }
 0x848   :  { %6624 = vst.msk [vmem:[%s13159_s4 + $0x2f8] sm:$0xff] %vm1536_vm0, %v6432_v21  ;;  %v6447_v23 = vadd.f32 %v5930_v30, %v5295_v22  ;;  %6249 = vperm.xlu0 %6815, %v7367_v14   ;;  %v14537_v22 = vld [vmem:[#allocation113_spill] sm:$0xff]  ;;  %v7378_v14 = vld [vmem:[%s13158_s3 + $0x558] sm:$0xff] }
 0x849   :  { %v5865_v29 = vpop.permute.xlu1 %5864  ;;  %v14538_v21 = vld [vmem:[#allocation257_spill] sm:$0xff] }
 0x84a   :  { %6639 = vst.msk [vmem:[%s13159_s4 + $0x370] sm:$0xff] %vm1536_vm0, %v6447_v23  ;;  %v6434_v50 = vadd.f32 %v5865_v29, %v5282_v51  ;;  %6184 = vperm.xlu1 %6814, %v7368_v25   ;;  %v5292_v34 = vmul.f32 %v14538_v21, %v14537_v22  ;;  %v7377_v30 = vld [vmem:[%s13158_s3 + $0x5c0] sm:$0xff]  ;;  %v5307_v51 = vmul.f32 %v11305_v20, %v14539_v16  ;;  %v7386_v21 = vld [vmem:[%s13158_s3 + $0x5a8] sm:$0xff] }
 0x84b   :  { %v5940_v60 = vpop.permute.xlu0 %5939 }
 0x84c   :  { %6626 = vst.msk [vmem:[%s13159_s4 + $0x308] sm:$0xff] %vm1536_vm0, %v6434_v50  ;;  %v6449_v13 = vadd.f32 %v5940_v60, %v5297_v39  ;;  %6259 = vperm.xlu0 %6815, %v7369_v42   ;;  %v5294_v39 = vmul.f32 %v14541_v28, %v14540_v46  ;;  %v7379_v50 = vld [vmem:[%s13158_s3 + $0x5d0] sm:$0xff]  ;;  %v14542_v60 = vld [vmem:[#allocation30_spill] sm:$0xff]  ;;  %v14543_v42 = vld [vmem:[#allocation137_spill] sm:$0xff] }
 0x84d   :  { %v5875_v56 = vpop.permute.xlu1 %5874  ;;  %v5309_v37 = vmul.f32 %v11315_v0, %v14542_v60  ;;  %v7387_v28 = vld [vmem:[%s13158_s3 + $0x5b8] sm:$0xff] }
 0x84e   :  { %6641 = vst.msk [vmem:[%s13159_s4 + $0x380] sm:$0xff] %vm1536_vm0, %v6449_v13  ;;  %v6436_v38 = vadd.f32 %v5875_v56, %v5284_v31  ;;  %6194 = vperm.xlu1 %6814, %v7370_v24   ;;  %v7380_v31 = vld [vmem:[%s13158_s3 + $0x568] sm:$0xff]  ;;  %v14544_v56 = vld [vmem:[#allocation264_spill] sm:$0xff]  ;;  %v14545_v24 = vld [vmem:[#allocation141_spill] sm:$0xff] }
 0x84f   :  { %v5950_v7 = vpop.permute.xlu0 %5949  ;;  %v5296_v44 = vmul.f32 %v14544_v56, %v14543_v42  ;;  %v7388_v56 = vld [vmem:[%s13158_s3 + $0x5c8] sm:$0xff] }
 0x850   :  { %6628 = vst.msk [vmem:[%s13159_s4 + $0x318] sm:$0xff] %vm1536_vm0, %v6436_v38  ;;  %v6451_v3 = vadd.f32 %v5950_v7, %v5299_v57  ;;  %6269 = vperm.xlu0 %6815, %v7371_v62   ;;  %v7381_v57 = vld [vmem:[%s13158_s3 + $0x5e0] sm:$0xff]  ;;  %v5311_v7 = vmul.f32 %v11322_v18, %v14545_v24  ;;  %v14547_v62 = vld [vmem:[#allocation270_spill] sm:$0xff] }
 0x851   :  { %v5885_v32 = vpop.permute.xlu1 %5884 }
 0x852   :  { %6643 = vst.msk [vmem:[%s13159_s4 + $0x390] sm:$0xff] %vm1536_vm0, %v6451_v3  ;;  %v6438_v6 = vadd.f32 %v5885_v32, %v5286_v9  ;;  %6204 = vperm.xlu1 %6814, %v7372_v4   ;;  %v14546_v3 = vld [vmem:[#allocation8_spill] sm:$0xff]  ;;  %v14549_v4 = vld [vmem:[#allocation197_spill] sm:$0xff] }
 0x853   :  { %v5960_v35 = vpop.permute.xlu0 %5959  ;;  %v5298_v32 = vmul.f32 %v14547_v62, %v14546_v3  ;;  %v7389_v62 = vld [vmem:[%s13158_s3 + $0x5d8] sm:$0xff] }
 0x854   :  { %6630 = vst.msk [vmem:[%s13159_s4 + $0x328] sm:$0xff] %vm1536_vm0, %v6438_v6  ;;  %v6453_v55 = vadd.f32 %v5960_v35, %v5301_v41  ;;  %6279 = vperm.xlu0 %6815, %v7373_v1   ;;  %v14548_v6 = vld [vmem:[#allocation36_spill] sm:$0xff]  ;;  %v14551_v1 = vld [vmem:[#allocation277_spill] sm:$0xff] }
 0x855   :  { %v5895_v33 = vpop.permute.xlu1 %5894  ;;  %v5313_v35 = vmul.f32 %v14549_v4, %v14548_v6 }
 0x856   :  { %6645 = vst.msk [vmem:[%s13159_s4 + $0x3a0] sm:$0xff] %vm1536_vm0, %v6453_v55  ;;  %v6440_v17 = vadd.f32 %v5895_v33, %v5288_v12  ;;  %6214 = vperm.xlu1 %6814, %v7374_v27   ;;  %v14550_v55 = vld [vmem:[#allocation12_spill] sm:$0xff]  ;;  %v14553_v27 = vld [vmem:[#allocation211_spill] sm:$0xff] }
 0x857   :  { %v5970_v53 = vpop.permute.xlu0 %5969  ;;  %v5300_v33 = vmul.f32 %v14551_v1, %v14550_v55  ;;  %v7390_v55 = vld [vmem:[%s13158_s3 + $0x5e8] sm:$0xff] }
 0x858   :  { %6632 = vst.msk [vmem:[%s13159_s4 + $0x338] sm:$0xff] %vm1536_vm0, %v6440_v17  ;;  %v6455_v61 = vadd.f32 %v5970_v53, %v5303_v47  ;;  %6289 = vperm.xlu0 %6815, %v7375_v45   ;;  %v14552_v17 = vld [vmem:[#allocation40_spill] sm:$0xff]  ;;  %v14555_v45 = vld [vmem:[#allocation233_spill] sm:$0xff] }
 0x859   :  { %v5905_v49 = vpop.permute.xlu1 %5904  ;;  %v5315_v53 = vmul.f32 %v14553_v27, %v14552_v17 }
 0x85a   :  { %6647 = vst.msk [vmem:[%s13159_s4 + $0x3b0] sm:$0xff] %vm1536_vm0, %v6455_v61  ;;  %v6442_v8 = vadd.f32 %v5905_v49, %v5290_v48  ;;  %6224 = vperm.xlu1 %6814, %v7376_v59   ;;  %v14554_v61 = vld [vmem:[#allocation16_spill] sm:$0xff]  ;;  %v14557_v59 = vld [vmem:[#allocation282_spill] sm:$0xff] }
 0x85b   :  { %v5980_v5 = vpop.permute.xlu0 %5979  ;;  %v5302_v49 = vmul.f32 %v14555_v45, %v14554_v61  ;;  %v7391_v61 = vld [vmem:[%s13158_s3 + $0x5f8] sm:$0xff] }
 0x85c   :  { %6634 = vst.msk [vmem:[%s13159_s4 + $0x348] sm:$0xff] %vm1536_vm0, %v6442_v8  ;;  %v6457_v11 = vadd.f32 %v5980_v5, %v5305_v54  ;;  %6299 = vperm.xlu0 %6815, %v7377_v30   ;;  %v14556_v8 = vld [vmem:[#allocation44_spill] sm:$0xff]  ;;  %v14559_v30 = vld [vmem:[#allocation201_spill] sm:$0xff] }
 0x85d   :  { %v5915_v36 = vpop.permute.xlu1 %5914  ;;  %v5317_v5 = vmul.f32 %v14557_v59, %v14556_v8 }
 0x85e   :  { %6649 = vst.msk [vmem:[%s13159_s4 + $0x3c0] sm:$0xff] %vm1536_vm0, %v6457_v11  ;;  %v6444_v23 = vadd.f32 %v5915_v36, %v5292_v34  ;;  %6234 = vperm.xlu1 %6814, %v7378_v14   ;;  %v14558_v11 = vld [vmem:[#allocation20_spill] sm:$0xff] }
 0x85f   :  { %v5990_v29 = vpop.permute.xlu0 %5989  ;;  %v5304_v36 = vmul.f32 %v14559_v30, %v14558_v11  ;;  %v14561_v14 = vld [vmem:[#allocation284_spill] sm:$0xff]  ;;  %v14582_v30 = vld [vmem:[#allocation42_spill] sm:$0xff] }
 0x860   :  { %6636 = vst.msk [vmem:[%s13159_s4 + $0x358] sm:$0xff] %vm1536_vm0, %v6444_v23  ;;  %v6459_v20 = vadd.f32 %v5990_v29, %v5307_v51  ;;  %6309 = vperm.xlu0 %6815, %v7379_v50   ;;  %v14560_v23 = vld [vmem:[#allocation50_spill] sm:$0xff] }
 0x861   :  { %v5925_v25 = vpop.permute.xlu1 %5924  ;;  %v5319_v29 = vmul.f32 %v14561_v14, %v14560_v23  ;;  %v14563_v50 = vld [vmem:[#allocation150_spill] sm:$0xff]  ;;  %v14584_v14 = vld [vmem:[#allocation87_spill] sm:$0xff] }
 0x862   :  { %6651 = vst.msk [vmem:[%s13159_s4 + $0x3d0] sm:$0xff] %vm1536_vm0, %v6459_v20  ;;  %v6446_v52 = vadd.f32 %v5925_v25, %v5294_v39  ;;  %6244 = vperm.xlu1 %6814, %v7380_v31   ;;  %v14562_v20 = vld [vmem:[#allocation24_spill] sm:$0xff]  ;;  %v14565_v31 = vld [vmem:[#allocation286_spill] sm:$0xff] }
 0x863   :  { %v6000_v13 = vpop.permute.xlu0 %5999  ;;  %v5306_v25 = vmul.f32 %v14563_v50, %v14562_v20  ;;  %v14586_v20 = vld [vmem:[#allocation47_spill] sm:$0xff]  ;;  %v14587_v50 = vld [vmem:[#allocation196_spill] sm:$0xff] }
 0x864   :  { %6638 = vst.msk [vmem:[%s13159_s4 + $0x368] sm:$0xff] %vm1536_vm0, %v6446_v52  ;;  %v6461_v0 = vadd.f32 %v6000_v13, %v5309_v37  ;;  %6319 = vperm.xlu0 %6815, %v7381_v57   ;;  %v14564_v52 = vld [vmem:[#allocation56_spill] sm:$0xff] }
 0x865   :  { %v5935_v38 = vpop.permute.xlu1 %5934  ;;  %v5321_v13 = vmul.f32 %v14565_v31, %v14564_v52  ;;  %v14567_v57 = vld [vmem:[#allocation204_spill] sm:$0xff]  ;;  %v14589_v31 = vld [vmem:[#allocation298_spill] sm:$0xff] }
 0x866   :  { %6653 = vst.msk [vmem:[%s13159_s4 + $0x3e0] sm:$0xff] %vm1536_vm0, %v6461_v0  ;;  %v6448_v10 = vadd.f32 %v5935_v38, %v5296_v44  ;;  %6254 = vperm.xlu1 %6814, %v7382_v58   ;;  %v14566_v0 = vld [vmem:[#allocation28_spill] sm:$0xff] }
 0x867   :  { %v6010_v9 = vpop.permute.xlu0 %6009  ;;  %v5308_v38 = vmul.f32 %v14567_v57, %v14566_v0  ;;  %v14569_v58 = vld [vmem:[#allocation288_spill] sm:$0xff] }
 0x868   :  { %6640 = vst.msk [vmem:[%s13159_s4 + $0x378] sm:$0xff] %vm1536_vm0, %v6448_v10  ;;  %v6463_v18 = vadd.f32 %v6010_v9, %v5311_v7  ;;  %6329 = vperm.xlu0 %6815, %v7383_v43   ;;  %v14568_v10 = vld [vmem:[#allocation63_spill] sm:$0xff]  ;;  %v14588_v52 = vld [vmem:[#allocation92_spill] sm:$0xff] }
 0x869   :  { %v5945_v41 = vpop.permute.xlu1 %5944  ;;  %v5323_v9 = vmul.f32 %v14569_v58, %v14568_v10  ;;  %v14571_v43 = vld [vmem:[#allocation207_spill] sm:$0xff]  ;;  %v14591_v0 = vld [vmem:[#allocation200_spill] sm:$0xff] }
 0x86a   :  { %6655 = vst.msk [vmem:[%s13159_s4 + $0x3f0] sm:$0xff] %vm1536_vm0, %v6463_v18  ;;  %v6450_v40 = vadd.f32 %v5945_v41, %v5298_v32  ;;  %6264 = vperm.xlu1 %6814, %v7384_v26   ;;  %v14570_v18 = vld [vmem:[#allocation32_spill] sm:$0xff] }
 0x86b   :  { %v6020_v12 = vpop.permute.xlu0 %6019  ;;  %v5310_v41 = vmul.f32 %v14571_v43, %v14570_v18  ;;  %v14593_v10 = vld [vmem:[#allocation300_spill] sm:$0xff] }
 0x86c   :  { %6642 = vst.msk [vmem:[%s13159_s4 + $0x388] sm:$0xff] %vm1536_vm0, %v6450_v40  ;;  %v6465_v2 = vadd.f32 %v6020_v12, %v5313_v35  ;;  %v14572_v35 = vld [vmem:[#allocation68_spill] sm:$0xff]  ;;  %v14573_v40 = vld [vmem:[#allocation290_spill] sm:$0xff] }
 0x86d   :  { %v5955_v47 = vpop.permute.xlu1 %5954  ;;  %v5325_v26 = vmul.f32 %v14573_v40, %v14572_v35 }
 0x86e   :  { %6657 = vst.msk [vmem:[%s13159_s4 + $0x400] sm:$0xff] %vm1536_vm0, %v6465_v2  ;;  %v6452_v15 = vadd.f32 %v5955_v47, %v5300_v33  ;;  %6274 = vperm.xlu1 %6814, %v7385_v63   ;;  %v14574_v33 = vld [vmem:[#allocation34_spill] sm:$0xff]  ;;  %v14575_v2 = vld [vmem:[#allocation187_spill] sm:$0xff] }
 0x86f   :  { %v6030_v48 = vpop.permute.xlu0 %6029  ;;  %v5312_v47 = vmul.f32 %v14575_v2, %v14574_v33 }
 0x870   :  { %6644 = vst.msk [vmem:[%s13159_s4 + $0x398] sm:$0xff] %vm1536_vm0, %v6452_v15  ;;  %v6467_v19 = vadd.f32 %v6030_v48, %v5315_v53  ;;  %v14576_v53 = vld [vmem:[#allocation75_spill] sm:$0xff]  ;;  %v14577_v15 = vld [vmem:[#allocation292_spill] sm:$0xff] }
 0x871   :  { %v5965_v54 = vpop.permute.xlu1 %5964  ;;  %v5327_v63 = vmul.f32 %v14577_v15, %v14576_v53 }
 0x872   :  { %6659 = vst.msk [vmem:[%s13159_s4 + $0x410] sm:$0xff] %vm1536_vm0, %v6467_v19  ;;  %v6454_v22 = vadd.f32 %v5965_v54, %v5302_v49  ;;  %6284 = vperm.xlu1 %6814, %v7386_v21   ;;  %v14578_v49 = vld [vmem:[#allocation38_spill] sm:$0xff] }
 0x873   :  { %v6040_v34 = vpop.permute.xlu0 %6039  ;;  %v14579_v19 = vld [vmem:[#allocation190_spill] sm:$0xff] }
 0x874   :  { %6646 = vst.msk [vmem:[%s13159_s4 + $0x3a8] sm:$0xff] %vm1536_vm0, %v6454_v22  ;;  %v6469_v16 = vadd.f32 %v6040_v34, %v5317_v5  ;;  %v5314_v54 = vmul.f32 %v14579_v19, %v14578_v49  ;;  %v14580_v5 = vld [vmem:[#allocation80_spill] sm:$0xff]  ;;  %v14581_v22 = vld [vmem:[#allocation294_spill] sm:$0xff] }
 0x875   :  { %v5975_v51 = vpop.permute.xlu1 %5974  ;;  %v5329_v21 = vmul.f32 %v14581_v22, %v14580_v5  ;;  %v14604_v19 = vld [vmem:[#allocation118_spill] sm:$0xff] }
 0x876   :  { %6661 = vst.msk [vmem:[%s13159_s4 + $0x420] sm:$0xff] %vm1536_vm0, %v6469_v16  ;;  %v6456_v46 = vadd.f32 %v5975_v51, %v5304_v36  ;;  %6294 = vperm.xlu1 %6814, %v7387_v28   ;;  %v14583_v36 = vld [vmem:[#allocation195_spill] sm:$0xff]  ;;  %v14606_v22 = vld [vmem:[#allocation78_spill] sm:$0xff] }
 0x877   :  { %v6050_v39 = vpop.permute.xlu0 %6049  ;;  %v5316_v16 = vmul.f32 %v14583_v36, %v14582_v30  ;;  %v14608_v36 = vld [vmem:[#allocation125_spill] sm:$0xff] }
 0x878   :  { %6648 = vst.msk [vmem:[%s13159_s4 + $0x3b8] sm:$0xff] %vm1536_vm0, %v6456_v46  ;;  %v6471_v60 = vadd.f32 %v6050_v39, %v5319_v29  ;;  %v14585_v29 = vld [vmem:[#allocation296_spill] sm:$0xff] }
 0x879   :  { %v5985_v37 = vpop.permute.xlu1 %5984  ;;  %v5331_v46 = vmul.f32 %v14585_v29, %v14584_v14  ;;  %v14610_v29 = vld [vmem:[#allocation83_spill] sm:$0xff] }
 0x87a   :  { %6663 = vst.msk [vmem:[%s13159_s4 + $0x430] sm:$0xff] %vm1536_vm0, %v6471_v60  ;;  %v6458_v42 = vadd.f32 %v5985_v37, %v5306_v25  ;;  %6304 = vperm.xlu1 %6814, %v7388_v56   ;;  %v5318_v25 = vmul.f32 %v14587_v50, %v14586_v20  ;;  %v14612_v50 = vld [vmem:[#allocation131_spill] sm:$0xff] }
 0x87b   :  { %v6060_v44 = vpop.permute.xlu0 %6059 }
 0x87c   :  { %6650 = vst.msk [vmem:[%s13159_s4 + $0x3c8] sm:$0xff] %vm1536_vm0, %v6458_v42  ;;  %v6473_v24 = vadd.f32 %v6060_v44, %v5321_v13  ;;  %v5333_v13 = vmul.f32 %v14589_v31, %v14588_v52  ;;  %v14590_v44 = vld [vmem:[#allocation54_spill] sm:$0xff] }
 0x87d   :  { %v5995_v7 = vpop.permute.xlu1 %5994  ;;  %v5320_v57 = vmul.f32 %v14591_v0, %v14590_v44  ;;  %v14614_v31 = vld [vmem:[#allocation90_spill] sm:$0xff]  ;;  %v14616_v0 = vld [vmem:[#allocation175_spill] sm:$0xff] }
 0x87e   :  { %6665 = vst.msk [vmem:[%s13159_s4 + $0x440] sm:$0xff] %vm1536_vm0, %v6473_v24  ;;  %v6460_v3 = vadd.f32 %v5995_v7, %v5308_v38  ;;  %6314 = vperm.xlu1 %6814, %v7389_v62   ;;  %v14592_v7 = vld [vmem:[#allocation99_spill] sm:$0xff] }
 0x87f   :  { %v6070_v32 = vpop.permute.xlu0 %6069  ;;  %v5335_v58 = vmul.f32 %v14593_v10, %v14592_v7  ;;  %v14594_v62 = vld [vmem:[#allocation59_spill] sm:$0xff]  ;;  %v14618_v10 = vld [vmem:[#allocation216_spill] sm:$0xff] }
 0x880   :  { %6652 = vst.msk [vmem:[%s13159_s4 + $0x3d8] sm:$0xff] %vm1536_vm0, %v6460_v3  ;;  %v6475_v6 = vadd.f32 %v6070_v32, %v5323_v9  ;;  %v14595_v32 = vld [vmem:[#allocation186_spill] sm:$0xff] }
 0x881   :  { %v6005_v4 = vpop.permute.xlu1 %6004  ;;  %v5322_v18 = vmul.f32 %v14595_v32, %v14594_v62  ;;  %v14620_v32 = vld [vmem:[#allocation143_spill] sm:$0xff] }
 0x882   :  { %6667 = vst.msk [vmem:[%s13159_s4 + $0x450] sm:$0xff] %vm1536_vm0, %v6475_v6  ;;  %v6462_v12 = vadd.f32 %v6005_v4, %v5310_v41  ;;  %6324 = vperm.xlu1 %6814, %v7390_v55   ;;  %v14596_v6 = vld [vmem:[#allocation105_spill] sm:$0xff]  ;;  %v14597_v4 = vld [vmem:[#allocation302_spill] sm:$0xff] }
 0x883   :  { %v6080_v1 = vpop.permute.xlu0 %6079  ;;  %v5337_v35 = vmul.f32 %v14597_v4, %v14596_v6  ;;  %v14599_v55 = vld [vmem:[#allocation193_spill] sm:$0xff]  ;;  %v14622_v4 = vld [vmem:[#allocation219_spill] sm:$0xff] }
 0x884   :  { %6654 = vst.msk [vmem:[%s13159_s4 + $0x3e8] sm:$0xff] %vm1536_vm0, %v6462_v12  ;;  %v6477_v17 = vadd.f32 %v6080_v1, %v5325_v26  ;;  %v14598_v12 = vld [vmem:[#allocation66_spill] sm:$0xff] }
 0x885   :  { %v6015_v27 = vpop.permute.xlu1 %6014  ;;  %v5324_v1 = vmul.f32 %v14599_v55, %v14598_v12  ;;  %v14624_v55 = vld [vmem:[#allocation147_spill] sm:$0xff] }
 0x886   :  { %6669 = vst.msk [vmem:[%s13159_s4 + $0x460] sm:$0xff] %vm1536_vm0, %v6477_v17  ;;  %v6464_v48 = vadd.f32 %v6015_v27, %v5312_v47  ;;  %6334 = vperm.xlu1 %6814, %v7391_v61   ;;  %v14600_v47 = vld [vmem:[#allocation112_spill] sm:$0xff] }
 0x887   :  { %v6090_v45 = vpop.permute.xlu0 %6089  ;;  %v14601_v17 = vld [vmem:[#allocation304_spill] sm:$0xff] }
 0x888   :  { %6656 = vst.msk [vmem:[%s13159_s4 + $0x3f8] sm:$0xff] %vm1536_vm0, %v6464_v48  ;;  %v6479_v8 = vadd.f32 %v6090_v45, %v5327_v63  ;;  %v5339_v27 = vmul.f32 %v14601_v17, %v14600_v47  ;;  %v14602_v63 = vld [vmem:[#allocation71_spill] sm:$0xff]  ;;  %v14603_v48 = vld [vmem:[#allocation149_spill] sm:$0xff] }
 0x889   :  { %v6025_v59 = vpop.permute.xlu1 %6024  ;;  %v5326_v61 = vmul.f32 %v14603_v48, %v14602_v63  ;;  %v14626_v17 = vld [vmem:[#allocation159_spill] sm:$0xff]  ;;  %v14628_v48 = vld [vmem:[#allocation154_spill] sm:$0xff] }
 0x88a   :  { %6671 = vst.msk [vmem:[%s13159_s4 + $0x470] sm:$0xff] %vm1536_vm0, %v6479_v8  ;;  %v6466_v34 = vadd.f32 %v6025_v59, %v5314_v54  ;;  %v14605_v54 = vld [vmem:[#allocation306_spill] sm:$0xff] }
 0x88b   :  { %v6100_v11 = vpop.permute.xlu0 %6099  ;;  %v5341_v8 = vmul.f32 %v14605_v54, %v14604_v19  ;;  %v14630_v54 = vld [vmem:[#allocation101_spill] sm:$0xff] }
 0x88c   :  { %6658 = vst.msk [vmem:[%s13159_s4 + $0x408] sm:$0xff] %vm1536_vm0, %v6466_v34  ;;  %v6481_v51 = vadd.f32 %v6100_v11, %v5329_v21  ;;  %v14607_v21 = vld [vmem:[#allocation218_spill] sm:$0xff] }
 0x88d   :  { %v6035_v23 = vpop.permute.xlu1 %6034  ;;  %v5328_v34 = vmul.f32 %v14607_v21, %v14606_v22  ;;  %v14632_v21 = vld [vmem:[#allocation162_spill] sm:$0xff] }
 0x88e   :  { %6673 = vst.msk [vmem:[%s13159_s4 + $0x480] sm:$0xff] %vm1536_vm0, %v6481_v51  ;;  %v6468_v28 = vadd.f32 %v6035_v23, %v5316_v16  ;;  %v14609_v16 = vld [vmem:[#allocation308_spill] sm:$0xff] }
 0x88f   :  { %v6110_v39 = vpop.permute.xlu0 %6109  ;;  %v5343_v51 = vmul.f32 %v14609_v16, %v14608_v36  ;;  %v14634_v16 = vld [vmem:[#allocation224_spill] sm:$0xff] }
 0x890   :  { %6660 = vst.msk [vmem:[%s13159_s4 + $0x418] sm:$0xff] %vm1536_vm0, %v6468_v28  ;;  %v6483_v60 = vadd.f32 %v6110_v39, %v5331_v46  ;;  %v14611_v46 = vld [vmem:[#allocation283_spill] sm:$0xff] }
 0x891   :  { %v6045_v37 = vpop.permute.xlu1 %6044  ;;  %v5330_v28 = vmul.f32 %v14611_v46, %v14610_v29  ;;  %v14636_v46 = vld [vmem:[#allocation169_spill] sm:$0xff] }
 0x892   :  { %6675 = vst.msk [vmem:[%s13159_s4 + $0x490] sm:$0xff] %vm1536_vm0, %v6483_v60  ;;  %v6470_v42 = vadd.f32 %v6045_v37, %v5318_v25  ;;  %v14613_v25 = vld [vmem:[#allocation310_spill] sm:$0xff] }
 0x893   :  { %v6120_v56 = vpop.permute.xlu0 %6119  ;;  %v5345_v60 = vmul.f32 %v14613_v25, %v14612_v50  ;;  %v14638_v25 = vld [vmem:[#allocation228_spill] sm:$0xff] }
 0x894   :  { %6662 = vst.msk [vmem:[%s13159_s4 + $0x428] sm:$0xff] %vm1536_vm0, %v6470_v42  ;;  %v6485_v38 = vadd.f32 %v6120_v56, %v5333_v13  ;;  %v14615_v13 = vld [vmem:[#allocation285_spill] sm:$0xff] }
 0x895   :  { %v6055_v24 = vpop.permute.xlu1 %6054  ;;  %v5332_v42 = vmul.f32 %v14615_v13, %v14614_v31  ;;  %v14640_v13 = vld [vmem:[#allocation188_spill] sm:$0xff] }
 0x896   :  { %6677 = vst.msk [vmem:[%s13159_s4 + $0x4a0] sm:$0xff] %vm1536_vm0, %v6485_v38  ;;  %v6472_v9 = vadd.f32 %v6055_v24, %v5320_v57  ;;  %v14617_v57 = vld [vmem:[#allocation312_spill] sm:$0xff] }
 0x897   :  { %v6130_v3 = vpop.permute.xlu0 %6129  ;;  %v5347_v38 = vmul.f32 %v14617_v57, %v14616_v0  ;;  %v14642_v57 = vld [vmem:[#allocation222_spill] sm:$0xff] }
 0x898   :  { %6664 = vst.msk [vmem:[%s13159_s4 + $0x438] sm:$0xff] %vm1536_vm0, %v6472_v9  ;;  %v6487_v43 = vadd.f32 %v6130_v3, %v5335_v58  ;;  %v14619_v58 = vld [vmem:[#allocation287_spill] sm:$0xff] }
 0x899   :  { %v6065_v41 = vpop.permute.xlu1 %6064  ;;  %v5334_v9 = vmul.f32 %v14619_v58, %v14618_v10  ;;  %v14644_v58 = vld [vmem:[#allocation262_spill] sm:$0xff] }
 0x89a   :  { %6679 = vst.msk [vmem:[%s13159_s4 + $0x4b0] sm:$0xff] %vm1536_vm0, %v6487_v43  ;;  %v6474_v40 = vadd.f32 %v6065_v41, %v5322_v18  ;;  %v14621_v18 = vld [vmem:[#allocation314_spill] sm:$0xff] }
 0x89b   :  { %v6140_v26 = vpop.permute.xlu0 %6139  ;;  %v5349_v43 = vmul.f32 %v14621_v18, %v14620_v32  ;;  %v14646_v18 = vld [vmem:[#allocation108_spill] sm:$0xff] }
 0x89c   :  { %6666 = vst.msk [vmem:[%s13159_s4 + $0x448] sm:$0xff] %vm1536_vm0, %v6474_v40  ;;  %v6489_v33 = vadd.f32 %v6140_v26, %v5337_v35  ;;  %v14623_v35 = vld [vmem:[#allocation289_spill] sm:$0xff] }
 0x89d   :  { %v6075_v2 = vpop.permute.xlu1 %6074  ;;  %v5336_v40 = vmul.f32 %v14623_v35, %v14622_v4  ;;  %v14648_v35 = vld [vmem:[#allocation177_spill] sm:$0xff] }
 0x89e   :  { %6681 = vst.msk [vmem:[%s13159_s4 + $0x4c0] sm:$0xff] %vm1536_vm0, %v6489_v33  ;;  %v6476_v53 = vadd.f32 %v6075_v2, %v5324_v1  ;;  %v14625_v1 = vld [vmem:[#allocation316_spill] sm:$0xff] }
 0x89f   :  { %v6150_v15 = vpop.permute.xlu0 %6149  ;;  %v5351_v33 = vmul.f32 %v14625_v1, %v14624_v55  ;;  %v14650_v1 = vld [vmem:[#allocation114_spill] sm:$0xff] }
 0x8a0   :  { %6668 = vst.msk [vmem:[%s13159_s4 + $0x458] sm:$0xff] %vm1536_vm0, %v6476_v53  ;;  %v6491_v45 = vadd.f32 %v6150_v15, %v5339_v27  ;;  %v14627_v27 = vld [vmem:[#allocation291_spill] sm:$0xff] }
 0x8a1   :  { %v6085_v49 = vpop.permute.xlu1 %6084  ;;  %v5338_v53 = vmul.f32 %v14627_v27, %v14626_v17  ;;  %v14652_v27 = vld [vmem:[#allocation202_spill] sm:$0xff] }
 0x8a2   :  { %6683 = vst.msk [vmem:[%s13159_s4 + $0x4d0] sm:$0xff] %vm1536_vm0, %v6491_v45  ;;  %v6478_v59 = vadd.f32 %v6085_v49, %v5326_v61  ;;  %v14629_v61 = vld [vmem:[#allocation318_spill] sm:$0xff] }
 0x8a3   :  { %v6160_v5 = vpop.permute.xlu0 %6159  ;;  %v5353_v45 = vmul.f32 %v14629_v61, %v14628_v48  ;;  %v14654_v61 = vld [vmem:[#allocation115_spill] sm:$0xff] }
 0x8a4   :  { %6670 = vst.msk [vmem:[%s13159_s4 + $0x468] sm:$0xff] %vm1536_vm0, %v6478_v59  ;;  %v6493_v11 = vadd.f32 %v6160_v5, %v5341_v8  ;;  %v14631_v8 = vld [vmem:[#allocation293_spill] sm:$0xff] }
 0x8a5   :  { %v6095_v30 = vpop.permute.xlu1 %6094  ;;  %v5340_v59 = vmul.f32 %v14631_v8, %v14630_v54  ;;  %v14656_v8 = vld [vmem:[#allocation267_spill] sm:$0xff] }
 0x8a6   :  { %6685 = vst.msk [vmem:[%s13159_s4 + $0x4e0] sm:$0xff] %vm1536_vm0, %v6493_v11  ;;  %v6480_v23 = vadd.f32 %v6095_v30, %v5328_v34  ;;  %v14633_v34 = vld [vmem:[#allocation320_spill] sm:$0xff] }
 0x8a7   :  { %v6170_v14 = vpop.permute.xlu0 %6169  ;;  %v5355_v11 = vmul.f32 %v14633_v34, %v14632_v21  ;;  %v14658_v34 = vld [vmem:[#allocation120_spill] sm:$0xff] }
 0x8a8   :  { %6672 = vst.msk [vmem:[%s13159_s4 + $0x478] sm:$0xff] %vm1536_vm0, %v6480_v23  ;;  %v6495_v39 = vadd.f32 %v6170_v14, %v5343_v51  ;;  %v14635_v51 = vld [vmem:[#allocation295_spill] sm:$0xff] }
 0x8a9   :  { %v6105_v20 = vpop.permute.xlu1 %6104  ;;  %v5342_v23 = vmul.f32 %v14635_v51, %v14634_v16  ;;  %v14660_v51 = vld [vmem:[#allocation269_spill] sm:$0xff] }
 0x8aa   :  { %6687 = vst.msk [vmem:[%s13159_s4 + $0x4f0] sm:$0xff] %vm1536_vm0, %v6495_v39  ;;  %v6482_v37 = vadd.f32 %v6105_v20, %v5330_v28  ;;  %v14637_v28 = vld [vmem:[#allocation322_spill] sm:$0xff] }
 0x8ab   :  { %v6180_v52 = vpop.permute.xlu0 %6179  ;;  %v5357_v39 = vmul.f32 %v14637_v28, %v14636_v46  ;;  %v14662_v28 = vld [vmem:[#allocation239_spill] sm:$0xff] }
 0x8ac   :  { %6674 = vst.msk [vmem:[%s13159_s4 + $0x488] sm:$0xff] %vm1536_vm0, %v6482_v37  ;;  %v6497_v56 = vadd.f32 %v6180_v52, %v5345_v60  ;;  %v14639_v60 = vld [vmem:[#allocation297_spill] sm:$0xff] }
 0x8ad   :  { %v6115_v44 = vpop.permute.xlu1 %6114  ;;  %v5344_v37 = vmul.f32 %v14639_v60, %v14638_v25  ;;  %v14664_v60 = vld [vmem:[#allocation273_spill] sm:$0xff] }
 0x8ae   :  { %6689 = vst.msk [vmem:[%s13159_s4 + $0x500] sm:$0xff] %vm1536_vm0, %v6497_v56  ;;  %v6484_v24 = vadd.f32 %v6115_v44, %v5332_v42  ;;  %v14641_v42 = vld [vmem:[#allocation324_spill] sm:$0xff] }
 0x8af   :  { %v6190_v7 = vpop.permute.xlu0 %6189  ;;  %v5359_v56 = vmul.f32 %v14641_v42, %v14640_v13  ;;  %v14666_v42 = vld [vmem:[#allocation127_spill] sm:$0xff] }
 0x8b0   :  { %6676 = vst.msk [vmem:[%s13159_s4 + $0x498] sm:$0xff] %vm1536_vm0, %v6484_v24  ;;  %v6499_v3 = vadd.f32 %v6190_v7, %v5347_v38  ;;  %v14643_v38 = vld [vmem:[#allocation299_spill] sm:$0xff] }
 0x8b1   :  { %v6125_v62 = vpop.permute.xlu1 %6124  ;;  %v5346_v24 = vmul.f32 %v14643_v38, %v14642_v57  ;;  %v14668_v38 = vld [vmem:[#allocation276_spill] sm:$0xff] }
 0x8b2   :  { %6691 = vst.msk [vmem:[%s13159_s4 + $0x510] sm:$0xff] %vm1536_vm0, %v6499_v3  ;;  %v6486_v41 = vadd.f32 %v6125_v62, %v5334_v9  ;;  %v14645_v9 = vld [vmem:[#allocation326_spill] sm:$0xff] }
 0x8b3   :  { %v6200_v6 = vpop.permute.xlu0 %6199  ;;  %v5361_v3 = vmul.f32 %v14645_v9, %v14644_v58  ;;  %v14670_v9 = vld [vmem:[#allocation244_spill] sm:$0xff] }
 0x8b4   :  { %6678 = vst.msk [vmem:[%s13159_s4 + $0x4a8] sm:$0xff] %vm1536_vm0, %v6486_v41  ;;  %v6501_v26 = vadd.f32 %v6200_v6, %v5349_v43  ;;  %v14647_v43 = vld [vmem:[#allocation301_spill] sm:$0xff] }
 0x8b5   :  { %v6135_v12 = vpop.permute.xlu1 %6134  ;;  %v5348_v41 = vmul.f32 %v14647_v43, %v14646_v18  ;;  %v14672_v43 = vld [vmem:[#allocation280_spill] sm:$0xff] }
 0x8b6   :  { %6693 = vst.msk [vmem:[%s13159_s4 + $0x520] sm:$0xff] %vm1536_vm0, %v6501_v26  ;;  %v6488_v2 = vadd.f32 %v6135_v12, %v5336_v40  ;;  %v14649_v40 = vld [vmem:[#allocation328_spill] sm:$0xff] }
 0x8b7   :  { %v6210_v47 = vpop.permute.xlu0 %6209  ;;  %v5363_v26 = vmul.f32 %v14649_v40, %v14648_v35  ;;  %v14674_v40 = vld [vmem:[#allocation246_spill] sm:$0xff] }
 0x8b8   :  { %6680 = vst.msk [vmem:[%s13159_s4 + $0x4b8] sm:$0xff] %vm1536_vm0, %v6488_v2  ;;  %v6503_v15 = vadd.f32 %v6210_v47, %v5351_v33  ;;  %v14651_v33 = vld [vmem:[#allocation303_spill] sm:$0xff] }
 0x8b9   :  { %v6145_v63 = vpop.permute.xlu1 %6144  ;;  %v5350_v2 = vmul.f32 %v14651_v33, %v14650_v1 }
 0x8ba   :  { %6695 = vst.msk [vmem:[%s13159_s4 + $0x530] sm:$0xff] %vm1536_vm0, %v6503_v15  ;;  %v6490_v49 = vadd.f32 %v6145_v63, %v5338_v53  ;;  %v14653_v53 = vld [vmem:[#allocation330_spill] sm:$0xff] }
 0x8bb   :  { %v6220_v19 = vpop.permute.xlu0 %6219  ;;  %v5365_v15 = vmul.f32 %v14653_v53, %v14652_v27 }
 0x8bc   :  { %6682 = vst.msk [vmem:[%s13159_s4 + $0x4c8] sm:$0xff] %vm1536_vm0, %v6490_v49  ;;  %v6505_v5 = vadd.f32 %v6220_v19, %v5353_v45  ;;  %v14655_v45 = vld [vmem:[#allocation305_spill] sm:$0xff] }
 0x8bd   :  { %v6155_v22 = vpop.permute.xlu1 %6154  ;;  %v5352_v49 = vmul.f32 %v14655_v45, %v14654_v61 }
 0x8be   :  { %6697 = vst.msk [vmem:[%s13159_s4 + $0x540] sm:$0xff] %vm1536_vm0, %v6505_v5  ;;  %v6492_v30 = vadd.f32 %v6155_v22, %v5340_v59  ;;  %v14657_v59 = vld [vmem:[#allocation52_spill] sm:$0xff] }
 0x8bf   :  { %v6230_v36 = vpop.permute.xlu0 %6229  ;;  %v5367_v5 = vmul.f32 %v14657_v59, %v14656_v8 }
 0x8c0   :  { %6684 = vst.msk [vmem:[%s13159_s4 + $0x4d8] sm:$0xff] %vm1536_vm0, %v6492_v30  ;;  %v6507_v14 = vadd.f32 %v6230_v36, %v5355_v11  ;;  %v14659_v11 = vld [vmem:[#allocation307_spill] sm:$0xff] }
 0x8c1   :  { %v6165_v29 = vpop.permute.xlu1 %6164  ;;  %v5354_v30 = vmul.f32 %v14659_v11, %v14658_v34 }
 0x8c2   :  { %6699 = vst.msk [vmem:[%s13159_s4 + $0x550] sm:$0xff] %vm1536_vm0, %v6507_v14  ;;  %v6494_v20 = vadd.f32 %v6165_v29, %v5342_v23  ;;  %v14661_v23 = vld [vmem:[#allocation212_spill] sm:$0xff] }
 0x8c3   :  { %v6240_v50 = vpop.permute.xlu0 %6239  ;;  %v5369_v14 = vmul.f32 %v14661_v23, %v14660_v51 }
 0x8c4   :  { %6686 = vst.msk [vmem:[%s13159_s4 + $0x4e8] sm:$0xff] %vm1536_vm0, %v6494_v20  ;;  %v6509_v52 = vadd.f32 %v6240_v50, %v5357_v39  ;;  %v14663_v39 = vld [vmem:[#allocation309_spill] sm:$0xff] }
 0x8c5   :  { %v6175_v31 = vpop.permute.xlu1 %6174  ;;  %v5356_v20 = vmul.f32 %v14663_v39, %v14662_v28 }
 0x8c6   :  { %6701 = vst.msk [vmem:[%s13159_s4 + $0x560] sm:$0xff] %vm1536_vm0, %v6509_v52  ;;  %v6496_v44 = vadd.f32 %v6175_v31, %v5344_v37  ;;  %v14665_v37 = vld [vmem:[#allocation69_spill] sm:$0xff] }
 0x8c7   :  { %v6250_v0 = vpop.permute.xlu0 %6249  ;;  %v5371_v52 = vmul.f32 %v14665_v37, %v14664_v60 }
 0x8c8   :  { %6688 = vst.msk [vmem:[%s13159_s4 + $0x4f8] sm:$0xff] %vm1536_vm0, %v6496_v44  ;;  %v6511_v7 = vadd.f32 %v6250_v0, %v5359_v56  ;;  %v14667_v56 = vld [vmem:[#allocation311_spill] sm:$0xff] }
 0x8c9   :  { %v6185_v10 = vpop.permute.xlu1 %6184  ;;  %v5358_v44 = vmul.f32 %v14667_v56, %v14666_v42 }
 0x8ca   :  { %6703 = vst.msk [vmem:[%s13159_s4 + $0x570] sm:$0xff] %vm1536_vm0, %v6511_v7  ;;  %v6498_v62 = vadd.f32 %v6185_v10, %v5346_v24  ;;  %v14669_v24 = vld [vmem:[#allocation179_spill] sm:$0xff] }
 0x8cb   :  { %v6260_v32 = vpop.permute.xlu0 %6259  ;;  %v5373_v7 = vmul.f32 %v14669_v24, %v14668_v38 }
 0x8cc   :  { %6690 = vst.msk [vmem:[%s13159_s4 + $0x508] sm:$0xff] %vm1536_vm0, %v6498_v62  ;;  %v6513_v6 = vadd.f32 %v6260_v32, %v5361_v3  ;;  %v14671_v3 = vld [vmem:[#allocation313_spill] sm:$0xff] }
 0x8cd   :  { %v6195_v4 = vpop.permute.xlu1 %6194  ;;  %v5360_v62 = vmul.f32 %v14671_v3, %v14670_v9 }
 0x8ce   :  { %6705 = vst.msk [vmem:[%s13159_s4 + $0x580] sm:$0xff] %vm1536_vm0, %v6513_v6  ;;  %v6500_v12 = vadd.f32 %v6195_v4, %v5348_v41  ;;  %v14673_v41 = vld [vmem:[#allocation81_spill] sm:$0xff] }
 0x8cf   :  { %v6270_v55 = vpop.permute.xlu0 %6269  ;;  %v5375_v6 = vmul.f32 %v14673_v41, %v14672_v43 }
 0x8d0   :  { %6692 = vst.msk [vmem:[%s13159_s4 + $0x518] sm:$0xff] %vm1536_vm0, %v6500_v12  ;;  %v6515_v47 = vadd.f32 %v6270_v55, %v5363_v26  ;;  %v14675_v26 = vld [vmem:[#allocation315_spill] sm:$0xff] }
 0x8d1   :  { %v6205_v17 = vpop.permute.xlu1 %6204  ;;  %v5362_v12 = vmul.f32 %v14675_v26, %v14674_v40 }
 0x8d2   :  { %6707 = vst.msk [vmem:[%s13159_s4 + $0x590] sm:$0xff] %vm1536_vm0, %v6515_v47  ;;  %v6502_v63 = vadd.f32 %v6205_v17, %v5350_v2  ;;  %v14676_v2 = vld [vmem:[#allocation139_spill] sm:$0xff]  ;;  %v14677_v47 = vld [vmem:[#allocation317_spill] sm:$0xff] }
 0x8d3   :  { %v6280_v48 = vpop.permute.xlu0 %6279  ;;  %v5364_v17 = vmul.f32 %v14677_v47, %v14676_v2 }
 0x8d4   :  { %6694 = vst.msk [vmem:[%s13159_s4 + $0x528] sm:$0xff] %vm1536_vm0, %v6502_v63  ;;  %v6517_v19 = vadd.f32 %v6280_v48, %v5365_v15  ;;  %v14678_v15 = vld [vmem:[#allocation140_spill] sm:$0xff]  ;;  %v14679_v63 = vld [vmem:[#allocation319_spill] sm:$0xff] }
 0x8d5   :  { %v6215_v54 = vpop.permute.xlu1 %6214  ;;  %v5366_v48 = vmul.f32 %v14679_v63, %v14678_v15 }
 0x8d6   :  { %6709 = vst.msk [vmem:[%s13159_s4 + $0x5a0] sm:$0xff] %vm1536_vm0, %v6517_v19  ;;  %v6504_v22 = vadd.f32 %v6215_v54, %v5352_v49  ;;  %v14680_v49 = vld [vmem:[#allocation145_spill] sm:$0xff] }
 0x8d7   :  { %v6290_v21 = vpop.permute.xlu0 %6289  ;;  %v14681_v19 = vld [vmem:[#allocation321_spill] sm:$0xff] }
 0x8d8   :  { %6696 = vst.msk [vmem:[%s13159_s4 + $0x538] sm:$0xff] %vm1536_vm0, %v6504_v22  ;;  %v6519_v36 = vadd.f32 %v6290_v21, %v5367_v5  ;;  %v5368_v54 = vmul.f32 %v14681_v19, %v14680_v49  ;;  %v14682_v5 = vld [vmem:[#allocation155_spill] sm:$0xff] }
 0x8d9   :  { %v6225_v16 = vpop.permute.xlu1 %6224  ;;  %v14683_v22 = vld [vmem:[#allocation323_spill] sm:$0xff] }
 0x8da   :  { %6711 = vst.msk [vmem:[%s13159_s4 + $0x5b0] sm:$0xff] %vm1536_vm0, %v6519_v36  ;;  %v6506_v29 = vadd.f32 %v6225_v16, %v5354_v30  ;;  %v5370_v21 = vmul.f32 %v14683_v22, %v14682_v5  ;;  %v14684_v30 = vld [vmem:[#allocation163_spill] sm:$0xff]  ;;  %v14685_v36 = vld [vmem:[#allocation325_spill] sm:$0xff] }
 0x8db   :  { %v6300_v46 = vpop.permute.xlu0 %6299  ;;  %v5372_v16 = vmul.f32 %v14685_v36, %v14684_v30 }
 0x8dc   :  { %6698 = vst.msk [vmem:[%s13159_s4 + $0x548] sm:$0xff] %vm1536_vm0, %v6506_v29  ;;  %v6521_v50 = vadd.f32 %v6300_v46, %v5369_v14  ;;  %v14686_v14 = vld [vmem:[#allocation171_spill] sm:$0xff] }
 0x8dd   :  { %v6235_v25 = vpop.permute.xlu1 %6234  ;;  %v14687_v29 = vld [vmem:[#allocation327_spill] sm:$0xff] }
 0x8de   :  { %6713 = vst.msk [vmem:[%s13159_s4 + $0x5c0] sm:$0xff] %vm1536_vm0, %v6521_v50  ;;  %v6508_v31 = vadd.f32 %v6235_v25, %v5356_v20  ;;  %v5374_v46 = vmul.f32 %v14687_v29, %v14686_v14  ;;  %v14688_v20 = vld [vmem:[#allocation181_spill] sm:$0xff] }
 0x8df   :  { %v6310_v13 = vpop.permute.xlu0 %6309  ;;  %v14689_v50 = vld [vmem:[#allocation329_spill] sm:$0xff] }
 0x8e0   :  { %6700 = vst.msk [vmem:[%s13159_s4 + $0x558] sm:$0xff] %vm1536_vm0, %v6508_v31  ;;  %v6523_v0 = vadd.f32 %v6310_v13, %v5371_v52  ;;  %v5376_v25 = vmul.f32 %v14689_v50, %v14688_v20 }
 0x8e1   :  { %v6245_v57 = vpop.permute.xlu1 %6244 }
 0x8e2   :  { %6715 = vst.msk [vmem:[%s13159_s4 + $0x5d0] sm:$0xff] %vm1536_vm0, %v6523_v0  ;;  %v6510_v10 = vadd.f32 %v6245_v57, %v5358_v44 }
 0x8e3   :  { %v6320_v58 = vpop.permute.xlu0 %6319 }
 0x8e4   :  { %6702 = vst.msk [vmem:[%s13159_s4 + $0x568] sm:$0xff] %vm1536_vm0, %v6510_v10  ;;  %v6525_v32 = vadd.f32 %v6320_v58, %v5373_v7 }
 0x8e5   :  { %v6255_v18 = vpop.permute.xlu1 %6254 }
 0x8e6   :  { %6717 = vst.msk [vmem:[%s13159_s4 + $0x5e0] sm:$0xff] %vm1536_vm0, %v6525_v32  ;;  %v6512_v4 = vadd.f32 %v6255_v18, %v5360_v62 }
 0x8e7   :  { %v6330_v35 = vpop.permute.xlu0 %6329 }
 0x8e8   :  { %6704 = vst.msk [vmem:[%s13159_s4 + $0x578] sm:$0xff] %vm1536_vm0, %v6512_v4  ;;  %v6527_v55 = vadd.f32 %v6330_v35, %v5375_v6 }
 0x8e9   :  { %v6265_v1 = vpop.permute.xlu1 %6264 }
 0x8ea   :  { %6719 = vst.msk [vmem:[%s13159_s4 + $0x5f0] sm:$0xff] %vm1536_vm0, %v6527_v55  ;;  %v6514_v33 = vadd.f32 %v6265_v1, %v5362_v12 }
 0x8ec   :  { %6706 = vst.msk [vmem:[%s13159_s4 + $0x588] sm:$0xff] %vm1536_vm0, %v6514_v33 }
 0x8ed   :  { %v6275_v27 = vpop.permute.xlu1 %6274 }
 0x8ee   :  { %v6516_v53 = vadd.f32 %v6275_v27, %v5364_v17 }
 0x8f0   :  { %6708 = vst.msk [vmem:[%s13159_s4 + $0x598] sm:$0xff] %vm1536_vm0, %v6516_v53 }
 0x8f1   :  { %v6285_v61 = vpop.permute.xlu1 %6284 }
 0x8f2   :  { %v6518_v45 = vadd.f32 %v6285_v61, %v5366_v48 }
 0x8f4   :  { %6710 = vst.msk [vmem:[%s13159_s4 + $0x5a8] sm:$0xff] %vm1536_vm0, %v6518_v45 }
 0x8f5   :  { %v6295_v8 = vpop.permute.xlu1 %6294 }
 0x8f6   :  { %v6520_v59 = vadd.f32 %v6295_v8, %v5368_v54 }
 0x8f8   :  { %6712 = vst.msk [vmem:[%s13159_s4 + $0x5b8] sm:$0xff] %vm1536_vm0, %v6520_v59 }
 0x8f9   :  { %v6305_v34 = vpop.permute.xlu1 %6304 }
 0x8fa   :  { %v6522_v11 = vadd.f32 %v6305_v34, %v5370_v21 }
 0x8fc   :  { %6714 = vst.msk [vmem:[%s13159_s4 + $0x5c8] sm:$0xff] %vm1536_vm0, %v6522_v11 }
 0x8fd   :  { %v6315_v51 = vpop.permute.xlu1 %6314 }
 0x8fe   :  { %v6524_v23 = vadd.f32 %v6315_v51, %v5372_v16 }
 0x900   :  { %6716 = vst.msk [vmem:[%s13159_s4 + $0x5d8] sm:$0xff] %vm1536_vm0, %v6524_v23 }
 0x901   :  { %v6325_v28 = vpop.permute.xlu1 %6324 }
 0x902   :  { %v6526_v39 = vadd.f32 %v6325_v28, %v5374_v46 }
 0x904   :  { %6718 = vst.msk [vmem:[%s13159_s4 + $0x5e8] sm:$0xff] %vm1536_vm0, %v6526_v39 }
 0x905   :  { %v6335_v60 = vpop.permute.xlu1 %6334 }
 0x906   :  { %v6528_v37 = vadd.f32 %v6335_v60, %v5376_v25 }
 0x908   :  { %6720 = vst.msk [vmem:[%s13159_s4 + $0x5f8] sm:$0xff] %vm1536_vm0, %v6528_v37 }
 0x909   :  { %6725 = vsyncpa [#allocation3], 1 }

</bundles_post_ra>
